<compile_context>
chip_gen: v5e
topology: v5e:2x2
jax: 0.10.0
libtpu: 0.0.40
codegen_flags: <defaults>
</compile_context>

<pallas_src>
import math
import functools

import jax
import jax.numpy as jnp
from jax.experimental import pallas as pl
from jax.experimental.pallas import tpu as pltpu

LN_EPS = 1e-5
COMPUTE_DTYPE = jnp.bfloat16   # MXU operand dtype; accumulation is always f32
ACT_DTYPE = jnp.bfloat16       # inter-kernel (HBM) activation dtype


def _round_up(x, m):
    return ((x + m - 1) // m) * m


# ----------------------------------------------------------------------------- in-kernel helpers

def _ln(y, g, b):
    """PyTorch-style LayerNorm over the last dim (biased variance), f32 math."""
    mean = jnp.mean(y, axis=-1, keepdims=True)
    var = jnp.mean(jnp.square(y - mean), axis=-1, keepdims=True)
    return (y - mean) * jax.lax.rsqrt(var + LN_EPS) * g + b


def _attention_into_scratch(q, k, v, scratch, *, B, Sq, Sk, nhead, Dh, cdt):
    """Scaled dot-product attention per (batch, head).

    Head outputs are written into the pre-allocated VMEM scratch (B*Sq, E) with static
    slices -- no concatenates, no XLU relayouts.  Softmax math is f32; the divide uses the
    EUP reciprocal slot.
    """
    scale = 1.0 / math.sqrt(Dh)
    q_bf = (q * scale).astype(cdt)          # fold softmax scale into q; cast once
    k_bf = k.astype(cdt)
    v_bf = v.astype(cdt)
    for b in range(B):                      # static python loops (B, nhead are small)
        for h in range(nhead):
            qs = q_bf[b * Sq:(b + 1) * Sq, h * Dh:(h + 1) * Dh]
            ks = k_bf[b * Sk:(b + 1) * Sk, h * Dh:(h + 1) * Dh]
            vs = v_bf[b * Sk:(b + 1) * Sk, h * Dh:(h + 1) * Dh]
            s = jax.lax.dot_general(qs, ks, (((1,), (1,)), ((), ())),
                                    preferred_element_type=jnp.float32)
            m = jnp.max(s, axis=-1, keepdims=True)
            p = jnp.exp(s - m)
            p = p * pl.reciprocal(jnp.sum(p, axis=-1, keepdims=True), approx=True)
            scratch[b * Sq:(b + 1) * Sq, h * Dh:(h + 1) * Dh] = jnp.dot(
                p.astype(cdt), vs, preferred_element_type=jnp.float32)


def _mha_self(x_bf, w_qkv, b_qkv, w_o, b_o, scratch, *, B, S, nhead, cdt):
    """Self-attention with one fused (E, 3E) QKV matmul."""
    E = w_o.shape[0]
    Dh = E // nhead
    qkv = jnp.dot(x_bf, w_qkv, preferred_element_type=jnp.float32) + b_qkv
    _attention_into_scratch(qkv[:, :E], qkv[:, E:2 * E], qkv[:, 2 * E:], scratch,
                            B=B, Sq=S, Sk=S, nhead=nhead, Dh=Dh, cdt=cdt)
    return jnp.dot(scratch[...].astype(cdt), w_o,
                   preferred_element_type=jnp.float32) + b_o


def _mha_cross(x_bf, mem_bf, w_qkv, b_qkv, w_o, b_o, scratch, *, B, Sq, Sk, nhead, cdt):
    """Cross-attention: Q matmul on x, fused (E, 2E) KV matmul on memory."""
    E = w_o.shape[0]
    Dh = E // nhead
    q = jnp.dot(x_bf, w_qkv[:, :E], preferred_element_type=jnp.float32) + b_qkv[:, :E]
    kv = jnp.dot(mem_bf, w_qkv[:, E:], preferred_element_type=jnp.float32) + b_qkv[:, E:]
    _attention_into_scratch(q, kv[:, :E], kv[:, E:], scratch,
                            B=B, Sq=Sq, Sk=Sk, nhead=nhead, Dh=Dh, cdt=cdt)
    return jnp.dot(scratch[...].astype(cdt), w_o,
                   preferred_element_type=jnp.float32) + b_o


def _ffn(x, x_bf, w1, b1, w2, b2, g, b, cdt):
    """Fused FFN (w1 + ReLU + w2) + residual + LayerNorm; intermediate stays in VMEM."""
    h = jnp.maximum(jnp.dot(x_bf, w1, preferred_element_type=jnp.float32) + b1, 0.0)
    ff = jnp.dot(h.astype(cdt), w2, preferred_element_type=jnp.float32) + b2
    return _ln(x + ff, g, b)


# ----------------------------------------------------------------------------- fused stack kernels

def _encoder_stack_kernel(x_ref,
                          wqkv, bqkv, wo, bo, g1, b1, w1, bf1, w2, bf2, g2, b2,
                          gf, bf_fin, o_ref, scratch,
                          *, L, B, S, nhead, cdt):
    """Whole encoder stack (L layers) + final encoder LayerNorm in one kernel."""
    x = x_ref[...].astype(jnp.float32)
    for l in range(L):                       # static layer loop; weights indexed at l
        x_bf = x.astype(cdt)
        sa = _mha_self(x_bf, wqkv[l], bqkv[l], wo[l], bo[l], scratch,
                       B=B, S=S, nhead=nhead, cdt=cdt)
        x = _ln(x + sa, g1[l], b1[l])
        x = _ffn(x, x.astype(cdt), w1[l], bf1[l], w2[l], bf2[l], g2[l], b2[l], cdt)
    x = _ln(x, gf[...], bf_fin[...])         # final encoder LayerNorm (fused, no extra launch)
    o_ref[...] = x.astype(o_ref.dtype)


def _decoder_stack_kernel(x_ref, mem_ref,
                          s_wqkv, s_bqkv, s_wo, s_bo, g1, b1,
                          c_wqkv, c_bqkv, c_wo, c_bo, g2, b2,
                          w1, bf1, w2, bf2, g3, b3,
                          o_ref, scratch,
                          *, L, B, St, Ss, nhead, cdt):
    """Whole decoder stack (L layers) in one kernel (final LN fused into generator)."""
    x = x_ref[...].astype(jnp.float32)
    mem_bf = mem_ref[...].astype(cdt)        # memory arrives as bf16; no per-layer recast
    for l in range(L):
        x_bf = x.astype(cdt)
        sa = _mha_self(x_bf, s_wqkv[l], s_bqkv[l], s_wo[l], s_bo[l], scratch,
                       B=B, S=St, nhead=nhead, cdt=cdt)
        x = _ln(x + sa, g1[l], b1[l])
        x_bf = x.astype(cdt)
        ca = _mha_cross(x_bf, mem_bf, c_wqkv[l], c_bqkv[l], c_wo[l], c_bo[l], scratch,
                        B=B, Sq=St, Sk=Ss, nhead=nhead, cdt=cdt)
        x = _ln(x + ca, g2[l], b2[l])
        x = _ffn(x, x.astype(cdt), w1[l], bf1[l], w2[l], bf2[l], g3[l], b3[l], cdt)
    o_ref[...] = x.astype(o_ref.dtype)


def _norm_generator_kernel(x_ref, g_ref, b_ref, w_ref, bias_ref, o_ref, xn_ref, *, cdt):
    """Final decoder LayerNorm fused with the generator matmul tile.

    LN is hoisted out of the vocab (inner) grid axis: computed once per row tile at j==0
    into VMEM scratch (as bf16) and reused for every vocab tile.
    """
    @pl.when(pl.program_id(1) == 0)
    def _():
        xn = _ln(x_ref[...].astype(jnp.float32), g_ref[...], b_ref[...])
        xn_ref[...] = xn.astype(cdt)

    o_ref[...] = (jnp.dot(xn_ref[...], w_ref[...], preferred_element_type=jnp.float32)
                  + bias_ref[...]).astype(o_ref.dtype)


# ----------------------------------------------------------------------------- pallas_call wrappers

def _replicated_specs(arrays):
    """Whole-array VMEM blocks with constant index maps (weights stay resident)."""
    return [pl.BlockSpec(a.shape, lambda i, _nd=a.ndim: (0,) * _nd) for a in arrays]


def encoder_stack(x, p, gf, bf_fin, nhead):
    B, S, E = x.shape
    M = B * S
    L = p["wqkv"].shape[0]
    args = [x.reshape(M, E),
            p["wqkv"], p["bqkv"], p["wo"], p["bo"], p["g1"], p["b1"],
            p["w1"], p["bf1"], p["w2"], p["bf2"], p["g2"], p["b2"],
            gf, bf_fin]
    out = pl.pallas_call(
        functools.partial(_encoder_stack_kernel, L=L, B=B, S=S, nhead=nhead,
                          cdt=COMPUTE_DTYPE),
        out_shape=jax.ShapeDtypeStruct((M, E), ACT_DTYPE),
        grid=(1,),
        in_specs=_replicated_specs(args),
        out_specs=pl.BlockSpec((M, E), lambda i: (0, 0)),
        scratch_shapes=[pltpu.VMEM((M, E), jnp.float32)],   # attention head-merge slab
    )(*args)
    return out.reshape(B, S, E)


def decoder_stack(x, mem, p, nhead):
    B, St, E = x.shape
    Ss = mem.shape[1]
    L = p["s_wqkv"].shape[0]
    args = [x.reshape(B * St, E), mem.reshape(B * Ss, E),
            p["s_wqkv"], p["s_bqkv"], p["s_wo"], p["s_bo"], p["g1"], p["b1"],
            p["c_wqkv"], p["c_bqkv"], p["c_wo"], p["c_bo"], p["g2"], p["b2"],
            p["w1"], p["bf1"], p["w2"], p["bf2"], p["g3"], p["b3"]]
    out = pl.pallas_call(
        functools.partial(_decoder_stack_kernel, L=L, B=B, St=St, Ss=Ss, nhead=nhead,
                          cdt=COMPUTE_DTYPE),
        out_shape=jax.ShapeDtypeStruct((B * St, E), ACT_DTYPE),
        grid=(1,),
        in_specs=_replicated_specs(args),
        out_specs=pl.BlockSpec((B * St, E), lambda i: (0, 0)),
        scratch_shapes=[pltpu.VMEM((B * St, E), jnp.float32)],
    )(*args)
    return out.reshape(B, St, E)


def norm_generator(x, gamma, beta, w, bias):
    """Fused (final decoder LayerNorm + generator linear), tiled over rows and vocab.

    Robust to non-divisible M / vocab via explicit padding (no full-width weight slab in
    VMEM).  Row axis is 'parallel' (v7x megacore); vocab axis is 'arbitrary' so the
    LN-hoist scratch written at j==0 is valid for all later vocab tiles.
    """
    B, St, E = x.shape
    M = B * St
    N = w.shape[1]

    tm = min(_round_up(M, 8), 256)
    Mp = _round_up(M, tm)
    tn = min(_round_up(N, 128), 1024)        # lane-dense, large vocab streamed in tiles
    Np = _round_up(N, tn)

    x2 = x.reshape(M, E)
    if Mp != M:
        x2 = jnp.pad(x2, ((0, Mp - M), (0, 0)))
    w2 = w if Np == N else jnp.pad(w, ((0, 0), (0, Np - N)))
    bias2 = bias if Np == N else jnp.pad(bias, ((0, 0), (0, Np - N)))

    out = pl.pallas_call(
        functools.partial(_norm_generator_kernel, cdt=COMPUTE_DTYPE),
        out_shape=jax.ShapeDtypeStruct((Mp, Np), jnp.float32),
        grid=(Mp // tm, Np // tn),
        in_specs=[
            pl.BlockSpec((tm, E), lambda i, j: (i, 0)),   # row tile of decoder output
            pl.BlockSpec((1, E), lambda i, j: (0, 0)),    # LN gamma (resident)
            pl.BlockSpec((1, E), lambda i, j: (0, 0)),    # LN beta
            pl.BlockSpec((E, tn), lambda i, j: (0, j)),   # generator weight tile (streamed)
            pl.BlockSpec((1, tn), lambda i, j: (0, j)),   # generator bias tile
        ],
        out_specs=pl.BlockSpec((tm, tn), lambda i, j: (i, j)),
        scratch_shapes=[pltpu.VMEM((tm, E), COMPUTE_DTYPE)],   # hoisted LN result
        compiler_params=pltpu.CompilerParams(
            dimension_semantics=("parallel", "arbitrary"),
            vmem_limit_bytes=32 * 1024 * 1024),                # safe on v5e/v6e/v7x
    )(x2, gamma, beta, w2, bias2)
    return out[:M, :N].reshape(B, St, N)


# ----------------------------------------------------------------------------- model (glue)

def make_positional_encoding(maxlen, emb_size):
    position = jnp.arange(maxlen, dtype=jnp.float32)[:, None]
    div_term = jnp.exp(jnp.arange(0, emb_size, 2, dtype=jnp.float32)
                       * (-math.log(10000.0) / emb_size))
    pe = jnp.zeros((maxlen, 1, emb_size), dtype=jnp.float32)
    pe = pe.at[:, 0, 0::2].set(jnp.sin(position * div_term))
    pe = pe.at[:, 0, 1::2].set(jnp.cos(position * div_term))
    return pe


def seq2seq_transformer_forward(params, src, tgt, nhead):
    # TODO(synk): embedding gather and PE add stay as XLA glue (no clean Pallas win here).
    src_emb = jnp.take(params["src_emb"], src, axis=0)            # (B, Ss, E)
    tgt_emb = jnp.take(params["tgt_emb"], tgt, axis=0)            # (B, St, E)
    # Reproduces the original module exactly: x + pe[:x.size(0)] with x batch-first.
    src_emb = src_emb + params["pe"][: src_emb.shape[0]]
    tgt_emb = tgt_emb + params["pe"][: tgt_emb.shape[0]]

    # Encoder stack (all layers + final encoder LN in ONE pallas_call).
    mem = encoder_stack(src_emb, params["enc"], params["enc_norm_g"],
                        params["enc_norm_b"], nhead)
    # Decoder stack (all layers in ONE pallas_call); memory arrives as bf16.
    out = decoder_stack(tgt_emb, mem, params["dec"], nhead)
    # Final decoder LayerNorm fused with the generator projection (tiled over vocab).
    return norm_generator(out, params["dec_norm_g"], params["dec_norm_b"],
                          params["gen_w"], params["gen_b"])


# ----------------------------------------------------------------------------- deterministic init

def init_params(key, src_vocab, tgt_vocab, emb, nhead, dff, n_enc, n_dec, maxlen=5000):
    keys = iter(jax.random.split(key, 64))

    def dense(shape, scale=0.02, dtype=COMPUTE_DTYPE):
        return (scale * jax.random.normal(next(keys), shape, dtype=jnp.float32)).astype(dtype)

    def zeros(shape):
        return jnp.zeros(shape, jnp.float32)

    def ones(shape):
        return jnp.ones(shape, jnp.float32)

    def enc_stack(L):
        return dict(
            wqkv=dense((L, emb, 3 * emb)), bqkv=zeros((L, 1, 3 * emb)),
            wo=dense((L, emb, emb)), bo=zeros((L, 1, emb)),
            g1=ones((L, 1, emb)), b1=zeros((L, 1, emb)),
            w1=dense((L, emb, dff)), bf1=zeros((L, 1, dff)),
            w2=dense((L, dff, emb)), bf2=zeros((L, 1, emb)),
            g2=ones((L, 1, emb)), b2=zeros((L, 1, emb)),
        )

    def dec_stack(L):
        return dict(
            s_wqkv=dense((L, emb, 3 * emb)), s_bqkv=zeros((L, 1, 3 * emb)),
            s_wo=dense((L, emb, emb)), s_bo=zeros((L, 1, emb)),
            g1=ones((L, 1, emb)), b1=zeros((L, 1, emb)),
            c_wqkv=dense((L, emb, 3 * emb)), c_bqkv=zeros((L, 1, 3 * emb)),
            c_wo=dense((L, emb, emb)), c_bo=zeros((L, 1, emb)),
            g2=ones((L, 1, emb)), b2=zeros((L, 1, emb)),
            w1=dense((L, emb, dff)), bf1=zeros((L, 1, dff)),
            w2=dense((L, dff, emb)), bf2=zeros((L, 1, emb)),
            g3=ones((L, 1, emb)), b3=zeros((L, 1, emb)),
        )

    return dict(
        src_emb=dense((src_vocab, emb), scale=1.0, dtype=jnp.float32),
        tgt_emb=dense((tgt_vocab, emb), scale=1.0, dtype=jnp.float32),
        enc=enc_stack(n_enc),
        dec=dec_stack(n_dec),
        enc_norm_g=ones((1, emb)), enc_norm_b=zeros((1, emb)),
        dec_norm_g=ones((1, emb)), dec_norm_b=zeros((1, emb)),
        gen_w=dense((emb, tgt_vocab)), gen_b=zeros((1, tgt_vocab)),
        pe=make_positional_encoding(maxlen, emb),
    )


# ----------------------------------------------------------------------------- main

if __name__ == "__main__":
    SRC_VOCAB, TGT_VOCAB = 50, 60
    EMB, NHEAD, DFF = 32, 4, 64
    N_ENC, N_DEC = 2, 2
    B, S_SRC, S_TGT = 2, 8, 8

    key = jax.random.PRNGKey(0)
    k_params, k_src, k_tgt = jax.random.split(key, 3)

    params = init_params(k_params, SRC_VOCAB, TGT_VOCAB, EMB, NHEAD, DFF, N_ENC, N_DEC)
    src = jax.random.randint(k_src, (B, S_SRC), 0, SRC_VOCAB, dtype=jnp.int32)
    tgt = jax.random.randint(k_tgt, (B, S_TGT), 0, TGT_VOCAB, dtype=jnp.int32)

    fwd = jax.jit(functools.partial(seq2seq_transformer_forward, nhead=NHEAD))
    logits = jax.block_until_ready(fwd(params, src, tgt))

    assert logits.shape == (B, S_TGT, TGT_VOCAB), logits.shape
    assert bool(jnp.all(jnp.isfinite(logits)))
    print("KERNEL_OK")
</pallas_src>

<mosaic_0001>
module attributes {stable_mosaic.version = 11 : i64} {
  func.func @_norm_generator_kernel(%arg0: i32, %arg1: i32, %arg2: memref<16x32xbf16, #tpu.memory_space<vmem>>, %arg3: memref<1x32xf32, #tpu.memory_space<vmem>>, %arg4: memref<1x32xf32, #tpu.memory_space<vmem>>, %arg5: memref<32x128xbf16, #tpu.memory_space<vmem>>, %arg6: memref<1x128xf32, #tpu.memory_space<vmem>>, %arg7: memref<16x128xf32, #tpu.memory_space<vmem>>, %arg8: memref<16x32xbf16, #tpu.memory_space<vmem>>) attributes {dimension_semantics = [#tpu.dimension_semantics<parallel>, #tpu.dimension_semantics<arbitrary>], iteration_bounds = array<i64: 1, 1>, scalar_prefetch = 0 : i64, scratch_operands = 1 : i64, tpu.core_type = #tpu.core_type<tc>, window_params = [{transform_indices = @transform_0, window_bounds = array<i64: 16, 32>}, {pipeline_mode = #tpu.pipeline_mode<synchronous>, transform_indices = @transform_1, window_bounds = array<i64: 1, 32>}, {pipeline_mode = #tpu.pipeline_mode<synchronous>, transform_indices = @transform_2, window_bounds = array<i64: 1, 32>}, {transform_indices = @transform_3, window_bounds = array<i64: 32, 128>}, {transform_indices = @transform_4, window_bounds = array<i64: 1, 128>}, {transform_indices = @transform_5, window_bounds = array<i64: 16, 128>}]} {
    %c0_i32 = arith.constant 0 : i32
    %0 = arith.cmpi eq, %arg1, %c0_i32 : i32
    %1 = arith.extui %0 : i1 to i32
    %c0_i32_0 = arith.constant 0 : i32
    %2 = arith.cmpi ne, %1, %c0_i32_0 : i32
    scf.if %2 {
      %c0_8 = arith.constant 0 : index
      %c0_9 = arith.constant 0 : index
      %10 = vector.load %arg2[%c0_8, %c0_9] : memref<16x32xbf16, #tpu.memory_space<vmem>>, vector<16x32xbf16>
      %11 = arith.extf %10 : vector<16x32xbf16> to vector<16x32xf32>
      %c0_10 = arith.constant 0 : index
      %c0_11 = arith.constant 0 : index
      %12 = vector.load %arg3[%c0_10, %c0_11] : memref<1x32xf32, #tpu.memory_space<vmem>>, vector<1x32xf32>
      %c0_12 = arith.constant 0 : index
      %c0_13 = arith.constant 0 : index
      %13 = vector.load %arg4[%c0_12, %c0_13] : memref<1x32xf32, #tpu.memory_space<vmem>>, vector<1x32xf32>
      %cst_14 = arith.constant dense<0.000000e+00> : vector<16xf32>
      %14 = vector.multi_reduction <add>, %11, %cst_14 [1] : vector<16x32xf32> to vector<16xf32>
      %15 = vector.shape_cast %14 : vector<16xf32> to vector<16x1xf32>
      %cst_15 = arith.constant 3.200000e+01 : f32
      %16 = vector.broadcast %cst_15 : f32 to vector<16x1xf32>
      %17 = arith.divf %15, %16 : vector<16x1xf32>
      %18 = vector.broadcast %17 : vector<16x1xf32> to vector<16x32xf32>
      %19 = arith.subf %11, %18 : vector<16x32xf32>
      %20 = arith.mulf %19, %19 : vector<16x32xf32>
      %cst_16 = arith.constant dense<0.000000e+00> : vector<16xf32>
      %21 = vector.multi_reduction <add>, %20, %cst_16 [1] : vector<16x32xf32> to vector<16xf32>
      %22 = vector.shape_cast %21 : vector<16xf32> to vector<16x1xf32>
      %cst_17 = arith.constant 3.200000e+01 : f32
      %23 = vector.broadcast %cst_17 : f32 to vector<16x1xf32>
      %24 = arith.divf %22, %23 : vector<16x1xf32>
      %25 = vector.broadcast %17 : vector<16x1xf32> to vector<16x32xf32>
      %26 = arith.subf %11, %25 : vector<16x32xf32>
      %cst_18 = arith.constant 9.99999974E-6 : f32
      %27 = vector.broadcast %cst_18 : f32 to vector<16x1xf32>
      %28 = arith.addf %24, %27 : vector<16x1xf32>
      %29 = math.rsqrt %28 : vector<16x1xf32>
      %30 = vector.broadcast %29 : vector<16x1xf32> to vector<16x32xf32>
      %31 = arith.mulf %26, %30 : vector<16x32xf32>
      %32 = vector.broadcast %12 : vector<1x32xf32> to vector<16x32xf32>
      %33 = arith.mulf %31, %32 : vector<16x32xf32>
      %34 = vector.broadcast %13 : vector<1x32xf32> to vector<16x32xf32>
      %35 = arith.addf %33, %34 : vector<16x32xf32>
      %36 = arith.truncf %35 : vector<16x32xf32> to vector<16x32xbf16>
      %c0_19 = arith.constant 0 : index
      %c0_20 = arith.constant 0 : index
      %37 = vector.load %arg8[%c0_19, %c0_20] : memref<16x32xbf16, #tpu.memory_space<vmem>>, vector<16x32xbf16>
      tpu.vector_store %arg8[%c0_19, %c0_20], %36 {strides = array<i32>} : memref<16x32xbf16, #tpu.memory_space<vmem>>, vector<16x32xbf16>,
    } else {
    }
    %c0 = arith.constant 0 : index
    %c0_1 = arith.constant 0 : index
    %3 = vector.load %arg8[%c0, %c0_1] : memref<16x32xbf16, #tpu.memory_space<vmem>>, vector<16x32xbf16>
    %c0_2 = arith.constant 0 : index
    %c0_3 = arith.constant 0 : index
    %4 = vector.load %arg5[%c0_2, %c0_3] : memref<32x128xbf16, #tpu.memory_space<vmem>>, vector<32x128xbf16>
    %cst = arith.constant dense<0.000000e+00> : vector<16x128xf32>
    %5 = tpu.matmul %3, %4, %cst {dimension_numbers = #tpu.dot_dimension_numbers<[1], [0], [0], [1], [0, 0, 1, 1], [], []>} : vector<16x32xbf16>, vector<32x128xbf16>, vector<16x128xf32> -> vector<16x128xf32>
    %c0_4 = arith.constant 0 : index
    %c0_5 = arith.constant 0 : index
    %6 = vector.load %arg6[%c0_4, %c0_5] : memref<1x128xf32, #tpu.memory_space<vmem>>, vector<1x128xf32>
    %7 = vector.broadcast %6 : vector<1x128xf32> to vector<16x128xf32>
    %8 = arith.addf %5, %7 : vector<16x128xf32>
    %c0_6 = arith.constant 0 : index
    %c0_7 = arith.constant 0 : index
    %9 = vector.load %arg7[%c0_6, %c0_7] : memref<16x128xf32, #tpu.memory_space<vmem>>, vector<16x128xf32>
    tpu.vector_store %arg7[%c0_6, %c0_7], %8 {strides = array<i32>} : memref<16x128xf32, #tpu.memory_space<vmem>>, vector<16x128xf32>,
    return
  }
  func.func @transform_0(%arg0: i32, %arg1: i32) -> (i32, i32) {
    %c0_i32 = arith.constant 0 : i32
    %c0_i32_0 = arith.constant 0 : i32
    return %arg0, %c0_i32 : i32, i32
  }
  func.func @transform_1(%arg0: i32, %arg1: i32) -> (i32, i32) {
    %c0_i32 = arith.constant 0 : i32
    %c0_i32_0 = arith.constant 0 : i32
    %c0_i32_1 = arith.constant 0 : i32
    return %c0_i32, %c0_i32_0 : i32, i32
  }
  func.func @transform_2(%arg0: i32, %arg1: i32) -> (i32, i32) {
    %c0_i32 = arith.constant 0 : i32
    %c0_i32_0 = arith.constant 0 : i32
    %c0_i32_1 = arith.constant 0 : i32
    return %c0_i32, %c0_i32_0 : i32, i32
  }
  func.func @transform_3(%arg0: i32, %arg1: i32) -> (i32, i32) {
    %c0_i32 = arith.constant 0 : i32
    %c0_i32_0 = arith.constant 0 : i32
    return %c0_i32, %arg1 : i32, i32
  }
  func.func @transform_4(%arg0: i32, %arg1: i32) -> (i32, i32) {
    %c0_i32 = arith.constant 0 : i32
    %c0_i32_0 = arith.constant 0 : i32
    return %c0_i32, %arg1 : i32, i32
  }
  func.func @transform_5(%arg0: i32, %arg1: i32) -> (i32, i32) {
    %c0_i32 = arith.constant 0 : i32
    return %arg0, %arg1 : i32, i32
  }
}

module attributes {stable_mosaic.version = 11 : i64} {
  func.func @_encoder_stack_kernel(%arg0: i32, %arg1: memref<16x32xf32, #tpu.memory_space<vmem>>, %arg2: memref<2x32x96xbf16, #tpu.memory_space<vmem>>, %arg3: memref<2x1x96xf32, #tpu.memory_space<vmem>>, %arg4: memref<2x32x32xbf16, #tpu.memory_space<vmem>>, %arg5: memref<2x1x32xf32, #tpu.memory_space<vmem>>, %arg6: memref<2x1x32xf32, #tpu.memory_space<vmem>>, %arg7: memref<2x1x32xf32, #tpu.memory_space<vmem>>, %arg8: memref<2x32x64xbf16, #tpu.memory_space<vmem>>, %arg9: memref<2x1x64xf32, #tpu.memory_space<vmem>>, %arg10: memref<2x64x32xbf16, #tpu.memory_space<vmem>>, %arg11: memref<2x1x32xf32, #tpu.memory_space<vmem>>, %arg12: memref<2x1x32xf32, #tpu.memory_space<vmem>>, %arg13: memref<2x1x32xf32, #tpu.memory_space<vmem>>, %arg14: memref<1x32xf32, #tpu.memory_space<vmem>>, %arg15: memref<1x32xf32, #tpu.memory_space<vmem>>, %arg16: memref<16x32xbf16, #tpu.memory_space<vmem>>, %arg17: memref<16x32xf32, #tpu.memory_space<vmem>>) attributes {dimension_semantics = [#tpu.dimension_semantics<arbitrary>], iteration_bounds = array<i64: 1>, scalar_prefetch = 0 : i64, scratch_operands = 1 : i64, tpu.core_type = #tpu.core_type<tc>, window_params = [{pipeline_mode = #tpu.pipeline_mode<synchronous>, transform_indices = @transform_0, window_bounds = array<i64: 16, 32>}, {pipeline_mode = #tpu.pipeline_mode<synchronous>, transform_indices = @transform_1, window_bounds = array<i64: 2, 32, 96>}, {pipeline_mode = #tpu.pipeline_mode<synchronous>, transform_indices = @transform_2, window_bounds = array<i64: 2, 1, 96>}, {pipeline_mode = #tpu.pipeline_mode<synchronous>, transform_indices = @transform_3, window_bounds = array<i64: 2, 32, 32>}, {pipeline_mode = #tpu.pipeline_mode<synchronous>, transform_indices = @transform_4, window_bounds = array<i64: 2, 1, 32>}, {pipeline_mode = #tpu.pipeline_mode<synchronous>, transform_indices = @transform_5, window_bounds = array<i64: 2, 1, 32>}, {pipeline_mode = #tpu.pipeline_mode<synchronous>, transform_indices = @transform_6, window_bounds = array<i64: 2, 1, 32>}, {pipeline_mode = #tpu.pipeline_mode<synchronous>, transform_indices = @transform_7, window_bounds = array<i64: 2, 32, 64>}, {pipeline_mode = #tpu.pipeline_mode<synchronous>, transform_indices = @transform_8, window_bounds = array<i64: 2, 1, 64>}, {pipeline_mode = #tpu.pipeline_mode<synchronous>, transform_indices = @transform_9, window_bounds = array<i64: 2, 64, 32>}, {pipeline_mode = #tpu.pipeline_mode<synchronous>, transform_indices = @transform_10, window_bounds = array<i64: 2, 1, 32>}, {pipeline_mode = #tpu.pipeline_mode<synchronous>, transform_indices = @transform_11, window_bounds = array<i64: 2, 1, 32>}, {pipeline_mode = #tpu.pipeline_mode<synchronous>, transform_indices = @transform_12, window_bounds = array<i64: 2, 1, 32>}, {pipeline_mode = #tpu.pipeline_mode<synchronous>, transform_indices = @transform_13, window_bounds = array<i64: 1, 32>}, {pipeline_mode = #tpu.pipeline_mode<synchronous>, transform_indices = @transform_14, window_bounds = array<i64: 1, 32>}, {pipeline_mode = #tpu.pipeline_mode<synchronous>, transform_indices = @transform_15, window_bounds = array<i64: 16, 32>}]} {
    %c0 = arith.constant 0 : index
    %c0_0 = arith.constant 0 : index
    %0 = vector.load %arg1[%c0, %c0_0] : memref<16x32xf32, #tpu.memory_space<vmem>>, vector<16x32xf32>
    %1 = arith.truncf %0 : vector<16x32xf32> to vector<16x32xbf16>
    %c0_1 = arith.constant 0 : index
    %c0_2 = arith.constant 0 : index
    %c0_3 = arith.constant 0 : index
    %2 = vector.load %arg2[%c0_1, %c0_2, %c0_3] : memref<2x32x96xbf16, #tpu.memory_space<vmem>>, vector<1x32x96xbf16>
    %3 = vector.shape_cast %2 : vector<1x32x96xbf16> to vector<32x96xbf16>
    %c0_4 = arith.constant 0 : index
    %c0_5 = arith.constant 0 : index
    %c0_6 = arith.constant 0 : index
    %4 = vector.load %arg3[%c0_4, %c0_5, %c0_6] : memref<2x1x96xf32, #tpu.memory_space<vmem>>, vector<1x1x96xf32>
    %5 = vector.shape_cast %4 : vector<1x1x96xf32> to vector<1x96xf32>
    %c0_7 = arith.constant 0 : index
    %c0_8 = arith.constant 0 : index
    %c0_9 = arith.constant 0 : index
    %6 = vector.load %arg4[%c0_7, %c0_8, %c0_9] : memref<2x32x32xbf16, #tpu.memory_space<vmem>>, vector<1x32x32xbf16>
    %7 = vector.shape_cast %6 : vector<1x32x32xbf16> to vector<32x32xbf16>
    %c0_10 = arith.constant 0 : index
    %c0_11 = arith.constant 0 : index
    %c0_12 = arith.constant 0 : index
    %8 = vector.load %arg5[%c0_10, %c0_11, %c0_12] : memref<2x1x32xf32, #tpu.memory_space<vmem>>, vector<1x1x32xf32>
    %9 = vector.shape_cast %8 : vector<1x1x32xf32> to vector<1x32xf32>
    %cst = arith.constant dense<0.000000e+00> : vector<16x96xf32>
    %10 = tpu.matmul %1, %3, %cst {dimension_numbers = #tpu.dot_dimension_numbers<[1], [0], [0], [1], [0, 0, 1, 1], [], []>} : vector<16x32xbf16>, vector<32x96xbf16>, vector<16x96xf32> -> vector<16x96xf32>
    %11 = vector.broadcast %5 : vector<1x96xf32> to vector<16x96xf32>
    %12 = arith.addf %10, %11 : vector<16x96xf32>
    %13 = vector.extract_strided_slice %12 {offsets = [0, 0], sizes = [16, 32], strides = [1, 1]} : vector<16x96xf32> to vector<16x32xf32>
    %14 = vector.extract_strided_slice %12 {offsets = [0, 32], sizes = [16, 32], strides = [1, 1]} : vector<16x96xf32> to vector<16x32xf32>
    %15 = vector.extract_strided_slice %12 {offsets = [0, 64], sizes = [16, 32], strides = [1, 1]} : vector<16x96xf32> to vector<16x32xf32>
    %cst_13 = arith.constant 0.353553385 : f32
    %16 = vector.broadcast %cst_13 : f32 to vector<16x32xf32>
    %17 = arith.mulf %13, %16 : vector<16x32xf32>
    %18 = arith.truncf %17 : vector<16x32xf32> to vector<16x32xbf16>
    %19 = arith.truncf %14 : vector<16x32xf32> to vector<16x32xbf16>
    %20 = arith.truncf %15 : vector<16x32xf32> to vector<16x32xbf16>
    %21 = vector.extract_strided_slice %18 {offsets = [0, 0], sizes = [8, 8], strides = [1, 1]} : vector<16x32xbf16> to vector<8x8xbf16>
    %22 = vector.extract_strided_slice %19 {offsets = [0, 0], sizes = [8, 8], strides = [1, 1]} : vector<16x32xbf16> to vector<8x8xbf16>
    %23 = vector.extract_strided_slice %20 {offsets = [0, 0], sizes = [8, 8], strides = [1, 1]} : vector<16x32xbf16> to vector<8x8xbf16>
    %cst_14 = arith.constant dense<0.000000e+00> : vector<8x8xf32>
    %24 = tpu.matmul %21, %22, %cst_14 {dimension_numbers = #tpu.dot_dimension_numbers<[1], [1], [0], [0], [0, 0, 1, 0], [], []>} : vector<8x8xbf16>, vector<8x8xbf16>, vector<8x8xf32> -> vector<8x8xf32>
    %cst_15 = arith.constant dense<0xFF800000> : vector<8xf32>
    %25 = vector.multi_reduction <maximumf>, %24, %cst_15 [1] : vector<8x8xf32> to vector<8xf32>
    %26 = vector.shape_cast %25 : vector<8xf32> to vector<8x1xf32>
    %27 = vector.broadcast %26 : vector<8x1xf32> to vector<8x8xf32>
    %28 = arith.subf %24, %27 : vector<8x8xf32>
    %29 = math.exp %28 : vector<8x8xf32>
    %cst_16 = arith.constant dense<0.000000e+00> : vector<8xf32>
    %30 = vector.multi_reduction <add>, %29, %cst_16 [1] : vector<8x8xf32> to vector<8xf32>
    %31 = vector.shape_cast %30 : vector<8xf32> to vector<8x1xf32>
    %32 = tpu.reciprocal %31 {approx = true} : vector<8x1xf32> -> vector<8x1xf32>
    %33 = vector.broadcast %32 : vector<8x1xf32> to vector<8x8xf32>
    %34 = arith.mulf %29, %33 : vector<8x8xf32>
    %35 = arith.truncf %34 : vector<8x8xf32> to vector<8x8xbf16>
    %cst_17 = arith.constant dense<0.000000e+00> : vector<8x8xf32>
    %36 = tpu.matmul %35, %23, %cst_17 {dimension_numbers = #tpu.dot_dimension_numbers<[1], [0], [0], [1], [0, 0, 1, 1], [], []>} : vector<8x8xbf16>, vector<8x8xbf16>, vector<8x8xf32> -> vector<8x8xf32>
    %c0_18 = arith.constant 0 : index
    %c0_19 = arith.constant 0 : index
    %37 = vector.load %arg17[%c0_18, %c0_19] : memref<16x32xf32, #tpu.memory_space<vmem>>, vector<8x8xf32>
    tpu.vector_store %arg17[%c0_18, %c0_19], %36 {strides = array<i32>} : memref<16x32xf32, #tpu.memory_space<vmem>>, vector<8x8xf32>,
    %38 = vector.extract_strided_slice %18 {offsets = [0, 8], sizes = [8, 8], strides = [1, 1]} : vector<16x32xbf16> to vector<8x8xbf16>
    %39 = vector.extract_strided_slice %19 {offsets = [0, 8], sizes = [8, 8], strides = [1, 1]} : vector<16x32xbf16> to vector<8x8xbf16>
    %40 = vector.extract_strided_slice %20 {offsets = [0, 8], sizes = [8, 8], strides = [1, 1]} : vector<16x32xbf16> to vector<8x8xbf16>
    %cst_20 = arith.constant dense<0.000000e+00> : vector<8x8xf32>
    %41 = tpu.matmul %38, %39, %cst_20 {dimension_numbers = #tpu.dot_dimension_numbers<[1], [1], [0], [0], [0, 0, 1, 0], [], []>} : vector<8x8xbf16>, vector<8x8xbf16>, vector<8x8xf32> -> vector<8x8xf32>
    %cst_21 = arith.constant dense<0xFF800000> : vector<8xf32>
    %42 = vector.multi_reduction <maximumf>, %41, %cst_21 [1] : vector<8x8xf32> to vector<8xf32>
    %43 = vector.shape_cast %42 : vector<8xf32> to vector<8x1xf32>
    %44 = vector.broadcast %43 : vector<8x1xf32> to vector<8x8xf32>
    %45 = arith.subf %41, %44 : vector<8x8xf32>
    %46 = math.exp %45 : vector<8x8xf32>
    %cst_22 = arith.constant dense<0.000000e+00> : vector<8xf32>
    %47 = vector.multi_reduction <add>, %46, %cst_22 [1] : vector<8x8xf32> to vector<8xf32>
    %48 = vector.shape_cast %47 : vector<8xf32> to vector<8x1xf32>
    %49 = tpu.reciprocal %48 {approx = true} : vector<8x1xf32> -> vector<8x1xf32>
    %50 = vector.broadcast %49 : vector<8x1xf32> to vector<8x8xf32>
    %51 = arith.mulf %46, %50 : vector<8x8xf32>
    %52 = arith.truncf %51 : vector<8x8xf32> to vector<8x8xbf16>
    %cst_23 = arith.constant dense<0.000000e+00> : vector<8x8xf32>
    %53 = tpu.matmul %52, %40, %cst_23 {dimension_numbers = #tpu.dot_dimension_numbers<[1], [0], [0], [1], [0, 0, 1, 1], [], []>} : vector<8x8xbf16>, vector<8x8xbf16>, vector<8x8xf32> -> vector<8x8xf32>
    %c0_24 = arith.constant 0 : index
    %c8 = arith.constant 8 : index
    %54 = vector.load %arg17[%c0_24, %c8] : memref<16x32xf32, #tpu.memory_space<vmem>>, vector<8x8xf32>
    tpu.vector_store %arg17[%c0_24, %c8], %53 {strides = array<i32>} : memref<16x32xf32, #tpu.memory_space<vmem>>, vector<8x8xf32>,
    %55 = vector.extract_strided_slice %18 {offsets = [0, 16], sizes = [8, 8], strides = [1, 1]} : vector<16x32xbf16> to vector<8x8xbf16>
    %56 = vector.extract_strided_slice %19 {offsets = [0, 16], sizes = [8, 8], strides = [1, 1]} : vector<16x32xbf16> to vector<8x8xbf16>
    %57 = vector.extract_strided_slice %20 {offsets = [0, 16], sizes = [8, 8], strides = [1, 1]} : vector<16x32xbf16> to vector<8x8xbf16>
    %cst_25 = arith.constant dense<0.000000e+00> : vector<8x8xf32>
    %58 = tpu.matmul %55, %56, %cst_25 {dimension_numbers = #tpu.dot_dimension_numbers<[1], [1], [0], [0], [0, 0, 1, 0], [], []>} : vector<8x8xbf16>, vector<8x8xbf16>, vector<8x8xf32> -> vector<8x8xf32>
    %cst_26 = arith.constant dense<0xFF800000> : vector<8xf32>
    %59 = vector.multi_reduction <maximumf>, %58, %cst_26 [1] : vector<8x8xf32> to vector<8xf32>
    %60 = vector.shape_cast %59 : vector<8xf32> to vector<8x1xf32>
    %61 = vector.broadcast %60 : vector<8x1xf32> to vector<8x8xf32>
    %62 = arith.subf %58, %61 : vector<8x8xf32>
    %63 = math.exp %62 : vector<8x8xf32>
    %cst_27 = arith.constant dense<0.000000e+00> : vector<8xf32>
    %64 = vector.multi_reduction <add>, %63, %cst_27 [1] : vector<8x8xf32> to vector<8xf32>
    %65 = vector.shape_cast %64 : vector<8xf32> to vector<8x1xf32>
    %66 = tpu.reciprocal %65 {approx = true} : vector<8x1xf32> -> vector<8x1xf32>
    %67 = vector.broadcast %66 : vector<8x1xf32> to vector<8x8xf32>
    %68 = arith.mulf %63, %67 : vector<8x8xf32>
    %69 = arith.truncf %68 : vector<8x8xf32> to vector<8x8xbf16>
    %cst_28 = arith.constant dense<0.000000e+00> : vector<8x8xf32>
    %70 = tpu.matmul %69, %57, %cst_28 {dimension_numbers = #tpu.dot_dimension_numbers<[1], [0], [0], [1], [0, 0, 1, 1], [], []>} : vector<8x8xbf16>, vector<8x8xbf16>, vector<8x8xf32> -> vector<8x8xf32>
    %c0_29 = arith.constant 0 : index
    %c16 = arith.constant 16 : index
    %71 = vector.load %arg17[%c0_29, %c16] : memref<16x32xf32, #tpu.memory_space<vmem>>, vector<8x8xf32>
    tpu.vector_store %arg17[%c0_29, %c16], %70 {strides = array<i32>} : memref<16x32xf32, #tpu.memory_space<vmem>>, vector<8x8xf32>,
    %72 = vector.extract_strided_slice %18 {offsets = [0, 24], sizes = [8, 8], strides = [1, 1]} : vector<16x32xbf16> to vector<8x8xbf16>
    %73 = vector.extract_strided_slice %19 {offsets = [0, 24], sizes = [8, 8], strides = [1, 1]} : vector<16x32xbf16> to vector<8x8xbf16>
    %74 = vector.extract_strided_slice %20 {offsets = [0, 24], sizes = [8, 8], strides = [1, 1]} : vector<16x32xbf16> to vector<8x8xbf16>
    %cst_30 = arith.constant dense<0.000000e+00> : vector<8x8xf32>
    %75 = tpu.matmul %72, %73, %cst_30 {dimension_numbers = #tpu.dot_dimension_numbers<[1], [1], [0], [0], [0, 0, 1, 0], [], []>} : vector<8x8xbf16>, vector<8x8xbf16>, vector<8x8xf32> -> vector<8x8xf32>
    %cst_31 = arith.constant dense<0xFF800000> : vector<8xf32>
    %76 = vector.multi_reduction <maximumf>, %75, %cst_31 [1] : vector<8x8xf32> to vector<8xf32>
    %77 = vector.shape_cast %76 : vector<8xf32> to vector<8x1xf32>
    %78 = vector.broadcast %77 : vector<8x1xf32> to vector<8x8xf32>
    %79 = arith.subf %75, %78 : vector<8x8xf32>
    %80 = math.exp %79 : vector<8x8xf32>
    %cst_32 = arith.constant dense<0.000000e+00> : vector<8xf32>
    %81 = vector.multi_reduction <add>, %80, %cst_32 [1] : vector<8x8xf32> to vector<8xf32>
    %82 = vector.shape_cast %81 : vector<8xf32> to vector<8x1xf32>
    %83 = tpu.reciprocal %82 {approx = true} : vector<8x1xf32> -> vector<8x1xf32>
    %84 = vector.broadcast %83 : vector<8x1xf32> to vector<8x8xf32>
    %85 = arith.mulf %80, %84 : vector<8x8xf32>
    %86 = arith.truncf %85 : vector<8x8xf32> to vector<8x8xbf16>
    %cst_33 = arith.constant dense<0.000000e+00> : vector<8x8xf32>
    %87 = tpu.matmul %86, %74, %cst_33 {dimension_numbers = #tpu.dot_dimension_numbers<[1], [0], [0], [1], [0, 0, 1, 1], [], []>} : vector<8x8xbf16>, vector<8x8xbf16>, vector<8x8xf32> -> vector<8x8xf32>
    %c0_34 = arith.constant 0 : index
    %c24 = arith.constant 24 : index
    %88 = vector.load %arg17[%c0_34, %c24] : memref<16x32xf32, #tpu.memory_space<vmem>>, vector<8x8xf32>
    tpu.vector_store %arg17[%c0_34, %c24], %87 {strides = array<i32>} : memref<16x32xf32, #tpu.memory_space<vmem>>, vector<8x8xf32>,
    %89 = vector.extract_strided_slice %18 {offsets = [8, 0], sizes = [8, 8], strides = [1, 1]} : vector<16x32xbf16> to vector<8x8xbf16>
    %90 = vector.extract_strided_slice %19 {offsets = [8, 0], sizes = [8, 8], strides = [1, 1]} : vector<16x32xbf16> to vector<8x8xbf16>
    %91 = vector.extract_strided_slice %20 {offsets = [8, 0], sizes = [8, 8], strides = [1, 1]} : vector<16x32xbf16> to vector<8x8xbf16>
    %cst_35 = arith.constant dense<0.000000e+00> : vector<8x8xf32>
    %92 = tpu.matmul %89, %90, %cst_35 {dimension_numbers = #tpu.dot_dimension_numbers<[1], [1], [0], [0], [0, 0, 1, 0], [], []>} : vector<8x8xbf16>, vector<8x8xbf16>, vector<8x8xf32> -> vector<8x8xf32>
    %cst_36 = arith.constant dense<0xFF800000> : vector<8xf32>
    %93 = vector.multi_reduction <maximumf>, %92, %cst_36 [1] : vector<8x8xf32> to vector<8xf32>
    %94 = vector.shape_cast %93 : vector<8xf32> to vector<8x1xf32>
    %95 = vector.broadcast %94 : vector<8x1xf32> to vector<8x8xf32>
    %96 = arith.subf %92, %95 : vector<8x8xf32>
    %97 = math.exp %96 : vector<8x8xf32>
    %cst_37 = arith.constant dense<0.000000e+00> : vector<8xf32>
    %98 = vector.multi_reduction <add>, %97, %cst_37 [1] : vector<8x8xf32> to vector<8xf32>
    %99 = vector.shape_cast %98 : vector<8xf32> to vector<8x1xf32>
    %100 = tpu.reciprocal %99 {approx = true} : vector<8x1xf32> -> vector<8x1xf32>
    %101 = vector.broadcast %100 : vector<8x1xf32> to vector<8x8xf32>
    %102 = arith.mulf %97, %101 : vector<8x8xf32>
    %103 = arith.truncf %102 : vector<8x8xf32> to vector<8x8xbf16>
    %cst_38 = arith.constant dense<0.000000e+00> : vector<8x8xf32>
    %104 = tpu.matmul %103, %91, %cst_38 {dimension_numbers = #tpu.dot_dimension_numbers<[1], [0], [0], [1], [0, 0, 1, 1], [], []>} : vector<8x8xbf16>, vector<8x8xbf16>, vector<8x8xf32> -> vector<8x8xf32>
    %c8_39 = arith.constant 8 : index
    %c0_40 = arith.constant 0 : index
    %105 = vector.load %arg17[%c8_39, %c0_40] : memref<16x32xf32, #tpu.memory_space<vmem>>, vector<8x8xf32>
    tpu.vector_store %arg17[%c8_39, %c0_40], %104 {strides = array<i32>} : memref<16x32xf32, #tpu.memory_space<vmem>>, vector<8x8xf32>,
    %106 = vector.extract_strided_slice %18 {offsets = [8, 8], sizes = [8, 8], strides = [1, 1]} : vector<16x32xbf16> to vector<8x8xbf16>
    %107 = vector.extract_strided_slice %19 {offsets = [8, 8], sizes = [8, 8], strides = [1, 1]} : vector<16x32xbf16> to vector<8x8xbf16>
    %108 = vector.extract_strided_slice %20 {offsets = [8, 8], sizes = [8, 8], strides = [1, 1]} : vector<16x32xbf16> to vector<8x8xbf16>
    %cst_41 = arith.constant dense<0.000000e+00> : vector<8x8xf32>
    %109 = tpu.matmul %106, %107, %cst_41 {dimension_numbers = #tpu.dot_dimension_numbers<[1], [1], [0], [0], [0, 0, 1, 0], [], []>} : vector<8x8xbf16>, vector<8x8xbf16>, vector<8x8xf32> -> vector<8x8xf32>
    %cst_42 = arith.constant dense<0xFF800000> : vector<8xf32>
    %110 = vector.multi_reduction <maximumf>, %109, %cst_42 [1] : vector<8x8xf32> to vector<8xf32>
    %111 = vector.shape_cast %110 : vector<8xf32> to vector<8x1xf32>
    %112 = vector.broadcast %111 : vector<8x1xf32> to vector<8x8xf32>
    %113 = arith.subf %109, %112 : vector<8x8xf32>
    %114 = math.exp %113 : vector<8x8xf32>
    %cst_43 = arith.constant dense<0.000000e+00> : vector<8xf32>
    %115 = vector.multi_reduction <add>, %114, %cst_43 [1] : vector<8x8xf32> to vector<8xf32>
    %116 = vector.shape_cast %115 : vector<8xf32> to vector<8x1xf32>
    %117 = tpu.reciprocal %116 {approx = true} : vector<8x1xf32> -> vector<8x1xf32>
    %118 = vector.broadcast %117 : vector<8x1xf32> to vector<8x8xf32>
    %119 = arith.mulf %114, %118 : vector<8x8xf32>
    %120 = arith.truncf %119 : vector<8x8xf32> to vector<8x8xbf16>
    %cst_44 = arith.constant dense<0.000000e+00> : vector<8x8xf32>
    %121 = tpu.matmul %120, %108, %cst_44 {dimension_numbers = #tpu.dot_dimension_numbers<[1], [0], [0], [1], [0, 0, 1, 1], [], []>} : vector<8x8xbf16>, vector<8x8xbf16>, vector<8x8xf32> -> vector<8x8xf32>
    %c8_45 = arith.constant 8 : index
    %c8_46 = arith.constant 8 : index
    %122 = vector.load %arg17[%c8_45, %c8_46] : memref<16x32xf32, #tpu.memory_space<vmem>>, vector<8x8xf32>
    tpu.vector_store %arg17[%c8_45, %c8_46], %121 {strides = array<i32>} : memref<16x32xf32, #tpu.memory_space<vmem>>, vector<8x8xf32>,
    %123 = vector.extract_strided_slice %18 {offsets = [8, 16], sizes = [8, 8], strides = [1, 1]} : vector<16x32xbf16> to vector<8x8xbf16>
    %124 = vector.extract_strided_slice %19 {offsets = [8, 16], sizes = [8, 8], strides = [1, 1]} : vector<16x32xbf16> to vector<8x8xbf16>
    %125 = vector.extract_strided_slice %20 {offsets = [8, 16], sizes = [8, 8], strides = [1, 1]} : vector<16x32xbf16> to vector<8x8xbf16>
    %cst_47 = arith.constant dense<0.000000e+00> : vector<8x8xf32>
    %126 = tpu.matmul %123, %124, %cst_47 {dimension_numbers = #tpu.dot_dimension_numbers<[1], [1], [0], [0], [0, 0, 1, 0], [], []>} : vector<8x8xbf16>, vector<8x8xbf16>, vector<8x8xf32> -> vector<8x8xf32>
    %cst_48 = arith.constant dense<0xFF800000> : vector<8xf32>
    %127 = vector.multi_reduction <maximumf>, %126, %cst_48 [1] : vector<8x8xf32> to vector<8xf32>
    %128 = vector.shape_cast %127 : vector<8xf32> to vector<8x1xf32>
    %129 = vector.broadcast %128 : vector<8x1xf32> to vector<8x8xf32>
    %130 = arith.subf %126, %129 : vector<8x8xf32>
    %131 = math.exp %130 : vector<8x8xf32>
    %cst_49 = arith.constant dense<0.000000e+00> : vector<8xf32>
    %132 = vector.multi_reduction <add>, %131, %cst_49 [1] : vector<8x8xf32> to vector<8xf32>
    %133 = vector.shape_cast %132 : vector<8xf32> to vector<8x1xf32>
    %134 = tpu.reciprocal %133 {approx = true} : vector<8x1xf32> -> vector<8x1xf32>
    %135 = vector.broadcast %134 : vector<8x1xf32> to vector<8x8xf32>
    %136 = arith.mulf %131, %135 : vector<8x8xf32>
    %137 = arith.truncf %136 : vector<8x8xf32> to vector<8x8xbf16>
    %cst_50 = arith.constant dense<0.000000e+00> : vector<8x8xf32>
    %138 = tpu.matmul %137, %125, %cst_50 {dimension_numbers = #tpu.dot_dimension_numbers<[1], [0], [0], [1], [0, 0, 1, 1], [], []>} : vector<8x8xbf16>, vector<8x8xbf16>, vector<8x8xf32> -> vector<8x8xf32>
    %c8_51 = arith.constant 8 : index
    %c16_52 = arith.constant 16 : index
    %139 = vector.load %arg17[%c8_51, %c16_52] : memref<16x32xf32, #tpu.memory_space<vmem>>, vector<8x8xf32>
    tpu.vector_store %arg17[%c8_51, %c16_52], %138 {strides = array<i32>} : memref<16x32xf32, #tpu.memory_space<vmem>>, vector<8x8xf32>,
    %140 = vector.extract_strided_slice %18 {offsets = [8, 24], sizes = [8, 8], strides = [1, 1]} : vector<16x32xbf16> to vector<8x8xbf16>
    %141 = vector.extract_strided_slice %19 {offsets = [8, 24], sizes = [8, 8], strides = [1, 1]} : vector<16x32xbf16> to vector<8x8xbf16>
    %142 = vector.extract_strided_slice %20 {offsets = [8, 24], sizes = [8, 8], strides = [1, 1]} : vector<16x32xbf16> to vector<8x8xbf16>
    %cst_53 = arith.constant dense<0.000000e+00> : vector<8x8xf32>
    %143 = tpu.matmul %140, %141, %cst_53 {dimension_numbers = #tpu.dot_dimension_numbers<[1], [1], [0], [0], [0, 0, 1, 0], [], []>} : vector<8x8xbf16>, vector<8x8xbf16>, vector<8x8xf32> -> vector<8x8xf32>
    %cst_54 = arith.constant dense<0xFF800000> : vector<8xf32>
    %144 = vector.multi_reduction <maximumf>, %143, %cst_54 [1] : vector<8x8xf32> to vector<8xf32>
    %145 = vector.shape_cast %144 : vector<8xf32> to vector<8x1xf32>
    %146 = vector.broadcast %145 : vector<8x1xf32> to vector<8x8xf32>
    %147 = arith.subf %143, %146 : vector<8x8xf32>
    %148 = math.exp %147 : vector<8x8xf32>
    %cst_55 = arith.constant dense<0.000000e+00> : vector<8xf32>
    %149 = vector.multi_reduction <add>, %148, %cst_55 [1] : vector<8x8xf32> to vector<8xf32>
    %150 = vector.shape_cast %149 : vector<8xf32> to vector<8x1xf32>
    %151 = tpu.reciprocal %150 {approx = true} : vector<8x1xf32> -> vector<8x1xf32>
    %152 = vector.broadcast %151 : vector<8x1xf32> to vector<8x8xf32>
    %153 = arith.mulf %148, %152 : vector<8x8xf32>
    %154 = arith.truncf %153 : vector<8x8xf32> to vector<8x8xbf16>
    %cst_56 = arith.constant dense<0.000000e+00> : vector<8x8xf32>
    %155 = tpu.matmul %154, %142, %cst_56 {dimension_numbers = #tpu.dot_dimension_numbers<[1], [0], [0], [1], [0, 0, 1, 1], [], []>} : vector<8x8xbf16>, vector<8x8xbf16>, vector<8x8xf32> -> vector<8x8xf32>
    %c8_57 = arith.constant 8 : index
    %c24_58 = arith.constant 24 : index
    %156 = vector.load %arg17[%c8_57, %c24_58] : memref<16x32xf32, #tpu.memory_space<vmem>>, vector<8x8xf32>
    tpu.vector_store %arg17[%c8_57, %c24_58], %155 {strides = array<i32>} : memref<16x32xf32, #tpu.memory_space<vmem>>, vector<8x8xf32>,
    %c0_59 = arith.constant 0 : index
    %c0_60 = arith.constant 0 : index
    %157 = vector.load %arg17[%c0_59, %c0_60] : memref<16x32xf32, #tpu.memory_space<vmem>>, vector<16x32xf32>
    %158 = arith.truncf %157 : vector<16x32xf32> to vector<16x32xbf16>
    %cst_61 = arith.constant dense<0.000000e+00> : vector<16x32xf32>
    %159 = tpu.matmul %158, %7, %cst_61 {dimension_numbers = #tpu.dot_dimension_numbers<[1], [0], [0], [1], [0, 0, 1, 1], [], []>} : vector<16x32xbf16>, vector<32x32xbf16>, vector<16x32xf32> -> vector<16x32xf32>
    %160 = vector.broadcast %9 : vector<1x32xf32> to vector<16x32xf32>
    %161 = arith.addf %159, %160 : vector<16x32xf32>
    %162 = arith.addf %0, %161 : vector<16x32xf32>
    %c0_62 = arith.constant 0 : index
    %c0_63 = arith.constant 0 : index
    %c0_64 = arith.constant 0 : index
    %163 = vector.load %arg6[%c0_62, %c0_63, %c0_64] : memref<2x1x32xf32, #tpu.memory_space<vmem>>, vector<1x1x32xf32>
    %164 = vector.shape_cast %163 : vector<1x1x32xf32> to vector<1x32xf32>
    %c0_65 = arith.constant 0 : index
    %c0_66 = arith.constant 0 : index
    %c0_67 = arith.constant 0 : index
    %165 = vector.load %arg7[%c0_65, %c0_66, %c0_67] : memref<2x1x32xf32, #tpu.memory_space<vmem>>, vector<1x1x32xf32>
    %166 = vector.shape_cast %165 : vector<1x1x32xf32> to vector<1x32xf32>
    %cst_68 = arith.constant dense<0.000000e+00> : vector<16xf32>
    %167 = vector.multi_reduction <add>, %162, %cst_68 [1] : vector<16x32xf32> to vector<16xf32>
    %168 = vector.shape_cast %167 : vector<16xf32> to vector<16x1xf32>
    %cst_69 = arith.constant 3.200000e+01 : f32
    %169 = vector.broadcast %cst_69 : f32 to vector<16x1xf32>
    %170 = arith.divf %168, %169 : vector<16x1xf32>
    %171 = vector.broadcast %170 : vector<16x1xf32> to vector<16x32xf32>
    %172 = arith.subf %162, %171 : vector<16x32xf32>
    %173 = arith.mulf %172, %172 : vector<16x32xf32>
    %cst_70 = arith.constant dense<0.000000e+00> : vector<16xf32>
    %174 = vector.multi_reduction <add>, %173, %cst_70 [1] : vector<16x32xf32> to vector<16xf32>
    %175 = vector.shape_cast %174 : vector<16xf32> to vector<16x1xf32>
    %cst_71 = arith.constant 3.200000e+01 : f32
    %176 = vector.broadcast %cst_71 : f32 to vector<16x1xf32>
    %177 = arith.divf %175, %176 : vector<16x1xf32>
    %178 = vector.broadcast %170 : vector<16x1xf32> to vector<16x32xf32>
    %179 = arith.subf %162, %178 : vector<16x32xf32>
    %cst_72 = arith.constant 9.99999974E-6 : f32
    %180 = vector.broadcast %cst_72 : f32 to vector<16x1xf32>
    %181 = arith.addf %177, %180 : vector<16x1xf32>
    %182 = math.rsqrt %181 : vector<16x1xf32>
    %183 = vector.broadcast %182 : vector<16x1xf32> to vector<16x32xf32>
    %184 = arith.mulf %179, %183 : vector<16x32xf32>
    %185 = vector.broadcast %164 : vector<1x32xf32> to vector<16x32xf32>
    %186 = arith.mulf %184, %185 : vector<16x32xf32>
    %187 = vector.broadcast %166 : vector<1x32xf32> to vector<16x32xf32>
    %188 = arith.addf %186, %187 : vector<16x32xf32>
    %189 = arith.truncf %188 : vector<16x32xf32> to vector<16x32xbf16>
    %c0_73 = arith.constant 0 : index
    %c0_74 = arith.constant 0 : index
    %c0_75 = arith.constant 0 : index
    %190 = vector.load %arg8[%c0_73, %c0_74, %c0_75] : memref<2x32x64xbf16, #tpu.memory_space<vmem>>, vector<1x32x64xbf16>
    %191 = vector.shape_cast %190 : vector<1x32x64xbf16> to vector<32x64xbf16>
    %c0_76 = arith.constant 0 : index
    %c0_77 = arith.constant 0 : index
    %c0_78 = arith.constant 0 : index
    %192 = vector.load %arg9[%c0_76, %c0_77, %c0_78] : memref<2x1x64xf32, #tpu.memory_space<vmem>>, vector<1x1x64xf32>
    %193 = vector.shape_cast %192 : vector<1x1x64xf32> to vector<1x64xf32>
    %c0_79 = arith.constant 0 : index
    %c0_80 = arith.constant 0 : index
    %c0_81 = arith.constant 0 : index
    %194 = vector.load %arg10[%c0_79, %c0_80, %c0_81] : memref<2x64x32xbf16, #tpu.memory_space<vmem>>, vector<1x64x32xbf16>
    %195 = vector.shape_cast %194 : vector<1x64x32xbf16> to vector<64x32xbf16>
    %c0_82 = arith.constant 0 : index
    %c0_83 = arith.constant 0 : index
    %c0_84 = arith.constant 0 : index
    %196 = vector.load %arg11[%c0_82, %c0_83, %c0_84] : memref<2x1x32xf32, #tpu.memory_space<vmem>>, vector<1x1x32xf32>
    %197 = vector.shape_cast %196 : vector<1x1x32xf32> to vector<1x32xf32>
    %c0_85 = arith.constant 0 : index
    %c0_86 = arith.constant 0 : index
    %c0_87 = arith.constant 0 : index
    %198 = vector.load %arg12[%c0_85, %c0_86, %c0_87] : memref<2x1x32xf32, #tpu.memory_space<vmem>>, vector<1x1x32xf32>
    %199 = vector.shape_cast %198 : vector<1x1x32xf32> to vector<1x32xf32>
    %c0_88 = arith.constant 0 : index
    %c0_89 = arith.constant 0 : index
    %c0_90 = arith.constant 0 : index
    %200 = vector.load %arg13[%c0_88, %c0_89, %c0_90] : memref<2x1x32xf32, #tpu.memory_space<vmem>>, vector<1x1x32xf32>
    %201 = vector.shape_cast %200 : vector<1x1x32xf32> to vector<1x32xf32>
    %cst_91 = arith.constant dense<0.000000e+00> : vector<16x64xf32>
    %202 = tpu.matmul %189, %191, %cst_91 {dimension_numbers = #tpu.dot_dimension_numbers<[1], [0], [0], [1], [0, 0, 1, 1], [], []>} : vector<16x32xbf16>, vector<32x64xbf16>, vector<16x64xf32> -> vector<16x64xf32>
    %203 = vector.broadcast %193 : vector<1x64xf32> to vector<16x64xf32>
    %204 = arith.addf %202, %203 : vector<16x64xf32>
    %cst_92 = arith.constant 0.000000e+00 : f32
    %205 = vector.broadcast %cst_92 : f32 to vector<16x64xf32>
    %206 = arith.maximumf %204, %205 : vector<16x64xf32>
    %207 = arith.truncf %206 : vector<16x64xf32> to vector<16x64xbf16>
    %cst_93 = arith.constant dense<0.000000e+00> : vector<16x32xf32>
    %208 = tpu.matmul %207, %195, %cst_93 {dimension_numbers = #tpu.dot_dimension_numbers<[1], [0], [0], [1], [0, 0, 1, 1], [], []>} : vector<16x64xbf16>, vector<64x32xbf16>, vector<16x32xf32> -> vector<16x32xf32>
    %209 = vector.broadcast %197 : vector<1x32xf32> to vector<16x32xf32>
    %210 = arith.addf %208, %209 : vector<16x32xf32>
    %211 = arith.addf %188, %210 : vector<16x32xf32>
    %cst_94 = arith.constant dense<0.000000e+00> : vector<16xf32>
    %212 = vector.multi_reduction <add>, %211, %cst_94 [1] : vector<16x32xf32> to vector<16xf32>
    %213 = vector.shape_cast %212 : vector<16xf32> to vector<16x1xf32>
    %cst_95 = arith.constant 3.200000e+01 : f32
    %214 = vector.broadcast %cst_95 : f32 to vector<16x1xf32>
    %215 = arith.divf %213, %214 : vector<16x1xf32>
    %216 = vector.broadcast %215 : vector<16x1xf32> to vector<16x32xf32>
    %217 = arith.subf %211, %216 : vector<16x32xf32>
    %218 = arith.mulf %217, %217 : vector<16x32xf32>
    %cst_96 = arith.constant dense<0.000000e+00> : vector<16xf32>
    %219 = vector.multi_reduction <add>, %218, %cst_96 [1] : vector<16x32xf32> to vector<16xf32>
    %220 = vector.shape_cast %219 : vector<16xf32> to vector<16x1xf32>
    %cst_97 = arith.constant 3.200000e+01 : f32
    %221 = vector.broadcast %cst_97 : f32 to vector<16x1xf32>
    %222 = arith.divf %220, %221 : vector<16x1xf32>
    %223 = vector.broadcast %215 : vector<16x1xf32> to vector<16x32xf32>
    %224 = arith.subf %211, %223 : vector<16x32xf32>
    %cst_98 = arith.constant 9.99999974E-6 : f32
    %225 = vector.broadcast %cst_98 : f32 to vector<16x1xf32>
    %226 = arith.addf %222, %225 : vector<16x1xf32>
    %227 = math.rsqrt %226 : vector<16x1xf32>
    %228 = vector.broadcast %227 : vector<16x1xf32> to vector<16x32xf32>
    %229 = arith.mulf %224, %228 : vector<16x32xf32>
    %230 = vector.broadcast %199 : vector<1x32xf32> to vector<16x32xf32>
    %231 = arith.mulf %229, %230 : vector<16x32xf32>
    %232 = vector.broadcast %201 : vector<1x32xf32> to vector<16x32xf32>
    %233 = arith.addf %231, %232 : vector<16x32xf32>
    %234 = arith.truncf %233 : vector<16x32xf32> to vector<16x32xbf16>
    %c1 = arith.constant 1 : index
    %c0_99 = arith.constant 0 : index
    %c0_100 = arith.constant 0 : index
    %235 = vector.load %arg2[%c1, %c0_99, %c0_100] : memref<2x32x96xbf16, #tpu.memory_space<vmem>>, vector<1x32x96xbf16>
    %236 = vector.shape_cast %235 : vector<1x32x96xbf16> to vector<32x96xbf16>
    %c1_101 = arith.constant 1 : index
    %c0_102 = arith.constant 0 : index
    %c0_103 = arith.constant 0 : index
    %237 = vector.load %arg3[%c1_101, %c0_102, %c0_103] : memref<2x1x96xf32, #tpu.memory_space<vmem>>, vector<1x1x96xf32>
    %238 = vector.shape_cast %237 : vector<1x1x96xf32> to vector<1x96xf32>
    %c1_104 = arith.constant 1 : index
    %c0_105 = arith.constant 0 : index
    %c0_106 = arith.constant 0 : index
    %239 = vector.load %arg4[%c1_104, %c0_105, %c0_106] : memref<2x32x32xbf16, #tpu.memory_space<vmem>>, vector<1x32x32xbf16>
    %240 = vector.shape_cast %239 : vector<1x32x32xbf16> to vector<32x32xbf16>
    %c1_107 = arith.constant 1 : index
    %c0_108 = arith.constant 0 : index
    %c0_109 = arith.constant 0 : index
    %241 = vector.load %arg5[%c1_107, %c0_108, %c0_109] : memref<2x1x32xf32, #tpu.memory_space<vmem>>, vector<1x1x32xf32>
    %242 = vector.shape_cast %241 : vector<1x1x32xf32> to vector<1x32xf32>
    %cst_110 = arith.constant dense<0.000000e+00> : vector<16x96xf32>
    %243 = tpu.matmul %234, %236, %cst_110 {dimension_numbers = #tpu.dot_dimension_numbers<[1], [0], [0], [1], [0, 0, 1, 1], [], []>} : vector<16x32xbf16>, vector<32x96xbf16>, vector<16x96xf32> -> vector<16x96xf32>
    %244 = vector.broadcast %238 : vector<1x96xf32> to vector<16x96xf32>
    %245 = arith.addf %243, %244 : vector<16x96xf32>
    %246 = vector.extract_strided_slice %245 {offsets = [0, 0], sizes = [16, 32], strides = [1, 1]} : vector<16x96xf32> to vector<16x32xf32>
    %247 = vector.extract_strided_slice %245 {offsets = [0, 32], sizes = [16, 32], strides = [1, 1]} : vector<16x96xf32> to vector<16x32xf32>
    %248 = vector.extract_strided_slice %245 {offsets = [0, 64], sizes = [16, 32], strides = [1, 1]} : vector<16x96xf32> to vector<16x32xf32>
    %cst_111 = arith.constant 0.353553385 : f32
    %249 = vector.broadcast %cst_111 : f32 to vector<16x32xf32>
    %250 = arith.mulf %246, %249 : vector<16x32xf32>
    %251 = arith.truncf %250 : vector<16x32xf32> to vector<16x32xbf16>
    %252 = arith.truncf %247 : vector<16x32xf32> to vector<16x32xbf16>
    %253 = arith.truncf %248 : vector<16x32xf32> to vector<16x32xbf16>
    %254 = vector.extract_strided_slice %251 {offsets = [0, 0], sizes = [8, 8], strides = [1, 1]} : vector<16x32xbf16> to vector<8x8xbf16>
    %255 = vector.extract_strided_slice %252 {offsets = [0, 0], sizes = [8, 8], strides = [1, 1]} : vector<16x32xbf16> to vector<8x8xbf16>
    %256 = vector.extract_strided_slice %253 {offsets = [0, 0], sizes = [8, 8], strides = [1, 1]} : vector<16x32xbf16> to vector<8x8xbf16>
    %cst_112 = arith.constant dense<0.000000e+00> : vector<8x8xf32>
    %257 = tpu.matmul %254, %255, %cst_112 {dimension_numbers = #tpu.dot_dimension_numbers<[1], [1], [0], [0], [0, 0, 1, 0], [], []>} : vector<8x8xbf16>, vector<8x8xbf16>, vector<8x8xf32> -> vector<8x8xf32>
    %cst_113 = arith.constant dense<0xFF800000> : vector<8xf32>
    %258 = vector.multi_reduction <maximumf>, %257, %cst_113 [1] : vector<8x8xf32> to vector<8xf32>
    %259 = vector.shape_cast %258 : vector<8xf32> to vector<8x1xf32>
    %260 = vector.broadcast %259 : vector<8x1xf32> to vector<8x8xf32>
    %261 = arith.subf %257, %260 : vector<8x8xf32>
    %262 = math.exp %261 : vector<8x8xf32>
    %cst_114 = arith.constant dense<0.000000e+00> : vector<8xf32>
    %263 = vector.multi_reduction <add>, %262, %cst_114 [1] : vector<8x8xf32> to vector<8xf32>
    %264 = vector.shape_cast %263 : vector<8xf32> to vector<8x1xf32>
    %265 = tpu.reciprocal %264 {approx = true} : vector<8x1xf32> -> vector<8x1xf32>
    %266 = vector.broadcast %265 : vector<8x1xf32> to vector<8x8xf32>
    %267 = arith.mulf %262, %266 : vector<8x8xf32>
    %268 = arith.truncf %267 : vector<8x8xf32> to vector<8x8xbf16>
    %cst_115 = arith.constant dense<0.000000e+00> : vector<8x8xf32>
    %269 = tpu.matmul %268, %256, %cst_115 {dimension_numbers = #tpu.dot_dimension_numbers<[1], [0], [0], [1], [0, 0, 1, 1], [], []>} : vector<8x8xbf16>, vector<8x8xbf16>, vector<8x8xf32> -> vector<8x8xf32>
    %c0_116 = arith.constant 0 : index
    %c0_117 = arith.constant 0 : index
    %270 = vector.load %arg17[%c0_116, %c0_117] : memref<16x32xf32, #tpu.memory_space<vmem>>, vector<8x8xf32>
    tpu.vector_store %arg17[%c0_116, %c0_117], %269 {strides = array<i32>} : memref<16x32xf32, #tpu.memory_space<vmem>>, vector<8x8xf32>,
    %271 = vector.extract_strided_slice %251 {offsets = [0, 8], sizes = [8, 8], strides = [1, 1]} : vector<16x32xbf16> to vector<8x8xbf16>
    %272 = vector.extract_strided_slice %252 {offsets = [0, 8], sizes = [8, 8], strides = [1, 1]} : vector<16x32xbf16> to vector<8x8xbf16>
    %273 = vector.extract_strided_slice %253 {offsets = [0, 8], sizes = [8, 8], strides = [1, 1]} : vector<16x32xbf16> to vector<8x8xbf16>
    %cst_118 = arith.constant dense<0.000000e+00> : vector<8x8xf32>
    %274 = tpu.matmul %271, %272, %cst_118 {dimension_numbers = #tpu.dot_dimension_numbers<[1], [1], [0], [0], [0, 0, 1, 0], [], []>} : vector<8x8xbf16>, vector<8x8xbf16>, vector<8x8xf32> -> vector<8x8xf32>
    %cst_119 = arith.constant dense<0xFF800000> : vector<8xf32>
    %275 = vector.multi_reduction <maximumf>, %274, %cst_119 [1] : vector<8x8xf32> to vector<8xf32>
    %276 = vector.shape_cast %275 : vector<8xf32> to vector<8x1xf32>
    %277 = vector.broadcast %276 : vector<8x1xf32> to vector<8x8xf32>
    %278 = arith.subf %274, %277 : vector<8x8xf32>
    %279 = math.exp %278 : vector<8x8xf32>
    %cst_120 = arith.constant dense<0.000000e+00> : vector<8xf32>
    %280 = vector.multi_reduction <add>, %279, %cst_120 [1] : vector<8x8xf32> to vector<8xf32>
    %281 = vector.shape_cast %280 : vector<8xf32> to vector<8x1xf32>
    %282 = tpu.reciprocal %281 {approx = true} : vector<8x1xf32> -> vector<8x1xf32>
    %283 = vector.broadcast %282 : vector<8x1xf32> to vector<8x8xf32>
    %284 = arith.mulf %279, %283 : vector<8x8xf32>
    %285 = arith.truncf %284 : vector<8x8xf32> to vector<8x8xbf16>
    %cst_121 = arith.constant dense<0.000000e+00> : vector<8x8xf32>
    %286 = tpu.matmul %285, %273, %cst_121 {dimension_numbers = #tpu.dot_dimension_numbers<[1], [0], [0], [1], [0, 0, 1, 1], [], []>} : vector<8x8xbf16>, vector<8x8xbf16>, vector<8x8xf32> -> vector<8x8xf32>
    %c0_122 = arith.constant 0 : index
    %c8_123 = arith.constant 8 : index
    %287 = vector.load %arg17[%c0_122, %c8_123] : memref<16x32xf32, #tpu.memory_space<vmem>>, vector<8x8xf32>
    tpu.vector_store %arg17[%c0_122, %c8_123], %286 {strides = array<i32>} : memref<16x32xf32, #tpu.memory_space<vmem>>, vector<8x8xf32>,
    %288 = vector.extract_strided_slice %251 {offsets = [0, 16], sizes = [8, 8], strides = [1, 1]} : vector<16x32xbf16> to vector<8x8xbf16>
    %289 = vector.extract_strided_slice %252 {offsets = [0, 16], sizes = [8, 8], strides = [1, 1]} : vector<16x32xbf16> to vector<8x8xbf16>
    %290 = vector.extract_strided_slice %253 {offsets = [0, 16], sizes = [8, 8], strides = [1, 1]} : vector<16x32xbf16> to vector<8x8xbf16>
    %cst_124 = arith.constant dense<0.000000e+00> : vector<8x8xf32>
    %291 = tpu.matmul %288, %289, %cst_124 {dimension_numbers = #tpu.dot_dimension_numbers<[1], [1], [0], [0], [0, 0, 1, 0], [], []>} : vector<8x8xbf16>, vector<8x8xbf16>, vector<8x8xf32> -> vector<8x8xf32>
    %cst_125 = arith.constant dense<0xFF800000> : vector<8xf32>
    %292 = vector.multi_reduction <maximumf>, %291, %cst_125 [1] : vector<8x8xf32> to vector<8xf32>
    %293 = vector.shape_cast %292 : vector<8xf32> to vector<8x1xf32>
    %294 = vector.broadcast %293 : vector<8x1xf32> to vector<8x8xf32>
    %295 = arith.subf %291, %294 : vector<8x8xf32>
    %296 = math.exp %295 : vector<8x8xf32>
    %cst_126 = arith.constant dense<0.000000e+00> : vector<8xf32>
    %297 = vector.multi_reduction <add>, %296, %cst_126 [1] : vector<8x8xf32> to vector<8xf32>
    %298 = vector.shape_cast %297 : vector<8xf32> to vector<8x1xf32>
    %299 = tpu.reciprocal %298 {approx = true} : vector<8x1xf32> -> vector<8x1xf32>
    %300 = vector.broadcast %299 : vector<8x1xf32> to vector<8x8xf32>
    %301 = arith.mulf %296, %300 : vector<8x8xf32>
    %302 = arith.truncf %301 : vector<8x8xf32> to vector<8x8xbf16>
    %cst_127 = arith.constant dense<0.000000e+00> : vector<8x8xf32>
    %303 = tpu.matmul %302, %290, %cst_127 {dimension_numbers = #tpu.dot_dimension_numbers<[1], [0], [0], [1], [0, 0, 1, 1], [], []>} : vector<8x8xbf16>, vector<8x8xbf16>, vector<8x8xf32> -> vector<8x8xf32>
    %c0_128 = arith.constant 0 : index
    %c16_129 = arith.constant 16 : index
    %304 = vector.load %arg17[%c0_128, %c16_129] : memref<16x32xf32, #tpu.memory_space<vmem>>, vector<8x8xf32>
    tpu.vector_store %arg17[%c0_128, %c16_129], %303 {strides = array<i32>} : memref<16x32xf32, #tpu.memory_space<vmem>>, vector<8x8xf32>,
    %305 = vector.extract_strided_slice %251 {offsets = [0, 24], sizes = [8, 8], strides = [1, 1]} : vector<16x32xbf16> to vector<8x8xbf16>
    %306 = vector.extract_strided_slice %252 {offsets = [0, 24], sizes = [8, 8], strides = [1, 1]} : vector<16x32xbf16> to vector<8x8xbf16>
    %307 = vector.extract_strided_slice %253 {offsets = [0, 24], sizes = [8, 8], strides = [1, 1]} : vector<16x32xbf16> to vector<8x8xbf16>
    %cst_130 = arith.constant dense<0.000000e+00> : vector<8x8xf32>
    %308 = tpu.matmul %305, %306, %cst_130 {dimension_numbers = #tpu.dot_dimension_numbers<[1], [1], [0], [0], [0, 0, 1, 0], [], []>} : vector<8x8xbf16>, vector<8x8xbf16>, vector<8x8xf32> -> vector<8x8xf32>
    %cst_131 = arith.constant dense<0xFF800000> : vector<8xf32>
    %309 = vector.multi_reduction <maximumf>, %308, %cst_131 [1] : vector<8x8xf32> to vector<8xf32>
    %310 = vector.shape_cast %309 : vector<8xf32> to vector<8x1xf32>
    %311 = vector.broadcast %310 : vector<8x1xf32> to vector<8x8xf32>
    %312 = arith.subf %308, %311 : vector<8x8xf32>
    %313 = math.exp %312 : vector<8x8xf32>
    %cst_132 = arith.constant dense<0.000000e+00> : vector<8xf32>
    %314 = vector.multi_reduction <add>, %313, %cst_132 [1] : vector<8x8xf32> to vector<8xf32>
    %315 = vector.shape_cast %314 : vector<8xf32> to vector<8x1xf32>
    %316 = tpu.reciprocal %315 {approx = true} : vector<8x1xf32> -> vector<8x1xf32>
    %317 = vector.broadcast %316 : vector<8x1xf32> to vector<8x8xf32>
    %318 = arith.mulf %313, %317 : vector<8x8xf32>
    %319 = arith.truncf %318 : vector<8x8xf32> to vector<8x8xbf16>
    %cst_133 = arith.constant dense<0.000000e+00> : vector<8x8xf32>
    %320 = tpu.matmul %319, %307, %cst_133 {dimension_numbers = #tpu.dot_dimension_numbers<[1], [0], [0], [1], [0, 0, 1, 1], [], []>} : vector<8x8xbf16>, vector<8x8xbf16>, vector<8x8xf32> -> vector<8x8xf32>
    %c0_134 = arith.constant 0 : index
    %c24_135 = arith.constant 24 : index
    %321 = vector.load %arg17[%c0_134, %c24_135] : memref<16x32xf32, #tpu.memory_space<vmem>>, vector<8x8xf32>
    tpu.vector_store %arg17[%c0_134, %c24_135], %320 {strides = array<i32>} : memref<16x32xf32, #tpu.memory_space<vmem>>, vector<8x8xf32>,
    %322 = vector.extract_strided_slice %251 {offsets = [8, 0], sizes = [8, 8], strides = [1, 1]} : vector<16x32xbf16> to vector<8x8xbf16>
    %323 = vector.extract_strided_slice %252 {offsets = [8, 0], sizes = [8, 8], strides = [1, 1]} : vector<16x32xbf16> to vector<8x8xbf16>
    %324 = vector.extract_strided_slice %253 {offsets = [8, 0], sizes = [8, 8], strides = [1, 1]} : vector<16x32xbf16> to vector<8x8xbf16>
    %cst_136 = arith.constant dense<0.000000e+00> : vector<8x8xf32>
    %325 = tpu.matmul %322, %323, %cst_136 {dimension_numbers = #tpu.dot_dimension_numbers<[1], [1], [0], [0], [0, 0, 1, 0], [], []>} : vector<8x8xbf16>, vector<8x8xbf16>, vector<8x8xf32> -> vector<8x8xf32>
    %cst_137 = arith.constant dense<0xFF800000> : vector<8xf32>
    %326 = vector.multi_reduction <maximumf>, %325, %cst_137 [1] : vector<8x8xf32> to vector<8xf32>
    %327 = vector.shape_cast %326 : vector<8xf32> to vector<8x1xf32>
    %328 = vector.broadcast %327 : vector<8x1xf32> to vector<8x8xf32>
    %329 = arith.subf %325, %328 : vector<8x8xf32>
    %330 = math.exp %329 : vector<8x8xf32>
    %cst_138 = arith.constant dense<0.000000e+00> : vector<8xf32>
    %331 = vector.multi_reduction <add>, %330, %cst_138 [1] : vector<8x8xf32> to vector<8xf32>
    %332 = vector.shape_cast %331 : vector<8xf32> to vector<8x1xf32>
    %333 = tpu.reciprocal %332 {approx = true} : vector<8x1xf32> -> vector<8x1xf32>
    %334 = vector.broadcast %333 : vector<8x1xf32> to vector<8x8xf32>
    %335 = arith.mulf %330, %334 : vector<8x8xf32>
    %336 = arith.truncf %335 : vector<8x8xf32> to vector<8x8xbf16>
    %cst_139 = arith.constant dense<0.000000e+00> : vector<8x8xf32>
    %337 = tpu.matmul %336, %324, %cst_139 {dimension_numbers = #tpu.dot_dimension_numbers<[1], [0], [0], [1], [0, 0, 1, 1], [], []>} : vector<8x8xbf16>, vector<8x8xbf16>, vector<8x8xf32> -> vector<8x8xf32>
    %c8_140 = arith.constant 8 : index
    %c0_141 = arith.constant 0 : index
    %338 = vector.load %arg17[%c8_140, %c0_141] : memref<16x32xf32, #tpu.memory_space<vmem>>, vector<8x8xf32>
    tpu.vector_store %arg17[%c8_140, %c0_141], %337 {strides = array<i32>} : memref<16x32xf32, #tpu.memory_space<vmem>>, vector<8x8xf32>,
    %339 = vector.extract_strided_slice %251 {offsets = [8, 8], sizes = [8, 8], strides = [1, 1]} : vector<16x32xbf16> to vector<8x8xbf16>
    %340 = vector.extract_strided_slice %252 {offsets = [8, 8], sizes = [8, 8], strides = [1, 1]} : vector<16x32xbf16> to vector<8x8xbf16>
    %341 = vector.extract_strided_slice %253 {offsets = [8, 8], sizes = [8, 8], strides = [1, 1]} : vector<16x32xbf16> to vector<8x8xbf16>
    %cst_142 = arith.constant dense<0.000000e+00> : vector<8x8xf32>
    %342 = tpu.matmul %339, %340, %cst_142 {dimension_numbers = #tpu.dot_dimension_numbers<[1], [1], [0], [0], [0, 0, 1, 0], [], []>} : vector<8x8xbf16>, vector<8x8xbf16>, vector<8x8xf32> -> vector<8x8xf32>
    %cst_143 = arith.constant dense<0xFF800000> : vector<8xf32>
    %343 = vector.multi_reduction <maximumf>, %342, %cst_143 [1] : vector<8x8xf32> to vector<8xf32>
    %344 = vector.shape_cast %343 : vector<8xf32> to vector<8x1xf32>
    %345 = vector.broadcast %344 : vector<8x1xf32> to vector<8x8xf32>
    %346 = arith.subf %342, %345 : vector<8x8xf32>
    %347 = math.exp %346 : vector<8x8xf32>
    %cst_144 = arith.constant dense<0.000000e+00> : vector<8xf32>
    %348 = vector.multi_reduction <add>, %347, %cst_144 [1] : vector<8x8xf32> to vector<8xf32>
    %349 = vector.shape_cast %348 : vector<8xf32> to vector<8x1xf32>
    %350 = tpu.reciprocal %349 {approx = true} : vector<8x1xf32> -> vector<8x1xf32>
    %351 = vector.broadcast %350 : vector<8x1xf32> to vector<8x8xf32>
    %352 = arith.mulf %347, %351 : vector<8x8xf32>
    %353 = arith.truncf %352 : vector<8x8xf32> to vector<8x8xbf16>
    %cst_145 = arith.constant dense<0.000000e+00> : vector<8x8xf32>
    %354 = tpu.matmul %353, %341, %cst_145 {dimension_numbers = #tpu.dot_dimension_numbers<[1], [0], [0], [1], [0, 0, 1, 1], [], []>} : vector<8x8xbf16>, vector<8x8xbf16>, vector<8x8xf32> -> vector<8x8xf32>
    %c8_146 = arith.constant 8 : index
    %c8_147 = arith.constant 8 : index
    %355 = vector.load %arg17[%c8_146, %c8_147] : memref<16x32xf32, #tpu.memory_space<vmem>>, vector<8x8xf32>
    tpu.vector_store %arg17[%c8_146, %c8_147], %354 {strides = array<i32>} : memref<16x32xf32, #tpu.memory_space<vmem>>, vector<8x8xf32>,
    %356 = vector.extract_strided_slice %251 {offsets = [8, 16], sizes = [8, 8], strides = [1, 1]} : vector<16x32xbf16> to vector<8x8xbf16>
    %357 = vector.extract_strided_slice %252 {offsets = [8, 16], sizes = [8, 8], strides = [1, 1]} : vector<16x32xbf16> to vector<8x8xbf16>
    %358 = vector.extract_strided_slice %253 {offsets = [8, 16], sizes = [8, 8], strides = [1, 1]} : vector<16x32xbf16> to vector<8x8xbf16>
    %cst_148 = arith.constant dense<0.000000e+00> : vector<8x8xf32>
    %359 = tpu.matmul %356, %357, %cst_148 {dimension_numbers = #tpu.dot_dimension_numbers<[1], [1], [0], [0], [0, 0, 1, 0], [], []>} : vector<8x8xbf16>, vector<8x8xbf16>, vector<8x8xf32> -> vector<8x8xf32>
    %cst_149 = arith.constant dense<0xFF800000> : vector<8xf32>
    %360 = vector.multi_reduction <maximumf>, %359, %cst_149 [1] : vector<8x8xf32> to vector<8xf32>
    %361 = vector.shape_cast %360 : vector<8xf32> to vector<8x1xf32>
    %362 = vector.broadcast %361 : vector<8x1xf32> to vector<8x8xf32>
    %363 = arith.subf %359, %362 : vector<8x8xf32>
    %364 = math.exp %363 : vector<8x8xf32>
    %cst_150 = arith.constant dense<0.000000e+00> : vector<8xf32>
    %365 = vector.multi_reduction <add>, %364, %cst_150 [1] : vector<8x8xf32> to vector<8xf32>
    %366 = vector.shape_cast %365 : vector<8xf32> to vector<8x1xf32>
    %367 = tpu.reciprocal %366 {approx = true} : vector<8x1xf32> -> vector<8x1xf32>
    %368 = vector.broadcast %367 : vector<8x1xf32> to vector<8x8xf32>
    %369 = arith.mulf %364, %368 : vector<8x8xf32>
    %370 = arith.truncf %369 : vector<8x8xf32> to vector<8x8xbf16>
    %cst_151 = arith.constant dense<0.000000e+00> : vector<8x8xf32>
    %371 = tpu.matmul %370, %358, %cst_151 {dimension_numbers = #tpu.dot_dimension_numbers<[1], [0], [0], [1], [0, 0, 1, 1], [], []>} : vector<8x8xbf16>, vector<8x8xbf16>, vector<8x8xf32> -> vector<8x8xf32>
    %c8_152 = arith.constant 8 : index
    %c16_153 = arith.constant 16 : index
    %372 = vector.load %arg17[%c8_152, %c16_153] : memref<16x32xf32, #tpu.memory_space<vmem>>, vector<8x8xf32>
    tpu.vector_store %arg17[%c8_152, %c16_153], %371 {strides = array<i32>} : memref<16x32xf32, #tpu.memory_space<vmem>>, vector<8x8xf32>,
    %373 = vector.extract_strided_slice %251 {offsets = [8, 24], sizes = [8, 8], strides = [1, 1]} : vector<16x32xbf16> to vector<8x8xbf16>
    %374 = vector.extract_strided_slice %252 {offsets = [8, 24], sizes = [8, 8], strides = [1, 1]} : vector<16x32xbf16> to vector<8x8xbf16>
    %375 = vector.extract_strided_slice %253 {offsets = [8, 24], sizes = [8, 8], strides = [1, 1]} : vector<16x32xbf16> to vector<8x8xbf16>
    %cst_154 = arith.constant dense<0.000000e+00> : vector<8x8xf32>
    %376 = tpu.matmul %373, %374, %cst_154 {dimension_numbers = #tpu.dot_dimension_numbers<[1], [1], [0], [0], [0, 0, 1, 0], [], []>} : vector<8x8xbf16>, vector<8x8xbf16>, vector<8x8xf32> -> vector<8x8xf32>
    %cst_155 = arith.constant dense<0xFF800000> : vector<8xf32>
    %377 = vector.multi_reduction <maximumf>, %376, %cst_155 [1] : vector<8x8xf32> to vector<8xf32>
    %378 = vector.shape_cast %377 : vector<8xf32> to vector<8x1xf32>
    %379 = vector.broadcast %378 : vector<8x1xf32> to vector<8x8xf32>
    %380 = arith.subf %376, %379 : vector<8x8xf32>
    %381 = math.exp %380 : vector<8x8xf32>
    %cst_156 = arith.constant dense<0.000000e+00> : vector<8xf32>
    %382 = vector.multi_reduction <add>, %381, %cst_156 [1] : vector<8x8xf32> to vector<8xf32>
    %383 = vector.shape_cast %382 : vector<8xf32> to vector<8x1xf32>
    %384 = tpu.reciprocal %383 {approx = true} : vector<8x1xf32> -> vector<8x1xf32>
    %385 = vector.broadcast %384 : vector<8x1xf32> to vector<8x8xf32>
    %386 = arith.mulf %381, %385 : vector<8x8xf32>
    %387 = arith.truncf %386 : vector<8x8xf32> to vector<8x8xbf16>
    %cst_157 = arith.constant dense<0.000000e+00> : vector<8x8xf32>
    %388 = tpu.matmul %387, %375, %cst_157 {dimension_numbers = #tpu.dot_dimension_numbers<[1], [0], [0], [1], [0, 0, 1, 1], [], []>} : vector<8x8xbf16>, vector<8x8xbf16>, vector<8x8xf32> -> vector<8x8xf32>
    %c8_158 = arith.constant 8 : index
    %c24_159 = arith.constant 24 : index
    %389 = vector.load %arg17[%c8_158, %c24_159] : memref<16x32xf32, #tpu.memory_space<vmem>>, vector<8x8xf32>
    tpu.vector_store %arg17[%c8_158, %c24_159], %388 {strides = array<i32>} : memref<16x32xf32, #tpu.memory_space<vmem>>, vector<8x8xf32>,
    %c0_160 = arith.constant 0 : index
    %c0_161 = arith.constant 0 : index
    %390 = vector.load %arg17[%c0_160, %c0_161] : memref<16x32xf32, #tpu.memory_space<vmem>>, vector<16x32xf32>
    %391 = arith.truncf %390 : vector<16x32xf32> to vector<16x32xbf16>
    %cst_162 = arith.constant dense<0.000000e+00> : vector<16x32xf32>
    %392 = tpu.matmul %391, %240, %cst_162 {dimension_numbers = #tpu.dot_dimension_numbers<[1], [0], [0], [1], [0, 0, 1, 1], [], []>} : vector<16x32xbf16>, vector<32x32xbf16>, vector<16x32xf32> -> vector<16x32xf32>
    %393 = vector.broadcast %242 : vector<1x32xf32> to vector<16x32xf32>
    %394 = arith.addf %392, %393 : vector<16x32xf32>
    %395 = arith.addf %233, %394 : vector<16x32xf32>
    %c1_163 = arith.constant 1 : index
    %c0_164 = arith.constant 0 : index
    %c0_165 = arith.constant 0 : index
    %396 = vector.load %arg6[%c1_163, %c0_164, %c0_165] : memref<2x1x32xf32, #tpu.memory_space<vmem>>, vector<1x1x32xf32>
    %397 = vector.shape_cast %396 : vector<1x1x32xf32> to vector<1x32xf32>
    %c1_166 = arith.constant 1 : index
    %c0_167 = arith.constant 0 : index
    %c0_168 = arith.constant 0 : index
    %398 = vector.load %arg7[%c1_166, %c0_167, %c0_168] : memref<2x1x32xf32, #tpu.memory_space<vmem>>, vector<1x1x32xf32>
    %399 = vector.shape_cast %398 : vector<1x1x32xf32> to vector<1x32xf32>
    %cst_169 = arith.constant dense<0.000000e+00> : vector<16xf32>
    %400 = vector.multi_reduction <add>, %395, %cst_169 [1] : vector<16x32xf32> to vector<16xf32>
    %401 = vector.shape_cast %400 : vector<16xf32> to vector<16x1xf32>
    %cst_170 = arith.constant 3.200000e+01 : f32
    %402 = vector.broadcast %cst_170 : f32 to vector<16x1xf32>
    %403 = arith.divf %401, %402 : vector<16x1xf32>
    %404 = vector.broadcast %403 : vector<16x1xf32> to vector<16x32xf32>
    %405 = arith.subf %395, %404 : vector<16x32xf32>
    %406 = arith.mulf %405, %405 : vector<16x32xf32>
    %cst_171 = arith.constant dense<0.000000e+00> : vector<16xf32>
    %407 = vector.multi_reduction <add>, %406, %cst_171 [1] : vector<16x32xf32> to vector<16xf32>
    %408 = vector.shape_cast %407 : vector<16xf32> to vector<16x1xf32>
    %cst_172 = arith.constant 3.200000e+01 : f32
    %409 = vector.broadcast %cst_172 : f32 to vector<16x1xf32>
    %410 = arith.divf %408, %409 : vector<16x1xf32>
    %411 = vector.broadcast %403 : vector<16x1xf32> to vector<16x32xf32>
    %412 = arith.subf %395, %411 : vector<16x32xf32>
    %cst_173 = arith.constant 9.99999974E-6 : f32
    %413 = vector.broadcast %cst_173 : f32 to vector<16x1xf32>
    %414 = arith.addf %410, %413 : vector<16x1xf32>
    %415 = math.rsqrt %414 : vector<16x1xf32>
    %416 = vector.broadcast %415 : vector<16x1xf32> to vector<16x32xf32>
    %417 = arith.mulf %412, %416 : vector<16x32xf32>
    %418 = vector.broadcast %397 : vector<1x32xf32> to vector<16x32xf32>
    %419 = arith.mulf %417, %418 : vector<16x32xf32>
    %420 = vector.broadcast %399 : vector<1x32xf32> to vector<16x32xf32>
    %421 = arith.addf %419, %420 : vector<16x32xf32>
    %422 = arith.truncf %421 : vector<16x32xf32> to vector<16x32xbf16>
    %c1_174 = arith.constant 1 : index
    %c0_175 = arith.constant 0 : index
    %c0_176 = arith.constant 0 : index
    %423 = vector.load %arg8[%c1_174, %c0_175, %c0_176] : memref<2x32x64xbf16, #tpu.memory_space<vmem>>, vector<1x32x64xbf16>
    %424 = vector.shape_cast %423 : vector<1x32x64xbf16> to vector<32x64xbf16>
    %c1_177 = arith.constant 1 : index
    %c0_178 = arith.constant 0 : index
    %c0_179 = arith.constant 0 : index
    %425 = vector.load %arg9[%c1_177, %c0_178, %c0_179] : memref<2x1x64xf32, #tpu.memory_space<vmem>>, vector<1x1x64xf32>
    %426 = vector.shape_cast %425 : vector<1x1x64xf32> to vector<1x64xf32>
    %c1_180 = arith.constant 1 : index
    %c0_181 = arith.constant 0 : index
    %c0_182 = arith.constant 0 : index
    %427 = vector.load %arg10[%c1_180, %c0_181, %c0_182] : memref<2x64x32xbf16, #tpu.memory_space<vmem>>, vector<1x64x32xbf16>
    %428 = vector.shape_cast %427 : vector<1x64x32xbf16> to vector<64x32xbf16>
    %c1_183 = arith.constant 1 : index
    %c0_184 = arith.constant 0 : index
    %c0_185 = arith.constant 0 : index
    %429 = vector.load %arg11[%c1_183, %c0_184, %c0_185] : memref<2x1x32xf32, #tpu.memory_space<vmem>>, vector<1x1x32xf32>
    %430 = vector.shape_cast %429 : vector<1x1x32xf32> to vector<1x32xf32>
    %c1_186 = arith.constant 1 : index
    %c0_187 = arith.constant 0 : index
    %c0_188 = arith.constant 0 : index
    %431 = vector.load %arg12[%c1_186, %c0_187, %c0_188] : memref<2x1x32xf32, #tpu.memory_space<vmem>>, vector<1x1x32xf32>
    %432 = vector.shape_cast %431 : vector<1x1x32xf32> to vector<1x32xf32>
    %c1_189 = arith.constant 1 : index
    %c0_190 = arith.constant 0 : index
    %c0_191 = arith.constant 0 : index
    %433 = vector.load %arg13[%c1_189, %c0_190, %c0_191] : memref<2x1x32xf32, #tpu.memory_space<vmem>>, vector<1x1x32xf32>
    %434 = vector.shape_cast %433 : vector<1x1x32xf32> to vector<1x32xf32>
    %cst_192 = arith.constant dense<0.000000e+00> : vector<16x64xf32>
    %435 = tpu.matmul %422, %424, %cst_192 {dimension_numbers = #tpu.dot_dimension_numbers<[1], [0], [0], [1], [0, 0, 1, 1], [], []>} : vector<16x32xbf16>, vector<32x64xbf16>, vector<16x64xf32> -> vector<16x64xf32>
    %436 = vector.broadcast %426 : vector<1x64xf32> to vector<16x64xf32>
    %437 = arith.addf %435, %436 : vector<16x64xf32>
    %cst_193 = arith.constant 0.000000e+00 : f32
    %438 = vector.broadcast %cst_193 : f32 to vector<16x64xf32>
    %439 = arith.maximumf %437, %438 : vector<16x64xf32>
    %440 = arith.truncf %439 : vector<16x64xf32> to vector<16x64xbf16>
    %cst_194 = arith.constant dense<0.000000e+00> : vector<16x32xf32>
    %441 = tpu.matmul %440, %428, %cst_194 {dimension_numbers = #tpu.dot_dimension_numbers<[1], [0], [0], [1], [0, 0, 1, 1], [], []>} : vector<16x64xbf16>, vector<64x32xbf16>, vector<16x32xf32> -> vector<16x32xf32>
    %442 = vector.broadcast %430 : vector<1x32xf32> to vector<16x32xf32>
    %443 = arith.addf %441, %442 : vector<16x32xf32>
    %444 = arith.addf %421, %443 : vector<16x32xf32>
    %cst_195 = arith.constant dense<0.000000e+00> : vector<16xf32>
    %445 = vector.multi_reduction <add>, %444, %cst_195 [1] : vector<16x32xf32> to vector<16xf32>
    %446 = vector.shape_cast %445 : vector<16xf32> to vector<16x1xf32>
    %cst_196 = arith.constant 3.200000e+01 : f32
    %447 = vector.broadcast %cst_196 : f32 to vector<16x1xf32>
    %448 = arith.divf %446, %447 : vector<16x1xf32>
    %449 = vector.broadcast %448 : vector<16x1xf32> to vector<16x32xf32>
    %450 = arith.subf %444, %449 : vector<16x32xf32>
    %451 = arith.mulf %450, %450 : vector<16x32xf32>
    %cst_197 = arith.constant dense<0.000000e+00> : vector<16xf32>
    %452 = vector.multi_reduction <add>, %451, %cst_197 [1] : vector<16x32xf32> to vector<16xf32>
    %453 = vector.shape_cast %452 : vector<16xf32> to vector<16x1xf32>
    %cst_198 = arith.constant 3.200000e+01 : f32
    %454 = vector.broadcast %cst_198 : f32 to vector<16x1xf32>
    %455 = arith.divf %453, %454 : vector<16x1xf32>
    %456 = vector.broadcast %448 : vector<16x1xf32> to vector<16x32xf32>
    %457 = arith.subf %444, %456 : vector<16x32xf32>
    %cst_199 = arith.constant 9.99999974E-6 : f32
    %458 = vector.broadcast %cst_199 : f32 to vector<16x1xf32>
    %459 = arith.addf %455, %458 : vector<16x1xf32>
    %460 = math.rsqrt %459 : vector<16x1xf32>
    %461 = vector.broadcast %460 : vector<16x1xf32> to vector<16x32xf32>
    %462 = arith.mulf %457, %461 : vector<16x32xf32>
    %463 = vector.broadcast %432 : vector<1x32xf32> to vector<16x32xf32>
    %464 = arith.mulf %462, %463 : vector<16x32xf32>
    %465 = vector.broadcast %434 : vector<1x32xf32> to vector<16x32xf32>
    %466 = arith.addf %464, %465 : vector<16x32xf32>
    %c0_200 = arith.constant 0 : index
    %c0_201 = arith.constant 0 : index
    %467 = vector.load %arg14[%c0_200, %c0_201] : memref<1x32xf32, #tpu.memory_space<vmem>>, vector<1x32xf32>
    %c0_202 = arith.constant 0 : index
    %c0_203 = arith.constant 0 : index
    %468 = vector.load %arg15[%c0_202, %c0_203] : memref<1x32xf32, #tpu.memory_space<vmem>>, vector<1x32xf32>
    %cst_204 = arith.constant dense<0.000000e+00> : vector<16xf32>
    %469 = vector.multi_reduction <add>, %466, %cst_204 [1] : vector<16x32xf32> to vector<16xf32>
    %470 = vector.shape_cast %469 : vector<16xf32> to vector<16x1xf32>
    %cst_205 = arith.constant 3.200000e+01 : f32
    %471 = vector.broadcast %cst_205 : f32 to vector<16x1xf32>
    %472 = arith.divf %470, %471 : vector<16x1xf32>
    %473 = vector.broadcast %472 : vector<16x1xf32> to vector<16x32xf32>
    %474 = arith.subf %466, %473 : vector<16x32xf32>
    %475 = arith.mulf %474, %474 : vector<16x32xf32>
    %cst_206 = arith.constant dense<0.000000e+00> : vector<16xf32>
    %476 = vector.multi_reduction <add>, %475, %cst_206 [1] : vector<16x32xf32> to vector<16xf32>
    %477 = vector.shape_cast %476 : vector<16xf32> to vector<16x1xf32>
    %cst_207 = arith.constant 3.200000e+01 : f32
    %478 = vector.broadcast %cst_207 : f32 to vector<16x1xf32>
    %479 = arith.divf %477, %478 : vector<16x1xf32>
    %480 = vector.broadcast %472 : vector<16x1xf32> to vector<16x32xf32>
    %481 = arith.subf %466, %480 : vector<16x32xf32>
    %cst_208 = arith.constant 9.99999974E-6 : f32
    %482 = vector.broadcast %cst_208 : f32 to vector<16x1xf32>
    %483 = arith.addf %479, %482 : vector<16x1xf32>
    %484 = math.rsqrt %483 : vector<16x1xf32>
    %485 = vector.broadcast %484 : vector<16x1xf32> to vector<16x32xf32>
    %486 = arith.mulf %481, %485 : vector<16x32xf32>
    %487 = vector.broadcast %467 : vector<1x32xf32> to vector<16x32xf32>
    %488 = arith.mulf %486, %487 : vector<16x32xf32>
    %489 = vector.broadcast %468 : vector<1x32xf32> to vector<16x32xf32>
    %490 = arith.addf %488, %489 : vector<16x32xf32>
    %491 = arith.truncf %490 : vector<16x32xf32> to vector<16x32xbf16>
    %c0_209 = arith.constant 0 : index
    %c0_210 = arith.constant 0 : index
    %492 = vector.load %arg16[%c0_209, %c0_210] : memref<16x32xbf16, #tpu.memory_space<vmem>>, vector<16x32xbf16>
    tpu.vector_store %arg16[%c0_209, %c0_210], %491 {strides = array<i32>} : memref<16x32xbf16, #tpu.memory_space<vmem>>, vector<16x32xbf16>,
    return
  }
  func.func @transform_0(%arg0: i32) -> (i32, i32) {
    %c0_i32 = arith.constant 0 : i32
    %c0_i32_0 = arith.constant 0 : i32
    %c0_i32_1 = arith.constant 0 : i32
    return %c0_i32, %c0_i32_0 : i32, i32
  }
  func.func @transform_1(%arg0: i32) -> (i32, i32, i32) {
    %c0_i32 = arith.constant 0 : i32
    %c0_i32_0 = arith.constant 0 : i32
    %c0_i32_1 = arith.constant 0 : i32
    %c0_i32_2 = arith.constant 0 : i32
    return %c0_i32, %c0_i32_0, %c0_i32_1 : i32, i32, i32
  }
  func.func @transform_2(%arg0: i32) -> (i32, i32, i32) {
    %c0_i32 = arith.constant 0 : i32
    %c0_i32_0 = arith.constant 0 : i32
    %c0_i32_1 = arith.constant 0 : i32
    %c0_i32_2 = arith.constant 0 : i32
    return %c0_i32, %c0_i32_0, %c0_i32_1 : i32, i32, i32
  }
  func.func @transform_3(%arg0: i32) -> (i32, i32, i32) {
    %c0_i32 = arith.constant 0 : i32
    %c0_i32_0 = arith.constant 0 : i32
    %c0_i32_1 = arith.constant 0 : i32
    %c0_i32_2 = arith.constant 0 : i32
    return %c0_i32, %c0_i32_0, %c0_i32_1 : i32, i32, i32
  }
  func.func @transform_4(%arg0: i32) -> (i32, i32, i32) {
    %c0_i32 = arith.constant 0 : i32
    %c0_i32_0 = arith.constant 0 : i32
    %c0_i32_1 = arith.constant 0 : i32
    %c0_i32_2 = arith.constant 0 : i32
    return %c0_i32, %c0_i32_0, %c0_i32_1 : i32, i32, i32
  }
  func.func @transform_5(%arg0: i32) -> (i32, i32, i32) {
    %c0_i32 = arith.constant 0 : i32
    %c0_i32_0 = arith.constant 0 : i32
    %c0_i32_1 = arith.constant 0 : i32
    %c0_i32_2 = arith.constant 0 : i32
    return %c0_i32, %c0_i32_0, %c0_i32_1 : i32, i32, i32
  }
  func.func @transform_6(%arg0: i32) -> (i32, i32, i32) {
    %c0_i32 = arith.constant 0 : i32
    %c0_i32_0 = arith.constant 0 : i32
    %c0_i32_1 = arith.constant 0 : i32
    %c0_i32_2 = arith.constant 0 : i32
    return %c0_i32, %c0_i32_0, %c0_i32_1 : i32, i32, i32
  }
  func.func @transform_7(%arg0: i32) -> (i32, i32, i32) {
    %c0_i32 = arith.constant 0 : i32
    %c0_i32_0 = arith.constant 0 : i32
    %c0_i32_1 = arith.constant 0 : i32
    %c0_i32_2 = arith.constant 0 : i32
    return %c0_i32, %c0_i32_0, %c0_i32_1 : i32, i32, i32
  }
  func.func @transform_8(%arg0: i32) -> (i32, i32, i32) {
    %c0_i32 = arith.constant 0 : i32
    %c0_i32_0 = arith.constant 0 : i32
    %c0_i32_1 = arith.constant 0 : i32
    %c0_i32_2 = arith.constant 0 : i32
    return %c0_i32, %c0_i32_0, %c0_i32_1 : i32, i32, i32
  }
  func.func @transform_9(%arg0: i32) -> (i32, i32, i32) {
    %c0_i32 = arith.constant 0 : i32
    %c0_i32_0 = arith.constant 0 : i32
    %c0_i32_1 = arith.constant 0 : i32
    %c0_i32_2 = arith.constant 0 : i32
    return %c0_i32, %c0_i32_0, %c0_i32_1 : i32, i32, i32
  }
  func.func @transform_10(%arg0: i32) -> (i32, i32, i32) {
    %c0_i32 = arith.constant 0 : i32
    %c0_i32_0 = arith.constant 0 : i32
    %c0_i32_1 = arith.constant 0 : i32
    %c0_i32_2 = arith.constant 0 : i32
    return %c0_i32, %c0_i32_0, %c0_i32_1 : i32, i32, i32
  }
  func.func @transform_11(%arg0: i32) -> (i32, i32, i32) {
    %c0_i32 = arith.constant 0 : i32
    %c0_i32_0 = arith.constant 0 : i32
    %c0_i32_1 = arith.constant 0 : i32
    %c0_i32_2 = arith.constant 0 : i32
    return %c0_i32, %c0_i32_0, %c0_i32_1 : i32, i32, i32
  }
  func.func @transform_12(%arg0: i32) -> (i32, i32, i32) {
    %c0_i32 = arith.constant 0 : i32
    %c0_i32_0 = arith.constant 0 : i32
    %c0_i32_1 = arith.constant 0 : i32
    %c0_i32_2 = arith.constant 0 : i32
    return %c0_i32, %c0_i32_0, %c0_i32_1 : i32, i32, i32
  }
  func.func @transform_13(%arg0: i32) -> (i32, i32) {
    %c0_i32 = arith.constant 0 : i32
    %c0_i32_0 = arith.constant 0 : i32
    %c0_i32_1 = arith.constant 0 : i32
    return %c0_i32, %c0_i32_0 : i32, i32
  }
  func.func @transform_14(%arg0: i32) -> (i32, i32) {
    %c0_i32 = arith.constant 0 : i32
    %c0_i32_0 = arith.constant 0 : i32
    %c0_i32_1 = arith.constant 0 : i32
    return %c0_i32, %c0_i32_0 : i32, i32
  }
  func.func @transform_15(%arg0: i32) -> (i32, i32) {
    %c0_i32 = arith.constant 0 : i32
    %c0_i32_0 = arith.constant 0 : i32
    %c0_i32_1 = arith.constant 0 : i32
    return %c0_i32, %c0_i32_0 : i32, i32
  }
}

module attributes {stable_mosaic.version = 11 : i64} {
  func.func @_decoder_stack_kernel(%arg0: i32, %arg1: memref<16x32xf32, #tpu.memory_space<vmem>>, %arg2: memref<16x32xbf16, #tpu.memory_space<vmem>>, %arg3: memref<2x32x96xbf16, #tpu.memory_space<vmem>>, %arg4: memref<2x1x96xf32, #tpu.memory_space<vmem>>, %arg5: memref<2x32x32xbf16, #tpu.memory_space<vmem>>, %arg6: memref<2x1x32xf32, #tpu.memory_space<vmem>>, %arg7: memref<2x1x32xf32, #tpu.memory_space<vmem>>, %arg8: memref<2x1x32xf32, #tpu.memory_space<vmem>>, %arg9: memref<2x32x96xbf16, #tpu.memory_space<vmem>>, %arg10: memref<2x1x96xf32, #tpu.memory_space<vmem>>, %arg11: memref<2x32x32xbf16, #tpu.memory_space<vmem>>, %arg12: memref<2x1x32xf32, #tpu.memory_space<vmem>>, %arg13: memref<2x1x32xf32, #tpu.memory_space<vmem>>, %arg14: memref<2x1x32xf32, #tpu.memory_space<vmem>>, %arg15: memref<2x32x64xbf16, #tpu.memory_space<vmem>>, %arg16: memref<2x1x64xf32, #tpu.memory_space<vmem>>, %arg17: memref<2x64x32xbf16, #tpu.memory_space<vmem>>, %arg18: memref<2x1x32xf32, #tpu.memory_space<vmem>>, %arg19: memref<2x1x32xf32, #tpu.memory_space<vmem>>, %arg20: memref<2x1x32xf32, #tpu.memory_space<vmem>>, %arg21: memref<16x32xbf16, #tpu.memory_space<vmem>>, %arg22: memref<16x32xf32, #tpu.memory_space<vmem>>) attributes {dimension_semantics = [#tpu.dimension_semantics<arbitrary>], iteration_bounds = array<i64: 1>, scalar_prefetch = 0 : i64, scratch_operands = 1 : i64, tpu.core_type = #tpu.core_type<tc>, window_params = [{pipeline_mode = #tpu.pipeline_mode<synchronous>, transform_indices = @transform_0, window_bounds = array<i64: 16, 32>}, {pipeline_mode = #tpu.pipeline_mode<synchronous>, transform_indices = @transform_1, window_bounds = array<i64: 16, 32>}, {pipeline_mode = #tpu.pipeline_mode<synchronous>, transform_indices = @transform_2, window_bounds = array<i64: 2, 32, 96>}, {pipeline_mode = #tpu.pipeline_mode<synchronous>, transform_indices = @transform_3, window_bounds = array<i64: 2, 1, 96>}, {pipeline_mode = #tpu.pipeline_mode<synchronous>, transform_indices = @transform_4, window_bounds = array<i64: 2, 32, 32>}, {pipeline_mode = #tpu.pipeline_mode<synchronous>, transform_indices = @transform_5, window_bounds = array<i64: 2, 1, 32>}, {pipeline_mode = #tpu.pipeline_mode<synchronous>, transform_indices = @transform_6, window_bounds = array<i64: 2, 1, 32>}, {pipeline_mode = #tpu.pipeline_mode<synchronous>, transform_indices = @transform_7, window_bounds = array<i64: 2, 1, 32>}, {pipeline_mode = #tpu.pipeline_mode<synchronous>, transform_indices = @transform_8, window_bounds = array<i64: 2, 32, 96>}, {pipeline_mode = #tpu.pipeline_mode<synchronous>, transform_indices = @transform_9, window_bounds = array<i64: 2, 1, 96>}, {pipeline_mode = #tpu.pipeline_mode<synchronous>, transform_indices = @transform_10, window_bounds = array<i64: 2, 32, 32>}, {pipeline_mode = #tpu.pipeline_mode<synchronous>, transform_indices = @transform_11, window_bounds = array<i64: 2, 1, 32>}, {pipeline_mode = #tpu.pipeline_mode<synchronous>, transform_indices = @transform_12, window_bounds = array<i64: 2, 1, 32>}, {pipeline_mode = #tpu.pipeline_mode<synchronous>, transform_indices = @transform_13, window_bounds = array<i64: 2, 1, 32>}, {pipeline_mode = #tpu.pipeline_mode<synchronous>, transform_indices = @transform_14, window_bounds = array<i64: 2, 32, 64>}, {pipeline_mode = #tpu.pipeline_mode<synchronous>, transform_indices = @transform_15, window_bounds = array<i64: 2, 1, 64>}, {pipeline_mode = #tpu.pipeline_mode<synchronous>, transform_indices = @transform_16, window_bounds = array<i64: 2, 64, 32>}, {pipeline_mode = #tpu.pipeline_mode<synchronous>, transform_indices = @transform_17, window_bounds = array<i64: 2, 1, 32>}, {pipeline_mode = #tpu.pipeline_mode<synchronous>, transform_indices = @transform_18, window_bounds = array<i64: 2, 1, 32>}, {pipeline_mode = #tpu.pipeline_mode<synchronous>, transform_indices = @transform_19, window_bounds = array<i64: 2, 1, 32>}, {pipeline_mode = #tpu.pipeline_mode<synchronous>, transform_indices = @transform_20, window_bounds = array<i64: 16, 32>}]} {
    %c0 = arith.constant 0 : index
    %c0_0 = arith.constant 0 : index
    %0 = vector.load %arg1[%c0, %c0_0] : memref<16x32xf32, #tpu.memory_space<vmem>>, vector<16x32xf32>
    %c0_1 = arith.constant 0 : index
    %c0_2 = arith.constant 0 : index
    %1 = vector.load %arg2[%c0_1, %c0_2] : memref<16x32xbf16, #tpu.memory_space<vmem>>, vector<16x32xbf16>
    %2 = arith.truncf %0 : vector<16x32xf32> to vector<16x32xbf16>
    %c0_3 = arith.constant 0 : index
    %c0_4 = arith.constant 0 : index
    %c0_5 = arith.constant 0 : index
    %3 = vector.load %arg3[%c0_3, %c0_4, %c0_5] : memref<2x32x96xbf16, #tpu.memory_space<vmem>>, vector<1x32x96xbf16>
    %4 = vector.shape_cast %3 : vector<1x32x96xbf16> to vector<32x96xbf16>
    %c0_6 = arith.constant 0 : index
    %c0_7 = arith.constant 0 : index
    %c0_8 = arith.constant 0 : index
    %5 = vector.load %arg4[%c0_6, %c0_7, %c0_8] : memref<2x1x96xf32, #tpu.memory_space<vmem>>, vector<1x1x96xf32>
    %6 = vector.shape_cast %5 : vector<1x1x96xf32> to vector<1x96xf32>
    %c0_9 = arith.constant 0 : index
    %c0_10 = arith.constant 0 : index
    %c0_11 = arith.constant 0 : index
    %7 = vector.load %arg5[%c0_9, %c0_10, %c0_11] : memref<2x32x32xbf16, #tpu.memory_space<vmem>>, vector<1x32x32xbf16>
    %8 = vector.shape_cast %7 : vector<1x32x32xbf16> to vector<32x32xbf16>
    %c0_12 = arith.constant 0 : index
    %c0_13 = arith.constant 0 : index
    %c0_14 = arith.constant 0 : index
    %9 = vector.load %arg6[%c0_12, %c0_13, %c0_14] : memref<2x1x32xf32, #tpu.memory_space<vmem>>, vector<1x1x32xf32>
    %10 = vector.shape_cast %9 : vector<1x1x32xf32> to vector<1x32xf32>
    %cst = arith.constant dense<0.000000e+00> : vector<16x96xf32>
    %11 = tpu.matmul %2, %4, %cst {dimension_numbers = #tpu.dot_dimension_numbers<[1], [0], [0], [1], [0, 0, 1, 1], [], []>} : vector<16x32xbf16>, vector<32x96xbf16>, vector<16x96xf32> -> vector<16x96xf32>
    %12 = vector.broadcast %6 : vector<1x96xf32> to vector<16x96xf32>
    %13 = arith.addf %11, %12 : vector<16x96xf32>
    %14 = vector.extract_strided_slice %13 {offsets = [0, 0], sizes = [16, 32], strides = [1, 1]} : vector<16x96xf32> to vector<16x32xf32>
    %15 = vector.extract_strided_slice %13 {offsets = [0, 32], sizes = [16, 32], strides = [1, 1]} : vector<16x96xf32> to vector<16x32xf32>
    %16 = vector.extract_strided_slice %13 {offsets = [0, 64], sizes = [16, 32], strides = [1, 1]} : vector<16x96xf32> to vector<16x32xf32>
    %cst_15 = arith.constant 0.353553385 : f32
    %17 = vector.broadcast %cst_15 : f32 to vector<16x32xf32>
    %18 = arith.mulf %14, %17 : vector<16x32xf32>
    %19 = arith.truncf %18 : vector<16x32xf32> to vector<16x32xbf16>
    %20 = arith.truncf %15 : vector<16x32xf32> to vector<16x32xbf16>
    %21 = arith.truncf %16 : vector<16x32xf32> to vector<16x32xbf16>
    %22 = vector.extract_strided_slice %19 {offsets = [0, 0], sizes = [8, 8], strides = [1, 1]} : vector<16x32xbf16> to vector<8x8xbf16>
    %23 = vector.extract_strided_slice %20 {offsets = [0, 0], sizes = [8, 8], strides = [1, 1]} : vector<16x32xbf16> to vector<8x8xbf16>
    %24 = vector.extract_strided_slice %21 {offsets = [0, 0], sizes = [8, 8], strides = [1, 1]} : vector<16x32xbf16> to vector<8x8xbf16>
    %cst_16 = arith.constant dense<0.000000e+00> : vector<8x8xf32>
    %25 = tpu.matmul %22, %23, %cst_16 {dimension_numbers = #tpu.dot_dimension_numbers<[1], [1], [0], [0], [0, 0, 1, 0], [], []>} : vector<8x8xbf16>, vector<8x8xbf16>, vector<8x8xf32> -> vector<8x8xf32>
    %cst_17 = arith.constant dense<0xFF800000> : vector<8xf32>
    %26 = vector.multi_reduction <maximumf>, %25, %cst_17 [1] : vector<8x8xf32> to vector<8xf32>
    %27 = vector.shape_cast %26 : vector<8xf32> to vector<8x1xf32>
    %28 = vector.broadcast %27 : vector<8x1xf32> to vector<8x8xf32>
    %29 = arith.subf %25, %28 : vector<8x8xf32>
    %30 = math.exp %29 : vector<8x8xf32>
    %cst_18 = arith.constant dense<0.000000e+00> : vector<8xf32>
    %31 = vector.multi_reduction <add>, %30, %cst_18 [1] : vector<8x8xf32> to vector<8xf32>
    %32 = vector.shape_cast %31 : vector<8xf32> to vector<8x1xf32>
    %33 = tpu.reciprocal %32 {approx = true} : vector<8x1xf32> -> vector<8x1xf32>
    %34 = vector.broadcast %33 : vector<8x1xf32> to vector<8x8xf32>
    %35 = arith.mulf %30, %34 : vector<8x8xf32>
    %36 = arith.truncf %35 : vector<8x8xf32> to vector<8x8xbf16>
    %cst_19 = arith.constant dense<0.000000e+00> : vector<8x8xf32>
    %37 = tpu.matmul %36, %24, %cst_19 {dimension_numbers = #tpu.dot_dimension_numbers<[1], [0], [0], [1], [0, 0, 1, 1], [], []>} : vector<8x8xbf16>, vector<8x8xbf16>, vector<8x8xf32> -> vector<8x8xf32>
    %c0_20 = arith.constant 0 : index
    %c0_21 = arith.constant 0 : index
    %38 = vector.load %arg22[%c0_20, %c0_21] : memref<16x32xf32, #tpu.memory_space<vmem>>, vector<8x8xf32>
    tpu.vector_store %arg22[%c0_20, %c0_21], %37 {strides = array<i32>} : memref<16x32xf32, #tpu.memory_space<vmem>>, vector<8x8xf32>,
    %39 = vector.extract_strided_slice %19 {offsets = [0, 8], sizes = [8, 8], strides = [1, 1]} : vector<16x32xbf16> to vector<8x8xbf16>
    %40 = vector.extract_strided_slice %20 {offsets = [0, 8], sizes = [8, 8], strides = [1, 1]} : vector<16x32xbf16> to vector<8x8xbf16>
    %41 = vector.extract_strided_slice %21 {offsets = [0, 8], sizes = [8, 8], strides = [1, 1]} : vector<16x32xbf16> to vector<8x8xbf16>
    %cst_22 = arith.constant dense<0.000000e+00> : vector<8x8xf32>
    %42 = tpu.matmul %39, %40, %cst_22 {dimension_numbers = #tpu.dot_dimension_numbers<[1], [1], [0], [0], [0, 0, 1, 0], [], []>} : vector<8x8xbf16>, vector<8x8xbf16>, vector<8x8xf32> -> vector<8x8xf32>
    %cst_23 = arith.constant dense<0xFF800000> : vector<8xf32>
    %43 = vector.multi_reduction <maximumf>, %42, %cst_23 [1] : vector<8x8xf32> to vector<8xf32>
    %44 = vector.shape_cast %43 : vector<8xf32> to vector<8x1xf32>
    %45 = vector.broadcast %44 : vector<8x1xf32> to vector<8x8xf32>
    %46 = arith.subf %42, %45 : vector<8x8xf32>
    %47 = math.exp %46 : vector<8x8xf32>
    %cst_24 = arith.constant dense<0.000000e+00> : vector<8xf32>
    %48 = vector.multi_reduction <add>, %47, %cst_24 [1] : vector<8x8xf32> to vector<8xf32>
    %49 = vector.shape_cast %48 : vector<8xf32> to vector<8x1xf32>
    %50 = tpu.reciprocal %49 {approx = true} : vector<8x1xf32> -> vector<8x1xf32>
    %51 = vector.broadcast %50 : vector<8x1xf32> to vector<8x8xf32>
    %52 = arith.mulf %47, %51 : vector<8x8xf32>
    %53 = arith.truncf %52 : vector<8x8xf32> to vector<8x8xbf16>
    %cst_25 = arith.constant dense<0.000000e+00> : vector<8x8xf32>
    %54 = tpu.matmul %53, %41, %cst_25 {dimension_numbers = #tpu.dot_dimension_numbers<[1], [0], [0], [1], [0, 0, 1, 1], [], []>} : vector<8x8xbf16>, vector<8x8xbf16>, vector<8x8xf32> -> vector<8x8xf32>
    %c0_26 = arith.constant 0 : index
    %c8 = arith.constant 8 : index
    %55 = vector.load %arg22[%c0_26, %c8] : memref<16x32xf32, #tpu.memory_space<vmem>>, vector<8x8xf32>
    tpu.vector_store %arg22[%c0_26, %c8], %54 {strides = array<i32>} : memref<16x32xf32, #tpu.memory_space<vmem>>, vector<8x8xf32>,
    %56 = vector.extract_strided_slice %19 {offsets = [0, 16], sizes = [8, 8], strides = [1, 1]} : vector<16x32xbf16> to vector<8x8xbf16>
    %57 = vector.extract_strided_slice %20 {offsets = [0, 16], sizes = [8, 8], strides = [1, 1]} : vector<16x32xbf16> to vector<8x8xbf16>
    %58 = vector.extract_strided_slice %21 {offsets = [0, 16], sizes = [8, 8], strides = [1, 1]} : vector<16x32xbf16> to vector<8x8xbf16>
    %cst_27 = arith.constant dense<0.000000e+00> : vector<8x8xf32>
    %59 = tpu.matmul %56, %57, %cst_27 {dimension_numbers = #tpu.dot_dimension_numbers<[1], [1], [0], [0], [0, 0, 1, 0], [], []>} : vector<8x8xbf16>, vector<8x8xbf16>, vector<8x8xf32> -> vector<8x8xf32>
    %cst_28 = arith.constant dense<0xFF800000> : vector<8xf32>
    %60 = vector.multi_reduction <maximumf>, %59, %cst_28 [1] : vector<8x8xf32> to vector<8xf32>
    %61 = vector.shape_cast %60 : vector<8xf32> to vector<8x1xf32>
    %62 = vector.broadcast %61 : vector<8x1xf32> to vector<8x8xf32>
    %63 = arith.subf %59, %62 : vector<8x8xf32>
    %64 = math.exp %63 : vector<8x8xf32>
    %cst_29 = arith.constant dense<0.000000e+00> : vector<8xf32>
    %65 = vector.multi_reduction <add>, %64, %cst_29 [1] : vector<8x8xf32> to vector<8xf32>
    %66 = vector.shape_cast %65 : vector<8xf32> to vector<8x1xf32>
    %67 = tpu.reciprocal %66 {approx = true} : vector<8x1xf32> -> vector<8x1xf32>
    %68 = vector.broadcast %67 : vector<8x1xf32> to vector<8x8xf32>
    %69 = arith.mulf %64, %68 : vector<8x8xf32>
    %70 = arith.truncf %69 : vector<8x8xf32> to vector<8x8xbf16>
    %cst_30 = arith.constant dense<0.000000e+00> : vector<8x8xf32>
    %71 = tpu.matmul %70, %58, %cst_30 {dimension_numbers = #tpu.dot_dimension_numbers<[1], [0], [0], [1], [0, 0, 1, 1], [], []>} : vector<8x8xbf16>, vector<8x8xbf16>, vector<8x8xf32> -> vector<8x8xf32>
    %c0_31 = arith.constant 0 : index
    %c16 = arith.constant 16 : index
    %72 = vector.load %arg22[%c0_31, %c16] : memref<16x32xf32, #tpu.memory_space<vmem>>, vector<8x8xf32>
    tpu.vector_store %arg22[%c0_31, %c16], %71 {strides = array<i32>} : memref<16x32xf32, #tpu.memory_space<vmem>>, vector<8x8xf32>,
    %73 = vector.extract_strided_slice %19 {offsets = [0, 24], sizes = [8, 8], strides = [1, 1]} : vector<16x32xbf16> to vector<8x8xbf16>
    %74 = vector.extract_strided_slice %20 {offsets = [0, 24], sizes = [8, 8], strides = [1, 1]} : vector<16x32xbf16> to vector<8x8xbf16>
    %75 = vector.extract_strided_slice %21 {offsets = [0, 24], sizes = [8, 8], strides = [1, 1]} : vector<16x32xbf16> to vector<8x8xbf16>
    %cst_32 = arith.constant dense<0.000000e+00> : vector<8x8xf32>
    %76 = tpu.matmul %73, %74, %cst_32 {dimension_numbers = #tpu.dot_dimension_numbers<[1], [1], [0], [0], [0, 0, 1, 0], [], []>} : vector<8x8xbf16>, vector<8x8xbf16>, vector<8x8xf32> -> vector<8x8xf32>
    %cst_33 = arith.constant dense<0xFF800000> : vector<8xf32>
    %77 = vector.multi_reduction <maximumf>, %76, %cst_33 [1] : vector<8x8xf32> to vector<8xf32>
    %78 = vector.shape_cast %77 : vector<8xf32> to vector<8x1xf32>
    %79 = vector.broadcast %78 : vector<8x1xf32> to vector<8x8xf32>
    %80 = arith.subf %76, %79 : vector<8x8xf32>
    %81 = math.exp %80 : vector<8x8xf32>
    %cst_34 = arith.constant dense<0.000000e+00> : vector<8xf32>
    %82 = vector.multi_reduction <add>, %81, %cst_34 [1] : vector<8x8xf32> to vector<8xf32>
    %83 = vector.shape_cast %82 : vector<8xf32> to vector<8x1xf32>
    %84 = tpu.reciprocal %83 {approx = true} : vector<8x1xf32> -> vector<8x1xf32>
    %85 = vector.broadcast %84 : vector<8x1xf32> to vector<8x8xf32>
    %86 = arith.mulf %81, %85 : vector<8x8xf32>
    %87 = arith.truncf %86 : vector<8x8xf32> to vector<8x8xbf16>
    %cst_35 = arith.constant dense<0.000000e+00> : vector<8x8xf32>
    %88 = tpu.matmul %87, %75, %cst_35 {dimension_numbers = #tpu.dot_dimension_numbers<[1], [0], [0], [1], [0, 0, 1, 1], [], []>} : vector<8x8xbf16>, vector<8x8xbf16>, vector<8x8xf32> -> vector<8x8xf32>
    %c0_36 = arith.constant 0 : index
    %c24 = arith.constant 24 : index
    %89 = vector.load %arg22[%c0_36, %c24] : memref<16x32xf32, #tpu.memory_space<vmem>>, vector<8x8xf32>
    tpu.vector_store %arg22[%c0_36, %c24], %88 {strides = array<i32>} : memref<16x32xf32, #tpu.memory_space<vmem>>, vector<8x8xf32>,
    %90 = vector.extract_strided_slice %19 {offsets = [8, 0], sizes = [8, 8], strides = [1, 1]} : vector<16x32xbf16> to vector<8x8xbf16>
    %91 = vector.extract_strided_slice %20 {offsets = [8, 0], sizes = [8, 8], strides = [1, 1]} : vector<16x32xbf16> to vector<8x8xbf16>
    %92 = vector.extract_strided_slice %21 {offsets = [8, 0], sizes = [8, 8], strides = [1, 1]} : vector<16x32xbf16> to vector<8x8xbf16>
    %cst_37 = arith.constant dense<0.000000e+00> : vector<8x8xf32>
    %93 = tpu.matmul %90, %91, %cst_37 {dimension_numbers = #tpu.dot_dimension_numbers<[1], [1], [0], [0], [0, 0, 1, 0], [], []>} : vector<8x8xbf16>, vector<8x8xbf16>, vector<8x8xf32> -> vector<8x8xf32>
    %cst_38 = arith.constant dense<0xFF800000> : vector<8xf32>
    %94 = vector.multi_reduction <maximumf>, %93, %cst_38 [1] : vector<8x8xf32> to vector<8xf32>
    %95 = vector.shape_cast %94 : vector<8xf32> to vector<8x1xf32>
    %96 = vector.broadcast %95 : vector<8x1xf32> to vector<8x8xf32>
    %97 = arith.subf %93, %96 : vector<8x8xf32>
    %98 = math.exp %97 : vector<8x8xf32>
    %cst_39 = arith.constant dense<0.000000e+00> : vector<8xf32>
    %99 = vector.multi_reduction <add>, %98, %cst_39 [1] : vector<8x8xf32> to vector<8xf32>
    %100 = vector.shape_cast %99 : vector<8xf32> to vector<8x1xf32>
    %101 = tpu.reciprocal %100 {approx = true} : vector<8x1xf32> -> vector<8x1xf32>
    %102 = vector.broadcast %101 : vector<8x1xf32> to vector<8x8xf32>
    %103 = arith.mulf %98, %102 : vector<8x8xf32>
    %104 = arith.truncf %103 : vector<8x8xf32> to vector<8x8xbf16>
    %cst_40 = arith.constant dense<0.000000e+00> : vector<8x8xf32>
    %105 = tpu.matmul %104, %92, %cst_40 {dimension_numbers = #tpu.dot_dimension_numbers<[1], [0], [0], [1], [0, 0, 1, 1], [], []>} : vector<8x8xbf16>, vector<8x8xbf16>, vector<8x8xf32> -> vector<8x8xf32>
    %c8_41 = arith.constant 8 : index
    %c0_42 = arith.constant 0 : index
    %106 = vector.load %arg22[%c8_41, %c0_42] : memref<16x32xf32, #tpu.memory_space<vmem>>, vector<8x8xf32>
    tpu.vector_store %arg22[%c8_41, %c0_42], %105 {strides = array<i32>} : memref<16x32xf32, #tpu.memory_space<vmem>>, vector<8x8xf32>,
    %107 = vector.extract_strided_slice %19 {offsets = [8, 8], sizes = [8, 8], strides = [1, 1]} : vector<16x32xbf16> to vector<8x8xbf16>
    %108 = vector.extract_strided_slice %20 {offsets = [8, 8], sizes = [8, 8], strides = [1, 1]} : vector<16x32xbf16> to vector<8x8xbf16>
    %109 = vector.extract_strided_slice %21 {offsets = [8, 8], sizes = [8, 8], strides = [1, 1]} : vector<16x32xbf16> to vector<8x8xbf16>
    %cst_43 = arith.constant dense<0.000000e+00> : vector<8x8xf32>
    %110 = tpu.matmul %107, %108, %cst_43 {dimension_numbers = #tpu.dot_dimension_numbers<[1], [1], [0], [0], [0, 0, 1, 0], [], []>} : vector<8x8xbf16>, vector<8x8xbf16>, vector<8x8xf32> -> vector<8x8xf32>
    %cst_44 = arith.constant dense<0xFF800000> : vector<8xf32>
    %111 = vector.multi_reduction <maximumf>, %110, %cst_44 [1] : vector<8x8xf32> to vector<8xf32>
    %112 = vector.shape_cast %111 : vector<8xf32> to vector<8x1xf32>
    %113 = vector.broadcast %112 : vector<8x1xf32> to vector<8x8xf32>
    %114 = arith.subf %110, %113 : vector<8x8xf32>
    %115 = math.exp %114 : vector<8x8xf32>
    %cst_45 = arith.constant dense<0.000000e+00> : vector<8xf32>
    %116 = vector.multi_reduction <add>, %115, %cst_45 [1] : vector<8x8xf32> to vector<8xf32>
    %117 = vector.shape_cast %116 : vector<8xf32> to vector<8x1xf32>
    %118 = tpu.reciprocal %117 {approx = true} : vector<8x1xf32> -> vector<8x1xf32>
    %119 = vector.broadcast %118 : vector<8x1xf32> to vector<8x8xf32>
    %120 = arith.mulf %115, %119 : vector<8x8xf32>
    %121 = arith.truncf %120 : vector<8x8xf32> to vector<8x8xbf16>
    %cst_46 = arith.constant dense<0.000000e+00> : vector<8x8xf32>
    %122 = tpu.matmul %121, %109, %cst_46 {dimension_numbers = #tpu.dot_dimension_numbers<[1], [0], [0], [1], [0, 0, 1, 1], [], []>} : vector<8x8xbf16>, vector<8x8xbf16>, vector<8x8xf32> -> vector<8x8xf32>
    %c8_47 = arith.constant 8 : index
    %c8_48 = arith.constant 8 : index
    %123 = vector.load %arg22[%c8_47, %c8_48] : memref<16x32xf32, #tpu.memory_space<vmem>>, vector<8x8xf32>
    tpu.vector_store %arg22[%c8_47, %c8_48], %122 {strides = array<i32>} : memref<16x32xf32, #tpu.memory_space<vmem>>, vector<8x8xf32>,
    %124 = vector.extract_strided_slice %19 {offsets = [8, 16], sizes = [8, 8], strides = [1, 1]} : vector<16x32xbf16> to vector<8x8xbf16>
    %125 = vector.extract_strided_slice %20 {offsets = [8, 16], sizes = [8, 8], strides = [1, 1]} : vector<16x32xbf16> to vector<8x8xbf16>
    %126 = vector.extract_strided_slice %21 {offsets = [8, 16], sizes = [8, 8], strides = [1, 1]} : vector<16x32xbf16> to vector<8x8xbf16>
    %cst_49 = arith.constant dense<0.000000e+00> : vector<8x8xf32>
    %127 = tpu.matmul %124, %125, %cst_49 {dimension_numbers = #tpu.dot_dimension_numbers<[1], [1], [0], [0], [0, 0, 1, 0], [], []>} : vector<8x8xbf16>, vector<8x8xbf16>, vector<8x8xf32> -> vector<8x8xf32>
    %cst_50 = arith.constant dense<0xFF800000> : vector<8xf32>
    %128 = vector.multi_reduction <maximumf>, %127, %cst_50 [1] : vector<8x8xf32> to vector<8xf32>
    %129 = vector.shape_cast %128 : vector<8xf32> to vector<8x1xf32>
    %130 = vector.broadcast %129 : vector<8x1xf32> to vector<8x8xf32>
    %131 = arith.subf %127, %130 : vector<8x8xf32>
    %132 = math.exp %131 : vector<8x8xf32>
    %cst_51 = arith.constant dense<0.000000e+00> : vector<8xf32>
    %133 = vector.multi_reduction <add>, %132, %cst_51 [1] : vector<8x8xf32> to vector<8xf32>
    %134 = vector.shape_cast %133 : vector<8xf32> to vector<8x1xf32>
    %135 = tpu.reciprocal %134 {approx = true} : vector<8x1xf32> -> vector<8x1xf32>
    %136 = vector.broadcast %135 : vector<8x1xf32> to vector<8x8xf32>
    %137 = arith.mulf %132, %136 : vector<8x8xf32>
    %138 = arith.truncf %137 : vector<8x8xf32> to vector<8x8xbf16>
    %cst_52 = arith.constant dense<0.000000e+00> : vector<8x8xf32>
    %139 = tpu.matmul %138, %126, %cst_52 {dimension_numbers = #tpu.dot_dimension_numbers<[1], [0], [0], [1], [0, 0, 1, 1], [], []>} : vector<8x8xbf16>, vector<8x8xbf16>, vector<8x8xf32> -> vector<8x8xf32>
    %c8_53 = arith.constant 8 : index
    %c16_54 = arith.constant 16 : index
    %140 = vector.load %arg22[%c8_53, %c16_54] : memref<16x32xf32, #tpu.memory_space<vmem>>, vector<8x8xf32>
    tpu.vector_store %arg22[%c8_53, %c16_54], %139 {strides = array<i32>} : memref<16x32xf32, #tpu.memory_space<vmem>>, vector<8x8xf32>,
    %141 = vector.extract_strided_slice %19 {offsets = [8, 24], sizes = [8, 8], strides = [1, 1]} : vector<16x32xbf16> to vector<8x8xbf16>
    %142 = vector.extract_strided_slice %20 {offsets = [8, 24], sizes = [8, 8], strides = [1, 1]} : vector<16x32xbf16> to vector<8x8xbf16>
    %143 = vector.extract_strided_slice %21 {offsets = [8, 24], sizes = [8, 8], strides = [1, 1]} : vector<16x32xbf16> to vector<8x8xbf16>
    %cst_55 = arith.constant dense<0.000000e+00> : vector<8x8xf32>
    %144 = tpu.matmul %141, %142, %cst_55 {dimension_numbers = #tpu.dot_dimension_numbers<[1], [1], [0], [0], [0, 0, 1, 0], [], []>} : vector<8x8xbf16>, vector<8x8xbf16>, vector<8x8xf32> -> vector<8x8xf32>
    %cst_56 = arith.constant dense<0xFF800000> : vector<8xf32>
    %145 = vector.multi_reduction <maximumf>, %144, %cst_56 [1] : vector<8x8xf32> to vector<8xf32>
    %146 = vector.shape_cast %145 : vector<8xf32> to vector<8x1xf32>
    %147 = vector.broadcast %146 : vector<8x1xf32> to vector<8x8xf32>
    %148 = arith.subf %144, %147 : vector<8x8xf32>
    %149 = math.exp %148 : vector<8x8xf32>
    %cst_57 = arith.constant dense<0.000000e+00> : vector<8xf32>
    %150 = vector.multi_reduction <add>, %149, %cst_57 [1] : vector<8x8xf32> to vector<8xf32>
    %151 = vector.shape_cast %150 : vector<8xf32> to vector<8x1xf32>
    %152 = tpu.reciprocal %151 {approx = true} : vector<8x1xf32> -> vector<8x1xf32>
    %153 = vector.broadcast %152 : vector<8x1xf32> to vector<8x8xf32>
    %154 = arith.mulf %149, %153 : vector<8x8xf32>
    %155 = arith.truncf %154 : vector<8x8xf32> to vector<8x8xbf16>
    %cst_58 = arith.constant dense<0.000000e+00> : vector<8x8xf32>
    %156 = tpu.matmul %155, %143, %cst_58 {dimension_numbers = #tpu.dot_dimension_numbers<[1], [0], [0], [1], [0, 0, 1, 1], [], []>} : vector<8x8xbf16>, vector<8x8xbf16>, vector<8x8xf32> -> vector<8x8xf32>
    %c8_59 = arith.constant 8 : index
    %c24_60 = arith.constant 24 : index
    %157 = vector.load %arg22[%c8_59, %c24_60] : memref<16x32xf32, #tpu.memory_space<vmem>>, vector<8x8xf32>
    tpu.vector_store %arg22[%c8_59, %c24_60], %156 {strides = array<i32>} : memref<16x32xf32, #tpu.memory_space<vmem>>, vector<8x8xf32>,
    %c0_61 = arith.constant 0 : index
    %c0_62 = arith.constant 0 : index
    %158 = vector.load %arg22[%c0_61, %c0_62] : memref<16x32xf32, #tpu.memory_space<vmem>>, vector<16x32xf32>
    %159 = arith.truncf %158 : vector<16x32xf32> to vector<16x32xbf16>
    %cst_63 = arith.constant dense<0.000000e+00> : vector<16x32xf32>
    %160 = tpu.matmul %159, %8, %cst_63 {dimension_numbers = #tpu.dot_dimension_numbers<[1], [0], [0], [1], [0, 0, 1, 1], [], []>} : vector<16x32xbf16>, vector<32x32xbf16>, vector<16x32xf32> -> vector<16x32xf32>
    %161 = vector.broadcast %10 : vector<1x32xf32> to vector<16x32xf32>
    %162 = arith.addf %160, %161 : vector<16x32xf32>
    %163 = arith.addf %0, %162 : vector<16x32xf32>
    %c0_64 = arith.constant 0 : index
    %c0_65 = arith.constant 0 : index
    %c0_66 = arith.constant 0 : index
    %164 = vector.load %arg7[%c0_64, %c0_65, %c0_66] : memref<2x1x32xf32, #tpu.memory_space<vmem>>, vector<1x1x32xf32>
    %165 = vector.shape_cast %164 : vector<1x1x32xf32> to vector<1x32xf32>
    %c0_67 = arith.constant 0 : index
    %c0_68 = arith.constant 0 : index
    %c0_69 = arith.constant 0 : index
    %166 = vector.load %arg8[%c0_67, %c0_68, %c0_69] : memref<2x1x32xf32, #tpu.memory_space<vmem>>, vector<1x1x32xf32>
    %167 = vector.shape_cast %166 : vector<1x1x32xf32> to vector<1x32xf32>
    %cst_70 = arith.constant dense<0.000000e+00> : vector<16xf32>
    %168 = vector.multi_reduction <add>, %163, %cst_70 [1] : vector<16x32xf32> to vector<16xf32>
    %169 = vector.shape_cast %168 : vector<16xf32> to vector<16x1xf32>
    %cst_71 = arith.constant 3.200000e+01 : f32
    %170 = vector.broadcast %cst_71 : f32 to vector<16x1xf32>
    %171 = arith.divf %169, %170 : vector<16x1xf32>
    %172 = vector.broadcast %171 : vector<16x1xf32> to vector<16x32xf32>
    %173 = arith.subf %163, %172 : vector<16x32xf32>
    %174 = arith.mulf %173, %173 : vector<16x32xf32>
    %cst_72 = arith.constant dense<0.000000e+00> : vector<16xf32>
    %175 = vector.multi_reduction <add>, %174, %cst_72 [1] : vector<16x32xf32> to vector<16xf32>
    %176 = vector.shape_cast %175 : vector<16xf32> to vector<16x1xf32>
    %cst_73 = arith.constant 3.200000e+01 : f32
    %177 = vector.broadcast %cst_73 : f32 to vector<16x1xf32>
    %178 = arith.divf %176, %177 : vector<16x1xf32>
    %179 = vector.broadcast %171 : vector<16x1xf32> to vector<16x32xf32>
    %180 = arith.subf %163, %179 : vector<16x32xf32>
    %cst_74 = arith.constant 9.99999974E-6 : f32
    %181 = vector.broadcast %cst_74 : f32 to vector<16x1xf32>
    %182 = arith.addf %178, %181 : vector<16x1xf32>
    %183 = math.rsqrt %182 : vector<16x1xf32>
    %184 = vector.broadcast %183 : vector<16x1xf32> to vector<16x32xf32>
    %185 = arith.mulf %180, %184 : vector<16x32xf32>
    %186 = vector.broadcast %165 : vector<1x32xf32> to vector<16x32xf32>
    %187 = arith.mulf %185, %186 : vector<16x32xf32>
    %188 = vector.broadcast %167 : vector<1x32xf32> to vector<16x32xf32>
    %189 = arith.addf %187, %188 : vector<16x32xf32>
    %190 = arith.truncf %189 : vector<16x32xf32> to vector<16x32xbf16>
    %c0_75 = arith.constant 0 : index
    %c0_76 = arith.constant 0 : index
    %c0_77 = arith.constant 0 : index
    %191 = vector.load %arg9[%c0_75, %c0_76, %c0_77] : memref<2x32x96xbf16, #tpu.memory_space<vmem>>, vector<1x32x96xbf16>
    %192 = vector.shape_cast %191 : vector<1x32x96xbf16> to vector<32x96xbf16>
    %c0_78 = arith.constant 0 : index
    %c0_79 = arith.constant 0 : index
    %c0_80 = arith.constant 0 : index
    %193 = vector.load %arg10[%c0_78, %c0_79, %c0_80] : memref<2x1x96xf32, #tpu.memory_space<vmem>>, vector<1x1x96xf32>
    %194 = vector.shape_cast %193 : vector<1x1x96xf32> to vector<1x96xf32>
    %c0_81 = arith.constant 0 : index
    %c0_82 = arith.constant 0 : index
    %c0_83 = arith.constant 0 : index
    %195 = vector.load %arg11[%c0_81, %c0_82, %c0_83] : memref<2x32x32xbf16, #tpu.memory_space<vmem>>, vector<1x32x32xbf16>
    %196 = vector.shape_cast %195 : vector<1x32x32xbf16> to vector<32x32xbf16>
    %c0_84 = arith.constant 0 : index
    %c0_85 = arith.constant 0 : index
    %c0_86 = arith.constant 0 : index
    %197 = vector.load %arg12[%c0_84, %c0_85, %c0_86] : memref<2x1x32xf32, #tpu.memory_space<vmem>>, vector<1x1x32xf32>
    %198 = vector.shape_cast %197 : vector<1x1x32xf32> to vector<1x32xf32>
    %199 = vector.extract_strided_slice %192 {offsets = [0, 0], sizes = [32, 32], strides = [1, 1]} : vector<32x96xbf16> to vector<32x32xbf16>
    %cst_87 = arith.constant dense<0.000000e+00> : vector<16x32xf32>
    %200 = tpu.matmul %190, %199, %cst_87 {dimension_numbers = #tpu.dot_dimension_numbers<[1], [0], [0], [1], [0, 0, 1, 1], [], []>} : vector<16x32xbf16>, vector<32x32xbf16>, vector<16x32xf32> -> vector<16x32xf32>
    %201 = vector.extract_strided_slice %194 {offsets = [0, 0], sizes = [1, 32], strides = [1, 1]} : vector<1x96xf32> to vector<1x32xf32>
    %202 = vector.broadcast %201 : vector<1x32xf32> to vector<16x32xf32>
    %203 = arith.addf %200, %202 : vector<16x32xf32>
    %204 = vector.extract_strided_slice %192 {offsets = [0, 32], sizes = [32, 64], strides = [1, 1]} : vector<32x96xbf16> to vector<32x64xbf16>
    %cst_88 = arith.constant dense<0.000000e+00> : vector<16x64xf32>
    %205 = tpu.matmul %1, %204, %cst_88 {dimension_numbers = #tpu.dot_dimension_numbers<[1], [0], [0], [1], [0, 0, 1, 1], [], []>} : vector<16x32xbf16>, vector<32x64xbf16>, vector<16x64xf32> -> vector<16x64xf32>
    %206 = vector.extract_strided_slice %194 {offsets = [0, 32], sizes = [1, 64], strides = [1, 1]} : vector<1x96xf32> to vector<1x64xf32>
    %207 = vector.broadcast %206 : vector<1x64xf32> to vector<16x64xf32>
    %208 = arith.addf %205, %207 : vector<16x64xf32>
    %209 = vector.extract_strided_slice %208 {offsets = [0, 0], sizes = [16, 32], strides = [1, 1]} : vector<16x64xf32> to vector<16x32xf32>
    %210 = vector.extract_strided_slice %208 {offsets = [0, 32], sizes = [16, 32], strides = [1, 1]} : vector<16x64xf32> to vector<16x32xf32>
    %cst_89 = arith.constant 0.353553385 : f32
    %211 = vector.broadcast %cst_89 : f32 to vector<16x32xf32>
    %212 = arith.mulf %203, %211 : vector<16x32xf32>
    %213 = arith.truncf %212 : vector<16x32xf32> to vector<16x32xbf16>
    %214 = arith.truncf %209 : vector<16x32xf32> to vector<16x32xbf16>
    %215 = arith.truncf %210 : vector<16x32xf32> to vector<16x32xbf16>
    %216 = vector.extract_strided_slice %213 {offsets = [0, 0], sizes = [8, 8], strides = [1, 1]} : vector<16x32xbf16> to vector<8x8xbf16>
    %217 = vector.extract_strided_slice %214 {offsets = [0, 0], sizes = [8, 8], strides = [1, 1]} : vector<16x32xbf16> to vector<8x8xbf16>
    %218 = vector.extract_strided_slice %215 {offsets = [0, 0], sizes = [8, 8], strides = [1, 1]} : vector<16x32xbf16> to vector<8x8xbf16>
    %cst_90 = arith.constant dense<0.000000e+00> : vector<8x8xf32>
    %219 = tpu.matmul %216, %217, %cst_90 {dimension_numbers = #tpu.dot_dimension_numbers<[1], [1], [0], [0], [0, 0, 1, 0], [], []>} : vector<8x8xbf16>, vector<8x8xbf16>, vector<8x8xf32> -> vector<8x8xf32>
    %cst_91 = arith.constant dense<0xFF800000> : vector<8xf32>
    %220 = vector.multi_reduction <maximumf>, %219, %cst_91 [1] : vector<8x8xf32> to vector<8xf32>
    %221 = vector.shape_cast %220 : vector<8xf32> to vector<8x1xf32>
    %222 = vector.broadcast %221 : vector<8x1xf32> to vector<8x8xf32>
    %223 = arith.subf %219, %222 : vector<8x8xf32>
    %224 = math.exp %223 : vector<8x8xf32>
    %cst_92 = arith.constant dense<0.000000e+00> : vector<8xf32>
    %225 = vector.multi_reduction <add>, %224, %cst_92 [1] : vector<8x8xf32> to vector<8xf32>
    %226 = vector.shape_cast %225 : vector<8xf32> to vector<8x1xf32>
    %227 = tpu.reciprocal %226 {approx = true} : vector<8x1xf32> -> vector<8x1xf32>
    %228 = vector.broadcast %227 : vector<8x1xf32> to vector<8x8xf32>
    %229 = arith.mulf %224, %228 : vector<8x8xf32>
    %230 = arith.truncf %229 : vector<8x8xf32> to vector<8x8xbf16>
    %cst_93 = arith.constant dense<0.000000e+00> : vector<8x8xf32>
    %231 = tpu.matmul %230, %218, %cst_93 {dimension_numbers = #tpu.dot_dimension_numbers<[1], [0], [0], [1], [0, 0, 1, 1], [], []>} : vector<8x8xbf16>, vector<8x8xbf16>, vector<8x8xf32> -> vector<8x8xf32>
    %c0_94 = arith.constant 0 : index
    %c0_95 = arith.constant 0 : index
    %232 = vector.load %arg22[%c0_94, %c0_95] : memref<16x32xf32, #tpu.memory_space<vmem>>, vector<8x8xf32>
    tpu.vector_store %arg22[%c0_94, %c0_95], %231 {strides = array<i32>} : memref<16x32xf32, #tpu.memory_space<vmem>>, vector<8x8xf32>,
    %233 = vector.extract_strided_slice %213 {offsets = [0, 8], sizes = [8, 8], strides = [1, 1]} : vector<16x32xbf16> to vector<8x8xbf16>
    %234 = vector.extract_strided_slice %214 {offsets = [0, 8], sizes = [8, 8], strides = [1, 1]} : vector<16x32xbf16> to vector<8x8xbf16>
    %235 = vector.extract_strided_slice %215 {offsets = [0, 8], sizes = [8, 8], strides = [1, 1]} : vector<16x32xbf16> to vector<8x8xbf16>
    %cst_96 = arith.constant dense<0.000000e+00> : vector<8x8xf32>
    %236 = tpu.matmul %233, %234, %cst_96 {dimension_numbers = #tpu.dot_dimension_numbers<[1], [1], [0], [0], [0, 0, 1, 0], [], []>} : vector<8x8xbf16>, vector<8x8xbf16>, vector<8x8xf32> -> vector<8x8xf32>
    %cst_97 = arith.constant dense<0xFF800000> : vector<8xf32>
    %237 = vector.multi_reduction <maximumf>, %236, %cst_97 [1] : vector<8x8xf32> to vector<8xf32>
    %238 = vector.shape_cast %237 : vector<8xf32> to vector<8x1xf32>
    %239 = vector.broadcast %238 : vector<8x1xf32> to vector<8x8xf32>
    %240 = arith.subf %236, %239 : vector<8x8xf32>
    %241 = math.exp %240 : vector<8x8xf32>
    %cst_98 = arith.constant dense<0.000000e+00> : vector<8xf32>
    %242 = vector.multi_reduction <add>, %241, %cst_98 [1] : vector<8x8xf32> to vector<8xf32>
    %243 = vector.shape_cast %242 : vector<8xf32> to vector<8x1xf32>
    %244 = tpu.reciprocal %243 {approx = true} : vector<8x1xf32> -> vector<8x1xf32>
    %245 = vector.broadcast %244 : vector<8x1xf32> to vector<8x8xf32>
    %246 = arith.mulf %241, %245 : vector<8x8xf32>
    %247 = arith.truncf %246 : vector<8x8xf32> to vector<8x8xbf16>
    %cst_99 = arith.constant dense<0.000000e+00> : vector<8x8xf32>
    %248 = tpu.matmul %247, %235, %cst_99 {dimension_numbers = #tpu.dot_dimension_numbers<[1], [0], [0], [1], [0, 0, 1, 1], [], []>} : vector<8x8xbf16>, vector<8x8xbf16>, vector<8x8xf32> -> vector<8x8xf32>
    %c0_100 = arith.constant 0 : index
    %c8_101 = arith.constant 8 : index
    %249 = vector.load %arg22[%c0_100, %c8_101] : memref<16x32xf32, #tpu.memory_space<vmem>>, vector<8x8xf32>
    tpu.vector_store %arg22[%c0_100, %c8_101], %248 {strides = array<i32>} : memref<16x32xf32, #tpu.memory_space<vmem>>, vector<8x8xf32>,
    %250 = vector.extract_strided_slice %213 {offsets = [0, 16], sizes = [8, 8], strides = [1, 1]} : vector<16x32xbf16> to vector<8x8xbf16>
    %251 = vector.extract_strided_slice %214 {offsets = [0, 16], sizes = [8, 8], strides = [1, 1]} : vector<16x32xbf16> to vector<8x8xbf16>
    %252 = vector.extract_strided_slice %215 {offsets = [0, 16], sizes = [8, 8], strides = [1, 1]} : vector<16x32xbf16> to vector<8x8xbf16>
    %cst_102 = arith.constant dense<0.000000e+00> : vector<8x8xf32>
    %253 = tpu.matmul %250, %251, %cst_102 {dimension_numbers = #tpu.dot_dimension_numbers<[1], [1], [0], [0], [0, 0, 1, 0], [], []>} : vector<8x8xbf16>, vector<8x8xbf16>, vector<8x8xf32> -> vector<8x8xf32>
    %cst_103 = arith.constant dense<0xFF800000> : vector<8xf32>
    %254 = vector.multi_reduction <maximumf>, %253, %cst_103 [1] : vector<8x8xf32> to vector<8xf32>
    %255 = vector.shape_cast %254 : vector<8xf32> to vector<8x1xf32>
    %256 = vector.broadcast %255 : vector<8x1xf32> to vector<8x8xf32>
    %257 = arith.subf %253, %256 : vector<8x8xf32>
    %258 = math.exp %257 : vector<8x8xf32>
    %cst_104 = arith.constant dense<0.000000e+00> : vector<8xf32>
    %259 = vector.multi_reduction <add>, %258, %cst_104 [1] : vector<8x8xf32> to vector<8xf32>
    %260 = vector.shape_cast %259 : vector<8xf32> to vector<8x1xf32>
    %261 = tpu.reciprocal %260 {approx = true} : vector<8x1xf32> -> vector<8x1xf32>
    %262 = vector.broadcast %261 : vector<8x1xf32> to vector<8x8xf32>
    %263 = arith.mulf %258, %262 : vector<8x8xf32>
    %264 = arith.truncf %263 : vector<8x8xf32> to vector<8x8xbf16>
    %cst_105 = arith.constant dense<0.000000e+00> : vector<8x8xf32>
    %265 = tpu.matmul %264, %252, %cst_105 {dimension_numbers = #tpu.dot_dimension_numbers<[1], [0], [0], [1], [0, 0, 1, 1], [], []>} : vector<8x8xbf16>, vector<8x8xbf16>, vector<8x8xf32> -> vector<8x8xf32>
    %c0_106 = arith.constant 0 : index
    %c16_107 = arith.constant 16 : index
    %266 = vector.load %arg22[%c0_106, %c16_107] : memref<16x32xf32, #tpu.memory_space<vmem>>, vector<8x8xf32>
    tpu.vector_store %arg22[%c0_106, %c16_107], %265 {strides = array<i32>} : memref<16x32xf32, #tpu.memory_space<vmem>>, vector<8x8xf32>,
    %267 = vector.extract_strided_slice %213 {offsets = [0, 24], sizes = [8, 8], strides = [1, 1]} : vector<16x32xbf16> to vector<8x8xbf16>
    %268 = vector.extract_strided_slice %214 {offsets = [0, 24], sizes = [8, 8], strides = [1, 1]} : vector<16x32xbf16> to vector<8x8xbf16>
    %269 = vector.extract_strided_slice %215 {offsets = [0, 24], sizes = [8, 8], strides = [1, 1]} : vector<16x32xbf16> to vector<8x8xbf16>
    %cst_108 = arith.constant dense<0.000000e+00> : vector<8x8xf32>
    %270 = tpu.matmul %267, %268, %cst_108 {dimension_numbers = #tpu.dot_dimension_numbers<[1], [1], [0], [0], [0, 0, 1, 0], [], []>} : vector<8x8xbf16>, vector<8x8xbf16>, vector<8x8xf32> -> vector<8x8xf32>
    %cst_109 = arith.constant dense<0xFF800000> : vector<8xf32>
    %271 = vector.multi_reduction <maximumf>, %270, %cst_109 [1] : vector<8x8xf32> to vector<8xf32>
    %272 = vector.shape_cast %271 : vector<8xf32> to vector<8x1xf32>
    %273 = vector.broadcast %272 : vector<8x1xf32> to vector<8x8xf32>
    %274 = arith.subf %270, %273 : vector<8x8xf32>
    %275 = math.exp %274 : vector<8x8xf32>
    %cst_110 = arith.constant dense<0.000000e+00> : vector<8xf32>
    %276 = vector.multi_reduction <add>, %275, %cst_110 [1] : vector<8x8xf32> to vector<8xf32>
    %277 = vector.shape_cast %276 : vector<8xf32> to vector<8x1xf32>
    %278 = tpu.reciprocal %277 {approx = true} : vector<8x1xf32> -> vector<8x1xf32>
    %279 = vector.broadcast %278 : vector<8x1xf32> to vector<8x8xf32>
    %280 = arith.mulf %275, %279 : vector<8x8xf32>
    %281 = arith.truncf %280 : vector<8x8xf32> to vector<8x8xbf16>
    %cst_111 = arith.constant dense<0.000000e+00> : vector<8x8xf32>
    %282 = tpu.matmul %281, %269, %cst_111 {dimension_numbers = #tpu.dot_dimension_numbers<[1], [0], [0], [1], [0, 0, 1, 1], [], []>} : vector<8x8xbf16>, vector<8x8xbf16>, vector<8x8xf32> -> vector<8x8xf32>
    %c0_112 = arith.constant 0 : index
    %c24_113 = arith.constant 24 : index
    %283 = vector.load %arg22[%c0_112, %c24_113] : memref<16x32xf32, #tpu.memory_space<vmem>>, vector<8x8xf32>
    tpu.vector_store %arg22[%c0_112, %c24_113], %282 {strides = array<i32>} : memref<16x32xf32, #tpu.memory_space<vmem>>, vector<8x8xf32>,
    %284 = vector.extract_strided_slice %213 {offsets = [8, 0], sizes = [8, 8], strides = [1, 1]} : vector<16x32xbf16> to vector<8x8xbf16>
    %285 = vector.extract_strided_slice %214 {offsets = [8, 0], sizes = [8, 8], strides = [1, 1]} : vector<16x32xbf16> to vector<8x8xbf16>
    %286 = vector.extract_strided_slice %215 {offsets = [8, 0], sizes = [8, 8], strides = [1, 1]} : vector<16x32xbf16> to vector<8x8xbf16>
    %cst_114 = arith.constant dense<0.000000e+00> : vector<8x8xf32>
    %287 = tpu.matmul %284, %285, %cst_114 {dimension_numbers = #tpu.dot_dimension_numbers<[1], [1], [0], [0], [0, 0, 1, 0], [], []>} : vector<8x8xbf16>, vector<8x8xbf16>, vector<8x8xf32> -> vector<8x8xf32>
    %cst_115 = arith.constant dense<0xFF800000> : vector<8xf32>
    %288 = vector.multi_reduction <maximumf>, %287, %cst_115 [1] : vector<8x8xf32> to vector<8xf32>
    %289 = vector.shape_cast %288 : vector<8xf32> to vector<8x1xf32>
    %290 = vector.broadcast %289 : vector<8x1xf32> to vector<8x8xf32>
    %291 = arith.subf %287, %290 : vector<8x8xf32>
    %292 = math.exp %291 : vector<8x8xf32>
    %cst_116 = arith.constant dense<0.000000e+00> : vector<8xf32>
    %293 = vector.multi_reduction <add>, %292, %cst_116 [1] : vector<8x8xf32> to vector<8xf32>
    %294 = vector.shape_cast %293 : vector<8xf32> to vector<8x1xf32>
    %295 = tpu.reciprocal %294 {approx = true} : vector<8x1xf32> -> vector<8x1xf32>
    %296 = vector.broadcast %295 : vector<8x1xf32> to vector<8x8xf32>
    %297 = arith.mulf %292, %296 : vector<8x8xf32>
    %298 = arith.truncf %297 : vector<8x8xf32> to vector<8x8xbf16>
    %cst_117 = arith.constant dense<0.000000e+00> : vector<8x8xf32>
    %299 = tpu.matmul %298, %286, %cst_117 {dimension_numbers = #tpu.dot_dimension_numbers<[1], [0], [0], [1], [0, 0, 1, 1], [], []>} : vector<8x8xbf16>, vector<8x8xbf16>, vector<8x8xf32> -> vector<8x8xf32>
    %c8_118 = arith.constant 8 : index
    %c0_119 = arith.constant 0 : index
    %300 = vector.load %arg22[%c8_118, %c0_119] : memref<16x32xf32, #tpu.memory_space<vmem>>, vector<8x8xf32>
    tpu.vector_store %arg22[%c8_118, %c0_119], %299 {strides = array<i32>} : memref<16x32xf32, #tpu.memory_space<vmem>>, vector<8x8xf32>,
    %301 = vector.extract_strided_slice %213 {offsets = [8, 8], sizes = [8, 8], strides = [1, 1]} : vector<16x32xbf16> to vector<8x8xbf16>
    %302 = vector.extract_strided_slice %214 {offsets = [8, 8], sizes = [8, 8], strides = [1, 1]} : vector<16x32xbf16> to vector<8x8xbf16>
    %303 = vector.extract_strided_slice %215 {offsets = [8, 8], sizes = [8, 8], strides = [1, 1]} : vector<16x32xbf16> to vector<8x8xbf16>
    %cst_120 = arith.constant dense<0.000000e+00> : vector<8x8xf32>
    %304 = tpu.matmul %301, %302, %cst_120 {dimension_numbers = #tpu.dot_dimension_numbers<[1], [1], [0], [0], [0, 0, 1, 0], [], []>} : vector<8x8xbf16>, vector<8x8xbf16>, vector<8x8xf32> -> vector<8x8xf32>
    %cst_121 = arith.constant dense<0xFF800000> : vector<8xf32>
    %305 = vector.multi_reduction <maximumf>, %304, %cst_121 [1] : vector<8x8xf32> to vector<8xf32>
    %306 = vector.shape_cast %305 : vector<8xf32> to vector<8x1xf32>
    %307 = vector.broadcast %306 : vector<8x1xf32> to vector<8x8xf32>
    %308 = arith.subf %304, %307 : vector<8x8xf32>
    %309 = math.exp %308 : vector<8x8xf32>
    %cst_122 = arith.constant dense<0.000000e+00> : vector<8xf32>
    %310 = vector.multi_reduction <add>, %309, %cst_122 [1] : vector<8x8xf32> to vector<8xf32>
    %311 = vector.shape_cast %310 : vector<8xf32> to vector<8x1xf32>
    %312 = tpu.reciprocal %311 {approx = true} : vector<8x1xf32> -> vector<8x1xf32>
    %313 = vector.broadcast %312 : vector<8x1xf32> to vector<8x8xf32>
    %314 = arith.mulf %309, %313 : vector<8x8xf32>
    %315 = arith.truncf %314 : vector<8x8xf32> to vector<8x8xbf16>
    %cst_123 = arith.constant dense<0.000000e+00> : vector<8x8xf32>
    %316 = tpu.matmul %315, %303, %cst_123 {dimension_numbers = #tpu.dot_dimension_numbers<[1], [0], [0], [1], [0, 0, 1, 1], [], []>} : vector<8x8xbf16>, vector<8x8xbf16>, vector<8x8xf32> -> vector<8x8xf32>
    %c8_124 = arith.constant 8 : index
    %c8_125 = arith.constant 8 : index
    %317 = vector.load %arg22[%c8_124, %c8_125] : memref<16x32xf32, #tpu.memory_space<vmem>>, vector<8x8xf32>
    tpu.vector_store %arg22[%c8_124, %c8_125], %316 {strides = array<i32>} : memref<16x32xf32, #tpu.memory_space<vmem>>, vector<8x8xf32>,
    %318 = vector.extract_strided_slice %213 {offsets = [8, 16], sizes = [8, 8], strides = [1, 1]} : vector<16x32xbf16> to vector<8x8xbf16>
    %319 = vector.extract_strided_slice %214 {offsets = [8, 16], sizes = [8, 8], strides = [1, 1]} : vector<16x32xbf16> to vector<8x8xbf16>
    %320 = vector.extract_strided_slice %215 {offsets = [8, 16], sizes = [8, 8], strides = [1, 1]} : vector<16x32xbf16> to vector<8x8xbf16>
    %cst_126 = arith.constant dense<0.000000e+00> : vector<8x8xf32>
    %321 = tpu.matmul %318, %319, %cst_126 {dimension_numbers = #tpu.dot_dimension_numbers<[1], [1], [0], [0], [0, 0, 1, 0], [], []>} : vector<8x8xbf16>, vector<8x8xbf16>, vector<8x8xf32> -> vector<8x8xf32>
    %cst_127 = arith.constant dense<0xFF800000> : vector<8xf32>
    %322 = vector.multi_reduction <maximumf>, %321, %cst_127 [1] : vector<8x8xf32> to vector<8xf32>
    %323 = vector.shape_cast %322 : vector<8xf32> to vector<8x1xf32>
    %324 = vector.broadcast %323 : vector<8x1xf32> to vector<8x8xf32>
    %325 = arith.subf %321, %324 : vector<8x8xf32>
    %326 = math.exp %325 : vector<8x8xf32>
    %cst_128 = arith.constant dense<0.000000e+00> : vector<8xf32>
    %327 = vector.multi_reduction <add>, %326, %cst_128 [1] : vector<8x8xf32> to vector<8xf32>
    %328 = vector.shape_cast %327 : vector<8xf32> to vector<8x1xf32>
    %329 = tpu.reciprocal %328 {approx = true} : vector<8x1xf32> -> vector<8x1xf32>
    %330 = vector.broadcast %329 : vector<8x1xf32> to vector<8x8xf32>
    %331 = arith.mulf %326, %330 : vector<8x8xf32>
    %332 = arith.truncf %331 : vector<8x8xf32> to vector<8x8xbf16>
    %cst_129 = arith.constant dense<0.000000e+00> : vector<8x8xf32>
    %333 = tpu.matmul %332, %320, %cst_129 {dimension_numbers = #tpu.dot_dimension_numbers<[1], [0], [0], [1], [0, 0, 1, 1], [], []>} : vector<8x8xbf16>, vector<8x8xbf16>, vector<8x8xf32> -> vector<8x8xf32>
    %c8_130 = arith.constant 8 : index
    %c16_131 = arith.constant 16 : index
    %334 = vector.load %arg22[%c8_130, %c16_131] : memref<16x32xf32, #tpu.memory_space<vmem>>, vector<8x8xf32>
    tpu.vector_store %arg22[%c8_130, %c16_131], %333 {strides = array<i32>} : memref<16x32xf32, #tpu.memory_space<vmem>>, vector<8x8xf32>,
    %335 = vector.extract_strided_slice %213 {offsets = [8, 24], sizes = [8, 8], strides = [1, 1]} : vector<16x32xbf16> to vector<8x8xbf16>
    %336 = vector.extract_strided_slice %214 {offsets = [8, 24], sizes = [8, 8], strides = [1, 1]} : vector<16x32xbf16> to vector<8x8xbf16>
    %337 = vector.extract_strided_slice %215 {offsets = [8, 24], sizes = [8, 8], strides = [1, 1]} : vector<16x32xbf16> to vector<8x8xbf16>
    %cst_132 = arith.constant dense<0.000000e+00> : vector<8x8xf32>
    %338 = tpu.matmul %335, %336, %cst_132 {dimension_numbers = #tpu.dot_dimension_numbers<[1], [1], [0], [0], [0, 0, 1, 0], [], []>} : vector<8x8xbf16>, vector<8x8xbf16>, vector<8x8xf32> -> vector<8x8xf32>
    %cst_133 = arith.constant dense<0xFF800000> : vector<8xf32>
    %339 = vector.multi_reduction <maximumf>, %338, %cst_133 [1] : vector<8x8xf32> to vector<8xf32>
    %340 = vector.shape_cast %339 : vector<8xf32> to vector<8x1xf32>
    %341 = vector.broadcast %340 : vector<8x1xf32> to vector<8x8xf32>
    %342 = arith.subf %338, %341 : vector<8x8xf32>
    %343 = math.exp %342 : vector<8x8xf32>
    %cst_134 = arith.constant dense<0.000000e+00> : vector<8xf32>
    %344 = vector.multi_reduction <add>, %343, %cst_134 [1] : vector<8x8xf32> to vector<8xf32>
    %345 = vector.shape_cast %344 : vector<8xf32> to vector<8x1xf32>
    %346 = tpu.reciprocal %345 {approx = true} : vector<8x1xf32> -> vector<8x1xf32>
    %347 = vector.broadcast %346 : vector<8x1xf32> to vector<8x8xf32>
    %348 = arith.mulf %343, %347 : vector<8x8xf32>
    %349 = arith.truncf %348 : vector<8x8xf32> to vector<8x8xbf16>
    %cst_135 = arith.constant dense<0.000000e+00> : vector<8x8xf32>
    %350 = tpu.matmul %349, %337, %cst_135 {dimension_numbers = #tpu.dot_dimension_numbers<[1], [0], [0], [1], [0, 0, 1, 1], [], []>} : vector<8x8xbf16>, vector<8x8xbf16>, vector<8x8xf32> -> vector<8x8xf32>
    %c8_136 = arith.constant 8 : index
    %c24_137 = arith.constant 24 : index
    %351 = vector.load %arg22[%c8_136, %c24_137] : memref<16x32xf32, #tpu.memory_space<vmem>>, vector<8x8xf32>
    tpu.vector_store %arg22[%c8_136, %c24_137], %350 {strides = array<i32>} : memref<16x32xf32, #tpu.memory_space<vmem>>, vector<8x8xf32>,
    %c0_138 = arith.constant 0 : index
    %c0_139 = arith.constant 0 : index
    %352 = vector.load %arg22[%c0_138, %c0_139] : memref<16x32xf32, #tpu.memory_space<vmem>>, vector<16x32xf32>
    %353 = arith.truncf %352 : vector<16x32xf32> to vector<16x32xbf16>
    %cst_140 = arith.constant dense<0.000000e+00> : vector<16x32xf32>
    %354 = tpu.matmul %353, %196, %cst_140 {dimension_numbers = #tpu.dot_dimension_numbers<[1], [0], [0], [1], [0, 0, 1, 1], [], []>} : vector<16x32xbf16>, vector<32x32xbf16>, vector<16x32xf32> -> vector<16x32xf32>
    %355 = vector.broadcast %198 : vector<1x32xf32> to vector<16x32xf32>
    %356 = arith.addf %354, %355 : vector<16x32xf32>
    %357 = arith.addf %189, %356 : vector<16x32xf32>
    %c0_141 = arith.constant 0 : index
    %c0_142 = arith.constant 0 : index
    %c0_143 = arith.constant 0 : index
    %358 = vector.load %arg13[%c0_141, %c0_142, %c0_143] : memref<2x1x32xf32, #tpu.memory_space<vmem>>, vector<1x1x32xf32>
    %359 = vector.shape_cast %358 : vector<1x1x32xf32> to vector<1x32xf32>
    %c0_144 = arith.constant 0 : index
    %c0_145 = arith.constant 0 : index
    %c0_146 = arith.constant 0 : index
    %360 = vector.load %arg14[%c0_144, %c0_145, %c0_146] : memref<2x1x32xf32, #tpu.memory_space<vmem>>, vector<1x1x32xf32>
    %361 = vector.shape_cast %360 : vector<1x1x32xf32> to vector<1x32xf32>
    %cst_147 = arith.constant dense<0.000000e+00> : vector<16xf32>
    %362 = vector.multi_reduction <add>, %357, %cst_147 [1] : vector<16x32xf32> to vector<16xf32>
    %363 = vector.shape_cast %362 : vector<16xf32> to vector<16x1xf32>
    %cst_148 = arith.constant 3.200000e+01 : f32
    %364 = vector.broadcast %cst_148 : f32 to vector<16x1xf32>
    %365 = arith.divf %363, %364 : vector<16x1xf32>
    %366 = vector.broadcast %365 : vector<16x1xf32> to vector<16x32xf32>
    %367 = arith.subf %357, %366 : vector<16x32xf32>
    %368 = arith.mulf %367, %367 : vector<16x32xf32>
    %cst_149 = arith.constant dense<0.000000e+00> : vector<16xf32>
    %369 = vector.multi_reduction <add>, %368, %cst_149 [1] : vector<16x32xf32> to vector<16xf32>
    %370 = vector.shape_cast %369 : vector<16xf32> to vector<16x1xf32>
    %cst_150 = arith.constant 3.200000e+01 : f32
    %371 = vector.broadcast %cst_150 : f32 to vector<16x1xf32>
    %372 = arith.divf %370, %371 : vector<16x1xf32>
    %373 = vector.broadcast %365 : vector<16x1xf32> to vector<16x32xf32>
    %374 = arith.subf %357, %373 : vector<16x32xf32>
    %cst_151 = arith.constant 9.99999974E-6 : f32
    %375 = vector.broadcast %cst_151 : f32 to vector<16x1xf32>
    %376 = arith.addf %372, %375 : vector<16x1xf32>
    %377 = math.rsqrt %376 : vector<16x1xf32>
    %378 = vector.broadcast %377 : vector<16x1xf32> to vector<16x32xf32>
    %379 = arith.mulf %374, %378 : vector<16x32xf32>
    %380 = vector.broadcast %359 : vector<1x32xf32> to vector<16x32xf32>
    %381 = arith.mulf %379, %380 : vector<16x32xf32>
    %382 = vector.broadcast %361 : vector<1x32xf32> to vector<16x32xf32>
    %383 = arith.addf %381, %382 : vector<16x32xf32>
    %384 = arith.truncf %383 : vector<16x32xf32> to vector<16x32xbf16>
    %c0_152 = arith.constant 0 : index
    %c0_153 = arith.constant 0 : index
    %c0_154 = arith.constant 0 : index
    %385 = vector.load %arg15[%c0_152, %c0_153, %c0_154] : memref<2x32x64xbf16, #tpu.memory_space<vmem>>, vector<1x32x64xbf16>
    %386 = vector.shape_cast %385 : vector<1x32x64xbf16> to vector<32x64xbf16>
    %c0_155 = arith.constant 0 : index
    %c0_156 = arith.constant 0 : index
    %c0_157 = arith.constant 0 : index
    %387 = vector.load %arg16[%c0_155, %c0_156, %c0_157] : memref<2x1x64xf32, #tpu.memory_space<vmem>>, vector<1x1x64xf32>
    %388 = vector.shape_cast %387 : vector<1x1x64xf32> to vector<1x64xf32>
    %c0_158 = arith.constant 0 : index
    %c0_159 = arith.constant 0 : index
    %c0_160 = arith.constant 0 : index
    %389 = vector.load %arg17[%c0_158, %c0_159, %c0_160] : memref<2x64x32xbf16, #tpu.memory_space<vmem>>, vector<1x64x32xbf16>
    %390 = vector.shape_cast %389 : vector<1x64x32xbf16> to vector<64x32xbf16>
    %c0_161 = arith.constant 0 : index
    %c0_162 = arith.constant 0 : index
    %c0_163 = arith.constant 0 : index
    %391 = vector.load %arg18[%c0_161, %c0_162, %c0_163] : memref<2x1x32xf32, #tpu.memory_space<vmem>>, vector<1x1x32xf32>
    %392 = vector.shape_cast %391 : vector<1x1x32xf32> to vector<1x32xf32>
    %c0_164 = arith.constant 0 : index
    %c0_165 = arith.constant 0 : index
    %c0_166 = arith.constant 0 : index
    %393 = vector.load %arg19[%c0_164, %c0_165, %c0_166] : memref<2x1x32xf32, #tpu.memory_space<vmem>>, vector<1x1x32xf32>
    %394 = vector.shape_cast %393 : vector<1x1x32xf32> to vector<1x32xf32>
    %c0_167 = arith.constant 0 : index
    %c0_168 = arith.constant 0 : index
    %c0_169 = arith.constant 0 : index
    %395 = vector.load %arg20[%c0_167, %c0_168, %c0_169] : memref<2x1x32xf32, #tpu.memory_space<vmem>>, vector<1x1x32xf32>
    %396 = vector.shape_cast %395 : vector<1x1x32xf32> to vector<1x32xf32>
    %cst_170 = arith.constant dense<0.000000e+00> : vector<16x64xf32>
    %397 = tpu.matmul %384, %386, %cst_170 {dimension_numbers = #tpu.dot_dimension_numbers<[1], [0], [0], [1], [0, 0, 1, 1], [], []>} : vector<16x32xbf16>, vector<32x64xbf16>, vector<16x64xf32> -> vector<16x64xf32>
    %398 = vector.broadcast %388 : vector<1x64xf32> to vector<16x64xf32>
    %399 = arith.addf %397, %398 : vector<16x64xf32>
    %cst_171 = arith.constant 0.000000e+00 : f32
    %400 = vector.broadcast %cst_171 : f32 to vector<16x64xf32>
    %401 = arith.maximumf %399, %400 : vector<16x64xf32>
    %402 = arith.truncf %401 : vector<16x64xf32> to vector<16x64xbf16>
    %cst_172 = arith.constant dense<0.000000e+00> : vector<16x32xf32>
    %403 = tpu.matmul %402, %390, %cst_172 {dimension_numbers = #tpu.dot_dimension_numbers<[1], [0], [0], [1], [0, 0, 1, 1], [], []>} : vector<16x64xbf16>, vector<64x32xbf16>, vector<16x32xf32> -> vector<16x32xf32>
    %404 = vector.broadcast %392 : vector<1x32xf32> to vector<16x32xf32>
    %405 = arith.addf %403, %404 : vector<16x32xf32>
    %406 = arith.addf %383, %405 : vector<16x32xf32>
    %cst_173 = arith.constant dense<0.000000e+00> : vector<16xf32>
    %407 = vector.multi_reduction <add>, %406, %cst_173 [1] : vector<16x32xf32> to vector<16xf32>
    %408 = vector.shape_cast %407 : vector<16xf32> to vector<16x1xf32>
    %cst_174 = arith.constant 3.200000e+01 : f32
    %409 = vector.broadcast %cst_174 : f32 to vector<16x1xf32>
    %410 = arith.divf %408, %409 : vector<16x1xf32>
    %411 = vector.broadcast %410 : vector<16x1xf32> to vector<16x32xf32>
    %412 = arith.subf %406, %411 : vector<16x32xf32>
    %413 = arith.mulf %412, %412 : vector<16x32xf32>
    %cst_175 = arith.constant dense<0.000000e+00> : vector<16xf32>
    %414 = vector.multi_reduction <add>, %413, %cst_175 [1] : vector<16x32xf32> to vector<16xf32>
    %415 = vector.shape_cast %414 : vector<16xf32> to vector<16x1xf32>
    %cst_176 = arith.constant 3.200000e+01 : f32
    %416 = vector.broadcast %cst_176 : f32 to vector<16x1xf32>
    %417 = arith.divf %415, %416 : vector<16x1xf32>
    %418 = vector.broadcast %410 : vector<16x1xf32> to vector<16x32xf32>
    %419 = arith.subf %406, %418 : vector<16x32xf32>
    %cst_177 = arith.constant 9.99999974E-6 : f32
    %420 = vector.broadcast %cst_177 : f32 to vector<16x1xf32>
    %421 = arith.addf %417, %420 : vector<16x1xf32>
    %422 = math.rsqrt %421 : vector<16x1xf32>
    %423 = vector.broadcast %422 : vector<16x1xf32> to vector<16x32xf32>
    %424 = arith.mulf %419, %423 : vector<16x32xf32>
    %425 = vector.broadcast %394 : vector<1x32xf32> to vector<16x32xf32>
    %426 = arith.mulf %424, %425 : vector<16x32xf32>
    %427 = vector.broadcast %396 : vector<1x32xf32> to vector<16x32xf32>
    %428 = arith.addf %426, %427 : vector<16x32xf32>
    %429 = arith.truncf %428 : vector<16x32xf32> to vector<16x32xbf16>
    %c1 = arith.constant 1 : index
    %c0_178 = arith.constant 0 : index
    %c0_179 = arith.constant 0 : index
    %430 = vector.load %arg3[%c1, %c0_178, %c0_179] : memref<2x32x96xbf16, #tpu.memory_space<vmem>>, vector<1x32x96xbf16>
    %431 = vector.shape_cast %430 : vector<1x32x96xbf16> to vector<32x96xbf16>
    %c1_180 = arith.constant 1 : index
    %c0_181 = arith.constant 0 : index
    %c0_182 = arith.constant 0 : index
    %432 = vector.load %arg4[%c1_180, %c0_181, %c0_182] : memref<2x1x96xf32, #tpu.memory_space<vmem>>, vector<1x1x96xf32>
    %433 = vector.shape_cast %432 : vector<1x1x96xf32> to vector<1x96xf32>
    %c1_183 = arith.constant 1 : index
    %c0_184 = arith.constant 0 : index
    %c0_185 = arith.constant 0 : index
    %434 = vector.load %arg5[%c1_183, %c0_184, %c0_185] : memref<2x32x32xbf16, #tpu.memory_space<vmem>>, vector<1x32x32xbf16>
    %435 = vector.shape_cast %434 : vector<1x32x32xbf16> to vector<32x32xbf16>
    %c1_186 = arith.constant 1 : index
    %c0_187 = arith.constant 0 : index
    %c0_188 = arith.constant 0 : index
    %436 = vector.load %arg6[%c1_186, %c0_187, %c0_188] : memref<2x1x32xf32, #tpu.memory_space<vmem>>, vector<1x1x32xf32>
    %437 = vector.shape_cast %436 : vector<1x1x32xf32> to vector<1x32xf32>
    %cst_189 = arith.constant dense<0.000000e+00> : vector<16x96xf32>
    %438 = tpu.matmul %429, %431, %cst_189 {dimension_numbers = #tpu.dot_dimension_numbers<[1], [0], [0], [1], [0, 0, 1, 1], [], []>} : vector<16x32xbf16>, vector<32x96xbf16>, vector<16x96xf32> -> vector<16x96xf32>
    %439 = vector.broadcast %433 : vector<1x96xf32> to vector<16x96xf32>
    %440 = arith.addf %438, %439 : vector<16x96xf32>
    %441 = vector.extract_strided_slice %440 {offsets = [0, 0], sizes = [16, 32], strides = [1, 1]} : vector<16x96xf32> to vector<16x32xf32>
    %442 = vector.extract_strided_slice %440 {offsets = [0, 32], sizes = [16, 32], strides = [1, 1]} : vector<16x96xf32> to vector<16x32xf32>
    %443 = vector.extract_strided_slice %440 {offsets = [0, 64], sizes = [16, 32], strides = [1, 1]} : vector<16x96xf32> to vector<16x32xf32>
    %cst_190 = arith.constant 0.353553385 : f32
    %444 = vector.broadcast %cst_190 : f32 to vector<16x32xf32>
    %445 = arith.mulf %441, %444 : vector<16x32xf32>
    %446 = arith.truncf %445 : vector<16x32xf32> to vector<16x32xbf16>
    %447 = arith.truncf %442 : vector<16x32xf32> to vector<16x32xbf16>
    %448 = arith.truncf %443 : vector<16x32xf32> to vector<16x32xbf16>
    %449 = vector.extract_strided_slice %446 {offsets = [0, 0], sizes = [8, 8], strides = [1, 1]} : vector<16x32xbf16> to vector<8x8xbf16>
    %450 = vector.extract_strided_slice %447 {offsets = [0, 0], sizes = [8, 8], strides = [1, 1]} : vector<16x32xbf16> to vector<8x8xbf16>
    %451 = vector.extract_strided_slice %448 {offsets = [0, 0], sizes = [8, 8], strides = [1, 1]} : vector<16x32xbf16> to vector<8x8xbf16>
    %cst_191 = arith.constant dense<0.000000e+00> : vector<8x8xf32>
    %452 = tpu.matmul %449, %450, %cst_191 {dimension_numbers = #tpu.dot_dimension_numbers<[1], [1], [0], [0], [0, 0, 1, 0], [], []>} : vector<8x8xbf16>, vector<8x8xbf16>, vector<8x8xf32> -> vector<8x8xf32>
    %cst_192 = arith.constant dense<0xFF800000> : vector<8xf32>
    %453 = vector.multi_reduction <maximumf>, %452, %cst_192 [1] : vector<8x8xf32> to vector<8xf32>
    %454 = vector.shape_cast %453 : vector<8xf32> to vector<8x1xf32>
    %455 = vector.broadcast %454 : vector<8x1xf32> to vector<8x8xf32>
    %456 = arith.subf %452, %455 : vector<8x8xf32>
    %457 = math.exp %456 : vector<8x8xf32>
    %cst_193 = arith.constant dense<0.000000e+00> : vector<8xf32>
    %458 = vector.multi_reduction <add>, %457, %cst_193 [1] : vector<8x8xf32> to vector<8xf32>
    %459 = vector.shape_cast %458 : vector<8xf32> to vector<8x1xf32>
    %460 = tpu.reciprocal %459 {approx = true} : vector<8x1xf32> -> vector<8x1xf32>
    %461 = vector.broadcast %460 : vector<8x1xf32> to vector<8x8xf32>
    %462 = arith.mulf %457, %461 : vector<8x8xf32>
    %463 = arith.truncf %462 : vector<8x8xf32> to vector<8x8xbf16>
    %cst_194 = arith.constant dense<0.000000e+00> : vector<8x8xf32>
    %464 = tpu.matmul %463, %451, %cst_194 {dimension_numbers = #tpu.dot_dimension_numbers<[1], [0], [0], [1], [0, 0, 1, 1], [], []>} : vector<8x8xbf16>, vector<8x8xbf16>, vector<8x8xf32> -> vector<8x8xf32>
    %c0_195 = arith.constant 0 : index
    %c0_196 = arith.constant 0 : index
    %465 = vector.load %arg22[%c0_195, %c0_196] : memref<16x32xf32, #tpu.memory_space<vmem>>, vector<8x8xf32>
    tpu.vector_store %arg22[%c0_195, %c0_196], %464 {strides = array<i32>} : memref<16x32xf32, #tpu.memory_space<vmem>>, vector<8x8xf32>,
    %466 = vector.extract_strided_slice %446 {offsets = [0, 8], sizes = [8, 8], strides = [1, 1]} : vector<16x32xbf16> to vector<8x8xbf16>
    %467 = vector.extract_strided_slice %447 {offsets = [0, 8], sizes = [8, 8], strides = [1, 1]} : vector<16x32xbf16> to vector<8x8xbf16>
    %468 = vector.extract_strided_slice %448 {offsets = [0, 8], sizes = [8, 8], strides = [1, 1]} : vector<16x32xbf16> to vector<8x8xbf16>
    %cst_197 = arith.constant dense<0.000000e+00> : vector<8x8xf32>
    %469 = tpu.matmul %466, %467, %cst_197 {dimension_numbers = #tpu.dot_dimension_numbers<[1], [1], [0], [0], [0, 0, 1, 0], [], []>} : vector<8x8xbf16>, vector<8x8xbf16>, vector<8x8xf32> -> vector<8x8xf32>
    %cst_198 = arith.constant dense<0xFF800000> : vector<8xf32>
    %470 = vector.multi_reduction <maximumf>, %469, %cst_198 [1] : vector<8x8xf32> to vector<8xf32>
    %471 = vector.shape_cast %470 : vector<8xf32> to vector<8x1xf32>
    %472 = vector.broadcast %471 : vector<8x1xf32> to vector<8x8xf32>
    %473 = arith.subf %469, %472 : vector<8x8xf32>
    %474 = math.exp %473 : vector<8x8xf32>
    %cst_199 = arith.constant dense<0.000000e+00> : vector<8xf32>
    %475 = vector.multi_reduction <add>, %474, %cst_199 [1] : vector<8x8xf32> to vector<8xf32>
    %476 = vector.shape_cast %475 : vector<8xf32> to vector<8x1xf32>
    %477 = tpu.reciprocal %476 {approx = true} : vector<8x1xf32> -> vector<8x1xf32>
    %478 = vector.broadcast %477 : vector<8x1xf32> to vector<8x8xf32>
    %479 = arith.mulf %474, %478 : vector<8x8xf32>
    %480 = arith.truncf %479 : vector<8x8xf32> to vector<8x8xbf16>
    %cst_200 = arith.constant dense<0.000000e+00> : vector<8x8xf32>
    %481 = tpu.matmul %480, %468, %cst_200 {dimension_numbers = #tpu.dot_dimension_numbers<[1], [0], [0], [1], [0, 0, 1, 1], [], []>} : vector<8x8xbf16>, vector<8x8xbf16>, vector<8x8xf32> -> vector<8x8xf32>
    %c0_201 = arith.constant 0 : index
    %c8_202 = arith.constant 8 : index
    %482 = vector.load %arg22[%c0_201, %c8_202] : memref<16x32xf32, #tpu.memory_space<vmem>>, vector<8x8xf32>
    tpu.vector_store %arg22[%c0_201, %c8_202], %481 {strides = array<i32>} : memref<16x32xf32, #tpu.memory_space<vmem>>, vector<8x8xf32>,
    %483 = vector.extract_strided_slice %446 {offsets = [0, 16], sizes = [8, 8], strides = [1, 1]} : vector<16x32xbf16> to vector<8x8xbf16>
    %484 = vector.extract_strided_slice %447 {offsets = [0, 16], sizes = [8, 8], strides = [1, 1]} : vector<16x32xbf16> to vector<8x8xbf16>
    %485 = vector.extract_strided_slice %448 {offsets = [0, 16], sizes = [8, 8], strides = [1, 1]} : vector<16x32xbf16> to vector<8x8xbf16>
    %cst_203 = arith.constant dense<0.000000e+00> : vector<8x8xf32>
    %486 = tpu.matmul %483, %484, %cst_203 {dimension_numbers = #tpu.dot_dimension_numbers<[1], [1], [0], [0], [0, 0, 1, 0], [], []>} : vector<8x8xbf16>, vector<8x8xbf16>, vector<8x8xf32> -> vector<8x8xf32>
    %cst_204 = arith.constant dense<0xFF800000> : vector<8xf32>
    %487 = vector.multi_reduction <maximumf>, %486, %cst_204 [1] : vector<8x8xf32> to vector<8xf32>
    %488 = vector.shape_cast %487 : vector<8xf32> to vector<8x1xf32>
    %489 = vector.broadcast %488 : vector<8x1xf32> to vector<8x8xf32>
    %490 = arith.subf %486, %489 : vector<8x8xf32>
    %491 = math.exp %490 : vector<8x8xf32>
    %cst_205 = arith.constant dense<0.000000e+00> : vector<8xf32>
    %492 = vector.multi_reduction <add>, %491, %cst_205 [1] : vector<8x8xf32> to vector<8xf32>
    %493 = vector.shape_cast %492 : vector<8xf32> to vector<8x1xf32>
    %494 = tpu.reciprocal %493 {approx = true} : vector<8x1xf32> -> vector<8x1xf32>
    %495 = vector.broadcast %494 : vector<8x1xf32> to vector<8x8xf32>
    %496 = arith.mulf %491, %495 : vector<8x8xf32>
    %497 = arith.truncf %496 : vector<8x8xf32> to vector<8x8xbf16>
    %cst_206 = arith.constant dense<0.000000e+00> : vector<8x8xf32>
    %498 = tpu.matmul %497, %485, %cst_206 {dimension_numbers = #tpu.dot_dimension_numbers<[1], [0], [0], [1], [0, 0, 1, 1], [], []>} : vector<8x8xbf16>, vector<8x8xbf16>, vector<8x8xf32> -> vector<8x8xf32>
    %c0_207 = arith.constant 0 : index
    %c16_208 = arith.constant 16 : index
    %499 = vector.load %arg22[%c0_207, %c16_208] : memref<16x32xf32, #tpu.memory_space<vmem>>, vector<8x8xf32>
    tpu.vector_store %arg22[%c0_207, %c16_208], %498 {strides = array<i32>} : memref<16x32xf32, #tpu.memory_space<vmem>>, vector<8x8xf32>,
    %500 = vector.extract_strided_slice %446 {offsets = [0, 24], sizes = [8, 8], strides = [1, 1]} : vector<16x32xbf16> to vector<8x8xbf16>
    %501 = vector.extract_strided_slice %447 {offsets = [0, 24], sizes = [8, 8], strides = [1, 1]} : vector<16x32xbf16> to vector<8x8xbf16>
    %502 = vector.extract_strided_slice %448 {offsets = [0, 24], sizes = [8, 8], strides = [1, 1]} : vector<16x32xbf16> to vector<8x8xbf16>
    %cst_209 = arith.constant dense<0.000000e+00> : vector<8x8xf32>
    %503 = tpu.matmul %500, %501, %cst_209 {dimension_numbers = #tpu.dot_dimension_numbers<[1], [1], [0], [0], [0, 0, 1, 0], [], []>} : vector<8x8xbf16>, vector<8x8xbf16>, vector<8x8xf32> -> vector<8x8xf32>
    %cst_210 = arith.constant dense<0xFF800000> : vector<8xf32>
    %504 = vector.multi_reduction <maximumf>, %503, %cst_210 [1] : vector<8x8xf32> to vector<8xf32>
    %505 = vector.shape_cast %504 : vector<8xf32> to vector<8x1xf32>
    %506 = vector.broadcast %505 : vector<8x1xf32> to vector<8x8xf32>
    %507 = arith.subf %503, %506 : vector<8x8xf32>
    %508 = math.exp %507 : vector<8x8xf32>
    %cst_211 = arith.constant dense<0.000000e+00> : vector<8xf32>
    %509 = vector.multi_reduction <add>, %508, %cst_211 [1] : vector<8x8xf32> to vector<8xf32>
    %510 = vector.shape_cast %509 : vector<8xf32> to vector<8x1xf32>
    %511 = tpu.reciprocal %510 {approx = true} : vector<8x1xf32> -> vector<8x1xf32>
    %512 = vector.broadcast %511 : vector<8x1xf32> to vector<8x8xf32>
    %513 = arith.mulf %508, %512 : vector<8x8xf32>
    %514 = arith.truncf %513 : vector<8x8xf32> to vector<8x8xbf16>
    %cst_212 = arith.constant dense<0.000000e+00> : vector<8x8xf32>
    %515 = tpu.matmul %514, %502, %cst_212 {dimension_numbers = #tpu.dot_dimension_numbers<[1], [0], [0], [1], [0, 0, 1, 1], [], []>} : vector<8x8xbf16>, vector<8x8xbf16>, vector<8x8xf32> -> vector<8x8xf32>
    %c0_213 = arith.constant 0 : index
    %c24_214 = arith.constant 24 : index
    %516 = vector.load %arg22[%c0_213, %c24_214] : memref<16x32xf32, #tpu.memory_space<vmem>>, vector<8x8xf32>
    tpu.vector_store %arg22[%c0_213, %c24_214], %515 {strides = array<i32>} : memref<16x32xf32, #tpu.memory_space<vmem>>, vector<8x8xf32>,
    %517 = vector.extract_strided_slice %446 {offsets = [8, 0], sizes = [8, 8], strides = [1, 1]} : vector<16x32xbf16> to vector<8x8xbf16>
    %518 = vector.extract_strided_slice %447 {offsets = [8, 0], sizes = [8, 8], strides = [1, 1]} : vector<16x32xbf16> to vector<8x8xbf16>
    %519 = vector.extract_strided_slice %448 {offsets = [8, 0], sizes = [8, 8], strides = [1, 1]} : vector<16x32xbf16> to vector<8x8xbf16>
    %cst_215 = arith.constant dense<0.000000e+00> : vector<8x8xf32>
    %520 = tpu.matmul %517, %518, %cst_215 {dimension_numbers = #tpu.dot_dimension_numbers<[1], [1], [0], [0], [0, 0, 1, 0], [], []>} : vector<8x8xbf16>, vector<8x8xbf16>, vector<8x8xf32> -> vector<8x8xf32>
    %cst_216 = arith.constant dense<0xFF800000> : vector<8xf32>
    %521 = vector.multi_reduction <maximumf>, %520, %cst_216 [1] : vector<8x8xf32> to vector<8xf32>
    %522 = vector.shape_cast %521 : vector<8xf32> to vector<8x1xf32>
    %523 = vector.broadcast %522 : vector<8x1xf32> to vector<8x8xf32>
    %524 = arith.subf %520, %523 : vector<8x8xf32>
    %525 = math.exp %524 : vector<8x8xf32>
    %cst_217 = arith.constant dense<0.000000e+00> : vector<8xf32>
    %526 = vector.multi_reduction <add>, %525, %cst_217 [1] : vector<8x8xf32> to vector<8xf32>
    %527 = vector.shape_cast %526 : vector<8xf32> to vector<8x1xf32>
    %528 = tpu.reciprocal %527 {approx = true} : vector<8x1xf32> -> vector<8x1xf32>
    %529 = vector.broadcast %528 : vector<8x1xf32> to vector<8x8xf32>
    %530 = arith.mulf %525, %529 : vector<8x8xf32>
    %531 = arith.truncf %530 : vector<8x8xf32> to vector<8x8xbf16>
    %cst_218 = arith.constant dense<0.000000e+00> : vector<8x8xf32>
    %532 = tpu.matmul %531, %519, %cst_218 {dimension_numbers = #tpu.dot_dimension_numbers<[1], [0], [0], [1], [0, 0, 1, 1], [], []>} : vector<8x8xbf16>, vector<8x8xbf16>, vector<8x8xf32> -> vector<8x8xf32>
    %c8_219 = arith.constant 8 : index
    %c0_220 = arith.constant 0 : index
    %533 = vector.load %arg22[%c8_219, %c0_220] : memref<16x32xf32, #tpu.memory_space<vmem>>, vector<8x8xf32>
    tpu.vector_store %arg22[%c8_219, %c0_220], %532 {strides = array<i32>} : memref<16x32xf32, #tpu.memory_space<vmem>>, vector<8x8xf32>,
    %534 = vector.extract_strided_slice %446 {offsets = [8, 8], sizes = [8, 8], strides = [1, 1]} : vector<16x32xbf16> to vector<8x8xbf16>
    %535 = vector.extract_strided_slice %447 {offsets = [8, 8], sizes = [8, 8], strides = [1, 1]} : vector<16x32xbf16> to vector<8x8xbf16>
    %536 = vector.extract_strided_slice %448 {offsets = [8, 8], sizes = [8, 8], strides = [1, 1]} : vector<16x32xbf16> to vector<8x8xbf16>
    %cst_221 = arith.constant dense<0.000000e+00> : vector<8x8xf32>
    %537 = tpu.matmul %534, %535, %cst_221 {dimension_numbers = #tpu.dot_dimension_numbers<[1], [1], [0], [0], [0, 0, 1, 0], [], []>} : vector<8x8xbf16>, vector<8x8xbf16>, vector<8x8xf32> -> vector<8x8xf32>
    %cst_222 = arith.constant dense<0xFF800000> : vector<8xf32>
    %538 = vector.multi_reduction <maximumf>, %537, %cst_222 [1] : vector<8x8xf32> to vector<8xf32>
    %539 = vector.shape_cast %538 : vector<8xf32> to vector<8x1xf32>
    %540 = vector.broadcast %539 : vector<8x1xf32> to vector<8x8xf32>
    %541 = arith.subf %537, %540 : vector<8x8xf32>
    %542 = math.exp %541 : vector<8x8xf32>
    %cst_223 = arith.constant dense<0.000000e+00> : vector<8xf32>
    %543 = vector.multi_reduction <add>, %542, %cst_223 [1] : vector<8x8xf32> to vector<8xf32>
    %544 = vector.shape_cast %543 : vector<8xf32> to vector<8x1xf32>
    %545 = tpu.reciprocal %544 {approx = true} : vector<8x1xf32> -> vector<8x1xf32>
    %546 = vector.broadcast %545 : vector<8x1xf32> to vector<8x8xf32>
    %547 = arith.mulf %542, %546 : vector<8x8xf32>
    %548 = arith.truncf %547 : vector<8x8xf32> to vector<8x8xbf16>
    %cst_224 = arith.constant dense<0.000000e+00> : vector<8x8xf32>
    %549 = tpu.matmul %548, %536, %cst_224 {dimension_numbers = #tpu.dot_dimension_numbers<[1], [0], [0], [1], [0, 0, 1, 1], [], []>} : vector<8x8xbf16>, vector<8x8xbf16>, vector<8x8xf32> -> vector<8x8xf32>
    %c8_225 = arith.constant 8 : index
    %c8_226 = arith.constant 8 : index
    %550 = vector.load %arg22[%c8_225, %c8_226] : memref<16x32xf32, #tpu.memory_space<vmem>>, vector<8x8xf32>
    tpu.vector_store %arg22[%c8_225, %c8_226], %549 {strides = array<i32>} : memref<16x32xf32, #tpu.memory_space<vmem>>, vector<8x8xf32>,
    %551 = vector.extract_strided_slice %446 {offsets = [8, 16], sizes = [8, 8], strides = [1, 1]} : vector<16x32xbf16> to vector<8x8xbf16>
    %552 = vector.extract_strided_slice %447 {offsets = [8, 16], sizes = [8, 8], strides = [1, 1]} : vector<16x32xbf16> to vector<8x8xbf16>
    %553 = vector.extract_strided_slice %448 {offsets = [8, 16], sizes = [8, 8], strides = [1, 1]} : vector<16x32xbf16> to vector<8x8xbf16>
    %cst_227 = arith.constant dense<0.000000e+00> : vector<8x8xf32>
    %554 = tpu.matmul %551, %552, %cst_227 {dimension_numbers = #tpu.dot_dimension_numbers<[1], [1], [0], [0], [0, 0, 1, 0], [], []>} : vector<8x8xbf16>, vector<8x8xbf16>, vector<8x8xf32> -> vector<8x8xf32>
    %cst_228 = arith.constant dense<0xFF800000> : vector<8xf32>
    %555 = vector.multi_reduction <maximumf>, %554, %cst_228 [1] : vector<8x8xf32> to vector<8xf32>
    %556 = vector.shape_cast %555 : vector<8xf32> to vector<8x1xf32>
    %557 = vector.broadcast %556 : vector<8x1xf32> to vector<8x8xf32>
    %558 = arith.subf %554, %557 : vector<8x8xf32>
    %559 = math.exp %558 : vector<8x8xf32>
    %cst_229 = arith.constant dense<0.000000e+00> : vector<8xf32>
    %560 = vector.multi_reduction <add>, %559, %cst_229 [1] : vector<8x8xf32> to vector<8xf32>
    %561 = vector.shape_cast %560 : vector<8xf32> to vector<8x1xf32>
    %562 = tpu.reciprocal %561 {approx = true} : vector<8x1xf32> -> vector<8x1xf32>
    %563 = vector.broadcast %562 : vector<8x1xf32> to vector<8x8xf32>
    %564 = arith.mulf %559, %563 : vector<8x8xf32>
    %565 = arith.truncf %564 : vector<8x8xf32> to vector<8x8xbf16>
    %cst_230 = arith.constant dense<0.000000e+00> : vector<8x8xf32>
    %566 = tpu.matmul %565, %553, %cst_230 {dimension_numbers = #tpu.dot_dimension_numbers<[1], [0], [0], [1], [0, 0, 1, 1], [], []>} : vector<8x8xbf16>, vector<8x8xbf16>, vector<8x8xf32> -> vector<8x8xf32>
    %c8_231 = arith.constant 8 : index
    %c16_232 = arith.constant 16 : index
    %567 = vector.load %arg22[%c8_231, %c16_232] : memref<16x32xf32, #tpu.memory_space<vmem>>, vector<8x8xf32>
    tpu.vector_store %arg22[%c8_231, %c16_232], %566 {strides = array<i32>} : memref<16x32xf32, #tpu.memory_space<vmem>>, vector<8x8xf32>,
    %568 = vector.extract_strided_slice %446 {offsets = [8, 24], sizes = [8, 8], strides = [1, 1]} : vector<16x32xbf16> to vector<8x8xbf16>
    %569 = vector.extract_strided_slice %447 {offsets = [8, 24], sizes = [8, 8], strides = [1, 1]} : vector<16x32xbf16> to vector<8x8xbf16>
    %570 = vector.extract_strided_slice %448 {offsets = [8, 24], sizes = [8, 8], strides = [1, 1]} : vector<16x32xbf16> to vector<8x8xbf16>
    %cst_233 = arith.constant dense<0.000000e+00> : vector<8x8xf32>
    %571 = tpu.matmul %568, %569, %cst_233 {dimension_numbers = #tpu.dot_dimension_numbers<[1], [1], [0], [0], [0, 0, 1, 0], [], []>} : vector<8x8xbf16>, vector<8x8xbf16>, vector<8x8xf32> -> vector<8x8xf32>
    %cst_234 = arith.constant dense<0xFF800000> : vector<8xf32>
    %572 = vector.multi_reduction <maximumf>, %571, %cst_234 [1] : vector<8x8xf32> to vector<8xf32>
    %573 = vector.shape_cast %572 : vector<8xf32> to vector<8x1xf32>
    %574 = vector.broadcast %573 : vector<8x1xf32> to vector<8x8xf32>
    %575 = arith.subf %571, %574 : vector<8x8xf32>
    %576 = math.exp %575 : vector<8x8xf32>
    %cst_235 = arith.constant dense<0.000000e+00> : vector<8xf32>
    %577 = vector.multi_reduction <add>, %576, %cst_235 [1] : vector<8x8xf32> to vector<8xf32>
    %578 = vector.shape_cast %577 : vector<8xf32> to vector<8x1xf32>
    %579 = tpu.reciprocal %578 {approx = true} : vector<8x1xf32> -> vector<8x1xf32>
    %580 = vector.broadcast %579 : vector<8x1xf32> to vector<8x8xf32>
    %581 = arith.mulf %576, %580 : vector<8x8xf32>
    %582 = arith.truncf %581 : vector<8x8xf32> to vector<8x8xbf16>
    %cst_236 = arith.constant dense<0.000000e+00> : vector<8x8xf32>
    %583 = tpu.matmul %582, %570, %cst_236 {dimension_numbers = #tpu.dot_dimension_numbers<[1], [0], [0], [1], [0, 0, 1, 1], [], []>} : vector<8x8xbf16>, vector<8x8xbf16>, vector<8x8xf32> -> vector<8x8xf32>
    %c8_237 = arith.constant 8 : index
    %c24_238 = arith.constant 24 : index
    %584 = vector.load %arg22[%c8_237, %c24_238] : memref<16x32xf32, #tpu.memory_space<vmem>>, vector<8x8xf32>
    tpu.vector_store %arg22[%c8_237, %c24_238], %583 {strides = array<i32>} : memref<16x32xf32, #tpu.memory_space<vmem>>, vector<8x8xf32>,
    %c0_239 = arith.constant 0 : index
    %c0_240 = arith.constant 0 : index
    %585 = vector.load %arg22[%c0_239, %c0_240] : memref<16x32xf32, #tpu.memory_space<vmem>>, vector<16x32xf32>
    %586 = arith.truncf %585 : vector<16x32xf32> to vector<16x32xbf16>
    %cst_241 = arith.constant dense<0.000000e+00> : vector<16x32xf32>
    %587 = tpu.matmul %586, %435, %cst_241 {dimension_numbers = #tpu.dot_dimension_numbers<[1], [0], [0], [1], [0, 0, 1, 1], [], []>} : vector<16x32xbf16>, vector<32x32xbf16>, vector<16x32xf32> -> vector<16x32xf32>
    %588 = vector.broadcast %437 : vector<1x32xf32> to vector<16x32xf32>
    %589 = arith.addf %587, %588 : vector<16x32xf32>
    %590 = arith.addf %428, %589 : vector<16x32xf32>
    %c1_242 = arith.constant 1 : index
    %c0_243 = arith.constant 0 : index
    %c0_244 = arith.constant 0 : index
    %591 = vector.load %arg7[%c1_242, %c0_243, %c0_244] : memref<2x1x32xf32, #tpu.memory_space<vmem>>, vector<1x1x32xf32>
    %592 = vector.shape_cast %591 : vector<1x1x32xf32> to vector<1x32xf32>
    %c1_245 = arith.constant 1 : index
    %c0_246 = arith.constant 0 : index
    %c0_247 = arith.constant 0 : index
    %593 = vector.load %arg8[%c1_245, %c0_246, %c0_247] : memref<2x1x32xf32, #tpu.memory_space<vmem>>, vector<1x1x32xf32>
    %594 = vector.shape_cast %593 : vector<1x1x32xf32> to vector<1x32xf32>
    %cst_248 = arith.constant dense<0.000000e+00> : vector<16xf32>
    %595 = vector.multi_reduction <add>, %590, %cst_248 [1] : vector<16x32xf32> to vector<16xf32>
    %596 = vector.shape_cast %595 : vector<16xf32> to vector<16x1xf32>
    %cst_249 = arith.constant 3.200000e+01 : f32
    %597 = vector.broadcast %cst_249 : f32 to vector<16x1xf32>
    %598 = arith.divf %596, %597 : vector<16x1xf32>
    %599 = vector.broadcast %598 : vector<16x1xf32> to vector<16x32xf32>
    %600 = arith.subf %590, %599 : vector<16x32xf32>
    %601 = arith.mulf %600, %600 : vector<16x32xf32>
    %cst_250 = arith.constant dense<0.000000e+00> : vector<16xf32>
    %602 = vector.multi_reduction <add>, %601, %cst_250 [1] : vector<16x32xf32> to vector<16xf32>
    %603 = vector.shape_cast %602 : vector<16xf32> to vector<16x1xf32>
    %cst_251 = arith.constant 3.200000e+01 : f32
    %604 = vector.broadcast %cst_251 : f32 to vector<16x1xf32>
    %605 = arith.divf %603, %604 : vector<16x1xf32>
    %606 = vector.broadcast %598 : vector<16x1xf32> to vector<16x32xf32>
    %607 = arith.subf %590, %606 : vector<16x32xf32>
    %cst_252 = arith.constant 9.99999974E-6 : f32
    %608 = vector.broadcast %cst_252 : f32 to vector<16x1xf32>
    %609 = arith.addf %605, %608 : vector<16x1xf32>
    %610 = math.rsqrt %609 : vector<16x1xf32>
    %611 = vector.broadcast %610 : vector<16x1xf32> to vector<16x32xf32>
    %612 = arith.mulf %607, %611 : vector<16x32xf32>
    %613 = vector.broadcast %592 : vector<1x32xf32> to vector<16x32xf32>
    %614 = arith.mulf %612, %613 : vector<16x32xf32>
    %615 = vector.broadcast %594 : vector<1x32xf32> to vector<16x32xf32>
    %616 = arith.addf %614, %615 : vector<16x32xf32>
    %617 = arith.truncf %616 : vector<16x32xf32> to vector<16x32xbf16>
    %c1_253 = arith.constant 1 : index
    %c0_254 = arith.constant 0 : index
    %c0_255 = arith.constant 0 : index
    %618 = vector.load %arg9[%c1_253, %c0_254, %c0_255] : memref<2x32x96xbf16, #tpu.memory_space<vmem>>, vector<1x32x96xbf16>
    %619 = vector.shape_cast %618 : vector<1x32x96xbf16> to vector<32x96xbf16>
    %c1_256 = arith.constant 1 : index
    %c0_257 = arith.constant 0 : index
    %c0_258 = arith.constant 0 : index
    %620 = vector.load %arg10[%c1_256, %c0_257, %c0_258] : memref<2x1x96xf32, #tpu.memory_space<vmem>>, vector<1x1x96xf32>
    %621 = vector.shape_cast %620 : vector<1x1x96xf32> to vector<1x96xf32>
    %c1_259 = arith.constant 1 : index
    %c0_260 = arith.constant 0 : index
    %c0_261 = arith.constant 0 : index
    %622 = vector.load %arg11[%c1_259, %c0_260, %c0_261] : memref<2x32x32xbf16, #tpu.memory_space<vmem>>, vector<1x32x32xbf16>
    %623 = vector.shape_cast %622 : vector<1x32x32xbf16> to vector<32x32xbf16>
    %c1_262 = arith.constant 1 : index
    %c0_263 = arith.constant 0 : index
    %c0_264 = arith.constant 0 : index
    %624 = vector.load %arg12[%c1_262, %c0_263, %c0_264] : memref<2x1x32xf32, #tpu.memory_space<vmem>>, vector<1x1x32xf32>
    %625 = vector.shape_cast %624 : vector<1x1x32xf32> to vector<1x32xf32>
    %626 = vector.extract_strided_slice %619 {offsets = [0, 0], sizes = [32, 32], strides = [1, 1]} : vector<32x96xbf16> to vector<32x32xbf16>
    %cst_265 = arith.constant dense<0.000000e+00> : vector<16x32xf32>
    %627 = tpu.matmul %617, %626, %cst_265 {dimension_numbers = #tpu.dot_dimension_numbers<[1], [0], [0], [1], [0, 0, 1, 1], [], []>} : vector<16x32xbf16>, vector<32x32xbf16>, vector<16x32xf32> -> vector<16x32xf32>
    %628 = vector.extract_strided_slice %621 {offsets = [0, 0], sizes = [1, 32], strides = [1, 1]} : vector<1x96xf32> to vector<1x32xf32>
    %629 = vector.broadcast %628 : vector<1x32xf32> to vector<16x32xf32>
    %630 = arith.addf %627, %629 : vector<16x32xf32>
    %631 = vector.extract_strided_slice %619 {offsets = [0, 32], sizes = [32, 64], strides = [1, 1]} : vector<32x96xbf16> to vector<32x64xbf16>
    %cst_266 = arith.constant dense<0.000000e+00> : vector<16x64xf32>
    %632 = tpu.matmul %1, %631, %cst_266 {dimension_numbers = #tpu.dot_dimension_numbers<[1], [0], [0], [1], [0, 0, 1, 1], [], []>} : vector<16x32xbf16>, vector<32x64xbf16>, vector<16x64xf32> -> vector<16x64xf32>
    %633 = vector.extract_strided_slice %621 {offsets = [0, 32], sizes = [1, 64], strides = [1, 1]} : vector<1x96xf32> to vector<1x64xf32>
    %634 = vector.broadcast %633 : vector<1x64xf32> to vector<16x64xf32>
    %635 = arith.addf %632, %634 : vector<16x64xf32>
    %636 = vector.extract_strided_slice %635 {offsets = [0, 0], sizes = [16, 32], strides = [1, 1]} : vector<16x64xf32> to vector<16x32xf32>
    %637 = vector.extract_strided_slice %635 {offsets = [0, 32], sizes = [16, 32], strides = [1, 1]} : vector<16x64xf32> to vector<16x32xf32>
    %cst_267 = arith.constant 0.353553385 : f32
    %638 = vector.broadcast %cst_267 : f32 to vector<16x32xf32>
    %639 = arith.mulf %630, %638 : vector<16x32xf32>
    %640 = arith.truncf %639 : vector<16x32xf32> to vector<16x32xbf16>
    %641 = arith.truncf %636 : vector<16x32xf32> to vector<16x32xbf16>
    %642 = arith.truncf %637 : vector<16x32xf32> to vector<16x32xbf16>
    %643 = vector.extract_strided_slice %640 {offsets = [0, 0], sizes = [8, 8], strides = [1, 1]} : vector<16x32xbf16> to vector<8x8xbf16>
    %644 = vector.extract_strided_slice %641 {offsets = [0, 0], sizes = [8, 8], strides = [1, 1]} : vector<16x32xbf16> to vector<8x8xbf16>
    %645 = vector.extract_strided_slice %642 {offsets = [0, 0], sizes = [8, 8], strides = [1, 1]} : vector<16x32xbf16> to vector<8x8xbf16>
    %cst_268 = arith.constant dense<0.000000e+00> : vector<8x8xf32>
    %646 = tpu.matmul %643, %644, %cst_268 {dimension_numbers = #tpu.dot_dimension_numbers<[1], [1], [0], [0], [0, 0, 1, 0], [], []>} : vector<8x8xbf16>, vector<8x8xbf16>, vector<8x8xf32> -> vector<8x8xf32>
    %cst_269 = arith.constant dense<0xFF800000> : vector<8xf32>
    %647 = vector.multi_reduction <maximumf>, %646, %cst_269 [1] : vector<8x8xf32> to vector<8xf32>
    %648 = vector.shape_cast %647 : vector<8xf32> to vector<8x1xf32>
    %649 = vector.broadcast %648 : vector<8x1xf32> to vector<8x8xf32>
    %650 = arith.subf %646, %649 : vector<8x8xf32>
    %651 = math.exp %650 : vector<8x8xf32>
    %cst_270 = arith.constant dense<0.000000e+00> : vector<8xf32>
    %652 = vector.multi_reduction <add>, %651, %cst_270 [1] : vector<8x8xf32> to vector<8xf32>
    %653 = vector.shape_cast %652 : vector<8xf32> to vector<8x1xf32>
    %654 = tpu.reciprocal %653 {approx = true} : vector<8x1xf32> -> vector<8x1xf32>
    %655 = vector.broadcast %654 : vector<8x1xf32> to vector<8x8xf32>
    %656 = arith.mulf %651, %655 : vector<8x8xf32>
    %657 = arith.truncf %656 : vector<8x8xf32> to vector<8x8xbf16>
    %cst_271 = arith.constant dense<0.000000e+00> : vector<8x8xf32>
    %658 = tpu.matmul %657, %645, %cst_271 {dimension_numbers = #tpu.dot_dimension_numbers<[1], [0], [0], [1], [0, 0, 1, 1], [], []>} : vector<8x8xbf16>, vector<8x8xbf16>, vector<8x8xf32> -> vector<8x8xf32>
    %c0_272 = arith.constant 0 : index
    %c0_273 = arith.constant 0 : index
    %659 = vector.load %arg22[%c0_272, %c0_273] : memref<16x32xf32, #tpu.memory_space<vmem>>, vector<8x8xf32>
    tpu.vector_store %arg22[%c0_272, %c0_273], %658 {strides = array<i32>} : memref<16x32xf32, #tpu.memory_space<vmem>>, vector<8x8xf32>,
    %660 = vector.extract_strided_slice %640 {offsets = [0, 8], sizes = [8, 8], strides = [1, 1]} : vector<16x32xbf16> to vector<8x8xbf16>
    %661 = vector.extract_strided_slice %641 {offsets = [0, 8], sizes = [8, 8], strides = [1, 1]} : vector<16x32xbf16> to vector<8x8xbf16>
    %662 = vector.extract_strided_slice %642 {offsets = [0, 8], sizes = [8, 8], strides = [1, 1]} : vector<16x32xbf16> to vector<8x8xbf16>
    %cst_274 = arith.constant dense<0.000000e+00> : vector<8x8xf32>
    %663 = tpu.matmul %660, %661, %cst_274 {dimension_numbers = #tpu.dot_dimension_numbers<[1], [1], [0], [0], [0, 0, 1, 0], [], []>} : vector<8x8xbf16>, vector<8x8xbf16>, vector<8x8xf32> -> vector<8x8xf32>
    %cst_275 = arith.constant dense<0xFF800000> : vector<8xf32>
    %664 = vector.multi_reduction <maximumf>, %663, %cst_275 [1] : vector<8x8xf32> to vector<8xf32>
    %665 = vector.shape_cast %664 : vector<8xf32> to vector<8x1xf32>
    %666 = vector.broadcast %665 : vector<8x1xf32> to vector<8x8xf32>
    %667 = arith.subf %663, %666 : vector<8x8xf32>
    %668 = math.exp %667 : vector<8x8xf32>
    %cst_276 = arith.constant dense<0.000000e+00> : vector<8xf32>
    %669 = vector.multi_reduction <add>, %668, %cst_276 [1] : vector<8x8xf32> to vector<8xf32>
    %670 = vector.shape_cast %669 : vector<8xf32> to vector<8x1xf32>
    %671 = tpu.reciprocal %670 {approx = true} : vector<8x1xf32> -> vector<8x1xf32>
    %672 = vector.broadcast %671 : vector<8x1xf32> to vector<8x8xf32>
    %673 = arith.mulf %668, %672 : vector<8x8xf32>
    %674 = arith.truncf %673 : vector<8x8xf32> to vector<8x8xbf16>
    %cst_277 = arith.constant dense<0.000000e+00> : vector<8x8xf32>
    %675 = tpu.matmul %674, %662, %cst_277 {dimension_numbers = #tpu.dot_dimension_numbers<[1], [0], [0], [1], [0, 0, 1, 1], [], []>} : vector<8x8xbf16>, vector<8x8xbf16>, vector<8x8xf32> -> vector<8x8xf32>
    %c0_278 = arith.constant 0 : index
    %c8_279 = arith.constant 8 : index
    %676 = vector.load %arg22[%c0_278, %c8_279] : memref<16x32xf32, #tpu.memory_space<vmem>>, vector<8x8xf32>
    tpu.vector_store %arg22[%c0_278, %c8_279], %675 {strides = array<i32>} : memref<16x32xf32, #tpu.memory_space<vmem>>, vector<8x8xf32>,
    %677 = vector.extract_strided_slice %640 {offsets = [0, 16], sizes = [8, 8], strides = [1, 1]} : vector<16x32xbf16> to vector<8x8xbf16>
    %678 = vector.extract_strided_slice %641 {offsets = [0, 16], sizes = [8, 8], strides = [1, 1]} : vector<16x32xbf16> to vector<8x8xbf16>
    %679 = vector.extract_strided_slice %642 {offsets = [0, 16], sizes = [8, 8], strides = [1, 1]} : vector<16x32xbf16> to vector<8x8xbf16>
    %cst_280 = arith.constant dense<0.000000e+00> : vector<8x8xf32>
    %680 = tpu.matmul %677, %678, %cst_280 {dimension_numbers = #tpu.dot_dimension_numbers<[1], [1], [0], [0], [0, 0, 1, 0], [], []>} : vector<8x8xbf16>, vector<8x8xbf16>, vector<8x8xf32> -> vector<8x8xf32>
    %cst_281 = arith.constant dense<0xFF800000> : vector<8xf32>
    %681 = vector.multi_reduction <maximumf>, %680, %cst_281 [1] : vector<8x8xf32> to vector<8xf32>
    %682 = vector.shape_cast %681 : vector<8xf32> to vector<8x1xf32>
    %683 = vector.broadcast %682 : vector<8x1xf32> to vector<8x8xf32>
    %684 = arith.subf %680, %683 : vector<8x8xf32>
    %685 = math.exp %684 : vector<8x8xf32>
    %cst_282 = arith.constant dense<0.000000e+00> : vector<8xf32>
    %686 = vector.multi_reduction <add>, %685, %cst_282 [1] : vector<8x8xf32> to vector<8xf32>
    %687 = vector.shape_cast %686 : vector<8xf32> to vector<8x1xf32>
    %688 = tpu.reciprocal %687 {approx = true} : vector<8x1xf32> -> vector<8x1xf32>
    %689 = vector.broadcast %688 : vector<8x1xf32> to vector<8x8xf32>
    %690 = arith.mulf %685, %689 : vector<8x8xf32>
    %691 = arith.truncf %690 : vector<8x8xf32> to vector<8x8xbf16>
    %cst_283 = arith.constant dense<0.000000e+00> : vector<8x8xf32>
    %692 = tpu.matmul %691, %679, %cst_283 {dimension_numbers = #tpu.dot_dimension_numbers<[1], [0], [0], [1], [0, 0, 1, 1], [], []>} : vector<8x8xbf16>, vector<8x8xbf16>, vector<8x8xf32> -> vector<8x8xf32>
    %c0_284 = arith.constant 0 : index
    %c16_285 = arith.constant 16 : index
    %693 = vector.load %arg22[%c0_284, %c16_285] : memref<16x32xf32, #tpu.memory_space<vmem>>, vector<8x8xf32>
    tpu.vector_store %arg22[%c0_284, %c16_285], %692 {strides = array<i32>} : memref<16x32xf32, #tpu.memory_space<vmem>>, vector<8x8xf32>,
    %694 = vector.extract_strided_slice %640 {offsets = [0, 24], sizes = [8, 8], strides = [1, 1]} : vector<16x32xbf16> to vector<8x8xbf16>
    %695 = vector.extract_strided_slice %641 {offsets = [0, 24], sizes = [8, 8], strides = [1, 1]} : vector<16x32xbf16> to vector<8x8xbf16>
    %696 = vector.extract_strided_slice %642 {offsets = [0, 24], sizes = [8, 8], strides = [1, 1]} : vector<16x32xbf16> to vector<8x8xbf16>
    %cst_286 = arith.constant dense<0.000000e+00> : vector<8x8xf32>
    %697 = tpu.matmul %694, %695, %cst_286 {dimension_numbers = #tpu.dot_dimension_numbers<[1], [1], [0], [0], [0, 0, 1, 0], [], []>} : vector<8x8xbf16>, vector<8x8xbf16>, vector<8x8xf32> -> vector<8x8xf32>
    %cst_287 = arith.constant dense<0xFF800000> : vector<8xf32>
    %698 = vector.multi_reduction <maximumf>, %697, %cst_287 [1] : vector<8x8xf32> to vector<8xf32>
    %699 = vector.shape_cast %698 : vector<8xf32> to vector<8x1xf32>
    %700 = vector.broadcast %699 : vector<8x1xf32> to vector<8x8xf32>
    %701 = arith.subf %697, %700 : vector<8x8xf32>
    %702 = math.exp %701 : vector<8x8xf32>
    %cst_288 = arith.constant dense<0.000000e+00> : vector<8xf32>
    %703 = vector.multi_reduction <add>, %702, %cst_288 [1] : vector<8x8xf32> to vector<8xf32>
    %704 = vector.shape_cast %703 : vector<8xf32> to vector<8x1xf32>
    %705 = tpu.reciprocal %704 {approx = true} : vector<8x1xf32> -> vector<8x1xf32>
    %706 = vector.broadcast %705 : vector<8x1xf32> to vector<8x8xf32>
    %707 = arith.mulf %702, %706 : vector<8x8xf32>
    %708 = arith.truncf %707 : vector<8x8xf32> to vector<8x8xbf16>
    %cst_289 = arith.constant dense<0.000000e+00> : vector<8x8xf32>
    %709 = tpu.matmul %708, %696, %cst_289 {dimension_numbers = #tpu.dot_dimension_numbers<[1], [0], [0], [1], [0, 0, 1, 1], [], []>} : vector<8x8xbf16>, vector<8x8xbf16>, vector<8x8xf32> -> vector<8x8xf32>
    %c0_290 = arith.constant 0 : index
    %c24_291 = arith.constant 24 : index
    %710 = vector.load %arg22[%c0_290, %c24_291] : memref<16x32xf32, #tpu.memory_space<vmem>>, vector<8x8xf32>
    tpu.vector_store %arg22[%c0_290, %c24_291], %709 {strides = array<i32>} : memref<16x32xf32, #tpu.memory_space<vmem>>, vector<8x8xf32>,
    %711 = vector.extract_strided_slice %640 {offsets = [8, 0], sizes = [8, 8], strides = [1, 1]} : vector<16x32xbf16> to vector<8x8xbf16>
    %712 = vector.extract_strided_slice %641 {offsets = [8, 0], sizes = [8, 8], strides = [1, 1]} : vector<16x32xbf16> to vector<8x8xbf16>
    %713 = vector.extract_strided_slice %642 {offsets = [8, 0], sizes = [8, 8], strides = [1, 1]} : vector<16x32xbf16> to vector<8x8xbf16>
    %cst_292 = arith.constant dense<0.000000e+00> : vector<8x8xf32>
    %714 = tpu.matmul %711, %712, %cst_292 {dimension_numbers = #tpu.dot_dimension_numbers<[1], [1], [0], [0], [0, 0, 1, 0], [], []>} : vector<8x8xbf16>, vector<8x8xbf16>, vector<8x8xf32> -> vector<8x8xf32>
    %cst_293 = arith.constant dense<0xFF800000> : vector<8xf32>
    %715 = vector.multi_reduction <maximumf>, %714, %cst_293 [1] : vector<8x8xf32> to vector<8xf32>
    %716 = vector.shape_cast %715 : vector<8xf32> to vector<8x1xf32>
    %717 = vector.broadcast %716 : vector<8x1xf32> to vector<8x8xf32>
    %718 = arith.subf %714, %717 : vector<8x8xf32>
    %719 = math.exp %718 : vector<8x8xf32>
    %cst_294 = arith.constant dense<0.000000e+00> : vector<8xf32>
    %720 = vector.multi_reduction <add>, %719, %cst_294 [1] : vector<8x8xf32> to vector<8xf32>
    %721 = vector.shape_cast %720 : vector<8xf32> to vector<8x1xf32>
    %722 = tpu.reciprocal %721 {approx = true} : vector<8x1xf32> -> vector<8x1xf32>
    %723 = vector.broadcast %722 : vector<8x1xf32> to vector<8x8xf32>
    %724 = arith.mulf %719, %723 : vector<8x8xf32>
    %725 = arith.truncf %724 : vector<8x8xf32> to vector<8x8xbf16>
    %cst_295 = arith.constant dense<0.000000e+00> : vector<8x8xf32>
    %726 = tpu.matmul %725, %713, %cst_295 {dimension_numbers = #tpu.dot_dimension_numbers<[1], [0], [0], [1], [0, 0, 1, 1], [], []>} : vector<8x8xbf16>, vector<8x8xbf16>, vector<8x8xf32> -> vector<8x8xf32>
    %c8_296 = arith.constant 8 : index
    %c0_297 = arith.constant 0 : index
    %727 = vector.load %arg22[%c8_296, %c0_297] : memref<16x32xf32, #tpu.memory_space<vmem>>, vector<8x8xf32>
    tpu.vector_store %arg22[%c8_296, %c0_297], %726 {strides = array<i32>} : memref<16x32xf32, #tpu.memory_space<vmem>>, vector<8x8xf32>,
    %728 = vector.extract_strided_slice %640 {offsets = [8, 8], sizes = [8, 8], strides = [1, 1]} : vector<16x32xbf16> to vector<8x8xbf16>
    %729 = vector.extract_strided_slice %641 {offsets = [8, 8], sizes = [8, 8], strides = [1, 1]} : vector<16x32xbf16> to vector<8x8xbf16>
    %730 = vector.extract_strided_slice %642 {offsets = [8, 8], sizes = [8, 8], strides = [1, 1]} : vector<16x32xbf16> to vector<8x8xbf16>
    %cst_298 = arith.constant dense<0.000000e+00> : vector<8x8xf32>
    %731 = tpu.matmul %728, %729, %cst_298 {dimension_numbers = #tpu.dot_dimension_numbers<[1], [1], [0], [0], [0, 0, 1, 0], [], []>} : vector<8x8xbf16>, vector<8x8xbf16>, vector<8x8xf32> -> vector<8x8xf32>
    %cst_299 = arith.constant dense<0xFF800000> : vector<8xf32>
    %732 = vector.multi_reduction <maximumf>, %731, %cst_299 [1] : vector<8x8xf32> to vector<8xf32>
    %733 = vector.shape_cast %732 : vector<8xf32> to vector<8x1xf32>
    %734 = vector.broadcast %733 : vector<8x1xf32> to vector<8x8xf32>
    %735 = arith.subf %731, %734 : vector<8x8xf32>
    %736 = math.exp %735 : vector<8x8xf32>
    %cst_300 = arith.constant dense<0.000000e+00> : vector<8xf32>
    %737 = vector.multi_reduction <add>, %736, %cst_300 [1] : vector<8x8xf32> to vector<8xf32>
    %738 = vector.shape_cast %737 : vector<8xf32> to vector<8x1xf32>
    %739 = tpu.reciprocal %738 {approx = true} : vector<8x1xf32> -> vector<8x1xf32>
    %740 = vector.broadcast %739 : vector<8x1xf32> to vector<8x8xf32>
    %741 = arith.mulf %736, %740 : vector<8x8xf32>
    %742 = arith.truncf %741 : vector<8x8xf32> to vector<8x8xbf16>
    %cst_301 = arith.constant dense<0.000000e+00> : vector<8x8xf32>
    %743 = tpu.matmul %742, %730, %cst_301 {dimension_numbers = #tpu.dot_dimension_numbers<[1], [0], [0], [1], [0, 0, 1, 1], [], []>} : vector<8x8xbf16>, vector<8x8xbf16>, vector<8x8xf32> -> vector<8x8xf32>
    %c8_302 = arith.constant 8 : index
    %c8_303 = arith.constant 8 : index
    %744 = vector.load %arg22[%c8_302, %c8_303] : memref<16x32xf32, #tpu.memory_space<vmem>>, vector<8x8xf32>
    tpu.vector_store %arg22[%c8_302, %c8_303], %743 {strides = array<i32>} : memref<16x32xf32, #tpu.memory_space<vmem>>, vector<8x8xf32>,
    %745 = vector.extract_strided_slice %640 {offsets = [8, 16], sizes = [8, 8], strides = [1, 1]} : vector<16x32xbf16> to vector<8x8xbf16>
    %746 = vector.extract_strided_slice %641 {offsets = [8, 16], sizes = [8, 8], strides = [1, 1]} : vector<16x32xbf16> to vector<8x8xbf16>
    %747 = vector.extract_strided_slice %642 {offsets = [8, 16], sizes = [8, 8], strides = [1, 1]} : vector<16x32xbf16> to vector<8x8xbf16>
    %cst_304 = arith.constant dense<0.000000e+00> : vector<8x8xf32>
    %748 = tpu.matmul %745, %746, %cst_304 {dimension_numbers = #tpu.dot_dimension_numbers<[1], [1], [0], [0], [0, 0, 1, 0], [], []>} : vector<8x8xbf16>, vector<8x8xbf16>, vector<8x8xf32> -> vector<8x8xf32>
    %cst_305 = arith.constant dense<0xFF800000> : vector<8xf32>
    %749 = vector.multi_reduction <maximumf>, %748, %cst_305 [1] : vector<8x8xf32> to vector<8xf32>
    %750 = vector.shape_cast %749 : vector<8xf32> to vector<8x1xf32>
    %751 = vector.broadcast %750 : vector<8x1xf32> to vector<8x8xf32>
    %752 = arith.subf %748, %751 : vector<8x8xf32>
    %753 = math.exp %752 : vector<8x8xf32>
    %cst_306 = arith.constant dense<0.000000e+00> : vector<8xf32>
    %754 = vector.multi_reduction <add>, %753, %cst_306 [1] : vector<8x8xf32> to vector<8xf32>
    %755 = vector.shape_cast %754 : vector<8xf32> to vector<8x1xf32>
    %756 = tpu.reciprocal %755 {approx = true} : vector<8x1xf32> -> vector<8x1xf32>
    %757 = vector.broadcast %756 : vector<8x1xf32> to vector<8x8xf32>
    %758 = arith.mulf %753, %757 : vector<8x8xf32>
    %759 = arith.truncf %758 : vector<8x8xf32> to vector<8x8xbf16>
    %cst_307 = arith.constant dense<0.000000e+00> : vector<8x8xf32>
    %760 = tpu.matmul %759, %747, %cst_307 {dimension_numbers = #tpu.dot_dimension_numbers<[1], [0], [0], [1], [0, 0, 1, 1], [], []>} : vector<8x8xbf16>, vector<8x8xbf16>, vector<8x8xf32> -> vector<8x8xf32>
    %c8_308 = arith.constant 8 : index
    %c16_309 = arith.constant 16 : index
    %761 = vector.load %arg22[%c8_308, %c16_309] : memref<16x32xf32, #tpu.memory_space<vmem>>, vector<8x8xf32>
    tpu.vector_store %arg22[%c8_308, %c16_309], %760 {strides = array<i32>} : memref<16x32xf32, #tpu.memory_space<vmem>>, vector<8x8xf32>,
    %762 = vector.extract_strided_slice %640 {offsets = [8, 24], sizes = [8, 8], strides = [1, 1]} : vector<16x32xbf16> to vector<8x8xbf16>
    %763 = vector.extract_strided_slice %641 {offsets = [8, 24], sizes = [8, 8], strides = [1, 1]} : vector<16x32xbf16> to vector<8x8xbf16>
    %764 = vector.extract_strided_slice %642 {offsets = [8, 24], sizes = [8, 8], strides = [1, 1]} : vector<16x32xbf16> to vector<8x8xbf16>
    %cst_310 = arith.constant dense<0.000000e+00> : vector<8x8xf32>
    %765 = tpu.matmul %762, %763, %cst_310 {dimension_numbers = #tpu.dot_dimension_numbers<[1], [1], [0], [0], [0, 0, 1, 0], [], []>} : vector<8x8xbf16>, vector<8x8xbf16>, vector<8x8xf32> -> vector<8x8xf32>
    %cst_311 = arith.constant dense<0xFF800000> : vector<8xf32>
    %766 = vector.multi_reduction <maximumf>, %765, %cst_311 [1] : vector<8x8xf32> to vector<8xf32>
    %767 = vector.shape_cast %766 : vector<8xf32> to vector<8x1xf32>
    %768 = vector.broadcast %767 : vector<8x1xf32> to vector<8x8xf32>
    %769 = arith.subf %765, %768 : vector<8x8xf32>
    %770 = math.exp %769 : vector<8x8xf32>
    %cst_312 = arith.constant dense<0.000000e+00> : vector<8xf32>
    %771 = vector.multi_reduction <add>, %770, %cst_312 [1] : vector<8x8xf32> to vector<8xf32>
    %772 = vector.shape_cast %771 : vector<8xf32> to vector<8x1xf32>
    %773 = tpu.reciprocal %772 {approx = true} : vector<8x1xf32> -> vector<8x1xf32>
    %774 = vector.broadcast %773 : vector<8x1xf32> to vector<8x8xf32>
    %775 = arith.mulf %770, %774 : vector<8x8xf32>
    %776 = arith.truncf %775 : vector<8x8xf32> to vector<8x8xbf16>
    %cst_313 = arith.constant dense<0.000000e+00> : vector<8x8xf32>
    %777 = tpu.matmul %776, %764, %cst_313 {dimension_numbers = #tpu.dot_dimension_numbers<[1], [0], [0], [1], [0, 0, 1, 1], [], []>} : vector<8x8xbf16>, vector<8x8xbf16>, vector<8x8xf32> -> vector<8x8xf32>
    %c8_314 = arith.constant 8 : index
    %c24_315 = arith.constant 24 : index
    %778 = vector.load %arg22[%c8_314, %c24_315] : memref<16x32xf32, #tpu.memory_space<vmem>>, vector<8x8xf32>
    tpu.vector_store %arg22[%c8_314, %c24_315], %777 {strides = array<i32>} : memref<16x32xf32, #tpu.memory_space<vmem>>, vector<8x8xf32>,
    %c0_316 = arith.constant 0 : index
    %c0_317 = arith.constant 0 : index
    %779 = vector.load %arg22[%c0_316, %c0_317] : memref<16x32xf32, #tpu.memory_space<vmem>>, vector<16x32xf32>
    %780 = arith.truncf %779 : vector<16x32xf32> to vector<16x32xbf16>
    %cst_318 = arith.constant dense<0.000000e+00> : vector<16x32xf32>
    %781 = tpu.matmul %780, %623, %cst_318 {dimension_numbers = #tpu.dot_dimension_numbers<[1], [0], [0], [1], [0, 0, 1, 1], [], []>} : vector<16x32xbf16>, vector<32x32xbf16>, vector<16x32xf32> -> vector<16x32xf32>
    %782 = vector.broadcast %625 : vector<1x32xf32> to vector<16x32xf32>
    %783 = arith.addf %781, %782 : vector<16x32xf32>
    %784 = arith.addf %616, %783 : vector<16x32xf32>
    %c1_319 = arith.constant 1 : index
    %c0_320 = arith.constant 0 : index
    %c0_321 = arith.constant 0 : index
    %785 = vector.load %arg13[%c1_319, %c0_320, %c0_321] : memref<2x1x32xf32, #tpu.memory_space<vmem>>, vector<1x1x32xf32>
    %786 = vector.shape_cast %785 : vector<1x1x32xf32> to vector<1x32xf32>
    %c1_322 = arith.constant 1 : index
    %c0_323 = arith.constant 0 : index
    %c0_324 = arith.constant 0 : index
    %787 = vector.load %arg14[%c1_322, %c0_323, %c0_324] : memref<2x1x32xf32, #tpu.memory_space<vmem>>, vector<1x1x32xf32>
    %788 = vector.shape_cast %787 : vector<1x1x32xf32> to vector<1x32xf32>
    %cst_325 = arith.constant dense<0.000000e+00> : vector<16xf32>
    %789 = vector.multi_reduction <add>, %784, %cst_325 [1] : vector<16x32xf32> to vector<16xf32>
    %790 = vector.shape_cast %789 : vector<16xf32> to vector<16x1xf32>
    %cst_326 = arith.constant 3.200000e+01 : f32
    %791 = vector.broadcast %cst_326 : f32 to vector<16x1xf32>
    %792 = arith.divf %790, %791 : vector<16x1xf32>
    %793 = vector.broadcast %792 : vector<16x1xf32> to vector<16x32xf32>
    %794 = arith.subf %784, %793 : vector<16x32xf32>
    %795 = arith.mulf %794, %794 : vector<16x32xf32>
    %cst_327 = arith.constant dense<0.000000e+00> : vector<16xf32>
    %796 = vector.multi_reduction <add>, %795, %cst_327 [1] : vector<16x32xf32> to vector<16xf32>
    %797 = vector.shape_cast %796 : vector<16xf32> to vector<16x1xf32>
    %cst_328 = arith.constant 3.200000e+01 : f32
    %798 = vector.broadcast %cst_328 : f32 to vector<16x1xf32>
    %799 = arith.divf %797, %798 : vector<16x1xf32>
    %800 = vector.broadcast %792 : vector<16x1xf32> to vector<16x32xf32>
    %801 = arith.subf %784, %800 : vector<16x32xf32>
    %cst_329 = arith.constant 9.99999974E-6 : f32
    %802 = vector.broadcast %cst_329 : f32 to vector<16x1xf32>
    %803 = arith.addf %799, %802 : vector<16x1xf32>
    %804 = math.rsqrt %803 : vector<16x1xf32>
    %805 = vector.broadcast %804 : vector<16x1xf32> to vector<16x32xf32>
    %806 = arith.mulf %801, %805 : vector<16x32xf32>
    %807 = vector.broadcast %786 : vector<1x32xf32> to vector<16x32xf32>
    %808 = arith.mulf %806, %807 : vector<16x32xf32>
    %809 = vector.broadcast %788 : vector<1x32xf32> to vector<16x32xf32>
    %810 = arith.addf %808, %809 : vector<16x32xf32>
    %811 = arith.truncf %810 : vector<16x32xf32> to vector<16x32xbf16>
    %c1_330 = arith.constant 1 : index
    %c0_331 = arith.constant 0 : index
    %c0_332 = arith.constant 0 : index
    %812 = vector.load %arg15[%c1_330, %c0_331, %c0_332] : memref<2x32x64xbf16, #tpu.memory_space<vmem>>, vector<1x32x64xbf16>
    %813 = vector.shape_cast %812 : vector<1x32x64xbf16> to vector<32x64xbf16>
    %c1_333 = arith.constant 1 : index
    %c0_334 = arith.constant 0 : index
    %c0_335 = arith.constant 0 : index
    %814 = vector.load %arg16[%c1_333, %c0_334, %c0_335] : memref<2x1x64xf32, #tpu.memory_space<vmem>>, vector<1x1x64xf32>
    %815 = vector.shape_cast %814 : vector<1x1x64xf32> to vector<1x64xf32>
    %c1_336 = arith.constant 1 : index
    %c0_337 = arith.constant 0 : index
    %c0_338 = arith.constant 0 : index
    %816 = vector.load %arg17[%c1_336, %c0_337, %c0_338] : memref<2x64x32xbf16, #tpu.memory_space<vmem>>, vector<1x64x32xbf16>
    %817 = vector.shape_cast %816 : vector<1x64x32xbf16> to vector<64x32xbf16>
    %c1_339 = arith.constant 1 : index
    %c0_340 = arith.constant 0 : index
    %c0_341 = arith.constant 0 : index
    %818 = vector.load %arg18[%c1_339, %c0_340, %c0_341] : memref<2x1x32xf32, #tpu.memory_space<vmem>>, vector<1x1x32xf32>
    %819 = vector.shape_cast %818 : vector<1x1x32xf32> to vector<1x32xf32>
    %c1_342 = arith.constant 1 : index
    %c0_343 = arith.constant 0 : index
    %c0_344 = arith.constant 0 : index
    %820 = vector.load %arg19[%c1_342, %c0_343, %c0_344] : memref<2x1x32xf32, #tpu.memory_space<vmem>>, vector<1x1x32xf32>
    %821 = vector.shape_cast %820 : vector<1x1x32xf32> to vector<1x32xf32>
    %c1_345 = arith.constant 1 : index
    %c0_346 = arith.constant 0 : index
    %c0_347 = arith.constant 0 : index
    %822 = vector.load %arg20[%c1_345, %c0_346, %c0_347] : memref<2x1x32xf32, #tpu.memory_space<vmem>>, vector<1x1x32xf32>
    %823 = vector.shape_cast %822 : vector<1x1x32xf32> to vector<1x32xf32>
    %cst_348 = arith.constant dense<0.000000e+00> : vector<16x64xf32>
    %824 = tpu.matmul %811, %813, %cst_348 {dimension_numbers = #tpu.dot_dimension_numbers<[1], [0], [0], [1], [0, 0, 1, 1], [], []>} : vector<16x32xbf16>, vector<32x64xbf16>, vector<16x64xf32> -> vector<16x64xf32>
    %825 = vector.broadcast %815 : vector<1x64xf32> to vector<16x64xf32>
    %826 = arith.addf %824, %825 : vector<16x64xf32>
    %cst_349 = arith.constant 0.000000e+00 : f32
    %827 = vector.broadcast %cst_349 : f32 to vector<16x64xf32>
    %828 = arith.maximumf %826, %827 : vector<16x64xf32>
    %829 = arith.truncf %828 : vector<16x64xf32> to vector<16x64xbf16>
    %cst_350 = arith.constant dense<0.000000e+00> : vector<16x32xf32>
    %830 = tpu.matmul %829, %817, %cst_350 {dimension_numbers = #tpu.dot_dimension_numbers<[1], [0], [0], [1], [0, 0, 1, 1], [], []>} : vector<16x64xbf16>, vector<64x32xbf16>, vector<16x32xf32> -> vector<16x32xf32>
    %831 = vector.broadcast %819 : vector<1x32xf32> to vector<16x32xf32>
    %832 = arith.addf %830, %831 : vector<16x32xf32>
    %833 = arith.addf %810, %832 : vector<16x32xf32>
    %cst_351 = arith.constant dense<0.000000e+00> : vector<16xf32>
    %834 = vector.multi_reduction <add>, %833, %cst_351 [1] : vector<16x32xf32> to vector<16xf32>
    %835 = vector.shape_cast %834 : vector<16xf32> to vector<16x1xf32>
    %cst_352 = arith.constant 3.200000e+01 : f32
    %836 = vector.broadcast %cst_352 : f32 to vector<16x1xf32>
    %837 = arith.divf %835, %836 : vector<16x1xf32>
    %838 = vector.broadcast %837 : vector<16x1xf32> to vector<16x32xf32>
    %839 = arith.subf %833, %838 : vector<16x32xf32>
    %840 = arith.mulf %839, %839 : vector<16x32xf32>
    %cst_353 = arith.constant dense<0.000000e+00> : vector<16xf32>
    %841 = vector.multi_reduction <add>, %840, %cst_353 [1] : vector<16x32xf32> to vector<16xf32>
    %842 = vector.shape_cast %841 : vector<16xf32> to vector<16x1xf32>
    %cst_354 = arith.constant 3.200000e+01 : f32
    %843 = vector.broadcast %cst_354 : f32 to vector<16x1xf32>
    %844 = arith.divf %842, %843 : vector<16x1xf32>
    %845 = vector.broadcast %837 : vector<16x1xf32> to vector<16x32xf32>
    %846 = arith.subf %833, %845 : vector<16x32xf32>
    %cst_355 = arith.constant 9.99999974E-6 : f32
    %847 = vector.broadcast %cst_355 : f32 to vector<16x1xf32>
    %848 = arith.addf %844, %847 : vector<16x1xf32>
    %849 = math.rsqrt %848 : vector<16x1xf32>
    %850 = vector.broadcast %849 : vector<16x1xf32> to vector<16x32xf32>
    %851 = arith.mulf %846, %850 : vector<16x32xf32>
    %852 = vector.broadcast %821 : vector<1x32xf32> to vector<16x32xf32>
    %853 = arith.mulf %851, %852 : vector<16x32xf32>
    %854 = vector.broadcast %823 : vector<1x32xf32> to vector<16x32xf32>
    %855 = arith.addf %853, %854 : vector<16x32xf32>
    %856 = arith.truncf %855 : vector<16x32xf32> to vector<16x32xbf16>
    %c0_356 = arith.constant 0 : index
    %c0_357 = arith.constant 0 : index
    %857 = vector.load %arg21[%c0_356, %c0_357] : memref<16x32xbf16, #tpu.memory_space<vmem>>, vector<16x32xbf16>
    tpu.vector_store %arg21[%c0_356, %c0_357], %856 {strides = array<i32>} : memref<16x32xbf16, #tpu.memory_space<vmem>>, vector<16x32xbf16>,
    return
  }
  func.func @transform_0(%arg0: i32) -> (i32, i32) {
    %c0_i32 = arith.constant 0 : i32
    %c0_i32_0 = arith.constant 0 : i32
    %c0_i32_1 = arith.constant 0 : i32
    return %c0_i32, %c0_i32_0 : i32, i32
  }
  func.func @transform_1(%arg0: i32) -> (i32, i32) {
    %c0_i32 = arith.constant 0 : i32
    %c0_i32_0 = arith.constant 0 : i32
    %c0_i32_1 = arith.constant 0 : i32
    return %c0_i32, %c0_i32_0 : i32, i32
  }
  func.func @transform_2(%arg0: i32) -> (i32, i32, i32) {
    %c0_i32 = arith.constant 0 : i32
    %c0_i32_0 = arith.constant 0 : i32
    %c0_i32_1 = arith.constant 0 : i32
    %c0_i32_2 = arith.constant 0 : i32
    return %c0_i32, %c0_i32_0, %c0_i32_1 : i32, i32, i32
  }
  func.func @transform_3(%arg0: i32) -> (i32, i32, i32) {
    %c0_i32 = arith.constant 0 : i32
    %c0_i32_0 = arith.constant 0 : i32
    %c0_i32_1 = arith.constant 0 : i32
    %c0_i32_2 = arith.constant 0 : i32
    return %c0_i32, %c0_i32_0, %c0_i32_1 : i32, i32, i32
  }
  func.func @transform_4(%arg0: i32) -> (i32, i32, i32) {
    %c0_i32 = arith.constant 0 : i32
    %c0_i32_0 = arith.constant 0 : i32
    %c0_i32_1 = arith.constant 0 : i32
    %c0_i32_2 = arith.constant 0 : i32
    return %c0_i32, %c0_i32_0, %c0_i32_1 : i32, i32, i32
  }
  func.func @transform_5(%arg0: i32) -> (i32, i32, i32) {
    %c0_i32 = arith.constant 0 : i32
    %c0_i32_0 = arith.constant 0 : i32
    %c0_i32_1 = arith.constant 0 : i32
    %c0_i32_2 = arith.constant 0 : i32
    return %c0_i32, %c0_i32_0, %c0_i32_1 : i32, i32, i32
  }
  func.func @transform_6(%arg0: i32) -> (i32, i32, i32) {
    %c0_i32 = arith.constant 0 : i32
    %c0_i32_0 = arith.constant 0 : i32
    %c0_i32_1 = arith.constant 0 : i32
    %c0_i32_2 = arith.constant 0 : i32
    return %c0_i32, %c0_i32_0, %c0_i32_1 : i32, i32, i32
  }
  func.func @transform_7(%arg0: i32) -> (i32, i32, i32) {
    %c0_i32 = arith.constant 0 : i32
    %c0_i32_0 = arith.constant 0 : i32
    %c0_i32_1 = arith.constant 0 : i32
    %c0_i32_2 = arith.constant 0 : i32
    return %c0_i32, %c0_i32_0, %c0_i32_1 : i32, i32, i32
  }
  func.func @transform_8(%arg0: i32) -> (i32, i32, i32) {
    %c0_i32 = arith.constant 0 : i32
    %c0_i32_0 = arith.constant 0 : i32
    %c0_i32_1 = arith.constant 0 : i32
    %c0_i32_2 = arith.constant 0 : i32
    return %c0_i32, %c0_i32_0, %c0_i32_1 : i32, i32, i32
  }
  func.func @transform_9(%arg0: i32) -> (i32, i32, i32) {
    %c0_i32 = arith.constant 0 : i32
    %c0_i32_0 = arith.constant 0 : i32
    %c0_i32_1 = arith.constant 0 : i32
    %c0_i32_2 = arith.constant 0 : i32
    return %c0_i32, %c0_i32_0, %c0_i32_1 : i32, i32, i32
  }
  func.func @transform_10(%arg0: i32) -> (i32, i32, i32) {
    %c0_i32 = arith.constant 0 : i32
    %c0_i32_0 = arith.constant 0 : i32
    %c0_i32_1 = arith.constant 0 : i32
    %c0_i32_2 = arith.constant 0 : i32
    return %c0_i32, %c0_i32_0, %c0_i32_1 : i32, i32, i32
  }
  func.func @transform_11(%arg0: i32) -> (i32, i32, i32) {
    %c0_i32 = arith.constant 0 : i32
    %c0_i32_0 = arith.constant 0 : i32
    %c0_i32_1 = arith.constant 0 : i32
    %c0_i32_2 = arith.constant 0 : i32
    return %c0_i32, %c0_i32_0, %c0_i32_1 : i32, i32, i32
  }
  func.func @transform_12(%arg0: i32) -> (i32, i32, i32) {
    %c0_i32 = arith.constant 0 : i32
    %c0_i32_0 = arith.constant 0 : i32
    %c0_i32_1 = arith.constant 0 : i32
    %c0_i32_2 = arith.constant 0 : i32
    return %c0_i32, %c0_i32_0, %c0_i32_1 : i32, i32, i32
  }
  func.func @transform_13(%arg0: i32) -> (i32, i32, i32) {
    %c0_i32 = arith.constant 0 : i32
    %c0_i32_0 = arith.constant 0 : i32
    %c0_i32_1 = arith.constant 0 : i32
    %c0_i32_2 = arith.constant 0 : i32
    return %c0_i32, %c0_i32_0, %c0_i32_1 : i32, i32, i32
  }
  func.func @transform_14(%arg0: i32) -> (i32, i32, i32) {
    %c0_i32 = arith.constant 0 : i32
    %c0_i32_0 = arith.constant 0 : i32
    %c0_i32_1 = arith.constant 0 : i32
    %c0_i32_2 = arith.constant 0 : i32
    return %c0_i32, %c0_i32_0, %c0_i32_1 : i32, i32, i32
  }
  func.func @transform_15(%arg0: i32) -> (i32, i32, i32) {
    %c0_i32 = arith.constant 0 : i32
    %c0_i32_0 = arith.constant 0 : i32
    %c0_i32_1 = arith.constant 0 : i32
    %c0_i32_2 = arith.constant 0 : i32
    return %c0_i32, %c0_i32_0, %c0_i32_1 : i32, i32, i32
  }
  func.func @transform_16(%arg0: i32) -> (i32, i32, i32) {
    %c0_i32 = arith.constant 0 : i32
    %c0_i32_0 = arith.constant 0 : i32
    %c0_i32_1 = arith.constant 0 : i32
    %c0_i32_2 = arith.constant 0 : i32
    return %c0_i32, %c0_i32_0, %c0_i32_1 : i32, i32, i32
  }
  func.func @transform_17(%arg0: i32) -> (i32, i32, i32) {
    %c0_i32 = arith.constant 0 : i32
    %c0_i32_0 = arith.constant 0 : i32
    %c0_i32_1 = arith.constant 0 : i32
    %c0_i32_2 = arith.constant 0 : i32
    return %c0_i32, %c0_i32_0, %c0_i32_1 : i32, i32, i32
  }
  func.func @transform_18(%arg0: i32) -> (i32, i32, i32) {
    %c0_i32 = arith.constant 0 : i32
    %c0_i32_0 = arith.constant 0 : i32
    %c0_i32_1 = arith.constant 0 : i32
    %c0_i32_2 = arith.constant 0 : i32
    return %c0_i32, %c0_i32_0, %c0_i32_1 : i32, i32, i32
  }
  func.func @transform_19(%arg0: i32) -> (i32, i32, i32) {
    %c0_i32 = arith.constant 0 : i32
    %c0_i32_0 = arith.constant 0 : i32
    %c0_i32_1 = arith.constant 0 : i32
    %c0_i32_2 = arith.constant 0 : i32
    return %c0_i32, %c0_i32_0, %c0_i32_1 : i32, i32, i32
  }
  func.func @transform_20(%arg0: i32) -> (i32, i32) {
    %c0_i32 = arith.constant 0 : i32
    %c0_i32_0 = arith.constant 0 : i32
    %c0_i32_1 = arith.constant 0 : i32
    return %c0_i32, %c0_i32_0 : i32, i32
  }
}

</mosaic_0001>

<bundles_post_ra>
// kernel: seq2seq_transformer_forward.5
= control target key start
LH: loop header
LB: loop body
LE: loop exit
PB: predicated region body
PF: predicated region fallthrough
CT: control target
= control target key end

     0   :  { %vm31_vm0 = vcmask 261120   ;;  %v179_v5 = vmov 32.0   ;;  %vm95_vm6 = vcmask 257024   ;;  %s239_s0 = inlined_call_operand.vmem [shape: bf16[16,32], index: 0, kind: input, shape index: {}]   ;;  %s240_s1 = inlined_call_operand.vmem [shape: f32[1,32], index: 1, kind: input, shape index: {}]   ;;  %s241_s2 = inlined_call_operand.vmem [shape: f32[1,32], index: 2, kind: input, shape index: {}]   ;;  %s242_s4 = inlined_call_operand.vmem [shape: f32[1,128], index: 4, kind: input, shape index: {}]   ;;  %s243_s3 = inlined_call_operand.vmem [shape: bf16[32,128], index: 3, kind: input, shape index: {}]   ;;  %s244_s5 = inlined_call_operand.vmem [shape: f32[16,128], index: 5, kind: output, shape index: {}]  }
   0x1   :  { %v166_v0 = vld [vmem:[%s239_s0] sm:$0xff]   ;;  %173 = vrcp.f32 %v179_v5  ;;  %v164_v25 = vld [vmem:[%s243_s3 + $0x8] sm:$0xff] }
   0x2   :  { %v167_v1 = vunpack.c.l.bf16 %v166_v0  ;;  %v168_v3 = vunpack.c.h.bf16 %v166_v0  ;;  %135 = vmatpush.bf16.msra.mxu0 %v164_v25  ;;  %v163_v28 = vld [vmem:[%s243_s3] sm:$0xff] }
   0x3   :  { %v170_v38 = vld [vmem:[%s240_s1] ss:$0 sm:$0xff] }
   0x4   :  { %v32_v2 = vsel %vm31_vm0, %v167_v1, 0.0  ;;  %v35_v4 = vsel %vm31_vm0, %v168_v3, 0.0  ;;  %v171_v41 = vld [vmem:[%s241_s2] ss:$0 sm:$0xff] }
   0x5   :  { %33 = vadd.xlane.f32.xlu0 %v32_v2  ;;  %v172_v55 = vld [vmem:[%s242_s4] ss:$0 sm:$0xff] }
   0x6   :  { %136 = vmatpush.bf16.msra.mxu0 %v163_v28 }
   0x7   :  { %v174_v6 = vpop.eup %173 }
   0x8   :  { %v39_v7 = vmul.f32 32.0, %v174_v6  ;;  %vm43_vm1 = vweird.f32 %v174_v6 }
   0xa   :  { %v40_v8 = vsub.f32 1.0, %v39_v7 }
   0xc   :  { %v41_v9 = vmul.f32 %v174_v6, %v40_v8 }
   0xd   :  { %36 = vadd.xlane.f32.xlu0 %v35_v4 }
   0xe   :  { %v42_v10 = vadd.f32 %v174_v6, %v41_v9 }
  0x10   :  { %v44_v11 = vsel %vm43_vm1, %v174_v6, %v42_v10 }
  0x78   :  { %v34_v12 = vpop.xlane.xlu0 %33 }
  0x79   :  { %v45_v13 = vmul.f32 %v44_v11, %v34_v12 }
  0x7b   :  { %v47_v14 = vsub.f32 %v167_v1, %v45_v13 }
  0x7d   :  { %v49_v15 = vmul.f32 %v47_v14, %v47_v14 }
  0x7f   :  { %v51_v16 = vsel %vm31_vm0, %v49_v15, 0.0 }
  0x80   :  { %52 = vadd.xlane.f32.xlu1 %v51_v16  ;;  %v37_v17 = vpop.xlane.xlu0 %36 }
  0x81   :  { %v46_v18 = vmul.f32 %v44_v11, %v37_v17 }
  0x83   :  { %v48_v19 = vsub.f32 %v168_v3, %v46_v18 }
  0x85   :  { %v50_v20 = vmul.f32 %v48_v19, %v48_v19 }
  0x87   :  { %v54_v21 = vsel %vm31_vm0, %v50_v20, 0.0 }
  0x88   :  { %55 = vadd.xlane.f32.xlu1 %v54_v21 }
  0xf3   :  { %v53_v22 = vpop.xlane.xlu1 %52 }
  0xf4   :  { %v57_v23 = vmul.f32 %v53_v22, %v44_v11 }
  0xf6   :  { %v59_v24 = vadd.f32 1e-05, %v57_v23 }
  0xf8   :  { %175 = vrsqrt.f32 %v59_v24  ;;  %vm67_vm3 = vweird.f32 %v59_v24 }
  0xfb   :  { %v56_v26 = vpop.xlane.xlu1 %55 }
  0xfc   :  { %v58_v27 = vmul.f32 %v56_v26, %v44_v11 }
  0xfe   :  { %v176_v29 = vpop.eup %175  ;;  %v60_v30 = vadd.f32 1e-05, %v58_v27 }
  0xff   :  { %v62_v31 = vmul.f32 %v176_v29, %v59_v24  ;;  %vm68_vm2 = vweird.f32 %v176_v29 }
 0x100   :  { %177 = vrsqrt.f32 %v60_v30  ;;  %vm69_vm4 = vmor %vm67_vm3, %vm68_vm2  ;;  %vm77_vm7 = vweird.f32 %v60_v30 }
 0x101   :  { %v63_v32 = vmul.f32 %v176_v29, %v62_v31 }
 0x103   :  { %v64_v33 = vmul.f32 0.5, %v63_v32 }
 0x105   :  { %v65_v34 = vsub.f32 1.5, %v64_v33 }
 0x106   :  { %v178_v35 = vpop.eup %177 }
 0x107   :  { %v66_v36 = vmul.f32 %v176_v29, %v65_v34  ;;  %v72_v37 = vmul.f32 %v178_v35, %v60_v30  ;;  %vm78_vm5 = vweird.f32 %v178_v35 }
 0x108   :  { %vm79_vm8 = vmor %vm77_vm7, %vm78_vm5 }
 0x109   :  { %v70_v39 = vsel %vm69_vm4, %v176_v29, %v66_v36  ;;  %v73_v40 = vmul.f32 %v178_v35, %v72_v37 }
 0x10a   :  { %v81_v42 = vmul.f32 %v70_v39, %v47_v14 }
 0x10b   :  { %v74_v43 = vmul.f32 0.5, %v73_v40 }
 0x10c   :  { %v86_v44 = vmul.f32 %v170_v38, %v81_v42 }
 0x10d   :  { %v75_v45 = vsub.f32 1.5, %v74_v43 }
 0x10e   :  { %v91_v46 = vadd.f32 %v171_v41, %v86_v44 }
 0x10f   :  { %v76_v47 = vmul.f32 %v178_v35, %v75_v45 }
 0x110   :  { %v93_v48 = vpack.c.bf16 %v91_v46, %v91_v46 }
 0x111   :  { %v80_v49 = vsel %vm79_vm8, %v178_v35, %v76_v47 }
 0x112   :  { %96 = vst.msk [vmem:[#allocation2] sm:$0xf] %vm95_vm6, %v93_v48  ;;  %v82_v50 = vmul.f32 %v80_v49, %v48_v19 }
 0x114   :  { %v87_v51 = vmul.f32 %v170_v38, %v82_v50 }
 0x116   :  { %v92_v52 = vadd.f32 %v171_v41, %v87_v51 }
 0x118   :  { %v94_v53 = vpack.c.bf16 %v92_v52, %v92_v52 }
 0x11a   :  { %97 = vst.msk [vmem:[#allocation2 + $0x4] sm:$0xf] %vm95_vm6, %v94_v53 }
 0x121   :  { %v162_v54 = vld [vmem:[#allocation2] sm:$0xff] }
 0x122   :  { %161 = vmatmul.msk.bf16.vlgmr.msra.gmra.mxu0 %vm31_vm0, %v162_v54 }
 0x19f   :  { %v138_v56 = vpop.f32.mrf.mxu0 }
 0x1a0   :  { %v139_v57 = vadd.f32 %v172_v55, %v138_v56 }
 0x1a2   :  { %143 = vst [vmem:[%s244_s5] sm:$0xff] %v139_v57 }
 0x1a7   :  { %v140_v58 = vpop.f32.mrf.mxu0 }
 0x1a8   :  { %v141_v59 = vadd.f32 %v172_v55, %v140_v58 }
 0x1aa   :  { %144 = vst [vmem:[%s244_s5 + $0x8] sm:$0xff] %v141_v59 }

// kernel: seq2seq_transformer_forward.3
= control target key start
LH: loop header
LB: loop body
LE: loop exit
PB: predicated region body
PF: predicated region fallthrough
CT: control target
= control target key end

     0   :  { %vm79_vm0 = vcmask 261120   ;;  %s1996_s28 = smov 104   ;;  %s1997_s29 = smov 120   ;;  %vm108_vm1 = vcmask 64512   ;;  %vm145_vm2 = vcmask 1043456   ;;  %vm226_vm3 = vcmask 130112   ;;  %s2538_s1 = inlined_call_operand.vmem [shape: bf16[2,32,96], index: 1, kind: input, shape index: {}]   ;;  %s2539_s0 = inlined_call_operand.vmem [shape: f32[16,32], index: 0, kind: input, shape index: {}]   ;;  %s2540_s2 = inlined_call_operand.vmem [shape: f32[2,1,96], index: 2, kind: input, shape index: {}]   ;;  %s2541_s4 = inlined_call_operand.vmem [shape: f32[2,1,32], index: 4, kind: input, shape index: {}]   ;;  %s2542_s3 = inlined_call_operand.vmem [shape: bf16[2,32,32], index: 3, kind: input, shape index: {}]   ;;  %s2543_s5 = inlined_call_operand.vmem [shape: f32[2,1,32], index: 5, kind: input, shape index: {}]   ;;  %s2544_s6 = inlined_call_operand.vmem [shape: f32[2,1,32], index: 6, kind: input, shape index: {}]   ;;  %s2545_s8 = inlined_call_operand.vmem [shape: f32[2,1,64], index: 8, kind: input, shape index: {}]   ;;  %s2546_s7 = inlined_call_operand.vmem [shape: bf16[2,32,64], index: 7, kind: input, shape index: {}]   ;;  %s2547_s10 = inlined_call_operand.vmem [shape: f32[2,1,32], index: 10, kind: input, shape index: {}]   ;;  %s2548_s9 = inlined_call_operand.vmem [shape: bf16[2,64,32], index: 9, kind: input, shape index: {}]   ;;  %s2549_s11 = inlined_call_operand.vmem [shape: f32[2,1,32], index: 11, kind: input, shape index: {}]   ;;  %s2550_s12 = inlined_call_operand.vmem [shape: f32[2,1,32], index: 12, kind: input, shape index: {}]   ;;  %s2551_s13 = inlined_call_operand.vmem [shape: f32[1,32], index: 13, kind: input, shape index: {}]   ;;  %s2552_s14 = inlined_call_operand.vmem [shape: f32[1,32], index: 14, kind: input, shape index: {}]   ;;  %s2553_s15 = inlined_call_operand.vmem [shape: bf16[16,32], index: 15, kind: output, shape index: {}]  }
   0x1   :  { %v1857_v0 = vld [vmem:[%s2538_s1 + $0x8] sm:$0xff]  ;;  %v1856_v1 = vld [vmem:[%s2538_s1] sm:$0xff]  ;;  %s1998_s30 = smov 88   ;;  %s1999_s16 = smov 80   ;;  %vm288_vm4 = vcmask 195712   ;;  %vm350_vm5 = vcmask 261312  }
   0x2   :  { %89 = vmatpush.bf16.msra.mxu0 %v1857_v0  ;;  %v2099_v2 = vld [vmem:[%s2539_s0] sm:$0xff]  ;;  %v2104_v3 = vld [vmem:[%s2539_s0 + $0x8] sm:$0xff]  ;;  %s1995_s0 = smov 96   ;;  %s2000_s17 = smov 72   ;;  %vm775_vm13 = vcmask 523264  }
   0x3   :  { %v53_v4 = vpack.c.bf16 %v2104_v3, %v2099_v2  ;;  %v1891_v5 = vld [vmem:[%s2540_s2] ss:$0 sm:$0xff]  ;;  %s2001_s18 = smov 112   ;;  %s2566_s19 = smov 56  }
   0x4   :  { %s2564_s20 = smov 64   ;;  %s2560_s21 = smov 48  }
   0x5   :  { %s2562_s22 = smov 40   ;;  %s2554_s23 = smov 16  }
   0x6   :  { %90 = vmatpush.bf16.msra.mxu0 %v1856_v1  ;;  %s2558_s24 = smov 8   ;;  %s2556_s25 = smov 24  }
   0x9   :  { %1716 = vmatmul.msk.bf16.vlgmr.msra.gmra.mxu0 %vm79_vm0, %v53_v4 }
  0x86   :  { %v92_v6 = vpop.f32.mrf.mxu0 }
  0x87   :  { %v93_v7 = vadd.f32 %v1891_v5, %v92_v6 }
  0x89   :  { %v97_v8 = vmul.f32 0.35355338, %v93_v7  ;;  %v101_v9 = vpack.c.bf16 %v93_v7, %v93_v7 }
  0x8b   :  { %v99_v10 = vpack.c.bf16 %v97_v8, %v97_v8  ;;  %v104_v11 = vunpack.c.l.b16 %v101_v9 }
  0x8d   :  { %v2112_v12 = vpack.c.b16 %v104_v11, %v104_v11  ;;  %v164_v13 = vunpack.c.l.b16 %v99_v10 }
  0x8e   :  { %v94_v14 = vpop.f32.mrf.mxu0 }
  0x8f   :  { %v95_v15 = vadd.f32 %v1891_v5, %v94_v14  ;;  %106 = vrot.lane.b32.xlu0 %v2112_v12, %s1995_s0  ;;  %v165_v16 = vpack.c.b16 %v164_v13, %v164_v13 }
  0x91   :  { %290 = vrot.lane.b32.xlu2 %v165_v16, %s1996_s28  ;;  %166 = vrot.lane.b32.xlu1 %v165_v16, %s1997_s29  ;;  %v98_v17 = vmul.f32 0.35355338, %v95_v15  ;;  %v102_v18 = vpack.c.bf16 %v95_v15, %v95_v15 }
  0x93   :  { %v100_v19 = vpack.c.bf16 %v98_v17, %v98_v17  ;;  %v353_v20 = vunpack.c.l.b16 %v102_v18 }
  0x95   :  { %v411_v21 = vunpack.c.l.b16 %v100_v19  ;;  %v2124_v22 = vpack.c.b16 %v353_v20, %v353_v20 }
  0x97   :  { %168 = vrot.lane.b32.xlu0 %v2112_v12, %s1998_s30  ;;  %v412_v23 = vpack.c.b16 %v411_v21, %v411_v21 }
  0x99   :  { %230 = vrot.lane.b32.xlu2 %v2112_v12, %s1999_s16  ;;  %292 = vrot.lane.b32.xlu1 %v2112_v12, %s2000_s17 }
  0x9f   :  { %415 = vrot.lane.b32.xlu0 %v2124_v22, %s1998_s30 }
  0xa1   :  { %413 = vrot.lane.b32.xlu2 %v412_v23, %s1997_s29  ;;  %228 = vrot.lane.b32.xlu1 %v165_v16, %s2001_s18 }
  0xa7   :  { %355 = vrot.lane.b32.xlu0 %v2124_v22, %s1995_s0 }
  0xa9   :  { %535 = vrot.lane.b32.xlu2 %v412_v23, %s1996_s28  ;;  %537 = vrot.lane.b32.xlu1 %v2124_v22, %s2000_s17 }
  0xaf   :  { %476 = vrot.lane.b32.xlu0 %v2124_v22, %s1999_s16 }
  0xb1   :  { %474 = vrot.lane.b32.xlu1 %v412_v23, %s2001_s18 }
  0xb9   :  { %201 = vrot.lane.b32.xlu1 %v2112_v12, %s2566_s19 }
  0xeb   :  { %v291_v24 = vpop.permute.xlu2 %290 }
  0xf3   :  { %v231_v25 = vpop.permute.xlu2 %230 }
  0xf4   :  { %v236_v26 = vsel %vm108_vm1, %v231_v25, 0 }
  0xf5   :  { %245 = vmatpush.bf16.xpose.msrb.mxu0 %v236_v26 }
  0xfb   :  { %v414_v43 = vpop.permute.xlu2 %413 }
 0x101   :  { %v107_v27 = vpop.permute.xlu0 %106 }
 0x102   :  { %v113_v28 = vsel %vm108_vm1, %v107_v27, 0 }
 0x103   :  { %122 = vmatpush.bf16.xpose.msra.mxu1 %v113_v28  ;;  %v167_v29 = vpop.permute.xlu1 %166  ;;  %v536_v45 = vpop.permute.xlu2 %535 }
 0x109   :  { %v169_v30 = vpop.permute.xlu0 %168 }
 0x10a   :  { %1717 = vmatmul.msk.bf16.vlgmr.msra.gmra.mxu1 %vm108_vm1, %v99_v10  ;;  %v174_v31 = vsel %vm108_vm1, %v169_v30, 0 }
 0x10b   :  { %183 = vmatpush.bf16.xpose.msra.mxu3 %v174_v31  ;;  %v293_v32 = vpop.permute.xlu1 %292 }
 0x10c   :  { %v298_v33 = vsel %vm108_vm1, %v293_v32, 0 }
 0x111   :  { %v416_v34 = vpop.permute.xlu0 %415 }
 0x112   :  { %v421_v35 = vsel %vm108_vm1, %v416_v34, 0  ;;  %1719 = vmatmul.msk.bf16.vlgmr.msra.gmra.mxu3 %vm108_vm1, %v167_v29 }
 0x113   :  { %307 = vmatpush.bf16.xpose.msrb.mxu3 %v298_v33  ;;  %v229_v36 = vpop.permute.xlu1 %228 }
 0x114   :  { %1721 = vmatmul.msk.bf16.vlgmr.msrb.gmra.mxu0 %vm108_vm1, %v229_v36 }
 0x119   :  { %v356_v37 = vpop.permute.xlu0 %355 }
 0x11a   :  { %v361_v38 = vsel %vm108_vm1, %v356_v37, 0 }
 0x11b   :  { %430 = vmatpush.bf16.xpose.msra.mxu3 %v421_v35  ;;  %370 = vmatpush.bf16.xpose.msra.mxu0 %v361_v38  ;;  %v538_v39 = vpop.permute.xlu1 %537 }
 0x11c   :  { %v543_v41 = vsel %vm108_vm1, %v538_v39, 0 }
 0x121   :  { %v477_v40 = vpop.permute.xlu0 %476 }
 0x122   :  { %v482_v42 = vsel %vm108_vm1, %v477_v40, 0  ;;  %1723 = vmatmul.msk.bf16.vlgmr.msrb.gmra.mxu3 %vm108_vm1, %v291_v24 }
 0x123   :  { %552 = vmatpush.bf16.xpose.msrb.mxu3 %v543_v41  ;;  %491 = vmatpush.bf16.xpose.msrb.mxu0 %v482_v42  ;;  %v475_v44 = vpop.permute.xlu1 %474 }
 0x124   :  { %1725 = vmatmul.msk.bf16.vlgmr.msra.gmra.mxu0 %vm108_vm1, %v100_v19 }
 0x12b   :  { %v202_v19 = vpop.permute.xlu1 %201 }
 0x12c   :  { %v207_v24 = vsel %vm145_vm2, %v202_v19, 0 }
 0x132   :  { %1727 = vmatmul.msk.bf16.vlgmr.msra.gmra.mxu3 %vm108_vm1, %v414_v43 }
 0x134   :  { %1729 = vmatmul.msk.bf16.vlgmr.msrb.gmra.mxu0 %vm108_vm1, %v475_v44 }
 0x142   :  { %1731 = vmatmul.msk.bf16.vlgmr.msrb.gmra.mxu3 %vm108_vm1, %v536_v45 }
 0x187   :  { %v124_v46 = vpop.f32.mrf.mxu1 }
 0x188   :  { %v128_v47 = vsel %vm108_vm1, %v124_v46, -inf }
 0x189   :  { %129 = vmax.xlane.f32.xlu2 %v128_v47 }
 0x18f   :  { %v126_v48 = vpop.f32.mrf.mxu1 }
 0x191   :  { %v247_v49 = vpop.f32.mrf.mxu0 }
 0x192   :  { %v251_v50 = vsel %vm108_vm1, %v247_v49, -inf }
 0x193   :  { %252 = vmax.xlane.f32.xlu2 %v251_v50 }
 0x195   :  { %v185_v51 = vpop.f32.mrf.mxu3 }
 0x196   :  { %v189_v52 = vsel %vm108_vm1, %v185_v51, -inf }
 0x197   :  { %190 = vmax.xlane.f32.xlu0 %v189_v52 }
 0x199   :  { %v249_v53 = vpop.f32.mrf.mxu0 }
 0x19d   :  { %v187_v54 = vpop.f32.mrf.mxu3 }
 0x1a1   :  { %v372_v55 = vpop.f32.mrf.mxu0 }
 0x1a2   :  { %v376_v56 = vsel %vm108_vm1, %v372_v55, -inf }
 0x1a3   :  { %377 = vmax.xlane.f32.xlu1 %v376_v56 }
 0x1a5   :  { %v2160_v57 = vpop.f32.mrf.mxu3 }
 0x1a6   :  { %v313_v59 = vsel %vm108_vm1, %v2160_v57, -inf }
 0x1a9   :  { %v374_v58 = vpop.f32.mrf.mxu0 }
 0x1ab   :  { %314 = vmax.xlane.f32.xlu1 %v313_v59  ;;  %140 = vrot.lane.b32.xlu2 %v2112_v12, %s2564_s20 }
 0x1ad   :  { %v311_v60 = vpop.f32.mrf.mxu3 }
 0x1b1   :  { %v493_v61 = vpop.f32.mrf.mxu0 }
 0x1b2   :  { %v497_v62 = vsel %vm108_vm1, %v493_v61, -inf }
 0x1b3   :  { %498 = vmax.xlane.f32.xlu0 %v497_v62 }
 0x1b5   :  { %v2167_v63 = vpop.f32.mrf.mxu3 }
 0x1b6   :  { %v436_v7 = vsel %vm108_vm1, %v2167_v63, -inf }
 0x1b9   :  { %v495_v0 = vpop.f32.mrf.mxu0 }
 0x1bd   :  { %v434_v1 = vpop.f32.mrf.mxu3 }
 0x1c4   :  { %263 = vrot.lane.b32.xlu1 %v2112_v12, %s2560_s21 }
 0x1c5   :  { %v554_v4 = vpop.f32.mrf.mxu3 }
 0x1c6   :  { %v558_v5 = vsel %vm108_vm1, %v554_v4, -inf }
 0x1c7   :  { %559 = vmax.xlane.f32.xlu0 %v558_v5 }
 0x1cd   :  { %v556_v6 = vpop.f32.mrf.mxu3 }
 0x1d4   :  { %437 = vmax.xlane.f32.xlu2 %v436_v7 }
 0x1fc   :  { %v130_v8 = vpop.xlane.xlu2 %129 }
 0x1fd   :  { %v131_v9 = vsub.f32 %v124_v46, %v130_v8 }
 0x1ff   :  { %v132_v10 = vmul.f32 1.442695, %v131_v9 }
 0x201   :  { %1909 = vpow2.f32 %v132_v10 }
 0x206   :  { %v253_v11 = vpop.xlane.xlu2 %252 }
 0x207   :  { %v2174_v13 = vpop.eup %1909  ;;  %v254_v14 = vsub.f32 %v247_v49, %v253_v11 }
 0x208   :  { %v134_v15 = vsel %vm108_vm1, %v2174_v13, 0.0 }
 0x209   :  { %v255_v16 = vmul.f32 1.442695, %v254_v14  ;;  %135 = vadd.xlane.f32.xlu0 %v134_v15 }
 0x20a   :  { %v191_v17 = vpop.xlane.xlu0 %190 }
 0x20b   :  { %1911 = vpow2.f32 %v255_v16  ;;  %v192_v18 = vsub.f32 %v185_v51, %v191_v17 }
 0x20d   :  { %v193_v20 = vmul.f32 1.442695, %v192_v18 }
 0x20e   :  { %v141_v21 = vpop.permute.xlu2 %140 }
 0x20f   :  { %1913 = vpow2.f32 %v193_v20  ;;  %v147_v23 = vsel %vm145_vm2, %v141_v21, 0 }
 0x210   :  { %156 = vmatpush.bf16.msra.mxu2 %v147_v23 }
 0x211   :  { %v1912_v25 = vpop.eup %1911 }
 0x212   :  { %v257_v26 = vsel %vm108_vm1, %v1912_v25, 0.0 }
 0x213   :  { %258 = vadd.xlane.f32.xlu2 %v257_v26 }
 0x214   :  { %216 = vmatpush.bf16.msrb.mxu2 %v207_v24 }
 0x215   :  { %v2181_v27 = vpop.eup %1913 }
 0x216   :  { %v195_v28 = vsel %vm108_vm1, %v2181_v27, 0.0  ;;  %v378_v29 = vpop.xlane.xlu1 %377 }
 0x217   :  { %196 = vadd.xlane.f32.xlu1 %v195_v28  ;;  %v379_v31 = vsub.f32 %v372_v55, %v378_v29 }
 0x219   :  { %v380_v34 = vmul.f32 1.442695, %v379_v31 }
 0x21b   :  { %1915 = vpow2.f32 %v380_v34 }
 0x21d   :  { %325 = vrot.lane.b32.xlu0 %v2112_v12, %s2562_s22 }
 0x21e   :  { %v315_v30 = vpop.xlane.xlu1 %314 }
 0x21f   :  { %v316_v36 = vsub.f32 %v2160_v57, %v315_v30 }
 0x221   :  { %v317_v37 = vmul.f32 1.442695, %v316_v36  ;;  %v1916_v39 = vpop.eup %1915 }
 0x222   :  { %v382_v42 = vsel %vm108_vm1, %v1916_v39, 0.0 }
 0x223   :  { %1917 = vpow2.f32 %v317_v37 }
 0x226   :  { %v499_v35 = vpop.xlane.xlu0 %498 }
 0x227   :  { %v500_v12 = vsub.f32 %v493_v61, %v499_v35 }
 0x229   :  { %v501_v41 = vmul.f32 1.442695, %v500_v12  ;;  %v1918_v46 = vpop.eup %1917 }
 0x22a   :  { %v319_v48 = vsel %vm108_vm1, %v1918_v46, 0.0 }
 0x22b   :  { %448 = vrot.lane.b32.xlu2 %v2124_v22, %s2566_s19  ;;  %1919 = vpow2.f32 %v501_v41 }
 0x230   :  { %388 = vrot.lane.b32.xlu1 %v2124_v22, %s2564_s20 }
 0x231   :  { %v2196_v49 = vpop.eup %1919 }
 0x232   :  { %v503_v51 = vsel %vm108_vm1, %v2196_v49, 0.0 }
 0x236   :  { %v264_v32 = vpop.permute.xlu1 %263 }
 0x237   :  { %v269_v33 = vsel %vm145_vm2, %v264_v32, 0 }
 0x238   :  { %278 = vmatpush.bf16.msrb.mxu1 %v269_v33 }
 0x23a   :  { %v560_v38 = vpop.xlane.xlu0 %559 }
 0x23b   :  { %v561_v40 = vsub.f32 %v554_v4, %v560_v38 }
 0x23d   :  { %v562_v45 = vmul.f32 1.442695, %v561_v40 }
 0x23f   :  { %1921 = vpow2.f32 %v562_v45 }
 0x245   :  { %v2198_v50 = vpop.eup %1921 }
 0x246   :  { %v564_v53 = vsel %vm108_vm1, %v2198_v50, 0.0 }
 0x247   :  { %383 = vadd.xlane.f32.xlu0 %v382_v42  ;;  %v438_v43 = vpop.xlane.xlu2 %437 }
 0x248   :  { %v439_v44 = vsub.f32 %v2167_v63, %v438_v43 }
 0x24a   :  { %v440_v47 = vmul.f32 1.442695, %v439_v44 }
 0x24c   :  { %1923 = vpow2.f32 %v440_v47 }
 0x24f   :  { %320 = vadd.xlane.f32.xlu0 %v319_v48 }
 0x252   :  { %v1924_v52 = vpop.eup %1923 }
 0x253   :  { %v442_v54 = vsel %vm108_vm1, %v1924_v52, 0.0 }
 0x254   :  { %504 = vadd.xlane.f32.xlu2 %v503_v51 }
 0x257   :  { %565 = vadd.xlane.f32.xlu0 %v564_v53 }
 0x25a   :  { %443 = vadd.xlane.f32.xlu1 %v442_v54  ;;  %v1859_v54 = vld [vmem:[%s2542_s3 + $0x8] sm:$0xff] }
 0x25b   :  { %623 = vmatpush.bf16.msra.mxu0 %v1859_v54 }
 0x26b   :  { %570 = vrot.lane.b32.xlu0 %v2124_v22, %s2562_s22 }
 0x273   :  { %509 = vrot.lane.b32.xlu1 %v2124_v22, %s2560_s21 }
 0x27c   :  { %v136_v55 = vpop.xlane.xlu0 %135 }
 0x27d   :  { %1925 = vrcp.f32 %v136_v55  ;;  %v1858_v55 = vld [vmem:[%s2542_s3] sm:$0xff] }
 0x27e   :  { %624 = vmatpush.bf16.msra.mxu0 %v1858_v55  ;;  %v1865_v55 = vld [vmem:[%s2548_s9 + $0x18] sm:$0xff] }
 0x27f   :  { %783 = vmatpush.bf16.msra.mxu3 %v1865_v55 }
 0x283   :  { %v1926_v56 = vpop.eup %1925 }
 0x284   :  { %v138_v57 = vmul.f32 %v1926_v56, %v2174_v13 }
 0x286   :  { %v259_v58 = vpop.xlane.xlu2 %258  ;;  %v139_v59 = vpack.c.bf16 %v138_v57, %v138_v57 }
 0x287   :  { %1927 = vrcp.f32 %v259_v58 }
 0x288   :  { %1718 = vmatmul.msk.bf16.vlgmr.msra.gmra.mxu2 %vm108_vm1, %v139_v59 }
 0x28a   :  { %v197_v60 = vpop.xlane.xlu1 %196 }
 0x28b   :  { %1929 = vrcp.f32 %v197_v60 }
 0x28d   :  { %v1928_v61 = vpop.eup %1927 }
 0x28e   :  { %v261_v62 = vmul.f32 %v1928_v61, %v1912_v25  ;;  %v449_v5 = vpop.permute.xlu2 %448 }
 0x28f   :  { %v326_v63 = vpop.permute.xlu0 %325  ;;  %v454_v7 = vsel %vm145_vm2, %v449_v5, 0 }
 0x290   :  { %v331_v0 = vsel %vm145_vm2, %v326_v63, 0  ;;  %v262_v1 = vpack.c.bf16 %v261_v62, %v261_v62  ;;  %v1892_v62 = vld [vmem:[%s2541_s4] ss:$0 sm:$0xff] }
 0x291   :  { %v1930_v4 = vpop.eup %1929  ;;  %340 = vmatpush.bf16.msra.mxu2 %v331_v0 }
 0x292   :  { %v199_v22 = vmul.f32 %v1930_v4, %v2181_v27  ;;  %1722 = vmatmul.msk.bf16.vlgmr.msrb.gmra.mxu1 %vm108_vm1, %v262_v1 }
 0x294   :  { %v200_v6 = vpack.c.bf16 %v199_v22, %v199_v22 }
 0x298   :  { %1720 = vmatmul.msk.bf16.vlgmr.msrb.gmra.mxu2 %vm108_vm1, %v200_v6 }
 0x299   :  { %463 = vmatpush.bf16.msrb.mxu2 %v454_v7 }
 0x2a2   :  { %v389_v8 = vpop.permute.xlu1 %388 }
 0x2a3   :  { %v394_v9 = vsel %vm145_vm2, %v389_v8, 0  ;;  %v2009_v8 = vmov 32.0  }
 0x2a4   :  { %403 = vmatpush.bf16.msra.mxu1 %v394_v9 }
 0x2ba   :  { %v384_v10 = vpop.xlane.xlu0 %383 }
 0x2bb   :  { %1931 = vrcp.f32 %v384_v10 }
 0x2c1   :  { %v1932_v11 = vpop.eup %1931 }
 0x2c2   :  { %v386_v13 = vmul.f32 %v1932_v11, %v1916_v39  ;;  %v321_v14 = vpop.xlane.xlu0 %320 }
 0x2c3   :  { %1933 = vrcp.f32 %v321_v14 }
 0x2c4   :  { %v387_v15 = vpack.c.bf16 %v386_v13, %v386_v13 }
 0x2c6   :  { %1726 = vmatmul.msk.bf16.vlgmr.msra.gmra.mxu1 %vm108_vm1, %v387_v15 }
 0x2c7   :  { %v505_v23 = vpop.xlane.xlu2 %504 }
 0x2c9   :  { %v1934_v16 = vpop.eup %1933 }
 0x2ca   :  { %v323_v17 = vmul.f32 %v1934_v16, %v1918_v46  ;;  %v566_v21 = vpop.xlane.xlu0 %565 }
 0x2cc   :  { %v324_v18 = vpack.c.bf16 %v323_v17, %v323_v17 }
 0x2cd   :  { %v444_v19 = vpop.xlane.xlu1 %443 }
 0x2ce   :  { %1724 = vmatmul.msk.bf16.vlgmr.msra.gmra.mxu2 %vm108_vm1, %v324_v18  ;;  %1935 = vrcp.f32 %v444_v19 }
 0x2cf   :  { %1937 = vrcp.f32 %v505_v23 }
 0x2d0   :  { %1939 = vrcp.f32 %v566_v21 }
 0x2d1   :  { %1941 = vrcp.f32 %v2009_v8 }
 0x2d4   :  { %v1936_v20 = vpop.eup %1935 }
 0x2d5   :  { %v446_v24 = vmul.f32 %v1936_v20, %v1924_v52  ;;  %v1938_v28 = vpop.eup %1937 }
 0x2d6   :  { %v507_v29 = vmul.f32 %v1938_v28, %v2196_v49  ;;  %v1940_v30 = vpop.eup %1939 }
 0x2d7   :  { %v447_v25 = vpack.c.bf16 %v446_v24, %v446_v24  ;;  %v568_v34 = vmul.f32 %v1940_v30, %v2198_v50  ;;  %v1942_v9 = vpop.eup %1941 }
 0x2d8   :  { %v508_v33 = vpack.c.bf16 %v507_v29, %v507_v29  ;;  %v642_v10 = vmul.f32 32.0, %v1942_v9  ;;  %vm646_vm6 = vweird.f32 %v1942_v9  ;;  %v1860_v29 = vld [vmem:[%s2546_s7] sm:$0xff] }
 0x2d9   :  { %v569_v35 = vpack.c.bf16 %v568_v34, %v568_v34 }
 0x2da   :  { %v643_v11 = vsub.f32 1.0, %v642_v10 }
 0x2dc   :  { %v644_v13 = vmul.f32 %v1942_v9, %v643_v11 }
 0x2dd   :  { %v571_v26 = vpop.permute.xlu0 %570 }
 0x2de   :  { %v576_v27 = vsel %vm145_vm2, %v571_v26, 0  ;;  %1728 = vmatmul.msk.bf16.vlgmr.msrb.gmra.mxu2 %vm108_vm1, %v447_v25  ;;  %v645_v14 = vadd.f32 %v1942_v9, %v644_v13  ;;  %v1861_v25 = vld [vmem:[%s2546_s7 + $0x8] sm:$0xff] }
 0x2df   :  { %585 = vmatpush.bf16.msra.mxu2 %v576_v27 }
 0x2e0   :  { %v2254_v15 = vsel %vm646_vm6, %v1942_v9, %v645_v14 }
 0x2e5   :  { %v510_v31 = vpop.permute.xlu1 %509 }
 0x2e6   :  { %v515_v32 = vsel %vm145_vm2, %v510_v31, 0 }
 0x2e7   :  { %524 = vmatpush.bf16.msrb.mxu1 %v515_v32 }
 0x2ea   :  { %1730 = vmatmul.msk.bf16.vlgmr.msrb.gmra.mxu1 %vm108_vm1, %v508_v33 }
 0x2eb   :  { %737 = vmatpush.bf16.msra.mxu1 %v1861_v25 }
 0x2ee   :  { %1732 = vmatmul.msk.bf16.vlgmr.msra.gmra.mxu2 %vm108_vm1, %v569_v35 }
 0x2ef   :  { %738 = vmatpush.bf16.msra.mxu1 %v1860_v29 }
 0x30b   :  { %v158_v36 = vpop.f32.mrf.mxu2 }
 0x30c   :  { %162 = vst.msk [vmem:[#allocation2] sm:$0xff] %vm108_vm1, %v158_v36 }
 0x30f   :  { %v280_v37 = vpop.f32.mrf.mxu1 }
 0x310   :  { %285 = vrot.lane.b32.xlu0 %v280_v37, %s2554_s23 }
 0x313   :  { %v160_v12 = vpop.f32.mrf.mxu2 }
 0x317   :  { %v282_v38 = vpop.f32.mrf.mxu1 }
 0x31b   :  { %v218_v39 = vpop.f32.mrf.mxu2 }
 0x31c   :  { %223 = vrot.lane.b32.xlu0 %v218_v39, %s2558_s24 }
 0x323   :  { %v220_v40 = vpop.f32.mrf.mxu2 }
 0x343   :  { %v405_v41 = vpop.f32.mrf.mxu1 }
 0x344   :  { %409 = vst.msk [vmem:[#allocation2 + $0x8] sm:$0xff] %vm108_vm1, %v405_v41 }
 0x34b   :  { %v407_v42 = vpop.f32.mrf.mxu1 }
 0x351   :  { %v342_v43 = vpop.f32.mrf.mxu2 }
 0x352   :  { %347 = vrot.lane.b32.xlu2 %v342_v43, %s2556_s25 }
 0x359   :  { %v344_v44 = vpop.f32.mrf.mxu2 }
 0x35a   :  { %v1893_v44 = vld [vmem:[%s2543_s5] ss:$0 sm:$0xff] }
 0x361   :  { %v465_v45 = vpop.f32.mrf.mxu2 }
 0x362   :  { %470 = vrot.lane.b32.xlu1 %v465_v45, %s2558_s24 }
 0x367   :  { %v526_v46 = vpop.f32.mrf.mxu1 }
 0x369   :  { %v467_v47 = vpop.f32.mrf.mxu2 }
 0x36a   :  { %531 = vrot.lane.b32.xlu1 %v526_v46, %s2554_s23 }
 0x36f   :  { %v528_v48 = vpop.f32.mrf.mxu1 }
 0x370   :  { %v1894_v48 = vld [vmem:[%s2544_s6] ss:$0 sm:$0xff] }
 0x371   :  { %v587_v49 = vpop.f32.mrf.mxu2 }
 0x372   :  { %592 = vrot.lane.b32.xlu0 %v587_v49, %s2556_s25 }
 0x379   :  { %v589_v50 = vpop.f32.mrf.mxu2 }
 0x382   :  { %v286_v51 = vpop.permute.xlu0 %285 }
 0x38e   :  { %v224_v52 = vpop.permute.xlu0 %223 }
 0x38f   :  { %227 = vst.msk [vmem:[#allocation2] sm:$0xff] %vm226_vm3, %v224_v52 }
 0x390   :  { %289 = vst.msk [vmem:[#allocation2] sm:$0xff] %vm288_vm4, %v286_v51 }
 0x3ac   :  { %v348_v53 = vpop.permute.xlu2 %347 }
 0x3ad   :  { %351 = vst.msk [vmem:[#allocation2] sm:$0xff] %vm350_vm5, %v348_v53 }
 0x3b4   :  { %v596_v59 = vld [vmem:[#allocation2] sm:$0xff] }
 0x3d4   :  { %v471_v56 = vpop.permute.xlu1 %470 }
 0x3d5   :  { %473 = vst.msk [vmem:[#allocation2 + $0x8] sm:$0xff] %vm226_vm3, %v471_v56  ;;  %v1864_v56 = vld [vmem:[%s2548_s9 + $0x10] sm:$0xff] }
 0x3d6   :  { %784 = vmatpush.bf16.msra.mxu3 %v1864_v56 }
 0x3dc   :  { %v532_v57 = vpop.permute.xlu1 %531 }
 0x3dd   :  { %534 = vst.msk [vmem:[#allocation2 + $0x8] sm:$0xff] %vm288_vm4, %v532_v57  ;;  %v1863_v57 = vld [vmem:[%s2548_s9 + $0x8] sm:$0xff] }
 0x3de   :  { %785 = vmatpush.bf16.msra.mxu3 %v1863_v57 }
 0x3e4   :  { %v593_v58 = vpop.permute.xlu0 %592 }
 0x3e5   :  { %595 = vst.msk [vmem:[#allocation2 + $0x8] sm:$0xff] %vm350_vm5, %v593_v58  ;;  %v1862_v58 = vld [vmem:[%s2548_s9] sm:$0xff] }
 0x3e6   :  { %786 = vmatpush.bf16.msra.mxu3 %v1862_v58 }
 0x3ec   :  { %v597_v60 = vld [vmem:[#allocation2 + $0x8] sm:$0xff] }
 0x3ed   :  { %v598_v61 = vpack.c.bf16 %v597_v60, %v596_v59  ;;  %v1895_v60 = vld [vmem:[%s2545_s8] ss:$0 sm:$0xff] }
 0x3ef   :  { %1741 = vmatmul.msk.bf16.vlgmr.msra.gmra.mxu0 %vm79_vm0, %v598_v61 }
 0x46c   :  { %v626_v63 = vpop.f32.mrf.mxu0 }
 0x46d   :  { %v627_v0 = vadd.f32 %v1892_v62, %v626_v63 }
 0x46f   :  { %v631_v1 = vadd.f32 %v627_v0, %v2099_v2 }
 0x471   :  { %v635_v4 = vsel %vm79_vm0, %v631_v1, 0.0 }
 0x472   :  { %636 = vadd.xlane.f32.xlu1 %v635_v4 }
 0x474   :  { %v628_v22 = vpop.f32.mrf.mxu0 }
 0x475   :  { %v629_v5 = vadd.f32 %v1892_v62, %v628_v22  ;;  %v1896_v22 = vld [vmem:[%s2547_s10] ss:$0 sm:$0xff] }
 0x477   :  { %v632_v6 = vadd.f32 %v629_v5, %v2104_v3 }
 0x479   :  { %v638_v7 = vsel %vm79_vm0, %v632_v6, 0.0 }
 0x47a   :  { %639 = vadd.xlane.f32.xlu0 %v638_v7 }
 0x4e5   :  { %v637_v2 = vpop.xlane.xlu1 %636 }
 0x4e6   :  { %v648_v16 = vmul.f32 %v2254_v15, %v637_v2 }
 0x4e8   :  { %v650_v17 = vsub.f32 %v631_v1, %v648_v16 }
 0x4ea   :  { %v652_v18 = vmul.f32 %v650_v17, %v650_v17 }
 0x4ec   :  { %v654_v3 = vsel %vm79_vm0, %v652_v18, 0.0 }
 0x4ed   :  { %v640_v19 = vpop.xlane.xlu0 %639  ;;  %655 = vadd.xlane.f32.xlu2 %v654_v3 }
 0x4ee   :  { %v649_v20 = vmul.f32 %v2254_v15, %v640_v19 }
 0x4f0   :  { %v651_v21 = vsub.f32 %v632_v6, %v649_v20 }
 0x4f2   :  { %v653_v23 = vmul.f32 %v651_v21, %v651_v21 }
 0x4f4   :  { %v657_v24 = vsel %vm79_vm0, %v653_v23, 0.0 }
 0x4f5   :  { %658 = vadd.xlane.f32.xlu1 %v657_v24  ;;  %v1867_v24 = vld [vmem:[%s2538_s1 + $0x18] sm:$0xff] }
 0x4f6   :  { %888 = vmatpush.bf16.msrb.mxu2 %v1867_v24 }
 0x560   :  { %v656_v26 = vpop.xlane.xlu2 %655 }
 0x561   :  { %v660_v27 = vmul.f32 %v656_v26, %v2254_v15 }
 0x563   :  { %v662_v28 = vadd.f32 1e-05, %v660_v27 }
 0x565   :  { %1943 = vrsqrt.f32 %v662_v28  ;;  %vm670_vm8 = vweird.f32 %v662_v28 }
 0x568   :  { %v659_v30 = vpop.xlane.xlu1 %658 }
 0x569   :  { %v661_v31 = vmul.f32 %v659_v30, %v2254_v15 }
 0x56b   :  { %v1944_v32 = vpop.eup %1943  ;;  %v663_v33 = vadd.f32 1e-05, %v661_v31 }
 0x56c   :  { %v665_v34 = vmul.f32 %v1944_v32, %v662_v28  ;;  %vm671_vm7 = vweird.f32 %v1944_v32  ;;  %v1866_v28 = vld [vmem:[%s2538_s1 + $0x10] sm:$0xff] }
 0x56d   :  { %1945 = vrsqrt.f32 %v663_v33  ;;  %vm672_vm9 = vmor %vm670_vm8, %vm671_vm7  ;;  %vm680_vm11 = vweird.f32 %v663_v33  ;;  %889 = vmatpush.bf16.msrb.mxu2 %v1866_v28 }
 0x56e   :  { %v666_v35 = vmul.f32 %v1944_v32, %v665_v34 }
 0x570   :  { %v667_v36 = vmul.f32 0.5, %v666_v35 }
 0x572   :  { %v668_v37 = vsub.f32 1.5, %v667_v36 }
 0x573   :  { %v1946_v12 = vpop.eup %1945 }
 0x574   :  { %v669_v38 = vmul.f32 %v1944_v32, %v668_v37  ;;  %v675_v39 = vmul.f32 %v1946_v12, %v663_v33  ;;  %vm681_vm10 = vweird.f32 %v1946_v12 }
 0x575   :  { %vm682_vm12 = vmor %vm680_vm11, %vm681_vm10 }
 0x576   :  { %v676_v40 = vmul.f32 %v1946_v12, %v675_v39  ;;  %v673_v41 = vsel %vm672_vm9, %v1944_v32, %v669_v38 }
 0x577   :  { %v684_v45 = vmul.f32 %v673_v41, %v650_v17 }
 0x578   :  { %v677_v42 = vmul.f32 0.5, %v676_v40 }
 0x579   :  { %v689_v49 = vmul.f32 %v1893_v44, %v684_v45 }
 0x57a   :  { %v678_v43 = vsub.f32 1.5, %v677_v42 }
 0x57b   :  { %v694_v52 = vadd.f32 %v1894_v48, %v689_v49 }
 0x57c   :  { %v679_v46 = vmul.f32 %v1946_v12, %v678_v43  ;;  %v1897_v43 = vld [vmem:[%s2549_s11] ss:$0 sm:$0xff] }
 0x57e   :  { %v683_v47 = vsel %vm682_vm12, %v1946_v12, %v679_v46 }
 0x57f   :  { %v685_v50 = vmul.f32 %v683_v47, %v651_v21  ;;  %v1898_v47 = vld [vmem:[%s2550_s12] ss:$0 sm:$0xff] }
 0x581   :  { %v690_v51 = vmul.f32 %v1893_v44, %v685_v50 }
 0x583   :  { %v695_v53 = vadd.f32 %v1894_v48, %v690_v51 }
 0x585   :  { %v696_v54 = vpack.c.bf16 %v695_v53, %v694_v52 }
 0x587   :  { %1750 = vmatmul.msk.bf16.vlgmr.msra.gmra.mxu1 %vm79_vm0, %v696_v54  ;;  %v1899_v54 = vld [vmem:[%s2540_s2 + $0x1] ss:$0 sm:$0xff]  ;;  %s2568_s2 = smov 56  }
 0x604   :  { %v740_v59 = vpop.f32.mrf.mxu1 }
 0x605   :  { %v741_v61 = vadd.f32 %v1895_v60, %v740_v59 }
 0x607   :  { %v745_v0 = vmax.f32 %v741_v61, 0.0 }
 0x60c   :  { %v742_v62 = vpop.f32.mrf.mxu1 }
 0x60d   :  { %v743_v63 = vadd.f32 %v1895_v60, %v742_v62 }
 0x60f   :  { %v746_v1 = vmax.f32 %v743_v63, 0.0 }
 0x611   :  { %v747_v4 = vpack.c.bf16 %v746_v1, %v745_v0 }
 0x613   :  { %1767 = vmatmul.msk.bf16.vlgmr.msra.gmra.mxu3 %vm775_vm13, %v747_v4 }
 0x696   :  { %v788_v5 = vpop.f32.mrf.mxu3 }
 0x697   :  { %v789_v6 = vadd.f32 %v1896_v22, %v788_v5 }
 0x699   :  { %v793_v7 = vadd.f32 %v789_v6, %v694_v52 }
 0x69b   :  { %v795_v8 = vsel %vm79_vm0, %v793_v7, 0.0 }
 0x69c   :  { %796 = vadd.xlane.f32.xlu0 %v795_v8 }
 0x69e   :  { %v790_v9 = vpop.f32.mrf.mxu3 }
 0x69f   :  { %v791_v10 = vadd.f32 %v1896_v22, %v790_v9 }
 0x6a1   :  { %v794_v11 = vadd.f32 %v791_v10, %v695_v53 }
 0x6a3   :  { %v798_v13 = vsel %vm79_vm0, %v794_v11, 0.0 }
 0x6a4   :  { %799 = vadd.xlane.f32.xlu1 %v798_v13 }
 0x70f   :  { %v797_v14 = vpop.xlane.xlu0 %796 }
 0x710   :  { %v801_v2 = vmul.f32 %v797_v14, %v2254_v15 }
 0x712   :  { %v803_v16 = vsub.f32 %v793_v7, %v801_v2 }
 0x714   :  { %v805_v17 = vmul.f32 %v803_v16, %v803_v16 }
 0x716   :  { %v807_v18 = vsel %vm79_vm0, %v805_v17, 0.0 }
 0x717   :  { %v800_v3 = vpop.xlane.xlu1 %799  ;;  %808 = vadd.xlane.f32.xlu0 %v807_v18 }
 0x718   :  { %v802_v19 = vmul.f32 %v800_v3, %v2254_v15 }
 0x71a   :  { %v804_v20 = vsub.f32 %v794_v11, %v802_v19 }
 0x71c   :  { %v806_v21 = vmul.f32 %v804_v20, %v804_v20 }
 0x71e   :  { %v810_v23 = vsel %vm79_vm0, %v806_v21, 0.0 }
 0x71f   :  { %811 = vadd.xlane.f32.xlu1 %v810_v23 }
 0x78a   :  { %v809_v25 = vpop.xlane.xlu0 %808 }
 0x78b   :  { %v813_v26 = vmul.f32 %v809_v25, %v2254_v15 }
 0x78d   :  { %v815_v27 = vadd.f32 1e-05, %v813_v26 }
 0x78f   :  { %1947 = vrsqrt.f32 %v815_v27  ;;  %vm823_vm15 = vweird.f32 %v815_v27 }
 0x792   :  { %v812_v29 = vpop.xlane.xlu1 %811 }
 0x793   :  { %v814_v30 = vmul.f32 %v812_v29, %v2254_v15 }
 0x795   :  { %v1948_v31 = vpop.eup %1947  ;;  %v816_v32 = vadd.f32 1e-05, %v814_v30 }
 0x796   :  { %v818_v33 = vmul.f32 %v1948_v31, %v815_v27  ;;  %vm824_vm14 = vweird.f32 %v1948_v31 }
 0x797   :  { %1949 = vrsqrt.f32 %v816_v32  ;;  %vm825_vm6 = vmor %vm823_vm15, %vm824_vm14  ;;  %vm833_vm8 = vweird.f32 %v816_v32 }
 0x798   :  { %v819_v34 = vmul.f32 %v1948_v31, %v818_v33 }
 0x79a   :  { %v820_v35 = vmul.f32 0.5, %v819_v34 }
 0x79c   :  { %v821_v36 = vsub.f32 1.5, %v820_v35 }
 0x79d   :  { %v1950_v37 = vpop.eup %1949 }
 0x79e   :  { %v822_v12 = vmul.f32 %v1948_v31, %v821_v36  ;;  %v828_v38 = vmul.f32 %v1950_v37, %v816_v32  ;;  %vm834_vm7 = vweird.f32 %v1950_v37 }
 0x79f   :  { %vm835_vm9 = vmor %vm833_vm8, %vm834_vm7 }
 0x7a0   :  { %v829_v39 = vmul.f32 %v1950_v37, %v828_v38  ;;  %v826_v40 = vsel %vm825_vm6, %v1948_v31, %v822_v12 }
 0x7a1   :  { %v837_v44 = vmul.f32 %v826_v40, %v803_v16 }
 0x7a2   :  { %v830_v41 = vmul.f32 0.5, %v829_v39 }
 0x7a3   :  { %v842_v48 = vmul.f32 %v1897_v43, %v837_v44 }
 0x7a4   :  { %v831_v42 = vsub.f32 1.5, %v830_v41 }
 0x7a5   :  { %v2314_v51 = vadd.f32 %v1898_v47, %v842_v48 }
 0x7a6   :  { %v832_v45 = vmul.f32 %v1950_v37, %v831_v42 }
 0x7a8   :  { %v836_v46 = vsel %vm835_vm9, %v1950_v37, %v832_v45 }
 0x7a9   :  { %v838_v49 = vmul.f32 %v836_v46, %v804_v20 }
 0x7ab   :  { %v843_v50 = vmul.f32 %v1897_v43, %v838_v49 }
 0x7ad   :  { %v2316_v52 = vadd.f32 %v1898_v47, %v843_v50 }
 0x7af   :  { %v849_v53 = vpack.c.bf16 %v2316_v52, %v2314_v51 }
 0x7b1   :  { %1786 = vmatmul.msk.bf16.vlgmr.msrb.gmra.mxu2 %vm79_vm0, %v849_v53 }
 0x834   :  { %v891_v55 = vpop.f32.mrf.mxu2 }
 0x835   :  { %v892_v56 = vadd.f32 %v1899_v54, %v891_v55 }
 0x837   :  { %v896_v57 = vmul.f32 0.35355338, %v892_v56  ;;  %v900_v58 = vpack.c.bf16 %v892_v56, %v892_v56 }
 0x839   :  { %v898_v59 = vpack.c.bf16 %v896_v57, %v896_v57  ;;  %v903_v60 = vunpack.c.l.b16 %v900_v58 }
 0x83b   :  { %v2324_v61 = vpack.c.b16 %v903_v60, %v903_v60  ;;  %v961_v62 = vunpack.c.l.b16 %v898_v59 }
 0x83c   :  { %v893_v63 = vpop.f32.mrf.mxu2 }
 0x83d   :  { %v894_v0 = vadd.f32 %v1899_v54, %v893_v63  ;;  %905 = vrot.lane.b32.xlu1 %v2324_v61, %s1995_s0  ;;  %965 = vrot.lane.b32.xlu2 %v2324_v61, %s1998_s30  ;;  %v962_v1 = vpack.c.b16 %v961_v62, %v961_v62 }
 0x83f   :  { %v897_v4 = vmul.f32 0.35355338, %v894_v0  ;;  %963 = vrot.lane.b32.xlu0 %v962_v1, %s1997_s29  ;;  %v901_v5 = vpack.c.bf16 %v894_v0, %v894_v0 }
 0x841   :  { %v899_v22 = vpack.c.bf16 %v897_v4, %v897_v4  ;;  %v1147_v7 = vunpack.c.l.b16 %v901_v5 }
 0x843   :  { %v1205_v6 = vunpack.c.l.b16 %v899_v22  ;;  %v2336_v9 = vpack.c.b16 %v1147_v7, %v1147_v7 }
 0x845   :  { %1026 = vrot.lane.b32.xlu1 %v2324_v61, %s1999_s16  ;;  %1085 = vrot.lane.b32.xlu2 %v962_v1, %s1996_s28  ;;  %v1206_v8 = vpack.c.b16 %v1205_v6, %v1205_v6 }
 0x847   :  { %1087 = vrot.lane.b32.xlu0 %v2324_v61, %s2000_s17 }
 0x84d   :  { %1207 = vrot.lane.b32.xlu1 %v1206_v8, %s1997_s29  ;;  %1024 = vrot.lane.b32.xlu2 %v962_v1, %s2001_s18  ;;  %s2571_s29 = smov 48  }
 0x84f   :  { %1209 = vrot.lane.b32.xlu0 %v2336_v9, %s1998_s30  ;;  %s2572_s30 = smov 8  }
 0x855   :  { %1329 = vrot.lane.b32.xlu1 %v1206_v8, %s1996_s28  ;;  %1331 = vrot.lane.b32.xlu2 %v2336_v9, %s2000_s17  ;;  %s2570_s28 = smov 40   ;;  %s2574_s17 = smov 24  }
 0x857   :  { %1149 = vrot.lane.b32.xlu0 %v2336_v9, %s1995_s0  ;;  %s2569_s0 = smov 64  }
 0x85d   :  { %1268 = vrot.lane.b32.xlu2 %v1206_v8, %s2001_s18 }
 0x85f   :  { %1270 = vrot.lane.b32.xlu0 %v2336_v9, %s1999_s16  ;;  %s2573_s16 = smov 16  }
 0x867   :  { %998 = vrot.lane.b32.xlu0 %v2324_v61, %s2568_s2 }
 0x897   :  { %v966_v10 = vpop.permute.xlu2 %965 }
 0x898   :  { %v971_v11 = vsel %vm108_vm1, %v966_v10, 0 }
 0x899   :  { %980 = vmatpush.bf16.xpose.msrb.mxu3 %v971_v11 }
 0x89f   :  { %v1086_v13 = vpop.permute.xlu2 %1085 }
 0x8a7   :  { %v1025_v17 = vpop.permute.xlu2 %1024 }
 0x8af   :  { %v906_v14 = vpop.permute.xlu1 %905  ;;  %v1332_v21 = vpop.permute.xlu2 %1331 }
 0x8b0   :  { %v911_v2 = vsel %vm108_vm1, %v906_v14, 0  ;;  %v1337_v25 = vsel %vm108_vm1, %v1332_v21, 0 }
 0x8b1   :  { %920 = vmatpush.bf16.xpose.msrb.mxu0 %v911_v2  ;;  %v964_v16 = vpop.permute.xlu0 %963 }
 0x8b2   :  { %1789 = vmatmul.msk.bf16.vlgmr.msrb.gmra.mxu3 %vm108_vm1, %v964_v16 }
 0x8b7   :  { %v1027_v18 = vpop.permute.xlu1 %1026  ;;  %v1269_v34 = vpop.permute.xlu2 %1268 }
 0x8b8   :  { %v1032_v3 = vsel %vm108_vm1, %v1027_v18, 0  ;;  %1787 = vmatmul.msk.bf16.vlgmr.msrb.gmra.mxu0 %vm108_vm1, %v898_v59 }
 0x8b9   :  { %1041 = vmatpush.bf16.xpose.msra.mxu0 %v1032_v3  ;;  %v1088_v19 = vpop.permute.xlu0 %1087 }
 0x8ba   :  { %v1093_v20 = vsel %vm108_vm1, %v1088_v19, 0 }
 0x8bb   :  { %1102 = vmatpush.bf16.xpose.msra.mxu3 %v1093_v20 }
 0x8bf   :  { %v1208_v28 = vpop.permute.xlu1 %1207 }
 0x8c1   :  { %v1210_v23 = vpop.permute.xlu0 %1209 }
 0x8c2   :  { %v1215_v24 = vsel %vm108_vm1, %v1210_v23, 0  ;;  %1793 = vmatmul.msk.bf16.vlgmr.msra.gmra.mxu3 %vm108_vm1, %v1086_v13 }
 0x8c3   :  { %1224 = vmatpush.bf16.xpose.msrb.mxu3 %v1215_v24 }
 0x8c7   :  { %v1330_v33 = vpop.permute.xlu1 %1329 }
 0x8c8   :  { %1791 = vmatmul.msk.bf16.vlgmr.msra.gmra.mxu0 %vm108_vm1, %v1025_v17 }
 0x8c9   :  { %v1150_v26 = vpop.permute.xlu0 %1149 }
 0x8ca   :  { %v1155_v27 = vsel %vm108_vm1, %v1150_v26, 0 }
 0x8cb   :  { %1346 = vmatpush.bf16.xpose.msra.mxu3 %v1337_v25  ;;  %1164 = vmatpush.bf16.xpose.msrb.mxu0 %v1155_v27 }
 0x8d1   :  { %v1271_v29 = vpop.permute.xlu0 %1270 }
 0x8d2   :  { %v1276_v30 = vsel %vm108_vm1, %v1271_v29, 0  ;;  %1797 = vmatmul.msk.bf16.vlgmr.msrb.gmra.mxu3 %vm108_vm1, %v1208_v28 }
 0x8d3   :  { %1285 = vmatpush.bf16.xpose.msra.mxu0 %v1276_v30 }
 0x8d8   :  { %1795 = vmatmul.msk.bf16.vlgmr.msrb.gmra.mxu0 %vm108_vm1, %v899_v22 }
 0x8d9   :  { %v999_v31 = vpop.permute.xlu0 %998 }
 0x8da   :  { %v1004_v32 = vsel %vm145_vm2, %v999_v31, 0 }
 0x8db   :  { %1013 = vmatpush.bf16.msra.mxu2 %v1004_v32 }
 0x8e2   :  { %1801 = vmatmul.msk.bf16.vlgmr.msra.gmra.mxu3 %vm108_vm1, %v1330_v33 }
 0x8e8   :  { %1799 = vmatmul.msk.bf16.vlgmr.msra.gmra.mxu0 %vm108_vm1, %v1269_v34 }
 0x935   :  { %v922_v35 = vpop.f32.mrf.mxu0  ;;  %v982_v36 = vpop.f32.mrf.mxu3 }
 0x936   :  { %v986_v37 = vsel %vm108_vm1, %v982_v36, -inf  ;;  %v926_v12 = vsel %vm108_vm1, %v922_v35, -inf }
 0x937   :  { %987 = vmax.xlane.f32.xlu1 %v986_v37  ;;  %927 = vmax.xlane.f32.xlu0 %v926_v12 }
 0x93d   :  { %v924_v38 = vpop.f32.mrf.mxu0  ;;  %v984_v39 = vpop.f32.mrf.mxu3 }
 0x945   :  { %v2371_v40 = vpop.f32.mrf.mxu0  ;;  %v2373_v41 = vpop.f32.mrf.mxu3 }
 0x946   :  { %v1108_v42 = vsel %vm108_vm1, %v2373_v41, -inf  ;;  %v1047_v43 = vsel %vm108_vm1, %v2371_v40, -inf }
 0x947   :  { %1109 = vmax.xlane.f32.xlu2 %v1108_v42  ;;  %1048 = vmax.xlane.f32.xlu1 %v1047_v43 }
 0x94d   :  { %v1045_v44 = vpop.f32.mrf.mxu0  ;;  %v1106_v45 = vpop.f32.mrf.mxu3 }
 0x955   :  { %v1166_v46 = vpop.f32.mrf.mxu0  ;;  %v1226_v47 = vpop.f32.mrf.mxu3 }
 0x956   :  { %v1230_v48 = vsel %vm108_vm1, %v1226_v47, -inf  ;;  %v1170_v49 = vsel %vm108_vm1, %v1166_v46, -inf }
 0x957   :  { %1231 = vmax.xlane.f32.xlu0 %v1230_v48  ;;  %1171 = vmax.xlane.f32.xlu2 %v1170_v49 }
 0x95d   :  { %v1168_v50 = vpop.f32.mrf.mxu0  ;;  %v1228_v53 = vpop.f32.mrf.mxu3 }
 0x965   :  { %v1287_v54 = vpop.f32.mrf.mxu0  ;;  %v2381_v55 = vpop.f32.mrf.mxu3 }
 0x966   :  { %v1352_v56 = vsel %vm108_vm1, %v2381_v55, -inf  ;;  %v1291_v57 = vsel %vm108_vm1, %v1287_v54, -inf }
 0x967   :  { %1353 = vmax.xlane.f32.xlu1 %v1352_v56  ;;  %1292 = vmax.xlane.f32.xlu2 %v1291_v57 }
 0x96d   :  { %v1289_v58 = vpop.f32.mrf.mxu0  ;;  %v1350_v59 = vpop.f32.mrf.mxu3 }
 0x97f   :  { %938 = vrot.lane.b32.xlu2 %v2324_v61, %s2569_s0 }
 0x9aa   :  { %v988_v60 = vpop.xlane.xlu1 %987  ;;  %v928_v62 = vpop.xlane.xlu0 %927 }
 0x9ab   :  { %v989_v63 = vsub.f32 %v982_v36, %v988_v60  ;;  %v929_v0 = vsub.f32 %v922_v35, %v928_v62 }
 0x9ad   :  { %v990_v1 = vmul.f32 1.442695, %v989_v63  ;;  %v930_v4 = vmul.f32 1.442695, %v929_v0 }
 0x9af   :  { %1951 = vpow2.f32 %v990_v1 }
 0x9b0   :  { %1953 = vpow2.f32 %v930_v4 }
 0x9b5   :  { %v1952_v22 = vpop.eup %1951 }
 0x9b6   :  { %v1954_v5 = vpop.eup %1953  ;;  %v992_v6 = vsel %vm108_vm1, %v1952_v22, 0.0 }
 0x9b7   :  { %993 = vadd.xlane.f32.xlu0 %v992_v6  ;;  %v932_v7 = vsel %vm108_vm1, %v1954_v5, 0.0 }
 0x9b8   :  { %933 = vadd.xlane.f32.xlu1 %v932_v7 }
 0x9ba   :  { %v1110_v8 = vpop.xlane.xlu2 %1109  ;;  %v1049_v25 = vpop.xlane.xlu1 %1048 }
 0x9bb   :  { %v1050_v27 = vsub.f32 %v2371_v40, %v1049_v25  ;;  %v1111_v30 = vsub.f32 %v2373_v41, %v1110_v8 }
 0x9bd   :  { %v1051_v29 = vmul.f32 1.442695, %v1050_v27  ;;  %v1112_v31 = vmul.f32 1.442695, %v1111_v30 }
 0x9ca   :  { %v1232_v10 = vpop.xlane.xlu0 %1231  ;;  %v1172_v14 = vpop.xlane.xlu2 %1171 }
 0x9cb   :  { %v1233_v11 = vsub.f32 %v1226_v47, %v1232_v10  ;;  %1120 = vrot.lane.b32.xlu0 %v2324_v61, %s2570_s28  ;;  %v1173_v20 = vsub.f32 %v1166_v46, %v1172_v14 }
 0x9cd   :  { %v1234_v13 = vmul.f32 1.442695, %v1233_v11  ;;  %v1174_v23 = vmul.f32 1.442695, %v1173_v20 }
 0x9cf   :  { %1955 = vpow2.f32 %v1234_v13 }
 0x9d1   :  { %1059 = vrot.lane.b32.xlu1 %v2324_v61, %s2571_s29 }
 0x9d5   :  { %v2394_v2 = vpop.eup %1955 }
 0x9d6   :  { %v1236_v16 = vsel %vm108_vm1, %v2394_v2, 0.0 }
 0x9d7   :  { %1237 = vadd.xlane.f32.xlu2 %v1236_v16 }
 0x9d9   :  { %1242 = vrot.lane.b32.xlu1 %v2336_v9, %s2568_s2 }
 0x9da   :  { %v1293_v17 = vpop.xlane.xlu2 %1292  ;;  %v1354_v36 = vpop.xlane.xlu1 %1353 }
 0x9db   :  { %v1294_v18 = vsub.f32 %v1287_v54, %v1293_v17  ;;  %v1355_v44 = vsub.f32 %v2381_v55, %v1354_v36 }
 0x9dd   :  { %v1295_v3 = vmul.f32 1.442695, %v1294_v18 }
 0x9df   :  { %1957 = vpow2.f32 %v1295_v3 }
 0x9e0   :  { %1959 = vpow2.f32 %v1174_v23 }
 0x9e1   :  { %1961 = vpow2.f32 %v1051_v29 }
 0x9e2   :  { %v939_v19 = vpop.permute.xlu2 %938  ;;  %1963 = vpow2.f32 %v1112_v31 }
 0x9e3   :  { %v944_v21 = vsel %vm145_vm2, %v939_v19, 0 }
 0x9e4   :  { %953 = vmatpush.bf16.msrb.mxu1 %v944_v21 }
 0x9e5   :  { %v2401_v61 = vpop.eup %1957 }
 0x9e6   :  { %v1297_v24 = vsel %vm108_vm1, %v2401_v61, 0.0  ;;  %v2405_v26 = vpop.eup %1959 }
 0x9e7   :  { %1298 = vadd.xlane.f32.xlu2 %v1297_v24  ;;  %v1176_v28 = vsel %vm108_vm1, %v2405_v26, 0.0  ;;  %v1962_v32 = vpop.eup %1961 }
 0x9e8   :  { %v1053_v33 = vsel %vm108_vm1, %v1962_v32, 0.0  ;;  %v1964_v34 = vpop.eup %1963 }
 0x9e9   :  { %v1114_v35 = vsel %vm108_vm1, %v1964_v34, 0.0 }
 0x9f5   :  { %1177 = vadd.xlane.f32.xlu0 %v1176_v28 }
 0x9ff   :  { %1303 = vrot.lane.b32.xlu2 %v2336_v9, %s2571_s29 }
 0xa03   :  { %1054 = vadd.xlane.f32.xlu1 %v1053_v33 }
 0xa09   :  { %1364 = vrot.lane.b32.xlu0 %v2336_v9, %s2570_s28 }
 0xa0b   :  { %1115 = vadd.xlane.f32.xlu1 %v1114_v35 }
 0xa24   :  { %1182 = vrot.lane.b32.xlu1 %v2336_v9, %s2569_s0  ;;  %v1356_v9 = vmul.f32 1.442695, %v1355_v44 }
 0xa2a   :  { %v994_v37 = vpop.xlane.xlu0 %993 }
 0xa2b   :  { %1965 = vrcp.f32 %v994_v37  ;;  %v934_v12 = vpop.xlane.xlu1 %933 }
 0xa2c   :  { %1967 = vrcp.f32 %v934_v12 }
 0xa2d   :  { %1969 = vpow2.f32 %v1356_v9 }
 0xa31   :  { %v1966_v38 = vpop.eup %1965 }
 0xa32   :  { %v1968_v39 = vpop.eup %1967  ;;  %v996_v40 = vmul.f32 %v1966_v38, %v1952_v22 }
 0xa33   :  { %v936_v41 = vmul.f32 %v1968_v39, %v1954_v5  ;;  %v1970_v49 = vpop.eup %1969 }
 0xa34   :  { %v997_v42 = vpack.c.bf16 %v996_v40, %v996_v40  ;;  %v1358_v54 = vsel %vm108_vm1, %v1970_v49, 0.0 }
 0xa35   :  { %v937_v43 = vpack.c.bf16 %v936_v41, %v936_v41 }
 0xa36   :  { %1790 = vmatmul.msk.bf16.vlgmr.msra.gmra.mxu2 %vm108_vm1, %v997_v42  ;;  %v1869_v42 = vld [vmem:[%s2542_s3 + $0x18] sm:$0xff] }
 0xa37   :  { %1788 = vmatmul.msk.bf16.vlgmr.msrb.gmra.mxu1 %vm108_vm1, %v937_v43  ;;  %1417 = vmatpush.bf16.msrb.mxu0 %v1869_v42  ;;  %v1868_v43 = vld [vmem:[%s2542_s3 + $0x10] sm:$0xff]  ;;  %v1903_v42 = vld [vmem:[%s2545_s8 + $0x1] ss:$0 sm:$0xff] }
 0xa3b   :  { %1418 = vmatpush.bf16.msrb.mxu0 %v1868_v43 }
 0xa3d   :  { %v1121_v45 = vpop.permute.xlu0 %1120 }
 0xa3e   :  { %v1126_v46 = vsel %vm145_vm2, %v1121_v45, 0 }
 0xa3f   :  { %1135 = vmatpush.bf16.msrb.mxu2 %v1126_v46 }
 0xa43   :  { %v1060_v47 = vpop.permute.xlu1 %1059 }
 0xa44   :  { %v1065_v48 = vsel %vm145_vm2, %v1060_v47, 0 }
 0xa45   :  { %1074 = vmatpush.bf16.msra.mxu1 %v1065_v48 }
 0xa4a   :  { %v1238_v62 = vpop.xlane.xlu2 %1237 }
 0xa4b   :  { %v1243_v50 = vpop.permute.xlu1 %1242 }
 0xa4c   :  { %v1248_v53 = vsel %vm145_vm2, %v1243_v50, 0 }
 0xa4d   :  { %1257 = vmatpush.bf16.msra.mxu2 %v1248_v53 }
 0xa4e   :  { %1359 = vadd.xlane.f32.xlu1 %v1358_v54 }
 0xa5a   :  { %v1299_v5 = vpop.xlane.xlu2 %1298 }
 0xa62   :  { %v1304_v10 = vpop.permute.xlu2 %1303 }
 0xa63   :  { %v1309_v17 = vsel %vm145_vm2, %v1304_v10, 0 }
 0xa68   :  { %v1178_v59 = vpop.xlane.xlu0 %1177 }
 0xa76   :  { %v1055_v56 = vpop.xlane.xlu1 %1054 }
 0xa77   :  { %1971 = vrcp.f32 %v1055_v56 }
 0xa7b   :  { %v1365_v1 = vpop.permute.xlu0 %1364 }
 0xa7c   :  { %v1370_v22 = vsel %vm145_vm2, %v1365_v1, 0 }
 0xa7d   :  { %v1972_v55 = vpop.eup %1971 }
 0xa7e   :  { %v1057_v57 = vmul.f32 %v1972_v55, %v1962_v32  ;;  %v1116_v58 = vpop.xlane.xlu1 %1115 }
 0xa7f   :  { %1973 = vrcp.f32 %v1116_v58 }
 0xa80   :  { %v1058_v60 = vpack.c.bf16 %v1057_v57, %v1057_v57  ;;  %1975 = vrcp.f32 %v1238_v62 }
 0xa81   :  { %1977 = vrcp.f32 %v1178_v59 }
 0xa82   :  { %1792 = vmatmul.msk.bf16.vlgmr.msra.gmra.mxu1 %vm108_vm1, %v1058_v60  ;;  %1979 = vrcp.f32 %v1299_v5 }
 0xa85   :  { %v1974_v63 = vpop.eup %1973 }
 0xa86   :  { %v1118_v0 = vmul.f32 %v1974_v63, %v1964_v34  ;;  %v1976_v6 = vpop.eup %1975 }
 0xa87   :  { %v1978_v7 = vpop.eup %1977  ;;  %v1240_v8 = vmul.f32 %v1976_v6, %v2394_v2 }
 0xa88   :  { %v1119_v4 = vpack.c.bf16 %v1118_v0, %v1118_v0  ;;  %v1180_v11 = vmul.f32 %v1978_v7, %v2405_v26  ;;  %v1980_v3 = vpop.eup %1979 }
 0xa89   :  { %v1241_v16 = vpack.c.bf16 %v1240_v8, %v1240_v8  ;;  %v1301_v2 = vmul.f32 %v1980_v3, %v2401_v61 }
 0xa8a   :  { %1794 = vmatmul.msk.bf16.vlgmr.msrb.gmra.mxu2 %vm108_vm1, %v1119_v4  ;;  %v1181_v18 = vpack.c.bf16 %v1180_v11, %v1180_v11  ;;  %v1870_v11 = vld [vmem:[%s2546_s7 + $0x10] sm:$0xff] }
 0xa8b   :  { %1379 = vmatpush.bf16.msrb.mxu2 %v1370_v22  ;;  %v1302_v19 = vpack.c.bf16 %v1301_v2, %v1301_v2 }
 0xa96   :  { %v1183_v13 = vpop.permute.xlu1 %1182 }
 0xa97   :  { %v1188_v14 = vsel %vm145_vm2, %v1183_v13, 0 }
 0xa98   :  { %1197 = vmatpush.bf16.msrb.mxu1 %v1188_v14 }
 0xa9a   :  { %1798 = vmatmul.msk.bf16.vlgmr.msra.gmra.mxu2 %vm108_vm1, %v1241_v16 }
 0xa9b   :  { %1796 = vmatmul.msk.bf16.vlgmr.msrb.gmra.mxu1 %vm108_vm1, %v1181_v18 }
 0xa9c   :  { %1318 = vmatpush.bf16.msra.mxu1 %v1309_v17 }
 0xaab   :  { %1800 = vmatmul.msk.bf16.vlgmr.msra.gmra.mxu1 %vm108_vm1, %v1302_v19 }
 0xab4   :  { %v955_v20 = vpop.f32.mrf.mxu1 }
 0xab5   :  { %959 = vst.msk [vmem:[#allocation2] sm:$0xff] %vm108_vm1, %v955_v20 }
 0xab9   :  { %v1015_v21 = vpop.f32.mrf.mxu2 }
 0xaba   :  { %1020 = vrot.lane.b32.xlu0 %v1015_v21, %s2572_s30 }
 0xabc   :  { %v957_v23 = vpop.f32.mrf.mxu1 }
 0xac1   :  { %v1360_v24 = vpop.xlane.xlu1 %1359  ;;  %v1017_v25 = vpop.f32.mrf.mxu2 }
 0xac2   :  { %1981 = vrcp.f32 %v1360_v24 }
 0xac8   :  { %v1982_v26 = vpop.eup %1981 }
 0xac9   :  { %v1362_v27 = vmul.f32 %v1982_v26, %v1970_v49  ;;  %v1900_v49 = vld [vmem:[%s2541_s4 + $0x1] ss:$0 sm:$0xff] }
 0xacb   :  { %v1363_v28 = vpack.c.bf16 %v1362_v27, %v1362_v27 }
 0xacd   :  { %1802 = vmatmul.msk.bf16.vlgmr.msrb.gmra.mxu2 %vm108_vm1, %v1363_v28  ;;  %v1901_v28 = vld [vmem:[%s2543_s5 + $0x1] ss:$0 sm:$0xff] }
 0xaff   :  { %v1076_v29 = vpop.f32.mrf.mxu1 }
 0xb00   :  { %1081 = vrot.lane.b32.xlu2 %v1076_v29, %s2573_s16 }
 0xb07   :  { %v1078_v61 = vpop.f32.mrf.mxu1 }
 0xb0d   :  { %v1137_v30 = vpop.f32.mrf.mxu2 }
 0xb0e   :  { %1142 = vrot.lane.b32.xlu1 %v1137_v30, %s2574_s17 }
 0xb15   :  { %v1139_v31 = vpop.f32.mrf.mxu2 }
 0xb16   :  { %v1902_v31 = vld [vmem:[%s2544_s6 + $0x1] ss:$0 sm:$0xff] }
 0xb18   :  { %v1199_v32 = vpop.f32.mrf.mxu1 }
 0xb19   :  { %1203 = vst.msk [vmem:[#allocation2 + $0x8] sm:$0xff] %vm108_vm1, %v1199_v32 }
 0xb1d   :  { %v1259_v33 = vpop.f32.mrf.mxu2 }
 0xb1e   :  { %1264 = vrot.lane.b32.xlu0 %v1259_v33, %s2572_s30 }
 0xb20   :  { %v1201_v34 = vpop.f32.mrf.mxu1 }
 0xb25   :  { %v1261_v35 = vpop.f32.mrf.mxu2 }
 0xb28   :  { %v1320_v36 = vpop.f32.mrf.mxu1 }
 0xb29   :  { %1325 = vrot.lane.b32.xlu0 %v1320_v36, %s2573_s16 }
 0xb2c   :  { %v1021_v37 = vpop.permute.xlu0 %1020 }
 0xb2d   :  { %1023 = vst.msk [vmem:[#allocation2] sm:$0xff] %vm226_vm3, %v1021_v37 }
 0xb30   :  { %v1322_v12 = vpop.f32.mrf.mxu1 }
 0xb31   :  { %v1875_v12 = vld [vmem:[%s2548_s9 + $0x38] sm:$0xff] }
 0xb32   :  { %1577 = vmatpush.bf16.msrb.mxu3 %v1875_v12 }
 0xb50   :  { %v1381_v38 = vpop.f32.mrf.mxu2 }
 0xb51   :  { %1386 = vrot.lane.b32.xlu2 %v1381_v38, %s2574_s17  ;;  %v1874_v38 = vld [vmem:[%s2548_s9 + $0x30] sm:$0xff] }
 0xb52   :  { %1578 = vmatpush.bf16.msrb.mxu3 %v1874_v38 }
 0xb58   :  { %v1383_v39 = vpop.f32.mrf.mxu2 }
 0xb59   :  { %v1873_v39 = vld [vmem:[%s2548_s9 + $0x28] sm:$0xff] }
 0xb5a   :  { %v1082_v40 = vpop.permute.xlu2 %1081  ;;  %1579 = vmatpush.bf16.msrb.mxu3 %v1873_v39 }
 0xb5b   :  { %1084 = vst.msk [vmem:[#allocation2] sm:$0xff] %vm288_vm4, %v1082_v40  ;;  %v1872_v40 = vld [vmem:[%s2548_s9 + $0x20] sm:$0xff] }
 0xb5e   :  { %1580 = vmatpush.bf16.msrb.mxu3 %v1872_v40 }
 0xb80   :  { %v1143_v41 = vpop.permute.xlu1 %1142 }
 0xb81   :  { %1145 = vst.msk [vmem:[#allocation2] sm:$0xff] %vm350_vm5, %v1143_v41 }
 0xb88   :  { %v1390_v9 = vld [vmem:[#allocation2] sm:$0xff] }
 0xb90   :  { %v1265_v44 = vpop.permute.xlu0 %1264 }
 0xb91   :  { %1267 = vst.msk [vmem:[#allocation2 + $0x8] sm:$0xff] %vm226_vm3, %v1265_v44 }
 0xb9b   :  { %v1326_v45 = vpop.permute.xlu0 %1325 }
 0xb9c   :  { %1328 = vst.msk [vmem:[#allocation2 + $0x8] sm:$0xff] %vm288_vm4, %v1326_v45 }
 0xbab   :  { %v1387_v46 = vpop.permute.xlu2 %1386 }
 0xbac   :  { %1389 = vst.msk [vmem:[#allocation2 + $0x8] sm:$0xff] %vm350_vm5, %v1387_v46 }
 0xbb3   :  { %v1391_v47 = vld [vmem:[#allocation2 + $0x8] sm:$0xff] }
 0xbb4   :  { %v1392_v48 = vpack.c.bf16 %v1391_v47, %v1390_v9 }
 0xbb6   :  { %1811 = vmatmul.msk.bf16.vlgmr.msrb.gmra.mxu0 %vm79_vm0, %v1392_v48  ;;  %v1904_v48 = vld [vmem:[%s2547_s10 + $0x1] ss:$0 sm:$0xff] }
 0xc33   :  { %v1420_v50 = vpop.f32.mrf.mxu0 }
 0xc34   :  { %v1421_v53 = vadd.f32 %v1900_v49, %v1420_v50 }
 0xc36   :  { %v1425_v54 = vadd.f32 %v1421_v53, %v2314_v51 }
 0xc38   :  { %v1431_v56 = vsel %vm79_vm0, %v1425_v54, 0.0 }
 0xc39   :  { %1432 = vadd.xlane.f32.xlu0 %v1431_v56 }
 0xc3b   :  { %v1422_v55 = vpop.f32.mrf.mxu0 }
 0xc3c   :  { %v1423_v57 = vadd.f32 %v1900_v49, %v1422_v55 }
 0xc3e   :  { %v1426_v58 = vadd.f32 %v1423_v57, %v2316_v52  ;;  %v1871_v52 = vld [vmem:[%s2546_s7 + $0x18] sm:$0xff] }
 0xc3f   :  { %1532 = vmatpush.bf16.msrb.mxu1 %v1871_v52 }
 0xc40   :  { %v1434_v59 = vsel %vm79_vm0, %v1426_v58, 0.0 }
 0xc41   :  { %1435 = vadd.xlane.f32.xlu2 %v1434_v59 }
 0xc43   :  { %1533 = vmatpush.bf16.msrb.mxu1 %v1870_v11 }
 0xcac   :  { %v1433_v60 = vpop.xlane.xlu0 %1432 }
 0xcad   :  { %v1437_v62 = vmul.f32 %v1433_v60, %v2254_v15 }
 0xcaf   :  { %v1439_v63 = vsub.f32 %v1425_v54, %v1437_v62 }
 0xcb1   :  { %v1441_v0 = vmul.f32 %v1439_v63, %v1439_v63 }
 0xcb3   :  { %v1443_v1 = vsel %vm79_vm0, %v1441_v0, 0.0 }
 0xcb4   :  { %v1436_v4 = vpop.xlane.xlu2 %1435  ;;  %1444 = vadd.xlane.f32.xlu1 %v1443_v1 }
 0xcb5   :  { %v1438_v51 = vmul.f32 %v1436_v4, %v2254_v15 }
 0xcb7   :  { %v1440_v22 = vsub.f32 %v1426_v58, %v1438_v51 }
 0xcb9   :  { %v1442_v5 = vmul.f32 %v1440_v22, %v1440_v22 }
 0xcbb   :  { %v1446_v6 = vsel %vm79_vm0, %v1442_v5, 0.0 }
 0xcbc   :  { %1447 = vadd.xlane.f32.xlu2 %v1446_v6 }
 0xd27   :  { %v1445_v7 = vpop.xlane.xlu1 %1444 }
 0xd28   :  { %v1449_v8 = vmul.f32 %v1445_v7, %v2254_v15 }
 0xd2a   :  { %v1451_v10 = vadd.f32 1e-05, %v1449_v8 }
 0xd2c   :  { %1983 = vrsqrt.f32 %v1451_v10  ;;  %vm1459_vm2 = vweird.f32 %v1451_v10 }
 0xd2f   :  { %v1448_v13 = vpop.xlane.xlu2 %1447 }
 0xd30   :  { %v1450_v14 = vmul.f32 %v1448_v13, %v2254_v15 }
 0xd32   :  { %v1984_v16 = vpop.eup %1983  ;;  %v1452_v17 = vadd.f32 1e-05, %v1450_v14 }
 0xd33   :  { %v1454_v18 = vmul.f32 %v1984_v16, %v1451_v10  ;;  %vm1460_vm1 = vweird.f32 %v1984_v16 }
 0xd34   :  { %1985 = vrsqrt.f32 %v1452_v17  ;;  %vm1461_vm3 = vmor %vm1459_vm2, %vm1460_vm1  ;;  %vm1469_vm5 = vweird.f32 %v1452_v17  ;;  %vm1701_vm1 = vcmask 257024  }
 0xd35   :  { %v1455_v3 = vmul.f32 %v1984_v16, %v1454_v18 }
 0xd37   :  { %v1456_v2 = vmul.f32 0.5, %v1455_v3 }
 0xd39   :  { %v1457_v19 = vsub.f32 1.5, %v1456_v2 }
 0xd3a   :  { %v1986_v20 = vpop.eup %1985 }
 0xd3b   :  { %v1458_v21 = vmul.f32 %v1984_v16, %v1457_v19  ;;  %v1464_v23 = vmul.f32 %v1986_v20, %v1452_v17  ;;  %vm1470_vm4 = vweird.f32 %v1986_v20 }
 0xd3c   :  { %vm1471_vm10 = vmor %vm1469_vm5, %vm1470_vm4 }
 0xd3d   :  { %v1465_v24 = vmul.f32 %v1986_v20, %v1464_v23  ;;  %v1462_v25 = vsel %vm1461_vm3, %v1984_v16, %v1458_v21 }
 0xd3e   :  { %v1473_v29 = vmul.f32 %v1462_v25, %v1439_v63  ;;  %v1906_v25 = vld [vmem:[%s2550_s12 + $0x1] ss:$0 sm:$0xff] }
 0xd3f   :  { %v1466_v26 = vmul.f32 0.5, %v1465_v24 }
 0xd40   :  { %v1478_v32 = vmul.f32 %v1901_v28, %v1473_v29 }
 0xd41   :  { %v1467_v27 = vsub.f32 1.5, %v1466_v26 }
 0xd42   :  { %v1483_v35 = vadd.f32 %v1902_v31, %v1478_v32 }
 0xd43   :  { %v1468_v61 = vmul.f32 %v1986_v20, %v1467_v27 }
 0xd45   :  { %v1472_v30 = vsel %vm1471_vm10, %v1986_v20, %v1468_v61  ;;  %v1905_v20 = vld [vmem:[%s2549_s11 + $0x1] ss:$0 sm:$0xff] }
 0xd46   :  { %v1474_v33 = vmul.f32 %v1472_v30, %v1440_v22 }
 0xd48   :  { %v1479_v34 = vmul.f32 %v1901_v28, %v1474_v33 }
 0xd4a   :  { %v1484_v36 = vadd.f32 %v1902_v31, %v1479_v34 }
 0xd4c   :  { %v1485_v37 = vpack.c.bf16 %v1484_v36, %v1483_v35 }
 0xd4e   :  { %1838 = vmatmul.msk.bf16.vlgmr.msrb.gmra.mxu1 %vm79_vm0, %v1485_v37 }
 0xdcb   :  { %v1535_v41 = vpop.f32.mrf.mxu1 }
 0xdcc   :  { %v1536_v43 = vadd.f32 %v1903_v42, %v1535_v41 }
 0xdce   :  { %v1540_v46 = vmax.f32 %v1536_v43, 0.0 }
 0xdd3   :  { %v1537_v44 = vpop.f32.mrf.mxu1 }
 0xdd4   :  { %v1538_v45 = vadd.f32 %v1903_v42, %v1537_v44 }
 0xdd6   :  { %v1541_v9 = vmax.f32 %v1538_v45, 0.0 }
 0xdd8   :  { %v1542_v47 = vpack.c.bf16 %v1541_v9, %v1540_v46 }
 0xdda   :  { %1855 = vmatmul.msk.bf16.vlgmr.msrb.gmra.mxu3 %vm775_vm13, %v1542_v47 }
 0xe5d   :  { %v1582_v49 = vpop.f32.mrf.mxu3 }
 0xe5e   :  { %v1583_v50 = vadd.f32 %v1904_v48, %v1582_v49 }
 0xe60   :  { %v1587_v53 = vadd.f32 %v1583_v50, %v1483_v35 }
 0xe62   :  { %v1589_v54 = vsel %vm79_vm0, %v1587_v53, 0.0 }
 0xe63   :  { %1590 = vadd.xlane.f32.xlu0 %v1589_v54 }
 0xe65   :  { %v1584_v56 = vpop.f32.mrf.mxu3 }
 0xe66   :  { %v1585_v55 = vadd.f32 %v1904_v48, %v1584_v56 }
 0xe68   :  { %v1588_v57 = vadd.f32 %v1585_v55, %v1484_v36 }
 0xe6a   :  { %v1592_v58 = vsel %vm79_vm0, %v1588_v57, 0.0 }
 0xe6b   :  { %1593 = vadd.xlane.f32.xlu2 %v1592_v58 }
 0xed6   :  { %v1591_v59 = vpop.xlane.xlu0 %1590 }
 0xed7   :  { %v1595_v60 = vmul.f32 %v1591_v59, %v2254_v15 }
 0xed9   :  { %v1597_v62 = vsub.f32 %v1587_v53, %v1595_v60  ;;  %v1907_v60 = vld [vmem:[%s2551_s13] ss:$0 sm:$0xff] }
 0xedb   :  { %v1599_v63 = vmul.f32 %v1597_v62, %v1597_v62 }
 0xedd   :  { %v1601_v0 = vsel %vm79_vm0, %v1599_v63, 0.0 }
 0xede   :  { %v1594_v1 = vpop.xlane.xlu2 %1593  ;;  %1602 = vadd.xlane.f32.xlu0 %v1601_v0 }
 0xedf   :  { %v1596_v4 = vmul.f32 %v1594_v1, %v2254_v15 }
 0xee1   :  { %v1598_v51 = vsub.f32 %v1588_v57, %v1596_v4 }
 0xee3   :  { %v1600_v22 = vmul.f32 %v1598_v51, %v1598_v51 }
 0xee5   :  { %v1604_v5 = vsel %vm79_vm0, %v1600_v22, 0.0 }
 0xee6   :  { %1605 = vadd.xlane.f32.xlu2 %v1604_v5 }
 0xf51   :  { %v1603_v6 = vpop.xlane.xlu0 %1602 }
 0xf52   :  { %v1607_v52 = vmul.f32 %v1603_v6, %v2254_v15 }
 0xf54   :  { %v1609_v7 = vadd.f32 1e-05, %v1607_v52 }
 0xf56   :  { %1987 = vrsqrt.f32 %v1609_v7  ;;  %vm1617_vm12 = vweird.f32 %v1609_v7 }
 0xf59   :  { %v1606_v8 = vpop.xlane.xlu2 %1605 }
 0xf5a   :  { %v1608_v10 = vmul.f32 %v1606_v8, %v2254_v15 }
 0xf5c   :  { %v1988_v11 = vpop.eup %1987  ;;  %v1610_v13 = vadd.f32 1e-05, %v1608_v10 }
 0xf5d   :  { %v1612_v14 = vmul.f32 %v1988_v11, %v1609_v7  ;;  %vm1618_vm11 = vweird.f32 %v1988_v11 }
 0xf5e   :  { %1989 = vrsqrt.f32 %v1610_v13  ;;  %vm1619_vm13 = vmor %vm1617_vm12, %vm1618_vm11  ;;  %vm1627_vm15 = vweird.f32 %v1610_v13 }
 0xf5f   :  { %v1613_v16 = vmul.f32 %v1988_v11, %v1612_v14 }
 0xf61   :  { %v1614_v17 = vmul.f32 0.5, %v1613_v16 }
 0xf63   :  { %v1615_v18 = vsub.f32 1.5, %v1614_v17 }
 0xf64   :  { %v1990_v3 = vpop.eup %1989 }
 0xf65   :  { %v1616_v2 = vmul.f32 %v1988_v11, %v1615_v18  ;;  %v1622_v19 = vmul.f32 %v1990_v3, %v1610_v13  ;;  %vm1628_vm14 = vweird.f32 %v1990_v3 }
 0xf66   :  { %vm1629_vm6 = vmor %vm1627_vm15, %vm1628_vm14 }
 0xf67   :  { %v1623_v21 = vmul.f32 %v1990_v3, %v1622_v19  ;;  %v1620_v23 = vsel %vm1619_vm13, %v1988_v11, %v1616_v2 }
 0xf68   :  { %v1631_v24 = vmul.f32 %v1620_v23, %v1597_v62 }
 0xf69   :  { %v1624_v26 = vmul.f32 0.5, %v1623_v21 }
 0xf6a   :  { %v1636_v27 = vmul.f32 %v1905_v20, %v1631_v24 }
 0xf6b   :  { %v1625_v28 = vsub.f32 1.5, %v1624_v26 }
 0xf6c   :  { %v1641_v29 = vadd.f32 %v1906_v25, %v1636_v27 }
 0xf6d   :  { %v1626_v61 = vmul.f32 %v1990_v3, %v1625_v28 }
 0xf6e   :  { %v1645_v30 = vsel %vm79_vm0, %v1641_v29, 0.0 }
 0xf6f   :  { %1646 = vadd.xlane.f32.xlu0 %v1645_v30  ;;  %v1630_v31 = vsel %vm1629_vm6, %v1990_v3, %v1626_v61 }
 0xf70   :  { %v1632_v32 = vmul.f32 %v1630_v31, %v1598_v51 }
 0xf72   :  { %v1637_v33 = vmul.f32 %v1905_v20, %v1632_v32 }
 0xf74   :  { %v1642_v34 = vadd.f32 %v1906_v25, %v1637_v33 }
 0xf76   :  { %v1648_v35 = vsel %vm79_vm0, %v1642_v34, 0.0 }
 0xf77   :  { %1649 = vadd.xlane.f32.xlu1 %v1648_v35 }
 0xfe2   :  { %v1647_v36 = vpop.xlane.xlu0 %1646 }
 0xfe3   :  { %v1651_v37 = vmul.f32 %v1647_v36, %v2254_v15 }
 0xfe5   :  { %v1653_v12 = vsub.f32 %v1641_v29, %v1651_v37 }
 0xfe7   :  { %v1655_v38 = vmul.f32 %v1653_v12, %v1653_v12 }
 0xfe9   :  { %v1657_v39 = vsel %vm79_vm0, %v1655_v38, 0.0 }
 0xfea   :  { %v1650_v40 = vpop.xlane.xlu1 %1649  ;;  %1658 = vadd.xlane.f32.xlu2 %v1657_v39 }
 0xfeb   :  { %v1652_v41 = vmul.f32 %v1650_v40, %v2254_v15 }
 0xfed   :  { %v1654_v42 = vsub.f32 %v1642_v34, %v1652_v41 }
 0xfef   :  { %v1656_v43 = vmul.f32 %v1654_v42, %v1654_v42 }
 0xff1   :  { %v1660_v44 = vsel %vm79_vm0, %v1656_v43, 0.0 }
 0xff2   :  { %1661 = vadd.xlane.f32.xlu0 %v1660_v44 }
0x105d   :  { %v1659_v45 = vpop.xlane.xlu2 %1658 }
0x105e   :  { %v1663_v46 = vmul.f32 %v1659_v45, %v2254_v15 }
0x1060   :  { %v1665_v9 = vadd.f32 1e-05, %v1663_v46 }
0x1062   :  { %1991 = vrsqrt.f32 %v1665_v9  ;;  %vm1673_vm0 = vweird.f32 %v1665_v9 }
0x1065   :  { %v1662_v47 = vpop.xlane.xlu0 %1661 }
0x1066   :  { %v1664_v48 = vmul.f32 %v1662_v47, %v2254_v15  ;;  %v1908_v15 = vld [vmem:[%s2552_s14] ss:$0 sm:$0xff] }
0x1068   :  { %v1992_v49 = vpop.eup %1991  ;;  %v1666_v50 = vadd.f32 1e-05, %v1664_v48 }
0x1069   :  { %v1668_v53 = vmul.f32 %v1992_v49, %v1665_v9  ;;  %vm1674_vm7 = vweird.f32 %v1992_v49 }
0x106a   :  { %1993 = vrsqrt.f32 %v1666_v50  ;;  %vm1675_vm8 = vmor %vm1673_vm0, %vm1674_vm7  ;;  %vm1683_vm2 = vweird.f32 %v1666_v50 }
0x106b   :  { %v1669_v54 = vmul.f32 %v1992_v49, %v1668_v53 }
0x106d   :  { %v1670_v56 = vmul.f32 0.5, %v1669_v54 }
0x106f   :  { %v1671_v55 = vsub.f32 1.5, %v1670_v56 }
0x1070   :  { %v1994_v57 = vpop.eup %1993 }
0x1071   :  { %v1672_v58 = vmul.f32 %v1992_v49, %v1671_v55  ;;  %v1678_v59 = vmul.f32 %v1994_v57, %v1666_v50  ;;  %vm1684_vm9 = vweird.f32 %v1994_v57 }
0x1072   :  { %vm1685_vm3 = vmor %vm1683_vm2, %vm1684_vm9 }
0x1073   :  { %v1676_v62 = vsel %vm1675_vm8, %v1992_v49, %v1672_v58  ;;  %v1679_v63 = vmul.f32 %v1994_v57, %v1678_v59 }
0x1074   :  { %v1687_v0 = vmul.f32 %v1676_v62, %v1653_v12 }
0x1075   :  { %v1680_v1 = vmul.f32 0.5, %v1679_v63 }
0x1076   :  { %v1692_v4 = vmul.f32 %v1907_v60, %v1687_v0 }
0x1077   :  { %v1681_v51 = vsub.f32 1.5, %v1680_v1 }
0x1078   :  { %v1697_v22 = vadd.f32 %v1908_v15, %v1692_v4 }
0x1079   :  { %v1682_v5 = vmul.f32 %v1994_v57, %v1681_v51 }
0x107a   :  { %v1699_v6 = vpack.c.bf16 %v1697_v22, %v1697_v22 }
0x107b   :  { %v1686_v52 = vsel %vm1685_vm3, %v1994_v57, %v1682_v5 }
0x107c   :  { %1702 = vst.msk [vmem:[%s2553_s15] sm:$0xf] %vm1701_vm1, %v1699_v6  ;;  %v1688_v7 = vmul.f32 %v1686_v52, %v1654_v42 }
0x107e   :  { %v1693_v8 = vmul.f32 %v1907_v60, %v1688_v7 }
0x1080   :  { %v1698_v10 = vadd.f32 %v1908_v15, %v1693_v8 }
0x1082   :  { %v1700_v11 = vpack.c.bf16 %v1698_v10, %v1698_v10 }
0x1084   :  { %1703 = vst.msk [vmem:[%s2553_s15 + $0x4] sm:$0xf] %vm1701_vm1, %v1700_v11 }

// kernel: seq2seq_transformer_forward.4
= control target key start
LH: loop header
LB: loop body
LE: loop exit
PB: predicated region body
PF: predicated region fallthrough
CT: control target
= control target key end

     0   :  { %vm96_vm0 = vcmask 261120   ;;  %s4385_s21 = smov 104   ;;  %s4391_s22 = smov 88   ;;  %vm125_vm1 = vcmask 64512   ;;  %vm162_vm2 = vcmask 1043456   ;;  %vm243_vm3 = vcmask 130112   ;;  %s4339_s2 = inlined_call_operand.vmem [shape: bf16[2,32,96], index: 2, kind: input, shape index: {}]   ;;  %s4340_s0 = inlined_call_operand.vmem [shape: f32[16,32], index: 0, kind: input, shape index: {}]   ;;  %s4341_s3 = inlined_call_operand.vmem [shape: f32[2,1,96], index: 3, kind: input, shape index: {}]   ;;  %s4342_s5 = inlined_call_operand.vmem [shape: f32[2,1,32], index: 5, kind: input, shape index: {}]   ;;  %s4343_s4 = inlined_call_operand.vmem [shape: bf16[2,32,32], index: 4, kind: input, shape index: {}]   ;;  %s4344_s6 = inlined_call_operand.vmem [shape: f32[2,1,32], index: 6, kind: input, shape index: {}]   ;;  %s4345_s8 = inlined_call_operand.vmem [shape: bf16[2,32,96], index: 8, kind: input, shape index: {}]   ;;  %s4346_s7 = inlined_call_operand.vmem [shape: f32[2,1,32], index: 7, kind: input, shape index: {}]   ;;  %s4347_s9 = inlined_call_operand.vmem [shape: f32[2,1,96], index: 9, kind: input, shape index: {}]   ;;  %s4348_s1 = inlined_call_operand.vmem [shape: bf16[16,32], index: 1, kind: input, shape index: {}]   ;;  %s4349_s11 = inlined_call_operand.vmem [shape: f32[2,1,32], index: 11, kind: input, shape index: {}]   ;;  %s4350_s10 = inlined_call_operand.vmem [shape: bf16[2,32,32], index: 10, kind: input, shape index: {}]   ;;  %s4351_s12 = inlined_call_operand.vmem [shape: f32[2,1,32], index: 12, kind: input, shape index: {}]   ;;  %s4352_s13 = inlined_call_operand.vmem [shape: f32[2,1,32], index: 13, kind: input, shape index: {}]   ;;  %s4353_s15 = inlined_call_operand.vmem [shape: f32[2,1,64], index: 15, kind: input, shape index: {}]   ;;  %s4354_s14 = inlined_call_operand.vmem [shape: bf16[2,32,64], index: 14, kind: input, shape index: {}]   ;;  %s4355_s17 = inlined_call_operand.vmem [shape: f32[2,1,32], index: 17, kind: input, shape index: {}]   ;;  %s4356_s16 = inlined_call_operand.vmem [shape: bf16[2,64,32], index: 16, kind: input, shape index: {}]   ;;  %s4357_s18 = inlined_call_operand.vmem [shape: f32[2,1,32], index: 18, kind: input, shape index: {}]   ;;  %s4358_s19 = inlined_call_operand.vmem [shape: f32[2,1,32], index: 19, kind: input, shape index: {}]   ;;  %s4359_s20 = inlined_call_operand.vmem [shape: bf16[16,32], index: 20, kind: output, shape index: {}]  }
   0x1   :  { %4396 = sst [smem:[#allocation3_spill]] %s4339_s2  ;;  %s4389_s2 = smov 96   ;;  %vm305_vm4 = vcmask 195712   ;;  %vm367_vm5 = vcmask 261312  }
   0x2   :  { %4397 = sst [smem:[#allocation4_spill]] %s4340_s0  ;;  %s4387_s0 = smov 120  }
   0x3   :  { %4398 = sst [smem:[#allocation5_spill]] %s4341_s3  ;;  %s4381_s24 = smov 80  }
   0x4   :  { %4399 = sst [smem:[#allocation6_spill]] %s4342_s5  ;;  %s4379_s3 = smov 72  }
   0x5   :  { %4400 = sst [smem:[#allocation7_spill]] %s4343_s4  ;;  %s4383_s25 = smov 112  }
   0x6   :  { %4401 = sst [smem:[#allocation8_spill]] %s4351_s12  ;;  %s4371_s5 = smov 56  }
   0x7   :  { %4402 = sst [smem:[#allocation9_spill]] %s4352_s13  ;;  %s4365_s27 = smov 48  }
   0x8   :  { %4403 = sst [smem:[#allocation10_spill]] %s4359_s20  ;;  %s4369_s28 = smov 40  }
   0x9   :  { %s4404_s23 = sld [smem:[#allocation3_spill]]  ;;  %s4373_s4 = smov 16  }
   0xa   :  { %s4405_s26 = sld [smem:[#allocation4_spill]]  ;;  %s4377_s29 = smov 8  }
   0xb   :  { %s4406_s30 = sld [smem:[#allocation5_spill]]  ;;  %s4416_s20 = smov 120  }
   0xf   :  { %v3217_v0 = vld [vmem:[%s4404_s23 + $0x8] sm:$0xff]  ;;  %v3216_v1 = vld [vmem:[%s4404_s23] sm:$0xff] }
  0x10   :  { %106 = vmatpush.bf16.msra.mxu0 %v3217_v0  ;;  %v3567_v2 = vld [vmem:[%s4405_s26] sm:$0xff]  ;;  %v3572_v3 = vld [vmem:[%s4405_s26 + $0x8] sm:$0xff]  ;;  %s4367_s26 = smov 64  }
  0x11   :  { %v70_v4 = vpack.c.bf16 %v3572_v3, %v3567_v2  ;;  %v3259_v5 = vld [vmem:[%s4406_s30] ss:$0 sm:$0xff] }
  0x14   :  { %107 = vmatpush.bf16.msra.mxu0 %v3216_v1 }
  0x17   :  { %2989 = vmatmul.msk.bf16.vlgmr.msra.gmra.mxu0 %vm96_vm0, %v70_v4 }
  0x94   :  { %v109_v6 = vpop.f32.mrf.mxu0 }
  0x95   :  { %v110_v7 = vadd.f32 %v3259_v5, %v109_v6 }
  0x97   :  { %v114_v8 = vmul.f32 0.35355338, %v110_v7  ;;  %v118_v9 = vpack.c.bf16 %v110_v7, %v110_v7 }
  0x99   :  { %v116_v10 = vpack.c.bf16 %v114_v8, %v114_v8  ;;  %v121_v11 = vunpack.c.l.b16 %v118_v9 }
  0x9b   :  { %v3580_v12 = vpack.c.b16 %v121_v11, %v121_v11  ;;  %v181_v13 = vunpack.c.l.b16 %v116_v10 }
  0x9c   :  { %v111_v14 = vpop.f32.mrf.mxu0 }
  0x9d   :  { %v112_v15 = vadd.f32 %v3259_v5, %v111_v14  ;;  %123 = vrot.lane.b32.xlu0 %v3580_v12, %s4389_s2  ;;  %v182_v16 = vpack.c.b16 %v181_v13, %v181_v13 }
  0x9f   :  { %307 = vrot.lane.b32.xlu2 %v182_v16, %s4385_s21  ;;  %183 = vrot.lane.b32.xlu1 %v182_v16, %s4387_s0  ;;  %v115_v17 = vmul.f32 0.35355338, %v112_v15  ;;  %v119_v18 = vpack.c.bf16 %v112_v15, %v112_v15 }
  0xa1   :  { %v117_v19 = vpack.c.bf16 %v115_v17, %v115_v17  ;;  %v370_v20 = vunpack.c.l.b16 %v119_v18 }
  0xa3   :  { %v428_v21 = vunpack.c.l.b16 %v117_v19  ;;  %v3592_v22 = vpack.c.b16 %v370_v20, %v370_v20 }
  0xa5   :  { %185 = vrot.lane.b32.xlu0 %v3580_v12, %s4391_s22  ;;  %v429_v23 = vpack.c.b16 %v428_v21, %v428_v21 }
  0xa7   :  { %247 = vrot.lane.b32.xlu2 %v3580_v12, %s4381_s24  ;;  %309 = vrot.lane.b32.xlu1 %v3580_v12, %s4379_s3 }
  0xad   :  { %432 = vrot.lane.b32.xlu0 %v3592_v22, %s4391_s22 }
  0xaf   :  { %430 = vrot.lane.b32.xlu2 %v429_v23, %s4387_s0  ;;  %245 = vrot.lane.b32.xlu1 %v182_v16, %s4383_s25 }
  0xb5   :  { %372 = vrot.lane.b32.xlu0 %v3592_v22, %s4389_s2 }
  0xb7   :  { %552 = vrot.lane.b32.xlu2 %v429_v23, %s4385_s21  ;;  %554 = vrot.lane.b32.xlu1 %v3592_v22, %s4379_s3  ;;  %s4410_s3 = smov 72  }
  0xbd   :  { %493 = vrot.lane.b32.xlu0 %v3592_v22, %s4381_s24  ;;  %s4409_s24 = smov 80  }
  0xbf   :  { %491 = vrot.lane.b32.xlu1 %v429_v23, %s4383_s25 }
  0xc7   :  { %218 = vrot.lane.b32.xlu1 %v3580_v12, %s4371_s5 }
  0xf9   :  { %v308_v24 = vpop.permute.xlu2 %307 }
 0x101   :  { %v248_v25 = vpop.permute.xlu2 %247 }
 0x102   :  { %v253_v26 = vsel %vm125_vm1, %v248_v25, 0 }
 0x103   :  { %262 = vmatpush.bf16.xpose.msrb.mxu0 %v253_v26 }
 0x109   :  { %v431_v43 = vpop.permute.xlu2 %430 }
 0x10f   :  { %v124_v27 = vpop.permute.xlu0 %123 }
 0x110   :  { %v130_v28 = vsel %vm125_vm1, %v124_v27, 0 }
 0x111   :  { %139 = vmatpush.bf16.xpose.msra.mxu1 %v130_v28  ;;  %v184_v29 = vpop.permute.xlu1 %183  ;;  %v553_v45 = vpop.permute.xlu2 %552 }
 0x117   :  { %v186_v30 = vpop.permute.xlu0 %185 }
 0x118   :  { %2990 = vmatmul.msk.bf16.vlgmr.msra.gmra.mxu1 %vm125_vm1, %v116_v10  ;;  %v191_v31 = vsel %vm125_vm1, %v186_v30, 0 }
 0x119   :  { %200 = vmatpush.bf16.xpose.msra.mxu3 %v191_v31  ;;  %v310_v32 = vpop.permute.xlu1 %309 }
 0x11a   :  { %v315_v33 = vsel %vm125_vm1, %v310_v32, 0 }
 0x11f   :  { %v433_v34 = vpop.permute.xlu0 %432 }
 0x120   :  { %v438_v35 = vsel %vm125_vm1, %v433_v34, 0  ;;  %2992 = vmatmul.msk.bf16.vlgmr.msra.gmra.mxu3 %vm125_vm1, %v184_v29 }
 0x121   :  { %324 = vmatpush.bf16.xpose.msrb.mxu3 %v315_v33  ;;  %v246_v36 = vpop.permute.xlu1 %245 }
 0x122   :  { %2994 = vmatmul.msk.bf16.vlgmr.msrb.gmra.mxu0 %vm125_vm1, %v246_v36 }
 0x127   :  { %v373_v37 = vpop.permute.xlu0 %372 }
 0x128   :  { %v378_v38 = vsel %vm125_vm1, %v373_v37, 0 }
 0x129   :  { %447 = vmatpush.bf16.xpose.msra.mxu3 %v438_v35  ;;  %387 = vmatpush.bf16.xpose.msra.mxu0 %v378_v38  ;;  %v555_v39 = vpop.permute.xlu1 %554 }
 0x12a   :  { %v560_v41 = vsel %vm125_vm1, %v555_v39, 0 }
 0x12f   :  { %v494_v40 = vpop.permute.xlu0 %493 }
 0x130   :  { %v499_v42 = vsel %vm125_vm1, %v494_v40, 0  ;;  %2996 = vmatmul.msk.bf16.vlgmr.msrb.gmra.mxu3 %vm125_vm1, %v308_v24 }
 0x131   :  { %569 = vmatpush.bf16.xpose.msrb.mxu3 %v560_v41  ;;  %508 = vmatpush.bf16.xpose.msrb.mxu0 %v499_v42  ;;  %v492_v44 = vpop.permute.xlu1 %491 }
 0x132   :  { %2998 = vmatmul.msk.bf16.vlgmr.msra.gmra.mxu0 %vm125_vm1, %v117_v19 }
 0x139   :  { %v219_v19 = vpop.permute.xlu1 %218 }
 0x13a   :  { %v224_v24 = vsel %vm162_vm2, %v219_v19, 0 }
 0x140   :  { %3000 = vmatmul.msk.bf16.vlgmr.msra.gmra.mxu3 %vm125_vm1, %v431_v43 }
 0x142   :  { %3002 = vmatmul.msk.bf16.vlgmr.msrb.gmra.mxu0 %vm125_vm1, %v492_v44 }
 0x150   :  { %3004 = vmatmul.msk.bf16.vlgmr.msrb.gmra.mxu3 %vm125_vm1, %v553_v45 }
 0x195   :  { %v141_v46 = vpop.f32.mrf.mxu1 }
 0x196   :  { %v145_v47 = vsel %vm125_vm1, %v141_v46, -inf }
 0x197   :  { %146 = vmax.xlane.f32.xlu2 %v145_v47 }
 0x19d   :  { %v143_v48 = vpop.f32.mrf.mxu1 }
 0x19f   :  { %v264_v49 = vpop.f32.mrf.mxu0 }
 0x1a0   :  { %v268_v50 = vsel %vm125_vm1, %v264_v49, -inf }
 0x1a1   :  { %269 = vmax.xlane.f32.xlu2 %v268_v50 }
 0x1a3   :  { %v202_v51 = vpop.f32.mrf.mxu3 }
 0x1a4   :  { %v206_v52 = vsel %vm125_vm1, %v202_v51, -inf }
 0x1a5   :  { %207 = vmax.xlane.f32.xlu0 %v206_v52 }
 0x1a7   :  { %v266_v53 = vpop.f32.mrf.mxu0 }
 0x1ab   :  { %v204_v54 = vpop.f32.mrf.mxu3 }
 0x1af   :  { %v389_v55 = vpop.f32.mrf.mxu0 }
 0x1b0   :  { %v393_v56 = vsel %vm125_vm1, %v389_v55, -inf }
 0x1b1   :  { %394 = vmax.xlane.f32.xlu1 %v393_v56 }
 0x1b3   :  { %v3628_v57 = vpop.f32.mrf.mxu3 }
 0x1b4   :  { %v330_v59 = vsel %vm125_vm1, %v3628_v57, -inf }
 0x1b7   :  { %v391_v58 = vpop.f32.mrf.mxu0 }
 0x1b9   :  { %331 = vmax.xlane.f32.xlu1 %v330_v59  ;;  %157 = vrot.lane.b32.xlu2 %v3580_v12, %s4367_s26 }
 0x1bb   :  { %v328_v60 = vpop.f32.mrf.mxu3 }
 0x1bf   :  { %v510_v61 = vpop.f32.mrf.mxu0 }
 0x1c0   :  { %v514_v62 = vsel %vm125_vm1, %v510_v61, -inf }
 0x1c1   :  { %515 = vmax.xlane.f32.xlu0 %v514_v62 }
 0x1c3   :  { %v3635_v63 = vpop.f32.mrf.mxu3 }
 0x1c4   :  { %v453_v7 = vsel %vm125_vm1, %v3635_v63, -inf }
 0x1c7   :  { %v512_v0 = vpop.f32.mrf.mxu0 }
 0x1cb   :  { %v451_v1 = vpop.f32.mrf.mxu3 }
 0x1d2   :  { %280 = vrot.lane.b32.xlu1 %v3580_v12, %s4365_s27 }
 0x1d3   :  { %v571_v4 = vpop.f32.mrf.mxu3 }
 0x1d4   :  { %v575_v5 = vsel %vm125_vm1, %v571_v4, -inf }
 0x1d5   :  { %576 = vmax.xlane.f32.xlu0 %v575_v5 }
 0x1db   :  { %v573_v6 = vpop.f32.mrf.mxu3 }
 0x1e2   :  { %454 = vmax.xlane.f32.xlu2 %v453_v7 }
 0x20a   :  { %v147_v8 = vpop.xlane.xlu2 %146 }
 0x20b   :  { %v148_v9 = vsub.f32 %v141_v46, %v147_v8 }
 0x20d   :  { %v149_v10 = vmul.f32 1.442695, %v148_v9 }
 0x20f   :  { %3283 = vpow2.f32 %v149_v10 }
 0x214   :  { %v270_v11 = vpop.xlane.xlu2 %269 }
 0x215   :  { %v3642_v13 = vpop.eup %3283  ;;  %v271_v14 = vsub.f32 %v264_v49, %v270_v11 }
 0x216   :  { %v151_v15 = vsel %vm125_vm1, %v3642_v13, 0.0 }
 0x217   :  { %v272_v16 = vmul.f32 1.442695, %v271_v14  ;;  %152 = vadd.xlane.f32.xlu0 %v151_v15 }
 0x218   :  { %v208_v17 = vpop.xlane.xlu0 %207 }
 0x219   :  { %3285 = vpow2.f32 %v272_v16  ;;  %v209_v18 = vsub.f32 %v202_v51, %v208_v17 }
 0x21b   :  { %v210_v20 = vmul.f32 1.442695, %v209_v18 }
 0x21c   :  { %v158_v21 = vpop.permute.xlu2 %157 }
 0x21d   :  { %3287 = vpow2.f32 %v210_v20  ;;  %v164_v23 = vsel %vm162_vm2, %v158_v21, 0 }
 0x21e   :  { %173 = vmatpush.bf16.msra.mxu2 %v164_v23 }
 0x21f   :  { %v3286_v25 = vpop.eup %3285 }
 0x220   :  { %v274_v26 = vsel %vm125_vm1, %v3286_v25, 0.0 }
 0x221   :  { %275 = vadd.xlane.f32.xlu2 %v274_v26 }
 0x222   :  { %233 = vmatpush.bf16.msrb.mxu2 %v224_v24 }
 0x223   :  { %v3649_v27 = vpop.eup %3287 }
 0x224   :  { %v212_v28 = vsel %vm125_vm1, %v3649_v27, 0.0  ;;  %v395_v29 = vpop.xlane.xlu1 %394 }
 0x225   :  { %213 = vadd.xlane.f32.xlu1 %v212_v28  ;;  %v396_v31 = vsub.f32 %v389_v55, %v395_v29 }
 0x227   :  { %v397_v34 = vmul.f32 1.442695, %v396_v31 }
 0x229   :  { %3289 = vpow2.f32 %v397_v34 }
 0x22b   :  { %342 = vrot.lane.b32.xlu0 %v3580_v12, %s4369_s28 }
 0x22c   :  { %v332_v30 = vpop.xlane.xlu1 %331 }
 0x22d   :  { %v333_v36 = vsub.f32 %v3628_v57, %v332_v30 }
 0x22f   :  { %v334_v37 = vmul.f32 1.442695, %v333_v36  ;;  %v3290_v39 = vpop.eup %3289 }
 0x230   :  { %v399_v42 = vsel %vm125_vm1, %v3290_v39, 0.0 }
 0x231   :  { %3291 = vpow2.f32 %v334_v37 }
 0x234   :  { %v516_v35 = vpop.xlane.xlu0 %515 }
 0x235   :  { %v517_v12 = vsub.f32 %v510_v61, %v516_v35 }
 0x237   :  { %v518_v41 = vmul.f32 1.442695, %v517_v12  ;;  %v3292_v46 = vpop.eup %3291 }
 0x238   :  { %v336_v48 = vsel %vm125_vm1, %v3292_v46, 0.0 }
 0x239   :  { %465 = vrot.lane.b32.xlu2 %v3592_v22, %s4371_s5  ;;  %3293 = vpow2.f32 %v518_v41  ;;  %s4407_s5 = sld [smem:[#allocation7_spill]] }
 0x23e   :  { %405 = vrot.lane.b32.xlu1 %v3592_v22, %s4367_s26  ;;  %s4411_s26 = smov 8  }
 0x23f   :  { %v3664_v49 = vpop.eup %3293 }
 0x240   :  { %v520_v51 = vsel %vm125_vm1, %v3664_v49, 0.0 }
 0x244   :  { %v281_v32 = vpop.permute.xlu1 %280 }
 0x245   :  { %v286_v33 = vsel %vm162_vm2, %v281_v32, 0 }
 0x246   :  { %295 = vmatpush.bf16.msrb.mxu1 %v286_v33 }
 0x248   :  { %v577_v38 = vpop.xlane.xlu0 %576 }
 0x249   :  { %v578_v40 = vsub.f32 %v571_v4, %v577_v38 }
 0x24b   :  { %v579_v45 = vmul.f32 1.442695, %v578_v40 }
 0x24d   :  { %3295 = vpow2.f32 %v579_v45 }
 0x253   :  { %v3666_v50 = vpop.eup %3295 }
 0x254   :  { %v581_v53 = vsel %vm125_vm1, %v3666_v50, 0.0 }
 0x255   :  { %400 = vadd.xlane.f32.xlu0 %v399_v42  ;;  %v455_v43 = vpop.xlane.xlu2 %454 }
 0x256   :  { %v456_v44 = vsub.f32 %v3635_v63, %v455_v43 }
 0x258   :  { %v457_v47 = vmul.f32 1.442695, %v456_v44 }
 0x25a   :  { %3297 = vpow2.f32 %v457_v47 }
 0x25d   :  { %337 = vadd.xlane.f32.xlu0 %v336_v48 }
 0x260   :  { %v3298_v52 = vpop.eup %3297 }
 0x261   :  { %v459_v54 = vsel %vm125_vm1, %v3298_v52, 0.0 }
 0x262   :  { %521 = vadd.xlane.f32.xlu2 %v520_v51 }
 0x265   :  { %582 = vadd.xlane.f32.xlu0 %v581_v53 }
 0x268   :  { %460 = vadd.xlane.f32.xlu1 %v459_v54  ;;  %v3219_v54 = vld [vmem:[%s4407_s5 + $0x8] sm:$0xff] }
 0x269   :  { %640 = vmatpush.bf16.msra.mxu0 %v3219_v54  ;;  %v3215_v54 = vld [vmem:[%s4348_s1] sm:$0xff] }
 0x279   :  { %587 = vrot.lane.b32.xlu0 %v3592_v22, %s4369_s28  ;;  %s4412_s28 = smov 16  }
 0x281   :  { %526 = vrot.lane.b32.xlu1 %v3592_v22, %s4365_s27  ;;  %s4375_s27 = smov 24  }
 0x28a   :  { %v153_v55 = vpop.xlane.xlu0 %152 }
 0x28b   :  { %3299 = vrcp.f32 %v153_v55  ;;  %v3218_v55 = vld [vmem:[%s4407_s5] sm:$0xff] }
 0x28c   :  { %641 = vmatpush.bf16.msra.mxu0 %v3218_v55 }
 0x291   :  { %v3300_v56 = vpop.eup %3299 }
 0x292   :  { %v155_v57 = vmul.f32 %v3300_v56, %v3642_v13 }
 0x294   :  { %v276_v58 = vpop.xlane.xlu2 %275  ;;  %v156_v59 = vpack.c.bf16 %v155_v57, %v155_v57 }
 0x295   :  { %3301 = vrcp.f32 %v276_v58 }
 0x296   :  { %2991 = vmatmul.msk.bf16.vlgmr.msra.gmra.mxu2 %vm125_vm1, %v156_v59 }
 0x298   :  { %v214_v60 = vpop.xlane.xlu1 %213 }
 0x299   :  { %3303 = vrcp.f32 %v214_v60 }
 0x29b   :  { %v3302_v61 = vpop.eup %3301 }
 0x29c   :  { %v278_v62 = vmul.f32 %v3302_v61, %v3286_v25  ;;  %v466_v5 = vpop.permute.xlu2 %465 }
 0x29d   :  { %v343_v63 = vpop.permute.xlu0 %342  ;;  %v471_v7 = vsel %vm162_vm2, %v466_v5, 0 }
 0x29e   :  { %v348_v0 = vsel %vm162_vm2, %v343_v63, 0  ;;  %v279_v1 = vpack.c.bf16 %v278_v62, %v278_v62 }
 0x29f   :  { %v3304_v4 = vpop.eup %3303  ;;  %357 = vmatpush.bf16.msra.mxu2 %v348_v0 }
 0x2a0   :  { %2995 = vmatmul.msk.bf16.vlgmr.msrb.gmra.mxu1 %vm125_vm1, %v279_v1  ;;  %v216_v22 = vmul.f32 %v3304_v4, %v3649_v27 }
 0x2a2   :  { %v217_v6 = vpack.c.bf16 %v216_v22, %v216_v22 }
 0x2a6   :  { %2993 = vmatmul.msk.bf16.vlgmr.msrb.gmra.mxu2 %vm125_vm1, %v217_v6 }
 0x2a7   :  { %480 = vmatpush.bf16.msrb.mxu2 %v471_v7 }
 0x2b0   :  { %v406_v8 = vpop.permute.xlu1 %405 }
 0x2b1   :  { %v411_v9 = vsel %vm162_vm2, %v406_v8, 0  ;;  %v3452_v8 = vmov 32.0  }
 0x2b2   :  { %420 = vmatpush.bf16.msra.mxu1 %v411_v9 }
 0x2c8   :  { %v401_v10 = vpop.xlane.xlu0 %400 }
 0x2c9   :  { %3305 = vrcp.f32 %v401_v10 }
 0x2cf   :  { %v3306_v11 = vpop.eup %3305 }
 0x2d0   :  { %v403_v13 = vmul.f32 %v3306_v11, %v3290_v39  ;;  %v338_v14 = vpop.xlane.xlu0 %337  ;;  %v3221_v11 = vld [vmem:[%s4345_s8 + $0x8] sm:$0xff] }
 0x2d1   :  { %3307 = vrcp.f32 %v338_v14 }
 0x2d2   :  { %v404_v15 = vpack.c.bf16 %v403_v13, %v403_v13 }
 0x2d4   :  { %2999 = vmatmul.msk.bf16.vlgmr.msra.gmra.mxu1 %vm125_vm1, %v404_v15 }
 0x2d5   :  { %v522_v23 = vpop.xlane.xlu2 %521 }
 0x2d7   :  { %v3308_v16 = vpop.eup %3307 }
 0x2d8   :  { %v340_v17 = vmul.f32 %v3308_v16, %v3292_v46  ;;  %v583_v21 = vpop.xlane.xlu0 %582 }
 0x2da   :  { %v341_v18 = vpack.c.bf16 %v340_v17, %v340_v17 }
 0x2db   :  { %v461_v19 = vpop.xlane.xlu1 %460 }
 0x2dc   :  { %2997 = vmatmul.msk.bf16.vlgmr.msra.gmra.mxu2 %vm125_vm1, %v341_v18  ;;  %3309 = vrcp.f32 %v461_v19 }
 0x2dd   :  { %3311 = vrcp.f32 %v522_v23 }
 0x2de   :  { %3313 = vrcp.f32 %v583_v21 }
 0x2df   :  { %3315 = vrcp.f32 %v3452_v8 }
 0x2e2   :  { %v3310_v20 = vpop.eup %3309 }
 0x2e3   :  { %v463_v24 = vmul.f32 %v3310_v20, %v3298_v52  ;;  %v3312_v28 = vpop.eup %3311 }
 0x2e4   :  { %v524_v29 = vmul.f32 %v3312_v28, %v3664_v49  ;;  %v3314_v30 = vpop.eup %3313 }
 0x2e5   :  { %v464_v25 = vpack.c.bf16 %v463_v24, %v463_v24  ;;  %v585_v34 = vmul.f32 %v3314_v30, %v3666_v50  ;;  %v3316_v9 = vpop.eup %3315 }
 0x2e6   :  { %v525_v33 = vpack.c.bf16 %v524_v29, %v524_v29  ;;  %v659_v10 = vmul.f32 32.0, %v3316_v9  ;;  %vm663_vm6 = vweird.f32 %v3316_v9 }
 0x2e7   :  { %v586_v35 = vpack.c.bf16 %v585_v34, %v585_v34 }
 0x2e8   :  { %v660_v13 = vsub.f32 1.0, %v659_v10 }
 0x2eb   :  { %v588_v26 = vpop.permute.xlu0 %587 }
 0x2ec   :  { %v593_v27 = vsel %vm162_vm2, %v588_v26, 0  ;;  %3001 = vmatmul.msk.bf16.vlgmr.msrb.gmra.mxu2 %vm125_vm1, %v464_v25 }
 0x2ed   :  { %602 = vmatpush.bf16.msra.mxu2 %v593_v27 }
 0x2f3   :  { %v527_v31 = vpop.permute.xlu1 %526 }
 0x2f4   :  { %v532_v32 = vsel %vm162_vm2, %v527_v31, 0  ;;  %v3263_v31 = vld [vmem:[%s4347_s9] ss:$0 sm:$0xff] }
 0x2f5   :  { %541 = vmatpush.bf16.msrb.mxu1 %v532_v32 }
 0x2f8   :  { %3003 = vmatmul.msk.bf16.vlgmr.msrb.gmra.mxu1 %vm125_vm1, %v525_v33 }
 0x2f9   :  { %748 = vmatpush.bf16.msra.mxu1 %v3221_v11 }
 0x2fc   :  { %3005 = vmatmul.msk.bf16.vlgmr.msra.gmra.mxu2 %vm125_vm1, %v586_v35 }
 0x319   :  { %v175_v36 = vpop.f32.mrf.mxu2 }
 0x31a   :  { %179 = vst.msk [vmem:[#allocation2] sm:$0xff] %vm125_vm1, %v175_v36 }
 0x31d   :  { %v297_v37 = vpop.f32.mrf.mxu1 }
 0x31e   :  { %302 = vrot.lane.b32.xlu0 %v297_v37, %s4373_s4 }
 0x321   :  { %v177_v12 = vpop.f32.mrf.mxu2 }
 0x325   :  { %v299_v38 = vpop.f32.mrf.mxu1 }
 0x329   :  { %v235_v39 = vpop.f32.mrf.mxu2 }
 0x32a   :  { %240 = vrot.lane.b32.xlu0 %v235_v39, %s4377_s29 }
 0x331   :  { %v237_v40 = vpop.f32.mrf.mxu2 }
 0x351   :  { %v422_v41 = vpop.f32.mrf.mxu1 }
 0x352   :  { %426 = vst.msk [vmem:[#allocation2 + $0x8] sm:$0xff] %vm125_vm1, %v422_v41 }
 0x359   :  { %v424_v42 = vpop.f32.mrf.mxu1 }
 0x35f   :  { %v359_v43 = vpop.f32.mrf.mxu2 }
 0x360   :  { %364 = vrot.lane.b32.xlu2 %v359_v43, %s4375_s27 }
 0x367   :  { %v361_v44 = vpop.f32.mrf.mxu2 }
 0x36f   :  { %v482_v45 = vpop.f32.mrf.mxu2 }
 0x370   :  { %487 = vrot.lane.b32.xlu1 %v482_v45, %s4377_s29  ;;  %s4408_s29 = sld [smem:[#allocation6_spill]] }
 0x375   :  { %v543_v46 = vpop.f32.mrf.mxu1 }
 0x376   :  { %v3260_v62 = vld [vmem:[%s4408_s29] ss:$0 sm:$0xff] }
 0x377   :  { %v484_v47 = vpop.f32.mrf.mxu2 }
 0x378   :  { %548 = vrot.lane.b32.xlu1 %v543_v46, %s4373_s4  ;;  %v3261_v46 = vld [vmem:[%s4344_s6] ss:$0 sm:$0xff]  ;;  %s4422_s4 = smov 48  }
 0x37d   :  { %v545_v48 = vpop.f32.mrf.mxu1 }
 0x37f   :  { %v604_v49 = vpop.f32.mrf.mxu2 }
 0x380   :  { %609 = vrot.lane.b32.xlu0 %v604_v49, %s4375_s27  ;;  %s4413_s27 = smov 24  }
 0x387   :  { %v606_v50 = vpop.f32.mrf.mxu2 }
 0x390   :  { %v303_v51 = vpop.permute.xlu0 %302 }
 0x39c   :  { %v241_v52 = vpop.permute.xlu0 %240 }
 0x39d   :  { %244 = vst.msk [vmem:[#allocation2] sm:$0xff] %vm243_vm3, %v241_v52  ;;  %v3262_v52 = vld [vmem:[%s4346_s7] ss:$0 sm:$0xff] }
 0x39e   :  { %306 = vst.msk [vmem:[#allocation2] sm:$0xff] %vm305_vm4, %v303_v51 }
 0x3ba   :  { %v365_v53 = vpop.permute.xlu2 %364 }
 0x3bb   :  { %368 = vst.msk [vmem:[#allocation2] sm:$0xff] %vm367_vm5, %v365_v53 }
 0x3c2   :  { %v613_v59 = vld [vmem:[#allocation2] sm:$0xff] }
 0x3e2   :  { %v488_v56 = vpop.permute.xlu1 %487 }
 0x3e3   :  { %490 = vst.msk [vmem:[#allocation2 + $0x8] sm:$0xff] %vm243_vm3, %v488_v56 }
 0x3ea   :  { %v549_v57 = vpop.permute.xlu1 %548 }
 0x3eb   :  { %551 = vst.msk [vmem:[#allocation2 + $0x8] sm:$0xff] %vm305_vm4, %v549_v57 }
 0x3f2   :  { %v610_v58 = vpop.permute.xlu0 %609 }
 0x3f3   :  { %612 = vst.msk [vmem:[#allocation2 + $0x8] sm:$0xff] %vm367_vm5, %v610_v58 }
 0x3fa   :  { %v614_v60 = vld [vmem:[#allocation2 + $0x8] sm:$0xff] }
 0x3fb   :  { %v615_v61 = vpack.c.bf16 %v614_v60, %v613_v59 }
 0x3fd   :  { %3014 = vmatmul.msk.bf16.vlgmr.msra.gmra.mxu0 %vm96_vm0, %v615_v61 }
 0x47a   :  { %v643_v63 = vpop.f32.mrf.mxu0 }
 0x47b   :  { %v644_v0 = vadd.f32 %v3260_v62, %v643_v63 }
 0x47d   :  { %v648_v1 = vadd.f32 %v644_v0, %v3567_v2  ;;  %v3220_v2 = vld [vmem:[%s4345_s8] sm:$0xff] }
 0x47e   :  { %749 = vmatpush.bf16.msra.mxu1 %v3220_v2 }
 0x47f   :  { %v652_v4 = vsel %vm96_vm0, %v648_v1, 0.0 }
 0x480   :  { %653 = vadd.xlane.f32.xlu1 %v652_v4 }
 0x482   :  { %v645_v22 = vpop.f32.mrf.mxu0 }
 0x483   :  { %v646_v5 = vadd.f32 %v3260_v62, %v645_v22 }
 0x485   :  { %v649_v6 = vadd.f32 %v646_v5, %v3572_v3  ;;  %v661_v3 = vmul.f32 %v3316_v9, %v660_v13 }
 0x487   :  { %v655_v7 = vsel %vm96_vm0, %v649_v6, 0.0  ;;  %v662_v14 = vadd.f32 %v3316_v9, %v661_v3 }
 0x488   :  { %656 = vadd.xlane.f32.xlu0 %v655_v7 }
 0x489   :  { %v3729_v15 = vsel %vm663_vm6, %v3316_v9, %v662_v14 }
 0x49c   :  { %763 = vrot.lane.b32.xlu0 %v3221_v11, %s4389_s2 }
 0x4f3   :  { %v654_v16 = vpop.xlane.xlu1 %653 }
 0x4f4   :  { %v665_v17 = vmul.f32 %v3729_v15, %v654_v16 }
 0x4f6   :  { %v667_v18 = vsub.f32 %v648_v1, %v665_v17 }
 0x4f8   :  { %v669_v19 = vmul.f32 %v667_v18, %v667_v18 }
 0x4fa   :  { %v671_v20 = vsel %vm96_vm0, %v669_v19, 0.0 }
 0x4fb   :  { %v657_v21 = vpop.xlane.xlu0 %656  ;;  %672 = vadd.xlane.f32.xlu2 %v671_v20 }
 0x4fc   :  { %v666_v23 = vmul.f32 %v3729_v15, %v657_v21 }
 0x4fe   :  { %v668_v24 = vsub.f32 %v649_v6, %v666_v23 }
 0x500   :  { %v670_v25 = vmul.f32 %v668_v24, %v668_v24 }
 0x502   :  { %v674_v26 = vsel %vm96_vm0, %v670_v25, 0.0 }
 0x503   :  { %675 = vadd.xlane.f32.xlu1 %v674_v26 }
 0x50e   :  { %v764_v27 = vpop.permute.xlu0 %763 }
 0x50f   :  { %779 = vmatpush.bf16.msra.mxu3 %v764_v27 }
 0x513   :  { %767 = vrot.lane.b32.xlu2 %v3263_v31, %s4389_s2 }
 0x51c   :  { %761 = vrot.lane.b32.xlu1 %v3220_v2, %s4389_s2 }
 0x56e   :  { %v673_v28 = vpop.xlane.xlu2 %672 }
 0x56f   :  { %v677_v29 = vmul.f32 %v673_v28, %v3729_v15 }
 0x571   :  { %v679_v30 = vadd.f32 1e-05, %v677_v29 }
 0x573   :  { %3317 = vrsqrt.f32 %v679_v30  ;;  %vm687_vm8 = vweird.f32 %v679_v30 }
 0x576   :  { %v676_v32 = vpop.xlane.xlu1 %675  ;;  %v768_v61 = vpop.permute.xlu2 %767 }
 0x577   :  { %v678_v33 = vmul.f32 %v676_v32, %v3729_v15 }
 0x579   :  { %v3318_v34 = vpop.eup %3317  ;;  %v680_v35 = vadd.f32 1e-05, %v678_v33 }
 0x57a   :  { %v682_v36 = vmul.f32 %v3318_v34, %v679_v30  ;;  %vm688_vm7 = vweird.f32 %v3318_v34 }
 0x57b   :  { %3319 = vrsqrt.f32 %v680_v35  ;;  %vm689_vm9 = vmor %vm687_vm8, %vm688_vm7  ;;  %vm697_vm11 = vweird.f32 %v680_v35 }
 0x57c   :  { %v683_v37 = vmul.f32 %v3318_v34, %v682_v36 }
 0x57e   :  { %v684_v12 = vmul.f32 0.5, %v683_v37 }
 0x580   :  { %v685_v38 = vsub.f32 1.5, %v684_v12 }
 0x581   :  { %v3320_v39 = vpop.eup %3319 }
 0x582   :  { %v686_v40 = vmul.f32 %v3318_v34, %v685_v38  ;;  %v692_v41 = vmul.f32 %v3320_v39, %v680_v35  ;;  %vm698_vm10 = vweird.f32 %v3320_v39 }
 0x583   :  { %vm699_vm12 = vmor %vm697_vm11, %vm698_vm10 }
 0x584   :  { %v693_v42 = vmul.f32 %v3320_v39, %v692_v41  ;;  %v690_v43 = vsel %vm689_vm9, %v3318_v34, %v686_v40  ;;  %vm1449_vm9 = vcmask 523264  }
 0x585   :  { %v701_v47 = vmul.f32 %v690_v43, %v667_v18 }
 0x586   :  { %v694_v44 = vmul.f32 0.5, %v693_v42 }
 0x587   :  { %v706_v50 = vmul.f32 %v3261_v46, %v701_v47 }
 0x588   :  { %v695_v45 = vsub.f32 1.5, %v694_v44 }
 0x589   :  { %v3751_v56 = vadd.f32 %v3262_v52, %v706_v50 }
 0x58a   :  { %v696_v48 = vmul.f32 %v3320_v39, %v695_v45 }
 0x58c   :  { %v700_v49 = vsel %vm699_vm12, %v3320_v39, %v696_v48 }
 0x58d   :  { %v702_v51 = vmul.f32 %v700_v49, %v668_v24 }
 0x58e   :  { %v762_v53 = vpop.permute.xlu1 %761 }
 0x58f   :  { %v707_v55 = vmul.f32 %v3261_v46, %v702_v51  ;;  %780 = vmatpush.bf16.msra.mxu3 %v762_v53 }
 0x591   :  { %v3753_v57 = vadd.f32 %v3262_v52, %v707_v55 }
 0x592   :  { %3028 = vmatmul.msk.bf16.vlgmr.msra.gmra.mxu3 %vm96_vm0, %v3215_v54 }
 0x593   :  { %v713_v58 = vpack.c.bf16 %v3753_v57, %v3751_v56 }
 0x595   :  { %3023 = vmatmul.msk.bf16.vlgmr.msra.gmra.mxu1 %vm96_vm0, %v713_v58 }
 0x612   :  { %v751_v59 = vpop.f32.mrf.mxu1 }
 0x613   :  { %v752_v60 = vadd.f32 %v3263_v31, %v751_v59 }
 0x615   :  { %v787_v62 = vmul.f32 0.35355338, %v752_v60  ;;  %v782_v63 = vpop.f32.mrf.mxu3 }
 0x616   :  { %v783_v0 = vadd.f32 %v782_v63, %v768_v61 }
 0x617   :  { %v789_v1 = vpack.c.bf16 %v787_v62, %v787_v62 }
 0x618   :  { %v791_v4 = vpack.c.bf16 %v783_v0, %v783_v0 }
 0x619   :  { %v850_v22 = vunpack.c.l.b16 %v789_v1 }
 0x61a   :  { %v797_v5 = vsel %vm125_vm1, %v791_v4, 0  ;;  %v825_v6 = vunpack.c.l.b16 %v791_v4  ;;  %v753_v7 = vpop.f32.mrf.mxu1 }
 0x61b   :  { %806 = vmatpush.bf16.xpose.msrb.mxu2 %v797_v5  ;;  %v851_v8 = vpack.c.b16 %v850_v22, %v850_v22  ;;  %v754_v10 = vadd.f32 %v3263_v31, %v753_v7 }
 0x61c   :  { %v3760_v9 = vpack.c.b16 %v825_v6, %v825_v6 }
 0x61d   :  { %v784_v11 = vpop.f32.mrf.mxu3  ;;  %974 = vrot.lane.b32.xlu2 %v851_v8, %s4385_s21  ;;  %852 = vrot.lane.b32.xlu1 %v851_v8, %s4387_s0  ;;  %v788_v2 = vmul.f32 0.35355338, %v754_v10 }
 0x61e   :  { %v785_v13 = vadd.f32 %v784_v11, %v768_v61  ;;  %854 = vrot.lane.b32.xlu0 %v3760_v9, %s4387_s0 }
 0x61f   :  { %v790_v16 = vpack.c.bf16 %v788_v2, %v788_v2 }
 0x620   :  { %v792_v3 = vpack.c.bf16 %v785_v13, %v785_v13 }
 0x621   :  { %v1092_v18 = vunpack.c.l.b16 %v790_v16 }
 0x622   :  { %v1067_v14 = vunpack.c.l.b16 %v792_v3  ;;  %3029 = vmatmul.msk.bf16.vlgmr.msrb.gmra.mxu2 %vm125_vm1, %v789_v1  ;;  %v1039_v29 = vsel %vm125_vm1, %v792_v3, 0 }
 0x623   :  { %v1093_v19 = vpack.c.b16 %v1092_v18, %v1092_v18 }
 0x624   :  { %v3767_v17 = vpack.c.b16 %v1067_v14, %v1067_v14 }
 0x625   :  { %976 = vrot.lane.b32.xlu1 %v3760_v9, %s4385_s21 }
 0x626   :  { %915 = vrot.lane.b32.xlu0 %v3760_v9, %s4383_s25  ;;  %1157 = vrot.lane.b32.xlu2 %v3767_v17, %s4383_s25 }
 0x62d   :  { %1096 = vrot.lane.b32.xlu1 %v3767_v17, %s4387_s0 }
 0x62e   :  { %1216 = vrot.lane.b32.xlu2 %v1093_v19, %s4385_s21  ;;  %913 = vrot.lane.b32.xlu0 %v851_v8, %s4383_s25 }
 0x635   :  { %1218 = vrot.lane.b32.xlu1 %v3767_v17, %s4385_s21  ;;  %s4420_s21 = smov 40  }
 0x636   :  { %1094 = vrot.lane.b32.xlu0 %v1093_v19, %s4387_s0  ;;  %s4421_s0 = smov 64  }
 0x63e   :  { %1155 = vrot.lane.b32.xlu0 %v1093_v19, %s4383_s25 }
 0x646   :  { %887 = vrot.lane.b32.xlu0 %v3760_v9, %s4391_s22 }
 0x677   :  { %v975_v24 = vpop.permute.xlu2 %974 }
 0x680   :  { %v1158_v30 = vpop.permute.xlu2 %1157 }
 0x681   :  { %v1163_v34 = vsel %vm125_vm1, %v1158_v30, 0 }
 0x688   :  { %v1217_v43 = vpop.permute.xlu2 %1216 }
 0x68f   :  { %v853_v20 = vpop.permute.xlu1 %852 }
 0x690   :  { %v855_v21 = vpop.permute.xlu0 %854 }
 0x691   :  { %v860_v23 = vsel %vm125_vm1, %v855_v21, 0 }
 0x692   :  { %869 = vmatpush.bf16.xpose.msrb.mxu1 %v860_v23 }
 0x697   :  { %v977_v25 = vpop.permute.xlu1 %976 }
 0x698   :  { %v982_v26 = vsel %vm125_vm1, %v977_v25, 0  ;;  %v916_v27 = vpop.permute.xlu0 %915 }
 0x699   :  { %v921_v28 = vsel %vm125_vm1, %v916_v27, 0  ;;  %3031 = vmatmul.msk.bf16.vlgmr.msrb.gmra.mxu1 %vm125_vm1, %v853_v20 }
 0x69a   :  { %991 = vmatpush.bf16.xpose.msra.mxu1 %v982_v26  ;;  %930 = vmatpush.bf16.xpose.msra.mxu2 %v921_v28 }
 0x69f   :  { %v1097_v31 = vpop.permute.xlu1 %1096 }
 0x6a0   :  { %v1102_v32 = vsel %vm125_vm1, %v1097_v31, 0  ;;  %v914_v33 = vpop.permute.xlu0 %913 }
 0x6a1   :  { %3033 = vmatmul.msk.bf16.vlgmr.msra.gmra.mxu2 %vm125_vm1, %v914_v33 }
 0x6a2   :  { %1048 = vmatpush.bf16.xpose.msrb.mxu2 %v1039_v29  ;;  %1111 = vmatpush.bf16.xpose.msrb.mxu1 %v1102_v32 }
 0x6a5   :  { %v808_v35 = vpop.f32.mrf.mxu2 }
 0x6a6   :  { %v812_v36 = vsel %vm125_vm1, %v808_v35, -inf }
 0x6a7   :  { %v1219_v37 = vpop.permute.xlu1 %1218  ;;  %813 = vmax.xlane.f32.xlu0 %v812_v36 }
 0x6a8   :  { %v1224_v12 = vsel %vm125_vm1, %v1219_v37, 0  ;;  %v1095_v38 = vpop.permute.xlu0 %1094 }
 0x6a9   :  { %3035 = vmatmul.msk.bf16.vlgmr.msra.gmra.mxu1 %vm125_vm1, %v975_v24 }
 0x6aa   :  { %1172 = vmatpush.bf16.xpose.msra.mxu2 %v1163_v34  ;;  %1233 = vmatpush.bf16.xpose.msra.mxu1 %v1224_v12 }
 0x6ad   :  { %v810_v39 = vpop.f32.mrf.mxu2 }
 0x6b0   :  { %v1156_v40 = vpop.permute.xlu0 %1155 }
 0x6b1   :  { %3037 = vmatmul.msk.bf16.vlgmr.msrb.gmra.mxu2 %vm125_vm1, %v790_v16 }
 0x6b8   :  { %v888_v41 = vpop.permute.xlu0 %887 }
 0x6b9   :  { %v893_v42 = vsel %vm162_vm2, %v888_v41, 0  ;;  %3039 = vmatmul.msk.bf16.vlgmr.msrb.gmra.mxu1 %vm125_vm1, %v1095_v38 }
 0x6ba   :  { %902 = vmatpush.bf16.msrb.mxu3 %v893_v42 }
 0x6c1   :  { %3041 = vmatmul.msk.bf16.vlgmr.msra.gmra.mxu2 %vm125_vm1, %v1156_v40 }
 0x6c9   :  { %3043 = vmatmul.msk.bf16.vlgmr.msra.gmra.mxu1 %vm125_vm1, %v1217_v43 }
 0x716   :  { %v871_v44 = vpop.f32.mrf.mxu1 }
 0x717   :  { %v875_v45 = vsel %vm125_vm1, %v871_v44, -inf }
 0x718   :  { %876 = vmax.xlane.f32.xlu1 %v875_v45 }
 0x71a   :  { %v814_v46 = vpop.xlane.xlu0 %813 }
 0x71b   :  { %v815_v47 = vsub.f32 %v808_v35, %v814_v46 }
 0x71d   :  { %v816_v49 = vmul.f32 1.442695, %v815_v47 }
 0x71e   :  { %v873_v48 = vpop.f32.mrf.mxu1 }
 0x71f   :  { %3321 = vpow2.f32 %v816_v49 }
 0x724   :  { %v932_v50 = vpop.f32.mrf.mxu2 }
 0x725   :  { %v936_v51 = vsel %vm125_vm1, %v932_v50, -inf  ;;  %v3322_v54 = vpop.eup %3321 }
 0x726   :  { %v993_v52 = vpop.f32.mrf.mxu1  ;;  %937 = vmax.xlane.f32.xlu1 %v936_v51  ;;  %v818_v58 = vsel %vm125_vm1, %v3322_v54, 0.0 }
 0x727   :  { %v997_v53 = vsel %vm125_vm1, %v993_v52, -inf }
 0x728   :  { %998 = vmax.xlane.f32.xlu2 %v997_v53 }
 0x72c   :  { %v934_v55 = vpop.f32.mrf.mxu2 }
 0x72e   :  { %v995_v59 = vpop.f32.mrf.mxu1  ;;  %819 = vadd.xlane.f32.xlu1 %v818_v58 }
 0x734   :  { %v3805_v60 = vpop.f32.mrf.mxu2 }
 0x735   :  { %v1054_v61 = vsel %vm125_vm1, %v3805_v60, -inf }
 0x736   :  { %v1113_v62 = vpop.f32.mrf.mxu1  ;;  %1055 = vmax.xlane.f32.xlu2 %v1054_v61 }
 0x737   :  { %v1117_v63 = vsel %vm125_vm1, %v1113_v62, -inf }
 0x738   :  { %1118 = vmax.xlane.f32.xlu0 %v1117_v63 }
 0x73c   :  { %v1052_v0 = vpop.f32.mrf.mxu2 }
 0x73e   :  { %v1115_v1 = vpop.f32.mrf.mxu1 }
 0x744   :  { %v1174_v4 = vpop.f32.mrf.mxu2 }
 0x745   :  { %v1178_v22 = vsel %vm125_vm1, %v1174_v4, -inf }
 0x746   :  { %v3811_v5 = vpop.f32.mrf.mxu1  ;;  %1179 = vmax.xlane.f32.xlu2 %v1178_v22 }
 0x747   :  { %v1239_v6 = vsel %vm125_vm1, %v3811_v5, -inf }
 0x748   :  { %1240 = vmax.xlane.f32.xlu1 %v1239_v6 }
 0x74c   :  { %v1176_v7 = vpop.f32.mrf.mxu2 }
 0x74e   :  { %v1237_v8 = vpop.f32.mrf.mxu1 }
 0x75e   :  { %827 = vrot.lane.b32.xlu2 %v3760_v9, %s4389_s2 }
 0x761   :  { %948 = vrot.lane.b32.xlu1 %v3760_v9, %s4409_s24 }
 0x769   :  { %1129 = vrot.lane.b32.xlu1 %v3767_v17, %s4391_s22  ;;  %s4424_s22 = sld [smem:[#allocation9_spill]] }
 0x78b   :  { %v877_v10 = vpop.xlane.xlu1 %876 }
 0x78c   :  { %v878_v11 = vsub.f32 %v871_v44, %v877_v10 }
 0x78e   :  { %v879_v13 = vmul.f32 1.442695, %v878_v11 }
 0x790   :  { %3323 = vpow2.f32 %v879_v13 }
 0x796   :  { %v3821_v2 = vpop.eup %3323 }
 0x797   :  { %v881_v3 = vsel %vm125_vm1, %v3821_v2, 0.0 }
 0x798   :  { %882 = vadd.xlane.f32.xlu0 %v881_v3 }
 0x799   :  { %v938_v14 = vpop.xlane.xlu1 %937 }
 0x79a   :  { %v939_v16 = vsub.f32 %v932_v50, %v938_v14 }
 0x79b   :  { %v999_v18 = vpop.xlane.xlu2 %998 }
 0x79c   :  { %v940_v19 = vmul.f32 1.442695, %v939_v16  ;;  %v1000_v20 = vsub.f32 %v993_v52, %v999_v18 }
 0x79e   :  { %3325 = vpow2.f32 %v940_v19  ;;  %v1001_v21 = vmul.f32 1.442695, %v1000_v20 }
 0x7a0   :  { %3327 = vpow2.f32 %v1001_v21 }
 0x7a1   :  { %v820_v31 = vpop.xlane.xlu1 %819 }
 0x7a4   :  { %v3825_v23 = vpop.eup %3325 }
 0x7a5   :  { %v942_v24 = vsel %vm125_vm1, %v3825_v23, 0.0 }
 0x7a6   :  { %943 = vadd.xlane.f32.xlu1 %v942_v24  ;;  %v3829_v25 = vpop.eup %3327 }
 0x7a7   :  { %v1003_v28 = vsel %vm125_vm1, %v3829_v25, 0.0 }
 0x7a9   :  { %v1056_v30 = vpop.xlane.xlu2 %1055 }
 0x7aa   :  { %v1057_v41 = vsub.f32 %v3805_v60, %v1056_v30 }
 0x7ab   :  { %v1119_v26 = vpop.xlane.xlu0 %1118 }
 0x7ac   :  { %v1120_v27 = vsub.f32 %v1113_v62, %v1119_v26  ;;  %1009 = vrot.lane.b32.xlu0 %v3760_v9, %s4410_s3  ;;  %v1058_v43 = vmul.f32 1.442695, %v1057_v41 }
 0x7ae   :  { %v1121_v29 = vmul.f32 1.442695, %v1120_v27  ;;  %1004 = vadd.xlane.f32.xlu1 %v1003_v28 }
 0x7b0   :  { %3329 = vpow2.f32 %v1121_v29 }
 0x7b1   :  { %3331 = vrcp.f32 %v820_v31 }
 0x7b6   :  { %v3835_v32 = vpop.eup %3329 }
 0x7b7   :  { %v1123_v33 = vsel %vm125_vm1, %v3835_v32, 0.0  ;;  %v3332_v37 = vpop.eup %3331 }
 0x7b8   :  { %1124 = vadd.xlane.f32.xlu2 %v1123_v33  ;;  %v822_v9 = vmul.f32 %v3332_v37, %v3322_v54 }
 0x7b9   :  { %v1180_v34 = vpop.xlane.xlu2 %1179 }
 0x7ba   :  { %v1181_v35 = vsub.f32 %v1174_v4, %v1180_v34  ;;  %v823_v40 = vpack.c.bf16 %v822_v9, %v822_v9 }
 0x7bb   :  { %v1241_v44 = vpop.xlane.xlu1 %1240 }
 0x7bc   :  { %v1182_v36 = vmul.f32 1.442695, %v1181_v35  ;;  %v1242_v49 = vsub.f32 %v3811_v5, %v1241_v44 }
 0x7be   :  { %3333 = vpow2.f32 %v1182_v36  ;;  %v1243_v50 = vmul.f32 1.442695, %v1242_v49 }
 0x7bf   :  { %3335 = vpow2.f32 %v1058_v43 }
 0x7c0   :  { %3337 = vpow2.f32 %v1243_v50  ;;  %v3223_v50 = vld [vmem:[%s4350_s10 + $0x8] sm:$0xff] }
 0x7c1   :  { %v828_v12 = vpop.permute.xlu2 %827  ;;  %1304 = vmatpush.bf16.msrb.mxu2 %v3223_v50 }
 0x7c2   :  { %v833_v38 = vsel %vm162_vm2, %v828_v12, 0 }
 0x7c3   :  { %842 = vmatpush.bf16.msrb.mxu0 %v833_v38 }
 0x7c4   :  { %v3840_v39 = vpop.eup %3333 }
 0x7c5   :  { %v1184_v42 = vsel %vm125_vm1, %v3840_v39, 0.0  ;;  %v3336_v45 = vpop.eup %3335 }
 0x7c6   :  { %1185 = vadd.xlane.f32.xlu2 %v1184_v42  ;;  %3030 = vmatmul.msk.bf16.vlgmr.msrb.gmra.mxu0 %vm125_vm1, %v823_v40  ;;  %v1060_v48 = vsel %vm125_vm1, %v3336_v45, 0.0  ;;  %v3338_v51 = vpop.eup %3337 }
 0x7c7   :  { %1069 = vrot.lane.b32.xlu1 %v3767_v17, %s4389_s2  ;;  %v1245_v52 = vsel %vm125_vm1, %v3338_v51, 0.0  ;;  %s4418_s2 = smov 112  }
 0x7d3   :  { %v949_v46 = vpop.permute.xlu1 %948 }
 0x7d4   :  { %v954_v47 = vsel %vm162_vm2, %v949_v46, 0 }
 0x7d5   :  { %963 = vmatpush.bf16.msra.mxu0 %v954_v47 }
 0x7d6   :  { %1061 = vadd.xlane.f32.xlu0 %v1060_v48 }
 0x7db   :  { %v1130_v54 = vpop.permute.xlu1 %1129 }
 0x7de   :  { %1190 = vrot.lane.b32.xlu2 %v3767_v17, %s4409_s24 }
 0x7ea   :  { %1251 = vrot.lane.b32.xlu0 %v3767_v17, %s4410_s3  ;;  %v1135_v17 = vsel %vm162_vm2, %v1130_v54, 0 }
 0x7f1   :  { %1246 = vadd.xlane.f32.xlu1 %v1245_v52 }
 0x80b   :  { %v883_v53 = vpop.xlane.xlu0 %882 }
 0x80c   :  { %3339 = vrcp.f32 %v883_v53 }
 0x812   :  { %v3340_v55 = vpop.eup %3339 }
 0x813   :  { %v885_v58 = vmul.f32 %v3340_v55, %v3821_v2 }
 0x815   :  { %v886_v59 = vpack.c.bf16 %v885_v58, %v885_v58 }
 0x817   :  { %3032 = vmatmul.msk.bf16.vlgmr.msrb.gmra.mxu3 %vm125_vm1, %v886_v59  ;;  %v3265_v59 = vld [vmem:[%s4349_s11] ss:$0 sm:$0xff] }
 0x819   :  { %v944_v60 = vpop.xlane.xlu1 %943 }
 0x81a   :  { %3341 = vrcp.f32 %v944_v60 }
 0x81e   :  { %v1010_v61 = vpop.permute.xlu0 %1009 }
 0x81f   :  { %v1015_v62 = vsel %vm162_vm2, %v1010_v61, 0 }
 0x820   :  { %v3342_v63 = vpop.eup %3341  ;;  %1024 = vmatpush.bf16.msra.mxu3 %v1015_v62 }
 0x821   :  { %v946_v0 = vmul.f32 %v3342_v63, %v3825_v23  ;;  %v1005_v1 = vpop.xlane.xlu1 %1004 }
 0x822   :  { %3343 = vrcp.f32 %v1005_v1 }
 0x823   :  { %v947_v4 = vpack.c.bf16 %v946_v0, %v946_v0 }
 0x824   :  { %1144 = vmatpush.bf16.msrb.mxu3 %v1135_v17 }
 0x825   :  { %3034 = vmatmul.msk.bf16.vlgmr.msra.gmra.mxu0 %vm125_vm1, %v947_v4 }
 0x828   :  { %v3344_v22 = vpop.eup %3343 }
 0x829   :  { %v1007_v5 = vmul.f32 %v3344_v22, %v3829_v25 }
 0x82b   :  { %v1008_v6 = vpack.c.bf16 %v1007_v5, %v1007_v5  ;;  %v1125_v7 = vpop.xlane.xlu2 %1124 }
 0x82c   :  { %3345 = vrcp.f32 %v1125_v7 }
 0x82d   :  { %3036 = vmatmul.msk.bf16.vlgmr.msra.gmra.mxu3 %vm125_vm1, %v1008_v6 }
 0x832   :  { %v3346_v8 = vpop.eup %3345 }
 0x833   :  { %v1127_v10 = vmul.f32 %v3346_v8, %v3835_v32 }
 0x835   :  { %v1128_v3 = vpack.c.bf16 %v1127_v10, %v1127_v10 }
 0x839   :  { %v1070_v11 = vpop.permute.xlu1 %1069  ;;  %v1186_v13 = vpop.xlane.xlu2 %1185 }
 0x83a   :  { %v1075_v2 = vsel %vm162_vm2, %v1070_v11, 0 }
 0x83b   :  { %1084 = vmatpush.bf16.msrb.mxu0 %v1075_v2 }
 0x83d   :  { %3040 = vmatmul.msk.bf16.vlgmr.msrb.gmra.mxu3 %vm125_vm1, %v1128_v3 }
 0x841   :  { %v1191_v14 = vpop.permute.xlu2 %1190 }
 0x842   :  { %v1196_v16 = vsel %vm162_vm2, %v1191_v14, 0 }
 0x843   :  { %v844_v18 = vpop.f32.mrf.mxu0  ;;  %1205 = vmatpush.bf16.msra.mxu0 %v1196_v16 }
 0x844   :  { %848 = vst.msk [vmem:[#allocation2] sm:$0xff] %vm125_vm1, %v844_v18  ;;  %v3224_v18 = vld [vmem:[%s4354_s14] sm:$0xff] }
 0x849   :  { %v1062_v19 = vpop.xlane.xlu0 %1061 }
 0x84a   :  { %3347 = vrcp.f32 %v1062_v19 }
 0x84b   :  { %v846_v20 = vpop.f32.mrf.mxu0  ;;  %3349 = vrcp.f32 %v1186_v13 }
 0x850   :  { %v3348_v21 = vpop.eup %3347 }
 0x851   :  { %v1064_v23 = vmul.f32 %v3348_v21, %v3336_v45  ;;  %v3350_v25 = vpop.eup %3349 }
 0x852   :  { %v1188_v28 = vmul.f32 %v3350_v25, %v3840_v39 }
 0x853   :  { %v1065_v24 = vpack.c.bf16 %v1064_v23, %v1064_v23 }
 0x854   :  { %v1189_v29 = vpack.c.bf16 %v1188_v28, %v1188_v28 }
 0x855   :  { %3038 = vmatmul.msk.bf16.vlgmr.msrb.gmra.mxu0 %vm125_vm1, %v1065_v24 }
 0x85c   :  { %v1252_v26 = vpop.permute.xlu0 %1251 }
 0x85d   :  { %v1257_v27 = vsel %vm162_vm2, %v1252_v26, 0 }
 0x85e   :  { %1266 = vmatpush.bf16.msra.mxu3 %v1257_v27 }
 0x864   :  { %v1247_v30 = vpop.xlane.xlu1 %1246 }
 0x865   :  { %3351 = vrcp.f32 %v1247_v30  ;;  %3042 = vmatmul.msk.bf16.vlgmr.msra.gmra.mxu0 %vm125_vm1, %v1189_v29 }
 0x86b   :  { %v3352_v31 = vpop.eup %3351 }
 0x86c   :  { %v1249_v32 = vmul.f32 %v3352_v31, %v3338_v51  ;;  %v3222_v51 = vld [vmem:[%s4350_s10] sm:$0xff] }
 0x86d   :  { %1305 = vmatpush.bf16.msrb.mxu2 %v3222_v51 }
 0x86e   :  { %v1250_v33 = vpack.c.bf16 %v1249_v32, %v1249_v32 }
 0x870   :  { %3044 = vmatmul.msk.bf16.vlgmr.msra.gmra.mxu3 %vm125_vm1, %v1250_v33 }
 0x89a   :  { %v904_v34 = vpop.f32.mrf.mxu3 }
 0x89b   :  { %909 = vrot.lane.b32.xlu0 %v904_v34, %s4411_s26 }
 0x8a2   :  { %v906_v35 = vpop.f32.mrf.mxu3  ;;  %v965_v36 = vpop.f32.mrf.mxu0 }
 0x8a3   :  { %970 = vrot.lane.b32.xlu2 %v965_v36, %s4412_s28  ;;  %v3266_v35 = vld [vmem:[%s4351_s12] ss:$0 sm:$0xff]  ;;  %s4414_s12 = smov 88  }
 0x8aa   :  { %v967_v37 = vpop.f32.mrf.mxu0 }
 0x8b0   :  { %v1026_v9 = vpop.f32.mrf.mxu3 }
 0x8b1   :  { %1031 = vrot.lane.b32.xlu1 %v1026_v9, %s4413_s27 }
 0x8b8   :  { %v1028_v12 = vpop.f32.mrf.mxu3 }
 0x8b9   :  { %v3267_v12 = vld [vmem:[%s4352_s13] ss:$0 sm:$0xff]  ;;  %s4415_s13 = smov 96  }
 0x8c0   :  { %v1146_v38 = vpop.f32.mrf.mxu3 }
 0x8c1   :  { %1151 = vrot.lane.b32.xlu0 %v1146_v38, %s4411_s26 }
 0x8c8   :  { %v1148_v39 = vpop.f32.mrf.mxu3 }
 0x8d2   :  { %v1086_v40 = vpop.f32.mrf.mxu0 }
 0x8d3   :  { %1090 = vst.msk [vmem:[#allocation2 + $0x8] sm:$0xff] %vm125_vm1, %v1086_v40 }
 0x8da   :  { %v1088_v41 = vpop.f32.mrf.mxu0 }
 0x8e2   :  { %v1207_v42 = vpop.f32.mrf.mxu0 }
 0x8e3   :  { %1212 = vrot.lane.b32.xlu0 %v1207_v42, %s4412_s28 }
 0x8ea   :  { %v1209_v43 = vpop.f32.mrf.mxu0 }
 0x8f3   :  { %v1268_v44 = vpop.f32.mrf.mxu3 }
 0x8f4   :  { %1273 = vrot.lane.b32.xlu2 %v1268_v44, %s4413_s27  ;;  %v3229_v44 = vld [vmem:[%s4356_s16 + $0x18] sm:$0xff] }
 0x8f5   :  { %1457 = vmatpush.bf16.msrb.mxu1 %v3229_v44 }
 0x8fb   :  { %v1270_v45 = vpop.f32.mrf.mxu3 }
 0x8fc   :  { %v3228_v45 = vld [vmem:[%s4356_s16 + $0x10] sm:$0xff] }
 0x8fd   :  { %v971_v47 = vpop.permute.xlu2 %970  ;;  %1458 = vmatpush.bf16.msrb.mxu1 %v3228_v45 }
 0x90d   :  { %v910_v46 = vpop.permute.xlu0 %909 }
 0x90e   :  { %912 = vst.msk [vmem:[#allocation2] sm:$0xff] %vm243_vm3, %v910_v46  ;;  %v3227_v46 = vld [vmem:[%s4356_s16 + $0x8] sm:$0xff] }
 0x90f   :  { %973 = vst.msk [vmem:[#allocation2] sm:$0xff] %vm305_vm4, %v971_v47  ;;  %1459 = vmatpush.bf16.msrb.mxu1 %v3227_v46  ;;  %v3226_v47 = vld [vmem:[%s4356_s16] sm:$0xff] }
 0x913   :  { %1460 = vmatpush.bf16.msrb.mxu1 %v3226_v47 }
 0x923   :  { %v1032_v48 = vpop.permute.xlu1 %1031 }
 0x924   :  { %1034 = vst.msk [vmem:[#allocation2] sm:$0xff] %vm367_vm5, %v1032_v48 }
 0x92b   :  { %v1277_v54 = vld [vmem:[#allocation2] sm:$0xff] }
 0x933   :  { %v1152_v49 = vpop.permute.xlu0 %1151 }
 0x934   :  { %1154 = vst.msk [vmem:[#allocation2 + $0x8] sm:$0xff] %vm243_vm3, %v1152_v49  ;;  %v3268_v49 = vld [vmem:[%s4353_s15] ss:$0 sm:$0xff] }
 0x94e   :  { %v1274_v53 = vpop.permute.xlu2 %1273 }
 0x955   :  { %v1213_v52 = vpop.permute.xlu0 %1212 }
 0x956   :  { %1215 = vst.msk [vmem:[#allocation2 + $0x8] sm:$0xff] %vm305_vm4, %v1213_v52 }
 0x957   :  { %1276 = vst.msk [vmem:[#allocation2 + $0x8] sm:$0xff] %vm367_vm5, %v1274_v53 }
 0x95e   :  { %v1278_v55 = vld [vmem:[#allocation2 + $0x8] sm:$0xff] }
 0x95f   :  { %v1279_v58 = vpack.c.bf16 %v1278_v55, %v1277_v54 }
 0x961   :  { %3053 = vmatmul.msk.bf16.vlgmr.msrb.gmra.mxu2 %vm96_vm0, %v1279_v58  ;;  %v3269_v58 = vld [vmem:[%s4355_s17] ss:$0 sm:$0xff] }
 0x9e4   :  { %v1307_v60 = vpop.f32.mrf.mxu2 }
 0x9e5   :  { %v1308_v61 = vadd.f32 %v3265_v59, %v1307_v60 }
 0x9e7   :  { %v1312_v62 = vadd.f32 %v1308_v61, %v3751_v56 }
 0x9e9   :  { %v1316_v63 = vsel %vm96_vm0, %v1312_v62, 0.0 }
 0x9ea   :  { %1317 = vadd.xlane.f32.xlu0 %v1316_v63 }
 0x9ec   :  { %v1309_v17 = vpop.f32.mrf.mxu2 }
 0x9ed   :  { %v1310_v0 = vadd.f32 %v3265_v59, %v1309_v17 }
 0x9ef   :  { %v1313_v1 = vadd.f32 %v1310_v0, %v3753_v57  ;;  %v3225_v57 = vld [vmem:[%s4354_s14 + $0x8] sm:$0xff] }
 0x9f0   :  { %1411 = vmatpush.bf16.msrb.mxu0 %v3225_v57 }
 0x9f1   :  { %v1319_v4 = vsel %vm96_vm0, %v1313_v1, 0.0 }
 0x9f2   :  { %1320 = vadd.xlane.f32.xlu2 %v1319_v4 }
 0x9f4   :  { %1412 = vmatpush.bf16.msrb.mxu0 %v3224_v18 }
 0xa5d   :  { %v1318_v22 = vpop.xlane.xlu0 %1317 }
 0xa5e   :  { %v1322_v5 = vmul.f32 %v1318_v22, %v3729_v15 }
 0xa60   :  { %v1324_v6 = vsub.f32 %v1312_v62, %v1322_v5 }
 0xa62   :  { %v1326_v7 = vmul.f32 %v1324_v6, %v1324_v6 }
 0xa64   :  { %v1328_v8 = vsel %vm96_vm0, %v1326_v7, 0.0 }
 0xa65   :  { %v1321_v10 = vpop.xlane.xlu2 %1320  ;;  %1329 = vadd.xlane.f32.xlu1 %v1328_v8 }
 0xa66   :  { %v1323_v56 = vmul.f32 %v1321_v10, %v3729_v15 }
 0xa68   :  { %v1325_v11 = vsub.f32 %v1313_v1, %v1323_v56 }
 0xa6a   :  { %v1327_v13 = vmul.f32 %v1325_v11, %v1325_v11 }
 0xa6c   :  { %v1331_v2 = vsel %vm96_vm0, %v1327_v13, 0.0 }
 0xa6d   :  { %1332 = vadd.xlane.f32.xlu2 %v1331_v2  ;;  %v3231_v2 = vld [vmem:[%s4404_s23 + $0x18] sm:$0xff] }
 0xa6e   :  { %1562 = vmatpush.bf16.msrb.mxu3 %v3231_v2 }
 0xad8   :  { %v1330_v3 = vpop.xlane.xlu1 %1329 }
 0xad9   :  { %v1334_v14 = vmul.f32 %v1330_v3, %v3729_v15 }
 0xadb   :  { %v1336_v16 = vadd.f32 1e-05, %v1334_v14 }
 0xadd   :  { %3353 = vrsqrt.f32 %v1336_v16  ;;  %vm1344_vm14 = vweird.f32 %v1336_v16 }
 0xae0   :  { %v1333_v19 = vpop.xlane.xlu2 %1332 }
 0xae1   :  { %v1335_v20 = vmul.f32 %v1333_v19, %v3729_v15 }
 0xae3   :  { %v3354_v21 = vpop.eup %3353  ;;  %v1337_v23 = vadd.f32 1e-05, %v1335_v20 }
 0xae4   :  { %v1339_v24 = vmul.f32 %v3354_v21, %v1336_v16  ;;  %vm1345_vm13 = vweird.f32 %v3354_v21  ;;  %v3230_v16 = vld [vmem:[%s4404_s23 + $0x10] sm:$0xff]  ;;  %s4419_s23 = smov 56  }
 0xae5   :  { %3355 = vrsqrt.f32 %v1337_v23  ;;  %vm1346_vm15 = vmor %vm1344_vm14, %vm1345_vm13  ;;  %vm1354_vm7 = vweird.f32 %v1337_v23  ;;  %1563 = vmatpush.bf16.msrb.mxu3 %v3230_v16 }
 0xae6   :  { %v1340_v25 = vmul.f32 %v3354_v21, %v1339_v24 }
 0xae8   :  { %v1341_v26 = vmul.f32 0.5, %v1340_v25 }
 0xaea   :  { %v1342_v27 = vsub.f32 1.5, %v1341_v26 }
 0xaeb   :  { %v3356_v28 = vpop.eup %3355 }
 0xaec   :  { %v1343_v29 = vmul.f32 %v3354_v21, %v1342_v27  ;;  %v1349_v30 = vmul.f32 %v3356_v28, %v1337_v23  ;;  %vm1355_vm6 = vweird.f32 %v3356_v28 }
 0xaed   :  { %vm1356_vm8 = vmor %vm1354_vm7, %vm1355_vm6 }
 0xaee   :  { %v1350_v31 = vmul.f32 %v3356_v28, %v1349_v30  ;;  %v1347_v32 = vsel %vm1346_vm15, %v3354_v21, %v1343_v29 }
 0xaef   :  { %v1358_v36 = vmul.f32 %v1347_v32, %v1324_v6 }
 0xaf0   :  { %v1351_v33 = vmul.f32 0.5, %v1350_v31 }
 0xaf1   :  { %v1363_v38 = vmul.f32 %v3266_v35, %v1358_v36 }
 0xaf2   :  { %v1352_v34 = vsub.f32 1.5, %v1351_v33 }
 0xaf3   :  { %v1368_v41 = vadd.f32 %v3267_v12, %v1363_v38 }
 0xaf4   :  { %v1353_v37 = vmul.f32 %v3356_v28, %v1352_v34  ;;  %v3270_v34 = vld [vmem:[%s4357_s18] ss:$0 sm:$0xff] }
 0xaf6   :  { %v1357_v9 = vsel %vm1356_vm8, %v3356_v28, %v1353_v37 }
 0xaf7   :  { %v1359_v39 = vmul.f32 %v1357_v9, %v1325_v11  ;;  %v3271_v9 = vld [vmem:[%s4358_s19] ss:$0 sm:$0xff] }
 0xaf9   :  { %v1364_v40 = vmul.f32 %v3266_v35, %v1359_v39 }
 0xafb   :  { %v1369_v42 = vadd.f32 %v3267_v12, %v1364_v40 }
 0xafd   :  { %v1370_v43 = vpack.c.bf16 %v1369_v42, %v1368_v41 }
 0xaff   :  { %3062 = vmatmul.msk.bf16.vlgmr.msrb.gmra.mxu0 %vm96_vm0, %v1370_v43  ;;  %v3272_v43 = vld [vmem:[%s4406_s30 + $0x1] ss:$0 sm:$0xff]  ;;  %s4417_s30 = smov 104  }
 0xb7c   :  { %v1414_v48 = vpop.f32.mrf.mxu0 }
 0xb7d   :  { %v1415_v50 = vadd.f32 %v3268_v49, %v1414_v48 }
 0xb7f   :  { %v1419_v53 = vmax.f32 %v1415_v50, 0.0 }
 0xb84   :  { %v1416_v51 = vpop.f32.mrf.mxu0 }
 0xb85   :  { %v1417_v52 = vadd.f32 %v3268_v49, %v1416_v51 }
 0xb87   :  { %v1420_v54 = vmax.f32 %v1417_v52, 0.0 }
 0xb89   :  { %v1421_v55 = vpack.c.bf16 %v1420_v54, %v1419_v53 }
 0xb8b   :  { %3079 = vmatmul.msk.bf16.vlgmr.msrb.gmra.mxu1 %vm1449_vm9, %v1421_v55 }
 0xc08   :  { %v1462_v59 = vpop.f32.mrf.mxu1 }
 0xc09   :  { %v1463_v60 = vadd.f32 %v3269_v58, %v1462_v59 }
 0xc0b   :  { %v1467_v61 = vadd.f32 %v1463_v60, %v1368_v41 }
 0xc0d   :  { %v1469_v62 = vsel %vm96_vm0, %v1467_v61, 0.0 }
 0xc0e   :  { %1470 = vadd.xlane.f32.xlu0 %v1469_v62 }
 0xc10   :  { %v1464_v63 = vpop.f32.mrf.mxu1 }
 0xc11   :  { %v1465_v17 = vadd.f32 %v3269_v58, %v1464_v63 }
 0xc13   :  { %v1468_v0 = vadd.f32 %v1465_v17, %v1369_v42 }
 0xc15   :  { %v1472_v1 = vsel %vm96_vm0, %v1468_v0, 0.0 }
 0xc16   :  { %1473 = vadd.xlane.f32.xlu2 %v1472_v1 }
 0xc81   :  { %v1471_v4 = vpop.xlane.xlu0 %1470 }
 0xc82   :  { %v1475_v22 = vmul.f32 %v1471_v4, %v3729_v15 }
 0xc84   :  { %v1477_v5 = vsub.f32 %v1467_v61, %v1475_v22 }
 0xc86   :  { %v1479_v6 = vmul.f32 %v1477_v5, %v1477_v5 }
 0xc88   :  { %v1481_v7 = vsel %vm96_vm0, %v1479_v6, 0.0 }
 0xc89   :  { %v1474_v8 = vpop.xlane.xlu2 %1473  ;;  %1482 = vadd.xlane.f32.xlu0 %v1481_v7 }
 0xc8a   :  { %v1476_v10 = vmul.f32 %v1474_v8, %v3729_v15 }
 0xc8c   :  { %v1478_v56 = vsub.f32 %v1468_v0, %v1476_v10 }
 0xc8e   :  { %v1480_v11 = vmul.f32 %v1478_v56, %v1478_v56 }
 0xc90   :  { %v1484_v13 = vsel %vm96_vm0, %v1480_v11, 0.0 }
 0xc91   :  { %1485 = vadd.xlane.f32.xlu2 %v1484_v13 }
 0xcfc   :  { %v1483_v57 = vpop.xlane.xlu0 %1482 }
 0xcfd   :  { %v1487_v3 = vmul.f32 %v1483_v57, %v3729_v15 }
 0xcff   :  { %v1489_v14 = vadd.f32 1e-05, %v1487_v3 }
 0xd01   :  { %3357 = vrsqrt.f32 %v1489_v14  ;;  %vm1497_vm11 = vweird.f32 %v1489_v14 }
 0xd04   :  { %v1486_v18 = vpop.xlane.xlu2 %1485 }
 0xd05   :  { %v1488_v19 = vmul.f32 %v1486_v18, %v3729_v15 }
 0xd07   :  { %v3358_v20 = vpop.eup %3357  ;;  %v1490_v21 = vadd.f32 1e-05, %v1488_v19 }
 0xd08   :  { %v1492_v23 = vmul.f32 %v3358_v20, %v1489_v14  ;;  %vm1498_vm10 = vweird.f32 %v3358_v20 }
 0xd09   :  { %3359 = vrsqrt.f32 %v1490_v21  ;;  %vm1499_vm12 = vmor %vm1497_vm11, %vm1498_vm10  ;;  %vm1507_vm14 = vweird.f32 %v1490_v21 }
 0xd0a   :  { %v1493_v24 = vmul.f32 %v3358_v20, %v1492_v23 }
 0xd0c   :  { %v1494_v25 = vmul.f32 0.5, %v1493_v24 }
 0xd0e   :  { %v1495_v26 = vsub.f32 1.5, %v1494_v25 }
 0xd0f   :  { %v3360_v27 = vpop.eup %3359 }
 0xd10   :  { %v1496_v28 = vmul.f32 %v3358_v20, %v1495_v26  ;;  %v1502_v29 = vmul.f32 %v3360_v27, %v1490_v21  ;;  %vm1508_vm13 = vweird.f32 %v3360_v27 }
 0xd11   :  { %vm1509_vm15 = vmor %vm1507_vm14, %vm1508_vm13 }
 0xd12   :  { %v1503_v30 = vmul.f32 %v3360_v27, %v1502_v29  ;;  %v1500_v31 = vsel %vm1499_vm12, %v3358_v20, %v1496_v28 }
 0xd13   :  { %v1511_v35 = vmul.f32 %v1500_v31, %v1477_v5 }
 0xd14   :  { %v1504_v32 = vmul.f32 0.5, %v1503_v30 }
 0xd15   :  { %v1516_v12 = vmul.f32 %v3270_v34, %v1511_v35 }
 0xd16   :  { %v1505_v33 = vsub.f32 1.5, %v1504_v32 }
 0xd17   :  { %v3959_v40 = vadd.f32 %v3271_v9, %v1516_v12 }
 0xd18   :  { %v1506_v36 = vmul.f32 %v3360_v27, %v1505_v33 }
 0xd1a   :  { %v1510_v37 = vsel %vm1509_vm15, %v3360_v27, %v1506_v36 }
 0xd1b   :  { %v1512_v38 = vmul.f32 %v1510_v37, %v1478_v56 }
 0xd1d   :  { %v1517_v39 = vmul.f32 %v3270_v34, %v1512_v38 }
 0xd1f   :  { %v3961_v41 = vadd.f32 %v3271_v9, %v1517_v39 }
 0xd21   :  { %v1523_v42 = vpack.c.bf16 %v3961_v41, %v3959_v40 }
 0xd23   :  { %3098 = vmatmul.msk.bf16.vlgmr.msrb.gmra.mxu3 %vm96_vm0, %v1523_v42 }
 0xda6   :  { %v1565_v44 = vpop.f32.mrf.mxu3 }
 0xda7   :  { %v1566_v45 = vadd.f32 %v3272_v43, %v1565_v44 }
 0xda9   :  { %v1570_v46 = vmul.f32 0.35355338, %v1566_v45  ;;  %v1574_v47 = vpack.c.bf16 %v1566_v45, %v1566_v45 }
 0xdab   :  { %v1572_v48 = vpack.c.bf16 %v1570_v46, %v1570_v46  ;;  %v1577_v49 = vunpack.c.l.b16 %v1574_v47 }
 0xdad   :  { %v3969_v50 = vpack.c.b16 %v1577_v49, %v1577_v49  ;;  %v1635_v51 = vunpack.c.l.b16 %v1572_v48 }
 0xdae   :  { %v1567_v52 = vpop.f32.mrf.mxu3 }
 0xdaf   :  { %v1568_v53 = vadd.f32 %v3272_v43, %v1567_v52  ;;  %1639 = vrot.lane.b32.xlu1 %v3969_v50, %s4414_s12  ;;  %1579 = vrot.lane.b32.xlu0 %v3969_v50, %s4415_s13  ;;  %v1636_v54 = vpack.c.b16 %v1635_v51, %v1635_v51 }
 0xdb1   :  { %1637 = vrot.lane.b32.xlu2 %v1636_v54, %s4416_s20  ;;  %v1571_v55 = vmul.f32 0.35355338, %v1568_v53  ;;  %v1575_v58 = vpack.c.bf16 %v1568_v53, %v1568_v53 }
 0xdb3   :  { %v1573_v59 = vpack.c.bf16 %v1571_v55, %v1571_v55  ;;  %v1821_v60 = vunpack.c.l.b16 %v1575_v58 }
 0xdb5   :  { %v1879_v61 = vunpack.c.l.b16 %v1573_v59  ;;  %v3981_v62 = vpack.c.b16 %v1821_v60, %v1821_v60 }
 0xdb7   :  { %1761 = vrot.lane.b32.xlu1 %v3969_v50, %s4410_s3  ;;  %1700 = vrot.lane.b32.xlu0 %v3969_v50, %s4409_s24  ;;  %v1880_v63 = vpack.c.b16 %v1879_v61, %v1879_v61 }
 0xdb9   :  { %1759 = vrot.lane.b32.xlu2 %v1636_v54, %s4417_s30 }
 0xdbf   :  { %1823 = vrot.lane.b32.xlu1 %v3981_v62, %s4415_s13  ;;  %1698 = vrot.lane.b32.xlu0 %v1636_v54, %s4418_s2 }
 0xdc1   :  { %1881 = vrot.lane.b32.xlu2 %v1880_v63, %s4416_s20 }
 0xdc7   :  { %1944 = vrot.lane.b32.xlu1 %v3981_v62, %s4409_s24  ;;  %1883 = vrot.lane.b32.xlu0 %v3981_v62, %s4414_s12 }
 0xdc9   :  { %1942 = vrot.lane.b32.xlu2 %v1880_v63, %s4418_s2 }
 0xdcf   :  { %2003 = vrot.lane.b32.xlu1 %v1880_v63, %s4417_s30  ;;  %2005 = vrot.lane.b32.xlu0 %v3981_v62, %s4410_s3 }
 0xdd1   :  { %1672 = vrot.lane.b32.xlu2 %v3969_v50, %s4419_s23 }
 0xe0b   :  { %v1638_v17 = vpop.permute.xlu2 %1637 }
 0xe13   :  { %v1760_v0 = vpop.permute.xlu2 %1759 }
 0xe1b   :  { %v1882_v1 = vpop.permute.xlu2 %1881 }
 0xe21   :  { %v1640_v4 = vpop.permute.xlu1 %1639  ;;  %v1580_v22 = vpop.permute.xlu0 %1579 }
 0xe22   :  { %v1645_v5 = vsel %vm125_vm1, %v1640_v4, 0  ;;  %v1585_v6 = vsel %vm125_vm1, %v1580_v22, 0 }
 0xe23   :  { %1594 = vmatpush.bf16.xpose.msra.mxu2 %v1585_v6  ;;  %1654 = vmatpush.bf16.xpose.msra.mxu1 %v1645_v5  ;;  %v1943_v7 = vpop.permute.xlu2 %1942 }
 0xe29   :  { %v1762_v8 = vpop.permute.xlu1 %1761  ;;  %v1701_v10 = vpop.permute.xlu0 %1700 }
 0xe2a   :  { %v1767_v56 = vsel %vm125_vm1, %v1762_v8, 0  ;;  %v1706_v11 = vsel %vm125_vm1, %v1701_v10, 0  ;;  %3099 = vmatmul.msk.bf16.vlgmr.msra.gmra.mxu2 %vm125_vm1, %v1572_v48  ;;  %3101 = vmatmul.msk.bf16.vlgmr.msra.gmra.mxu1 %vm125_vm1, %v1638_v17 }
 0xe2b   :  { %1715 = vmatpush.bf16.xpose.msrb.mxu2 %v1706_v11  ;;  %1776 = vmatpush.bf16.xpose.msrb.mxu1 %v1767_v56  ;;  %v1673_v13 = vpop.permute.xlu2 %1672 }
 0xe2c   :  { %v1678_v2 = vsel %vm162_vm2, %v1673_v13, 0 }
 0xe2d   :  { %1687 = vmatpush.bf16.msra.mxu3 %v1678_v2 }
 0xe31   :  { %v1824_v57 = vpop.permute.xlu1 %1823  ;;  %v1699_v3 = vpop.permute.xlu0 %1698 }
 0xe32   :  { %v1829_v14 = vsel %vm125_vm1, %v1824_v57, 0 }
 0xe33   :  { %1838 = vmatpush.bf16.xpose.msra.mxu2 %v1829_v14 }
 0xe39   :  { %v1945_v16 = vpop.permute.xlu1 %1944  ;;  %v1884_v18 = vpop.permute.xlu0 %1883 }
 0xe3a   :  { %v1950_v19 = vsel %vm125_vm1, %v1945_v16, 0  ;;  %v1889_v20 = vsel %vm125_vm1, %v1884_v18, 0  ;;  %3103 = vmatmul.msk.bf16.vlgmr.msrb.gmra.mxu2 %vm125_vm1, %v1699_v3  ;;  %3105 = vmatmul.msk.bf16.vlgmr.msrb.gmra.mxu1 %vm125_vm1, %v1760_v0 }
 0xe3b   :  { %1898 = vmatpush.bf16.xpose.msra.mxu1 %v1889_v20  ;;  %1959 = vmatpush.bf16.xpose.msrb.mxu2 %v1950_v19 }
 0xe41   :  { %v2006_v21 = vpop.permute.xlu0 %2005  ;;  %v2004_v24 = vpop.permute.xlu1 %2003 }
 0xe42   :  { %v2011_v23 = vsel %vm125_vm1, %v2006_v21, 0 }
 0xe43   :  { %2020 = vmatpush.bf16.xpose.msrb.mxu1 %v2011_v23 }
 0xe4a   :  { %3107 = vmatmul.msk.bf16.vlgmr.msra.gmra.mxu2 %vm125_vm1, %v1573_v59  ;;  %3109 = vmatmul.msk.bf16.vlgmr.msra.gmra.mxu1 %vm125_vm1, %v1882_v1 }
 0xe5a   :  { %3111 = vmatmul.msk.bf16.vlgmr.msrb.gmra.mxu2 %vm125_vm1, %v1943_v7  ;;  %3113 = vmatmul.msk.bf16.vlgmr.msrb.gmra.mxu1 %vm125_vm1, %v2004_v24 }
 0xea7   :  { %v1656_v25 = vpop.f32.mrf.mxu1 }
 0xea8   :  { %v1660_v26 = vsel %vm125_vm1, %v1656_v25, -inf }
 0xea9   :  { %1661 = vmax.xlane.f32.xlu0 %v1660_v26 }
 0xead   :  { %v1596_v27 = vpop.f32.mrf.mxu2 }
 0xeae   :  { %v1600_v28 = vsel %vm125_vm1, %v1596_v27, -inf }
 0xeaf   :  { %v1658_v29 = vpop.f32.mrf.mxu1  ;;  %1601 = vmax.xlane.f32.xlu2 %v1600_v28 }
 0xeb5   :  { %v1598_v30 = vpop.f32.mrf.mxu2 }
 0xeb7   :  { %v1778_v31 = vpop.f32.mrf.mxu1 }
 0xeb8   :  { %v1782_v32 = vsel %vm125_vm1, %v1778_v31, -inf }
 0xeb9   :  { %1783 = vmax.xlane.f32.xlu1 %v1782_v32 }
 0xebd   :  { %v1717_v33 = vpop.f32.mrf.mxu2 }
 0xebe   :  { %v1721_v34 = vsel %vm125_vm1, %v1717_v33, -inf }
 0xebf   :  { %v1780_v35 = vpop.f32.mrf.mxu1  ;;  %1722 = vmax.xlane.f32.xlu0 %v1721_v34 }
 0xec5   :  { %v1719_v36 = vpop.f32.mrf.mxu2 }
 0xec7   :  { %v1900_v37 = vpop.f32.mrf.mxu1 }
 0xec8   :  { %v1904_v9 = vsel %vm125_vm1, %v1900_v37, -inf }
 0xec9   :  { %1905 = vmax.xlane.f32.xlu2 %v1904_v9 }
 0xecd   :  { %v1840_v12 = vpop.f32.mrf.mxu2 }
 0xece   :  { %v1844_v38 = vsel %vm125_vm1, %v1840_v12, -inf }
 0xecf   :  { %v1902_v39 = vpop.f32.mrf.mxu1  ;;  %1845 = vmax.xlane.f32.xlu1 %v1844_v38 }
 0xed5   :  { %v1842_v42 = vpop.f32.mrf.mxu2 }
 0xed7   :  { %v4020_v43 = vpop.f32.mrf.mxu1 }
 0xed8   :  { %v2026_v44 = vsel %vm125_vm1, %v4020_v43, -inf }
 0xed9   :  { %2027 = vmax.xlane.f32.xlu0 %v2026_v44 }
 0xedd   :  { %v1961_v45 = vpop.f32.mrf.mxu2 }
 0xede   :  { %v1965_v46 = vsel %vm125_vm1, %v1961_v45, -inf }
 0xedf   :  { %v2024_v47 = vpop.f32.mrf.mxu1  ;;  %1966 = vmax.xlane.f32.xlu1 %v1965_v46 }
 0xee5   :  { %v1963_v48 = vpop.f32.mrf.mxu2 }
 0xeed   :  { %1794 = vrot.lane.b32.xlu0 %v3969_v50, %s4420_s21 }
 0xef5   :  { %1916 = vrot.lane.b32.xlu0 %v3981_v62, %s4419_s23 }
 0xef8   :  { %1612 = vrot.lane.b32.xlu1 %v3969_v50, %s4421_s0 }
 0xf1c   :  { %v1662_v49 = vpop.xlane.xlu0 %1661 }
 0xf1d   :  { %v1663_v51 = vsub.f32 %v1656_v25, %v1662_v49 }
 0xf1f   :  { %v1664_v52 = vmul.f32 1.442695, %v1663_v51 }
 0xf21   :  { %3361 = vpow2.f32 %v1664_v52 }
 0xf22   :  { %v1602_v53 = vpop.xlane.xlu2 %1601 }
 0xf23   :  { %v1603_v54 = vsub.f32 %v1596_v27, %v1602_v53 }
 0xf25   :  { %v1604_v55 = vmul.f32 1.442695, %v1603_v54 }
 0xf27   :  { %v4031_v58 = vpop.eup %3361  ;;  %3363 = vpow2.f32 %v1604_v55 }
 0xf28   :  { %v1666_v59 = vsel %vm125_vm1, %v4031_v58, 0.0 }
 0xf29   :  { %1667 = vadd.xlane.f32.xlu2 %v1666_v59 }
 0xf2c   :  { %v1784_v60 = vpop.xlane.xlu1 %1783 }
 0xf2d   :  { %v4035_v61 = vpop.eup %3363  ;;  %v1785_v63 = vsub.f32 %v1778_v31, %v1784_v60 }
 0xf2e   :  { %v1606_v17 = vsel %vm125_vm1, %v4035_v61, 0.0 }
 0xf2f   :  { %v1786_v0 = vmul.f32 1.442695, %v1785_v63  ;;  %1607 = vadd.xlane.f32.xlu0 %v1606_v17 }
 0xf31   :  { %3365 = vpow2.f32 %v1786_v0 }
 0xf32   :  { %v1723_v1 = vpop.xlane.xlu0 %1722 }
 0xf33   :  { %v1724_v4 = vsub.f32 %v1717_v33, %v1723_v1 }
 0xf35   :  { %v1725_v22 = vmul.f32 1.442695, %v1724_v4 }
 0xf37   :  { %v4039_v5 = vpop.eup %3365  ;;  %3367 = vpow2.f32 %v1725_v22 }
 0xf38   :  { %v1788_v6 = vsel %vm125_vm1, %v4039_v5, 0.0 }
 0xf39   :  { %1789 = vadd.xlane.f32.xlu0 %v1788_v6 }
 0xf3c   :  { %v1906_v7 = vpop.xlane.xlu2 %1905 }
 0xf3d   :  { %v4043_v8 = vpop.eup %3367  ;;  %v1907_v10 = vsub.f32 %v1900_v37, %v1906_v7 }
 0xf3e   :  { %v1727_v11 = vsel %vm125_vm1, %v4043_v8, 0.0 }
 0xf3f   :  { %v1908_v56 = vmul.f32 1.442695, %v1907_v10 }
 0xf41   :  { %3369 = vpow2.f32 %v1908_v56  ;;  %1733 = vrot.lane.b32.xlu2 %v3969_v50, %s4422_s4  ;;  %1728 = vadd.xlane.f32.xlu0 %v1727_v11 }
 0xf42   :  { %v1846_v57 = vpop.xlane.xlu1 %1845 }
 0xf43   :  { %v1847_v19 = vsub.f32 %v1840_v12, %v1846_v57 }
 0xf45   :  { %v1848_v20 = vmul.f32 1.442695, %v1847_v19 }
 0xf47   :  { %v4049_v13 = vpop.eup %3369 }
 0xf48   :  { %v1910_v2 = vsel %vm125_vm1, %v4049_v13, 0.0 }
 0xf49   :  { %1911 = vadd.xlane.f32.xlu1 %v1910_v2 }
 0xf4c   :  { %v2028_v18 = vpop.xlane.xlu0 %2027 }
 0xf4d   :  { %v2029_v29 = vsub.f32 %v4020_v43, %v2028_v18 }
 0xf4f   :  { %v2030_v30 = vmul.f32 1.442695, %v2029_v29 }
 0xf52   :  { %v1967_v3 = vpop.xlane.xlu1 %1966 }
 0xf53   :  { %v1968_v14 = vsub.f32 %v1961_v45, %v1967_v3 }
 0xf55   :  { %v1969_v16 = vmul.f32 1.442695, %v1968_v14  ;;  %1856 = vrot.lane.b32.xlu0 %v3981_v62, %s4421_s0 }
 0xf57   :  { %3371 = vpow2.f32 %v1969_v16 }
 0xf58   :  { %3373 = vpow2.f32 %v1848_v20 }
 0xf59   :  { %3375 = vpow2.f32 %v2030_v30 }
 0xf5d   :  { %v4055_v21 = vpop.eup %3371 }
 0xf5e   :  { %v1971_v50 = vsel %vm125_vm1, %v4055_v21, 0.0  ;;  %v3374_v25 = vpop.eup %3373 }
 0xf5f   :  { %v1795_v23 = vpop.permute.xlu0 %1794  ;;  %1972 = vadd.xlane.f32.xlu1 %v1971_v50  ;;  %v1850_v26 = vsel %vm125_vm1, %v3374_v25, 0.0  ;;  %v4065_v31 = vpop.eup %3375 }
 0xf60   :  { %v1800_v24 = vsel %vm162_vm2, %v1795_v23, 0  ;;  %v2032_v32 = vsel %vm125_vm1, %v4065_v31, 0.0 }
 0xf61   :  { %1809 = vmatpush.bf16.msrb.mxu3 %v1800_v24 }
 0xf67   :  { %v1917_v33 = vpop.permute.xlu0 %1916 }
 0xf68   :  { %v1922_v39 = vsel %vm162_vm2, %v1917_v33, 0  ;;  %v3233_v33 = vld [vmem:[%s4407_s5 + $0x18] sm:$0xff] }
 0xf69   :  { %2091 = vmatpush.bf16.msra.mxu2 %v3233_v33 }
 0xf6a   :  { %1851 = vadd.xlane.f32.xlu2 %v1850_v26  ;;  %v1613_v27 = vpop.permute.xlu1 %1612 }
 0xf6b   :  { %v1618_v28 = vsel %vm162_vm2, %v1613_v27, 0 }
 0xf6c   :  { %1627 = vmatpush.bf16.msra.mxu0 %v1618_v28 }
 0xf78   :  { %1977 = vrot.lane.b32.xlu1 %v3981_v62, %s4422_s4 }
 0xf7f   :  { %2033 = vadd.xlane.f32.xlu0 %v2032_v32 }
 0xf82   :  { %2038 = vrot.lane.b32.xlu2 %v3981_v62, %s4420_s21 }
 0xf9c   :  { %v1668_v34 = vpop.xlane.xlu2 %1667 }
 0xf9d   :  { %3377 = vrcp.f32 %v1668_v34 }
 0xfa2   :  { %v1608_v35 = vpop.xlane.xlu0 %1607 }
 0xfa3   :  { %v3378_v36 = vpop.eup %3377  ;;  %3379 = vrcp.f32 %v1608_v35  ;;  %v3232_v35 = vld [vmem:[%s4407_s5 + $0x10] sm:$0xff] }
 0xfa4   :  { %v1670_v37 = vmul.f32 %v3378_v36, %v4031_v58  ;;  %v1734_v9 = vpop.permute.xlu2 %1733  ;;  %2092 = vmatpush.bf16.msra.mxu2 %v3232_v35 }
 0xfa5   :  { %v1739_v12 = vsel %vm162_vm2, %v1734_v9, 0 }
 0xfa6   :  { %v1671_v38 = vpack.c.bf16 %v1670_v37, %v1670_v37  ;;  %1748 = vmatpush.bf16.msrb.mxu0 %v1739_v12 }
 0xfa8   :  { %3102 = vmatmul.msk.bf16.vlgmr.msra.gmra.mxu3 %vm125_vm1, %v1671_v38 }
 0xfa9   :  { %v3380_v42 = vpop.eup %3379  ;;  %1931 = vmatpush.bf16.msra.mxu3 %v1922_v39  ;;  %v3273_v39 = vld [vmem:[%s4408_s29 + $0x1] ss:$0 sm:$0xff] }
 0xfaa   :  { %v1610_v62 = vmul.f32 %v3380_v42, %v4035_v61 }
 0xfac   :  { %v1611_v43 = vpack.c.bf16 %v1610_v62, %v1610_v62  ;;  %v1790_v44 = vpop.xlane.xlu0 %1789 }
 0xfad   :  { %3381 = vrcp.f32 %v1790_v44 }
 0xfae   :  { %3100 = vmatmul.msk.bf16.vlgmr.msra.gmra.mxu0 %vm125_vm1, %v1611_v43 }
 0xfb3   :  { %v3382_v45 = vpop.eup %3381 }
 0xfb4   :  { %v1792_v46 = vmul.f32 %v3382_v45, %v4039_v5  ;;  %v1729_v47 = vpop.xlane.xlu0 %1728 }
 0xfb5   :  { %3383 = vrcp.f32 %v1729_v47 }
 0xfb6   :  { %v1793_v48 = vpack.c.bf16 %v1792_v46, %v1792_v46 }
 0xfb8   :  { %3106 = vmatmul.msk.bf16.vlgmr.msrb.gmra.mxu3 %vm125_vm1, %v1793_v48 }
 0xfbb   :  { %v3384_v49 = vpop.eup %3383 }
 0xfbc   :  { %v1731_v51 = vmul.f32 %v3384_v49, %v4043_v8  ;;  %v1912_v52 = vpop.xlane.xlu1 %1911  ;;  %v3235_v49 = vld [vmem:[%s4345_s8 + $0x18] sm:$0xff] }
 0xfbd   :  { %3385 = vrcp.f32 %v1912_v52 }
 0xfbe   :  { %v1732_v53 = vpack.c.bf16 %v1731_v51, %v1731_v51 }
 0xfc0   :  { %3104 = vmatmul.msk.bf16.vlgmr.msrb.gmra.mxu0 %vm125_vm1, %v1732_v53 }
 0xfc3   :  { %v3386_v54 = vpop.eup %3385 }
 0xfc4   :  { %v1914_v55 = vmul.f32 %v3386_v54, %v4049_v13 }
 0xfc6   :  { %v1915_v58 = vpack.c.bf16 %v1914_v55, %v1914_v55 }
 0xfc7   :  { %v1857_v59 = vpop.permute.xlu0 %1856 }
 0xfc8   :  { %v1862_v60 = vsel %vm162_vm2, %v1857_v59, 0  ;;  %3110 = vmatmul.msk.bf16.vlgmr.msra.gmra.mxu3 %vm125_vm1, %v1915_v58 }
 0xfc9   :  { %1871 = vmatpush.bf16.msra.mxu0 %v1862_v60 }
 0xfd2   :  { %v1973_v63 = vpop.xlane.xlu1 %1972 }
 0xfdd   :  { %v1852_v61 = vpop.xlane.xlu2 %1851 }
 0xfde   :  { %3387 = vrcp.f32 %v1852_v61 }
 0xfdf   :  { %3389 = vrcp.f32 %v1973_v63  ;;  %v4133_v63 = vld [vmem:[%s4347_s9 + $0x1] ss:$0 sm:$0xff] }
 0xfe4   :  { %v3388_v17 = vpop.eup %3387 }
 0xfe5   :  { %v1854_v0 = vmul.f32 %v3388_v17, %v3374_v25  ;;  %v2039_v1 = vpop.permute.xlu2 %2038  ;;  %v3390_v7 = vpop.eup %3389 }
 0xfe6   :  { %v2044_v4 = vsel %vm162_vm2, %v2039_v1, 0  ;;  %v1975_v10 = vmul.f32 %v3390_v7, %v4055_v21 }
 0xfe7   :  { %v1855_v22 = vpack.c.bf16 %v1854_v0, %v1854_v0  ;;  %2053 = vmatpush.bf16.msrb.mxu3 %v2044_v4 }
 0xfe8   :  { %v1976_v56 = vpack.c.bf16 %v1975_v10, %v1975_v10 }
 0xfe9   :  { %3108 = vmatmul.msk.bf16.vlgmr.msra.gmra.mxu0 %vm125_vm1, %v1855_v22 }
 0xfea   :  { %v1978_v5 = vpop.permute.xlu1 %1977 }
 0xfeb   :  { %v1983_v6 = vsel %vm162_vm2, %v1978_v5, 0 }
 0xfec   :  { %1992 = vmatpush.bf16.msrb.mxu0 %v1983_v6 }
 0xff0   :  { %2198 = vmatpush.bf16.msra.mxu0 %v3235_v49 }
 0xff2   :  { %v2034_v8 = vpop.xlane.xlu0 %2033 }
 0xff3   :  { %3391 = vrcp.f32 %v2034_v8 }
 0xff9   :  { %v3392_v11 = vpop.eup %3391  ;;  %3112 = vmatmul.msk.bf16.vlgmr.msrb.gmra.mxu0 %vm125_vm1, %v1976_v56  ;;  %v3437_v56 = vld [vmem:[%s4348_s1] sm:$0xff] }
 0xffa   :  { %v2036_v13 = vmul.f32 %v3392_v11, %v4065_v31 }
 0xffc   :  { %v2037_v2 = vpack.c.bf16 %v2036_v13, %v2036_v13 }
 0xffe   :  { %3114 = vmatmul.msk.bf16.vlgmr.msrb.gmra.mxu3 %vm125_vm1, %v2037_v2 }
0x102b   :  { %v1629_v57 = vpop.f32.mrf.mxu0  ;;  %v1689_v3 = vpop.f32.mrf.mxu3 }
0x102c   :  { %1633 = vst.msk [vmem:[#allocation2] sm:$0xff] %vm125_vm1, %v1629_v57  ;;  %1694 = vrot.lane.b32.xlu2 %v1689_v3, %s4411_s26 }
0x1033   :  { %v1631_v14 = vpop.f32.mrf.mxu0  ;;  %v1691_v16 = vpop.f32.mrf.mxu3 }
0x103b   :  { %v1811_v18 = vpop.f32.mrf.mxu3 }
0x103d   :  { %v1750_v19 = vpop.f32.mrf.mxu0 }
0x103e   :  { %1755 = vrot.lane.b32.xlu1 %v1750_v19, %s4412_s28 }
0x1043   :  { %v1813_v20 = vpop.f32.mrf.mxu3 }
0x1045   :  { %v1752_v21 = vpop.f32.mrf.mxu0 }
0x1046   :  { %1816 = vrot.lane.b32.xlu1 %v1811_v18, %s4413_s27  ;;  %v3274_v21 = vld [vmem:[%s4344_s6 + $0x1] ss:$0 sm:$0xff] }
0x104b   :  { %v1933_v50 = vpop.f32.mrf.mxu3 }
0x104c   :  { %1938 = vrot.lane.b32.xlu0 %v1933_v50, %s4411_s26 }
0x1053   :  { %v1935_v23 = vpop.f32.mrf.mxu3 }
0x1066   :  { %v1873_v24 = vpop.f32.mrf.mxu0 }
0x1067   :  { %1877 = vst.msk [vmem:[#allocation2 + $0x8] sm:$0xff] %vm125_vm1, %v1873_v24 }
0x106e   :  { %v1875_v25 = vpop.f32.mrf.mxu0 }
0x106f   :  { %v3275_v25 = vld [vmem:[%s4346_s7 + $0x1] ss:$0 sm:$0xff] }
0x1076   :  { %v1994_v26 = vpop.f32.mrf.mxu0 }
0x1077   :  { %1999 = vrot.lane.b32.xlu2 %v1994_v26, %s4412_s28 }
0x107e   :  { %v1996_v27 = vpop.f32.mrf.mxu0 }
0x1081   :  { %v2055_v28 = vpop.f32.mrf.mxu3 }
0x1082   :  { %2060 = vrot.lane.b32.xlu2 %v2055_v28, %s4413_s27 }
0x1086   :  { %v1695_v29 = vpop.permute.xlu2 %1694 }
0x1087   :  { %1697 = vst.msk [vmem:[#allocation2] sm:$0xff] %vm243_vm3, %v1695_v29 }
0x1089   :  { %v2057_v30 = vpop.f32.mrf.mxu3 }
0x10b0   :  { %v1756_v31 = vpop.permute.xlu1 %1755 }
0x10b1   :  { %1758 = vst.msk [vmem:[#allocation2] sm:$0xff] %vm305_vm4, %v1756_v31 }
0x10b8   :  { %v1817_v32 = vpop.permute.xlu1 %1816 }
0x10b9   :  { %1819 = vst.msk [vmem:[#allocation2] sm:$0xff] %vm367_vm5, %v1817_v32 }
0x10be   :  { %v1939_v34 = vpop.permute.xlu0 %1938 }
0x10bf   :  { %1941 = vst.msk [vmem:[#allocation2 + $0x8] sm:$0xff] %vm243_vm3, %v1939_v34 }
0x10c0   :  { %v2064_v9 = vld [vmem:[#allocation2] sm:$0xff] }
0x10d1   :  { %v2000_v36 = vpop.permute.xlu2 %1999 }
0x10d2   :  { %2002 = vst.msk [vmem:[#allocation2 + $0x8] sm:$0xff] %vm305_vm4, %v2000_v36 }
0x10dc   :  { %v2061_v37 = vpop.permute.xlu2 %2060 }
0x10dd   :  { %2063 = vst.msk [vmem:[#allocation2 + $0x8] sm:$0xff] %vm367_vm5, %v2061_v37 }
0x10e4   :  { %v2065_v12 = vld [vmem:[#allocation2 + $0x8] sm:$0xff] }
0x10e5   :  { %v2066_v38 = vpack.c.bf16 %v2065_v12, %v2064_v9 }
0x10e7   :  { %3123 = vmatmul.msk.bf16.vlgmr.msra.gmra.mxu2 %vm96_vm0, %v2066_v38 }
0x116a   :  { %v2094_v42 = vpop.f32.mrf.mxu2 }
0x116b   :  { %v2095_v62 = vadd.f32 %v3273_v39, %v2094_v42 }
0x116d   :  { %v2099_v43 = vadd.f32 %v2095_v62, %v3959_v40  ;;  %v3234_v40 = vld [vmem:[%s4345_s8 + $0x10] sm:$0xff] }
0x116e   :  { %2199 = vmatpush.bf16.msra.mxu0 %v3234_v40 }
0x116f   :  { %v2105_v44 = vsel %vm96_vm0, %v2099_v43, 0.0 }
0x1170   :  { %2106 = vadd.xlane.f32.xlu0 %v2105_v44 }
0x1172   :  { %v2096_v45 = vpop.f32.mrf.mxu2 }
0x1173   :  { %v2097_v46 = vadd.f32 %v3273_v39, %v2096_v45 }
0x1175   :  { %v2100_v47 = vadd.f32 %v2097_v46, %v3961_v41 }
0x1177   :  { %v2108_v48 = vsel %vm96_vm0, %v2100_v47, 0.0 }
0x1178   :  { %2109 = vadd.xlane.f32.xlu1 %v2108_v48 }
0x1191   :  { %2208 = vrot.lane.b32.xlu1 %v3235_v49, %s4415_s13 }
0x11e3   :  { %v2107_v51 = vpop.xlane.xlu0 %2106 }
0x11e4   :  { %v2111_v52 = vmul.f32 %v2107_v51, %v3729_v15 }
0x11e6   :  { %v2113_v53 = vsub.f32 %v2099_v43, %v2111_v52 }
0x11e8   :  { %v2115_v41 = vmul.f32 %v2113_v53, %v2113_v53 }
0x11ea   :  { %v2117_v54 = vsel %vm96_vm0, %v2115_v41, 0.0 }
0x11eb   :  { %v2110_v55 = vpop.xlane.xlu1 %2109  ;;  %2118 = vadd.xlane.f32.xlu2 %v2117_v54 }
0x11ec   :  { %v2112_v58 = vmul.f32 %v2110_v55, %v3729_v15 }
0x11ee   :  { %v2114_v59 = vsub.f32 %v2100_v47, %v2112_v58 }
0x11f0   :  { %v2116_v60 = vmul.f32 %v2114_v59, %v2114_v59 }
0x11f2   :  { %v2120_v61 = vsel %vm96_vm0, %v2116_v60, 0.0 }
0x11f3   :  { %2121 = vadd.xlane.f32.xlu0 %v2120_v61 }
0x1203   :  { %2206 = vrot.lane.b32.xlu2 %v3234_v40, %s4415_s13  ;;  %v2209_v17 = vpop.permute.xlu1 %2208 }
0x1204   :  { %2221 = vmatpush.bf16.msra.mxu1 %v2209_v17 }
0x1207   :  { %2212 = vrot.lane.b32.xlu0 %v4133_v63, %s4415_s13 }
0x125e   :  { %v2119_v0 = vpop.xlane.xlu2 %2118 }
0x125f   :  { %v2123_v1 = vmul.f32 %v2119_v0, %v3729_v15 }
0x1261   :  { %v2125_v4 = vadd.f32 1e-05, %v2123_v1 }
0x1263   :  { %3393 = vrsqrt.f32 %v2125_v4  ;;  %vm2133_vm7 = vweird.f32 %v2125_v4 }
0x1266   :  { %v2207_v22 = vpop.permute.xlu2 %2206  ;;  %v2122_v5 = vpop.xlane.xlu0 %2121 }
0x1267   :  { %v2124_v6 = vmul.f32 %v2122_v5, %v3729_v15  ;;  %2222 = vmatpush.bf16.msra.mxu1 %v2207_v22 }
0x1269   :  { %v3394_v7 = vpop.eup %3393  ;;  %v2126_v8 = vadd.f32 1e-05, %v2124_v6 }
0x126a   :  { %v2128_v10 = vmul.f32 %v3394_v7, %v2125_v4  ;;  %3145 = vmatmul.msk.bf16.vlgmr.msra.gmra.mxu1 %vm96_vm0, %v3437_v56  ;;  %vm2134_vm6 = vweird.f32 %v3394_v7 }
0x126b   :  { %3395 = vrsqrt.f32 %v2126_v8  ;;  %vm2135_vm8 = vmor %vm2133_vm7, %vm2134_vm6  ;;  %vm2143_vm11 = vweird.f32 %v2126_v8  ;;  %vm2974_vm6 = vcmask 257024  }
0x126c   :  { %v2129_v11 = vmul.f32 %v3394_v7, %v2128_v10 }
0x126e   :  { %v2130_v13 = vmul.f32 0.5, %v2129_v11 }
0x1270   :  { %v2131_v2 = vsub.f32 1.5, %v2130_v13 }
0x1271   :  { %v3396_v57 = vpop.eup %3395 }
0x1272   :  { %v2132_v3 = vmul.f32 %v3394_v7, %v2131_v2  ;;  %v2138_v14 = vmul.f32 %v3396_v57, %v2126_v8  ;;  %vm2144_vm10 = vweird.f32 %v3396_v57 }
0x1273   :  { %vm2145_vm12 = vmor %vm2143_vm11, %vm2144_vm10 }
0x1274   :  { %v2139_v16 = vmul.f32 %v3396_v57, %v2138_v14  ;;  %v2136_v18 = vsel %vm2135_vm8, %v3394_v7, %v2132_v3 }
0x1275   :  { %v2147_v50 = vmul.f32 %v2136_v18, %v2113_v53 }
0x1276   :  { %v2140_v19 = vmul.f32 0.5, %v2139_v16 }
0x1277   :  { %v2152_v26 = vmul.f32 %v3274_v21, %v2147_v50 }
0x1278   :  { %v2141_v20 = vsub.f32 1.5, %v2140_v19 }
0x1279   :  { %v4150_v29 = vadd.f32 %v3275_v25, %v2152_v26  ;;  %v2213_v32 = vpop.permute.xlu0 %2212 }
0x127a   :  { %v2142_v23 = vmul.f32 %v3396_v57, %v2141_v20 }
0x127c   :  { %v2146_v24 = vsel %vm2145_vm12, %v3396_v57, %v2142_v23 }
0x127d   :  { %v2148_v27 = vmul.f32 %v2146_v24, %v2114_v59 }
0x127f   :  { %v2153_v28 = vmul.f32 %v3274_v21, %v2148_v27 }
0x1281   :  { %v4152_v30 = vadd.f32 %v3275_v25, %v2153_v28 }
0x1283   :  { %v2159_v31 = vpack.c.bf16 %v4152_v30, %v4150_v29 }
0x1285   :  { %3144 = vmatmul.msk.bf16.vlgmr.msra.gmra.mxu0 %vm96_vm0, %v2159_v31 }
0x12e7   :  { %v2224_v33 = vpop.f32.mrf.mxu1 }
0x12e8   :  { %v2225_v34 = vadd.f32 %v2224_v33, %v2213_v32 }
0x12ea   :  { %v2233_v35 = vpack.c.bf16 %v2225_v34, %v2225_v34 }
0x12ec   :  { %v2267_v36 = vunpack.c.l.b16 %v2233_v35  ;;  %v2239_v37 = vsel %vm125_vm1, %v2233_v35, 0 }
0x12ed   :  { %2248 = vmatpush.bf16.xpose.msra.mxu3 %v2239_v37 }
0x12ee   :  { %v4158_v9 = vpack.c.b16 %v2267_v36, %v2267_v36 }
0x12ef   :  { %v2226_v12 = vpop.f32.mrf.mxu1 }
0x12f0   :  { %2357 = vrot.lane.b32.xlu1 %v4158_v9, %s4418_s2  ;;  %2296 = vrot.lane.b32.xlu2 %v4158_v9, %s4416_s20  ;;  %v2227_v38 = vadd.f32 %v2226_v12, %v2213_v32 }
0x12f2   :  { %v2234_v39 = vpack.c.bf16 %v2227_v38, %v2227_v38 }
0x12f4   :  { %v2509_v42 = vunpack.c.l.b16 %v2234_v39  ;;  %v2481_v60 = vsel %vm125_vm1, %v2234_v39, 0 }
0x12f6   :  { %v4166_v62 = vpack.c.b16 %v2509_v42, %v2509_v42 }
0x12f8   :  { %2418 = vrot.lane.b32.xlu1 %v4158_v9, %s4417_s30 }
0x1300   :  { %2599 = vrot.lane.b32.xlu1 %v4166_v62, %s4418_s2 }
0x1302   :  { %v2201_v43 = vpop.f32.mrf.mxu0 }
0x1303   :  { %v2202_v44 = vadd.f32 %v4133_v63, %v2201_v43 }
0x1305   :  { %v2229_v45 = vmul.f32 0.35355338, %v2202_v44 }
0x1307   :  { %v2231_v46 = vpack.c.bf16 %v2229_v45, %v2229_v45 }
0x1308   :  { %2660 = vrot.lane.b32.xlu1 %v4166_v62, %s4417_s30 }
0x1309   :  { %v2292_v47 = vunpack.c.l.b16 %v2231_v46  ;;  %3146 = vmatmul.msk.bf16.vlgmr.msra.gmra.mxu3 %vm125_vm1, %v2231_v46 }
0x130a   :  { %v2203_v48 = vpop.f32.mrf.mxu0 }
0x130b   :  { %v2293_v49 = vpack.c.b16 %v2292_v47, %v2292_v47  ;;  %v2204_v40 = vadd.f32 %v4133_v63, %v2203_v48 }
0x130d   :  { %2294 = vrot.lane.b32.xlu0 %v2293_v49, %s4416_s20  ;;  %2355 = vrot.lane.b32.xlu2 %v2293_v49, %s4418_s2  ;;  %v2230_v51 = vmul.f32 0.35355338, %v2204_v40 }
0x130f   :  { %v2232_v52 = vpack.c.bf16 %v2230_v51, %v2230_v51 }
0x1311   :  { %v2534_v53 = vunpack.c.l.b16 %v2232_v52 }
0x1313   :  { %v2535_v41 = vpack.c.b16 %v2534_v53, %v2534_v53 }
0x1315   :  { %2416 = vrot.lane.b32.xlu0 %v2293_v49, %s4417_s30  ;;  %2538 = vrot.lane.b32.xlu2 %v4166_v62, %s4416_s20 }
0x131d   :  { %2536 = vrot.lane.b32.xlu0 %v2535_v41, %s4416_s20  ;;  %2597 = vrot.lane.b32.xlu2 %v2535_v41, %s4418_s2  ;;  %s4423_s20 = sld [smem:[#allocation8_spill]] }
0x1325   :  { %2658 = vrot.lane.b32.xlu0 %v2535_v41, %s4417_s30 }
0x134a   :  { %v2297_v54 = vpop.permute.xlu2 %2296 }
0x134b   :  { %v2302_v55 = vsel %vm125_vm1, %v2297_v54, 0 }
0x134c   :  { %2311 = vmatpush.bf16.xpose.msrb.mxu0 %v2302_v55 }
0x1362   :  { %v2358_v58 = vpop.permute.xlu1 %2357 }
0x1363   :  { %v2363_v59 = vsel %vm125_vm1, %v2358_v58, 0 }
0x1364   :  { %2372 = vmatpush.bf16.xpose.msrb.mxu3 %v2363_v59 }
0x1367   :  { %v2356_v61 = vpop.permute.xlu2 %2355 }
0x136a   :  { %v2419_v63 = vpop.permute.xlu1 %2418 }
0x136b   :  { %v2424_v17 = vsel %vm125_vm1, %v2419_v63, 0  ;;  %3150 = vmatmul.msk.bf16.vlgmr.msrb.gmra.mxu3 %vm125_vm1, %v2356_v61 }
0x136c   :  { %2490 = vmatpush.bf16.xpose.msra.mxu3 %v2481_v60  ;;  %2433 = vmatpush.bf16.xpose.msra.mxu0 %v2424_v17 }
0x136f   :  { %v2539_v4 = vpop.permute.xlu2 %2538 }
0x1370   :  { %v2544_v5 = vsel %vm125_vm1, %v2539_v4, 0 }
0x1372   :  { %v2600_v0 = vpop.permute.xlu1 %2599 }
0x1373   :  { %v2605_v1 = vsel %vm125_vm1, %v2600_v0, 0 }
0x1374   :  { %2614 = vmatpush.bf16.xpose.msrb.mxu3 %v2605_v1 }
0x1377   :  { %v2598_v6 = vpop.permute.xlu2 %2597 }
0x137a   :  { %v2661_v8 = vpop.permute.xlu1 %2660 }
0x137b   :  { %3154 = vmatmul.msk.bf16.vlgmr.msra.gmra.mxu3 %vm125_vm1, %v2232_v52  ;;  %v2666_v11 = vsel %vm125_vm1, %v2661_v8, 0 }
0x137f   :  { %v2295_v22 = vpop.permute.xlu0 %2294 }
0x1380   :  { %3148 = vmatmul.msk.bf16.vlgmr.msrb.gmra.mxu0 %vm125_vm1, %v2295_v22 }
0x1381   :  { %2553 = vmatpush.bf16.xpose.msrb.mxu0 %v2544_v5 }
0x1387   :  { %v2417_v56 = vpop.permute.xlu0 %2416 }
0x138b   :  { %3158 = vmatmul.msk.bf16.vlgmr.msrb.gmra.mxu3 %vm125_vm1, %v2598_v6 }
0x138c   :  { %v2250_v7 = vpop.f32.mrf.mxu3 }
0x138d   :  { %v2254_v10 = vsel %vm125_vm1, %v2250_v7, -inf }
0x138e   :  { %2255 = vmax.xlane.f32.xlu2 %v2254_v10 }
0x138f   :  { %v2537_v2 = vpop.permute.xlu0 %2536 }
0x1390   :  { %3152 = vmatmul.msk.bf16.vlgmr.msra.gmra.mxu0 %vm125_vm1, %v2417_v56 }
0x1391   :  { %2675 = vmatpush.bf16.xpose.msra.mxu0 %v2666_v11 }
0x1394   :  { %v2252_v13 = vpop.f32.mrf.mxu3 }
0x1397   :  { %v2659_v57 = vpop.permute.xlu0 %2658 }
0x13a0   :  { %3156 = vmatmul.msk.bf16.vlgmr.msrb.gmra.mxu0 %vm125_vm1, %v2537_v2 }
0x13b0   :  { %3160 = vmatmul.msk.bf16.vlgmr.msra.gmra.mxu0 %vm125_vm1, %v2659_v57 }
0x13ee   :  { %v2374_v3 = vpop.f32.mrf.mxu3 }
0x13ef   :  { %v2378_v14 = vsel %vm125_vm1, %v2374_v3, -inf }
0x13f0   :  { %2379 = vmax.xlane.f32.xlu0 %v2378_v14 }
0x13f6   :  { %v2376_v16 = vpop.f32.mrf.mxu3 }
0x13fd   :  { %v2313_v18 = vpop.f32.mrf.mxu0 }
0x13fe   :  { %v2492_v19 = vpop.f32.mrf.mxu3  ;;  %v2317_v20 = vsel %vm125_vm1, %v2313_v18, -inf }
0x13ff   :  { %2318 = vmax.xlane.f32.xlu1 %v2317_v20  ;;  %v2496_v34 = vsel %vm125_vm1, %v2492_v19, -inf }
0x1401   :  { %v2256_v21 = vpop.xlane.xlu2 %2255 }
0x1402   :  { %v2257_v50 = vsub.f32 %v2250_v7, %v2256_v21 }
0x1404   :  { %v2258_v23 = vmul.f32 1.442695, %v2257_v50  ;;  %2329 = vrot.lane.b32.xlu0 %v4158_v9, %s4414_s12 }
0x1405   :  { %v2315_v24 = vpop.f32.mrf.mxu0 }
0x1406   :  { %3397 = vpow2.f32 %v2258_v23  ;;  %v2494_v25 = vpop.f32.mrf.mxu3 }
0x140c   :  { %v3398_v26 = vpop.eup %3397 }
0x140d   :  { %v2435_v27 = vpop.f32.mrf.mxu0  ;;  %v2260_v28 = vsel %vm125_vm1, %v3398_v26, 0.0 }
0x140e   :  { %v4203_v31 = vpop.f32.mrf.mxu3  ;;  %2261 = vadd.xlane.f32.xlu1 %v2260_v28  ;;  %v2439_v32 = vsel %vm125_vm1, %v2435_v27, -inf }
0x140f   :  { %2440 = vmax.xlane.f32.xlu2 %v2439_v32  ;;  %v2620_v43 = vsel %vm125_vm1, %v4203_v31, -inf }
0x1415   :  { %v2437_v33 = vpop.f32.mrf.mxu0 }
0x1416   :  { %v2618_v35 = vpop.f32.mrf.mxu3  ;;  %2497 = vmax.xlane.f32.xlu1 %v2496_v34 }
0x141d   :  { %v2555_v36 = vpop.f32.mrf.mxu0 }
0x141e   :  { %v2559_v38 = vsel %vm125_vm1, %v2555_v36, -inf }
0x1425   :  { %v2557_v37 = vpop.f32.mrf.mxu0 }
0x1427   :  { %2390 = vrot.lane.b32.xlu2 %v4158_v9, %s4409_s24 }
0x142d   :  { %v2677_v12 = vpop.f32.mrf.mxu0 }
0x142e   :  { %2560 = vmax.xlane.f32.xlu0 %v2559_v38  ;;  %v2681_v42 = vsel %vm125_vm1, %v2677_v12, -inf }
0x142f   :  { %2269 = vrot.lane.b32.xlu1 %v4158_v9, %s4415_s13 }
0x1435   :  { %v2679_v39 = vpop.f32.mrf.mxu0 }
0x1436   :  { %2682 = vmax.xlane.f32.xlu0 %v2681_v42 }
0x144a   :  { %2451 = vrot.lane.b32.xlu0 %v4158_v9, %s4410_s3 }
0x1450   :  { %2621 = vmax.xlane.f32.xlu2 %v2620_v43 }
0x1463   :  { %v2380_v44 = vpop.xlane.xlu0 %2379 }
0x1464   :  { %v2381_v51 = vsub.f32 %v2374_v3, %v2380_v44 }
0x1466   :  { %v2382_v53 = vmul.f32 1.442695, %v2381_v51 }
0x1468   :  { %2511 = vrot.lane.b32.xlu2 %v4166_v62, %s4415_s13 }
0x1472   :  { %v2319_v47 = vpop.xlane.xlu1 %2318 }
0x1473   :  { %v2320_v48 = vsub.f32 %v2313_v18, %v2319_v47 }
0x1475   :  { %v2321_v40 = vmul.f32 1.442695, %v2320_v48 }
0x1476   :  { %v2330_v45 = vpop.permute.xlu0 %2329 }
0x1477   :  { %v2335_v46 = vsel %vm162_vm2, %v2330_v45, 0  ;;  %3399 = vpow2.f32 %v2321_v40 }
0x1478   :  { %2344 = vmatpush.bf16.msrb.mxu1 %v2335_v46 }
0x147d   :  { %v3400_v55 = vpop.eup %3399 }
0x147e   :  { %v2323_v59 = vsel %vm125_vm1, %v3400_v55, 0.0 }
0x1481   :  { %v2262_v49 = vpop.xlane.xlu1 %2261 }
0x1482   :  { %v2441_v41 = vpop.xlane.xlu2 %2440 }
0x1483   :  { %v2442_v58 = vsub.f32 %v2435_v27, %v2441_v41 }
0x1485   :  { %v2443_v60 = vmul.f32 1.442695, %v2442_v58 }
0x1489   :  { %v2498_v52 = vpop.xlane.xlu1 %2497 }
0x148a   :  { %v2499_v9 = vsub.f32 %v2492_v19, %v2498_v52  ;;  %v2391_v5 = vpop.permute.xlu2 %2390 }
0x148b   :  { %v2396_v11 = vsel %vm162_vm2, %v2391_v5, 0 }
0x148c   :  { %v2500_v54 = vmul.f32 1.442695, %v2499_v9 }
0x148e   :  { %3401 = vpow2.f32 %v2500_v54 }
0x148f   :  { %3403 = vpow2.f32 %v2382_v53 }
0x1490   :  { %3405 = vrcp.f32 %v2262_v49 }
0x1491   :  { %2324 = vadd.xlane.f32.xlu2 %v2323_v59  ;;  %3407 = vpow2.f32 %v2443_v60 }
0x1494   :  { %v4221_v61 = vpop.eup %3401 }
0x1495   :  { %v3404_v63 = vpop.eup %3403  ;;  %v2502_v17 = vsel %vm125_vm1, %v4221_v61, 0.0 }
0x1496   :  { %2503 = vadd.xlane.f32.xlu1 %v2502_v17  ;;  %v2384_v0 = vsel %vm125_vm1, %v3404_v63, 0.0  ;;  %v3406_v1 = vpop.eup %3405 }
0x1497   :  { %v3408_v4 = vpop.eup %3407  ;;  %v2264_v22 = vmul.f32 %v3406_v1, %v3398_v26 }
0x1498   :  { %v2445_v6 = vsel %vm125_vm1, %v3408_v4, 0.0 }
0x1499   :  { %2385 = vadd.xlane.f32.xlu2 %v2384_v0  ;;  %v2265_v13 = vpack.c.bf16 %v2264_v22, %v2264_v22 }
0x14a1   :  { %v2270_v7 = vpop.permute.xlu1 %2269  ;;  %2446 = vadd.xlane.f32.xlu2 %v2445_v6  ;;  %v2561_v8 = vpop.xlane.xlu0 %2560 }
0x14a2   :  { %v2275_v10 = vsel %vm162_vm2, %v2270_v7, 0  ;;  %v2562_v56 = vsub.f32 %v2555_v36, %v2561_v8 }
0x14a3   :  { %2284 = vmatpush.bf16.msrb.mxu2 %v2275_v10 }
0x14a4   :  { %v2563_v2 = vmul.f32 1.442695, %v2562_v56 }
0x14a6   :  { %3409 = vpow2.f32 %v2563_v2  ;;  %3147 = vmatmul.msk.bf16.vlgmr.msrb.gmra.mxu2 %vm125_vm1, %v2265_v13 }
0x14a7   :  { %2405 = vmatpush.bf16.msra.mxu2 %v2396_v11 }
0x14a9   :  { %v2683_v57 = vpop.xlane.xlu0 %2682 }
0x14aa   :  { %v2684_v3 = vsub.f32 %v2677_v12, %v2683_v57 }
0x14ac   :  { %v3410_v14 = vpop.eup %3409  ;;  %v2685_v16 = vmul.f32 1.442695, %v2684_v3 }
0x14ad   :  { %v2565_v18 = vsel %vm125_vm1, %v3410_v14, 0.0 }
0x14ae   :  { %3411 = vpow2.f32 %v2685_v16  ;;  %2566 = vadd.xlane.f32.xlu0 %v2565_v18 }
0x14b4   :  { %v3412_v19 = vpop.eup %3411 }
0x14b5   :  { %v2687_v20 = vsel %vm125_vm1, %v3412_v19, 0.0 }
0x14b6   :  { %2688 = vadd.xlane.f32.xlu1 %v2687_v20 }
0x14b9   :  { %2571 = vrot.lane.b32.xlu2 %v4166_v62, %s4414_s12 }
0x14bc   :  { %v2452_v21 = vpop.permute.xlu0 %2451 }
0x14bd   :  { %v2457_v50 = vsel %vm162_vm2, %v2452_v21, 0 }
0x14be   :  { %2466 = vmatpush.bf16.msra.mxu1 %v2457_v50  ;;  %v3237_v50 = vld [vmem:[%s4350_s10 + $0x18] sm:$0xff] }
0x14bf   :  { %2746 = vmatpush.bf16.msra.mxu3 %v3237_v50  ;;  %v3279_v50 = vld [vmem:[%s4353_s15 + $0x1] ss:$0 sm:$0xff] }
0x14c2   :  { %2632 = vrot.lane.b32.xlu0 %v4166_v62, %s4409_s24 }
0x14c3   :  { %v2622_v23 = vpop.xlane.xlu2 %2621 }
0x14c4   :  { %v2623_v26 = vsub.f32 %v4203_v31, %v2622_v23  ;;  %v3236_v23 = vld [vmem:[%s4350_s10 + $0x10] sm:$0xff] }
0x14c5   :  { %2747 = vmatpush.bf16.msra.mxu3 %v3236_v23 }
0x14c6   :  { %v2624_v27 = vmul.f32 1.442695, %v2623_v26 }
0x14c8   :  { %3413 = vpow2.f32 %v2624_v27 }
0x14cb   :  { %v2512_v24 = vpop.permute.xlu2 %2511 }
0x14cc   :  { %v2517_v25 = vsel %vm162_vm2, %v2512_v24, 0 }
0x14cd   :  { %2526 = vmatpush.bf16.msrb.mxu2 %v2517_v25 }
0x14ce   :  { %v3414_v28 = vpop.eup %3413 }
0x14cf   :  { %2693 = vrot.lane.b32.xlu1 %v4166_v62, %s4410_s3  ;;  %v2626_v32 = vsel %vm125_vm1, %v3414_v28, 0.0 }
0x14e2   :  { %2627 = vadd.xlane.f32.xlu2 %v2626_v32 }
0x1504   :  { %v2325_v33 = vpop.xlane.xlu2 %2324 }
0x1505   :  { %3415 = vrcp.f32 %v2325_v33  ;;  %v3276_v33 = vld [vmem:[%s4349_s11 + $0x1] ss:$0 sm:$0xff] }
0x1509   :  { %v2504_v31 = vpop.xlane.xlu1 %2503 }
0x150b   :  { %v3416_v34 = vpop.eup %3415 }
0x150c   :  { %v2327_v35 = vmul.f32 %v3416_v34, %v3400_v55  ;;  %v2386_v36 = vpop.xlane.xlu2 %2385 }
0x150d   :  { %3417 = vrcp.f32 %v2386_v36 }
0x150e   :  { %v2328_v37 = vpack.c.bf16 %v2327_v35, %v2327_v35 }
0x1510   :  { %3149 = vmatmul.msk.bf16.vlgmr.msrb.gmra.mxu1 %vm125_vm1, %v2328_v37 }
0x1513   :  { %v3418_v12 = vpop.eup %3417 }
0x1514   :  { %v2388_v38 = vmul.f32 %v3418_v12, %v3404_v63  ;;  %v2447_v62 = vpop.xlane.xlu2 %2446 }
0x1515   :  { %3419 = vrcp.f32 %v2447_v62 }
0x1516   :  { %v2389_v39 = vpack.c.bf16 %v2388_v38, %v2388_v38  ;;  %3421 = vrcp.f32 %v2504_v31 }
0x1518   :  { %3151 = vmatmul.msk.bf16.vlgmr.msra.gmra.mxu2 %vm125_vm1, %v2389_v39 }
0x151b   :  { %v3420_v42 = vpop.eup %3419 }
0x151c   :  { %v2449_v43 = vmul.f32 %v3420_v42, %v3408_v4  ;;  %v2572_v44 = vpop.permute.xlu2 %2571  ;;  %v3422_v47 = vpop.eup %3421 }
0x151d   :  { %v2577_v45 = vsel %vm162_vm2, %v2572_v44, 0  ;;  %v2506_v49 = vmul.f32 %v3422_v47, %v4221_v61 }
0x151e   :  { %v2450_v46 = vpack.c.bf16 %v2449_v43, %v2449_v43  ;;  %2586 = vmatpush.bf16.msrb.mxu1 %v2577_v45 }
0x151f   :  { %v2507_v40 = vpack.c.bf16 %v2506_v49, %v2506_v49 }
0x1520   :  { %3153 = vmatmul.msk.bf16.vlgmr.msra.gmra.mxu1 %vm125_vm1, %v2450_v46 }
0x1521   :  { %v2567_v48 = vpop.xlane.xlu0 %2566 }
0x1522   :  { %3423 = vrcp.f32 %v2567_v48 }
0x1528   :  { %v3424_v51 = vpop.eup %3423  ;;  %3155 = vmatmul.msk.bf16.vlgmr.msrb.gmra.mxu2 %vm125_vm1, %v2507_v40 }
0x1529   :  { %v2286_v52 = vpop.f32.mrf.mxu2  ;;  %v2569_v9 = vmul.f32 %v3424_v51, %v3410_v14  ;;  %v2689_v54 = vpop.xlane.xlu1 %2688 }
0x152a   :  { %2290 = vst.msk [vmem:[#allocation2] sm:$0xff] %vm125_vm1, %v2286_v52  ;;  %3425 = vrcp.f32 %v2689_v54 }
0x152b   :  { %v2570_v53 = vpack.c.bf16 %v2569_v9, %v2569_v9  ;;  %v3238_v9 = vld [vmem:[%s4354_s14 + $0x10] sm:$0xff] }
0x1530   :  { %3157 = vmatmul.msk.bf16.vlgmr.msrb.gmra.mxu1 %vm125_vm1, %v2570_v53  ;;  %v3426_v59 = vpop.eup %3425 }
0x1531   :  { %v2288_v41 = vpop.f32.mrf.mxu2  ;;  %v2691_v60 = vmul.f32 %v3426_v59, %v3412_v19 }
0x1533   :  { %v2692_v17 = vpack.c.bf16 %v2691_v60, %v2691_v60 }
0x1534   :  { %v2633_v55 = vpop.permute.xlu0 %2632 }
0x1535   :  { %v2638_v58 = vsel %vm162_vm2, %v2633_v55, 0 }
0x1536   :  { %2647 = vmatpush.bf16.msra.mxu2 %v2638_v58 }
0x1541   :  { %v2694_v61 = vpop.permute.xlu1 %2693 }
0x1542   :  { %v2699_v63 = vsel %vm162_vm2, %v2694_v61, 0 }
0x1543   :  { %2708 = vmatpush.bf16.msra.mxu1 %v2699_v63 }
0x1546   :  { %3161 = vmatmul.msk.bf16.vlgmr.msra.gmra.mxu1 %vm125_vm1, %v2692_v17 }
0x1555   :  { %v2628_v0 = vpop.xlane.xlu2 %2627 }
0x1556   :  { %3427 = vrcp.f32 %v2628_v0 }
0x155c   :  { %v3428_v1 = vpop.eup %3427 }
0x155d   :  { %v2630_v4 = vmul.f32 %v3428_v1, %v3414_v28 }
0x155f   :  { %v2631_v22 = vpack.c.bf16 %v2630_v4, %v2630_v4 }
0x1561   :  { %3159 = vmatmul.msk.bf16.vlgmr.msra.gmra.mxu2 %vm125_vm1, %v2631_v22 }
0x158d   :  { %v2346_v5 = vpop.f32.mrf.mxu1 }
0x158e   :  { %2351 = vrot.lane.b32.xlu0 %v2346_v5, %s4411_s26 }
0x1595   :  { %v2348_v6 = vpop.f32.mrf.mxu1 }
0x1596   :  { %v3277_v6 = vld [vmem:[%s4423_s20 + $0x1] ss:$0 sm:$0xff] }
0x159b   :  { %v2407_v7 = vpop.f32.mrf.mxu2 }
0x159c   :  { %2412 = vrot.lane.b32.xlu0 %v2407_v7, %s4412_s28 }
0x159d   :  { %v2468_v8 = vpop.f32.mrf.mxu1 }
0x15a3   :  { %v2409_v10 = vpop.f32.mrf.mxu2 }
0x15a5   :  { %v2470_v56 = vpop.f32.mrf.mxu1 }
0x15a6   :  { %v3278_v56 = vld [vmem:[%s4424_s22 + $0x1] ss:$0 sm:$0xff] }
0x15ab   :  { %v2528_v11 = vpop.f32.mrf.mxu2 }
0x15ac   :  { %2532 = vst.msk [vmem:[#allocation2 + $0x8] sm:$0xff] %vm125_vm1, %v2528_v11 }
0x15ad   :  { %v2588_v13 = vpop.f32.mrf.mxu1 }
0x15ae   :  { %2593 = vrot.lane.b32.xlu1 %v2588_v13, %s4411_s26  ;;  %s4425_s26 = sld [smem:[#allocation10_spill]] }
0x15b3   :  { %v2530_v2 = vpop.f32.mrf.mxu2 }
0x15b5   :  { %v2590_v57 = vpop.f32.mrf.mxu1 }
0x15b6   :  { %2473 = vrot.lane.b32.xlu1 %v2468_v8, %s4413_s27 }
0x15c3   :  { %v2710_v3 = vpop.f32.mrf.mxu1 }
0x15c4   :  { %2715 = vrot.lane.b32.xlu0 %v2710_v3, %s4413_s27 }
0x15cb   :  { %v2712_v14 = vpop.f32.mrf.mxu1 }
0x15e4   :  { %v2649_v16 = vpop.f32.mrf.mxu2 }
0x15e5   :  { %2654 = vrot.lane.b32.xlu2 %v2649_v16, %s4412_s28  ;;  %v3243_v16 = vld [vmem:[%s4356_s16 + $0x38] sm:$0xff] }
0x15e6   :  { %2906 = vmatpush.bf16.msrb.mxu0 %v3243_v16 }
0x15ec   :  { %v2651_v18 = vpop.f32.mrf.mxu2 }
0x15ed   :  { %v3242_v18 = vld [vmem:[%s4356_s16 + $0x30] sm:$0xff] }
0x15ee   :  { %2907 = vmatpush.bf16.msrb.mxu0 %v3242_v18 }
0x1600   :  { %v2352_v19 = vpop.permute.xlu0 %2351 }
0x1601   :  { %2354 = vst.msk [vmem:[#allocation2] sm:$0xff] %vm243_vm3, %v2352_v19  ;;  %v3241_v19 = vld [vmem:[%s4356_s16 + $0x28] sm:$0xff] }
0x1602   :  { %2908 = vmatpush.bf16.msrb.mxu0 %v3241_v19 }
0x160e   :  { %v2413_v20 = vpop.permute.xlu0 %2412 }
0x160f   :  { %2415 = vst.msk [vmem:[#allocation2] sm:$0xff] %vm305_vm4, %v2413_v20  ;;  %v3240_v20 = vld [vmem:[%s4356_s16 + $0x20] sm:$0xff] }
0x1610   :  { %2909 = vmatpush.bf16.msrb.mxu0 %v3240_v20 }
0x1620   :  { %v2594_v21 = vpop.permute.xlu1 %2593 }
0x1621   :  { %2596 = vst.msk [vmem:[#allocation2 + $0x8] sm:$0xff] %vm243_vm3, %v2594_v21 }
0x1628   :  { %v2474_v24 = vpop.permute.xlu1 %2473 }
0x1629   :  { %2476 = vst.msk [vmem:[#allocation2] sm:$0xff] %vm367_vm5, %v2474_v24 }
0x1630   :  { %v2719_v27 = vld [vmem:[#allocation2] sm:$0xff] }
0x1636   :  { %v2716_v26 = vpop.permute.xlu0 %2715 }
0x163f   :  { %v2655_v25 = vpop.permute.xlu2 %2654 }
0x1640   :  { %2657 = vst.msk [vmem:[#allocation2 + $0x8] sm:$0xff] %vm305_vm4, %v2655_v25 }
0x1641   :  { %2718 = vst.msk [vmem:[#allocation2 + $0x8] sm:$0xff] %vm367_vm5, %v2716_v26 }
0x1648   :  { %v2720_v28 = vld [vmem:[#allocation2 + $0x8] sm:$0xff] }
0x1649   :  { %v2721_v32 = vpack.c.bf16 %v2720_v28, %v2719_v27 }
0x164b   :  { %3170 = vmatmul.msk.bf16.vlgmr.msra.gmra.mxu3 %vm96_vm0, %v2721_v32  ;;  %v3280_v32 = vld [vmem:[%s4355_s17 + $0x1] ss:$0 sm:$0xff] }
0x16ce   :  { %v2749_v34 = vpop.f32.mrf.mxu3 }
0x16cf   :  { %v2750_v35 = vadd.f32 %v3276_v33, %v2749_v34 }
0x16d1   :  { %v2754_v36 = vadd.f32 %v2750_v35, %v4150_v29 }
0x16d3   :  { %v2760_v37 = vsel %vm96_vm0, %v2754_v36, 0.0 }
0x16d4   :  { %2761 = vadd.xlane.f32.xlu1 %v2760_v37 }
0x16d6   :  { %v2751_v12 = vpop.f32.mrf.mxu3 }
0x16d7   :  { %v2752_v38 = vadd.f32 %v3276_v33, %v2751_v12 }
0x16d9   :  { %v2755_v62 = vadd.f32 %v2752_v38, %v4152_v30  ;;  %v3239_v30 = vld [vmem:[%s4354_s14 + $0x18] sm:$0xff] }
0x16da   :  { %2861 = vmatpush.bf16.msrb.mxu2 %v3239_v30 }
0x16db   :  { %v2763_v31 = vsel %vm96_vm0, %v2755_v62, 0.0 }
0x16dc   :  { %2764 = vadd.xlane.f32.xlu0 %v2763_v31 }
0x16de   :  { %2862 = vmatpush.bf16.msrb.mxu2 %v3238_v9 }
0x1747   :  { %v2762_v39 = vpop.xlane.xlu1 %2761 }
0x1748   :  { %v2766_v42 = vmul.f32 %v2762_v39, %v3729_v15 }
0x174a   :  { %v2768_v43 = vsub.f32 %v2754_v36, %v2766_v42 }
0x174c   :  { %v2770_v44 = vmul.f32 %v2768_v43, %v2768_v43 }
0x174e   :  { %v2772_v45 = vsel %vm96_vm0, %v2770_v44, 0.0 }
0x174f   :  { %v2765_v46 = vpop.xlane.xlu0 %2764  ;;  %2773 = vadd.xlane.f32.xlu2 %v2772_v45 }
0x1750   :  { %v2767_v29 = vmul.f32 %v2765_v46, %v3729_v15 }
0x1752   :  { %v2769_v47 = vsub.f32 %v2755_v62, %v2767_v29 }
0x1754   :  { %v2771_v48 = vmul.f32 %v2769_v47, %v2769_v47 }
0x1756   :  { %v2775_v49 = vsel %vm96_vm0, %v2771_v48, 0.0 }
0x1757   :  { %2776 = vadd.xlane.f32.xlu1 %v2775_v49 }
0x17c2   :  { %v2774_v40 = vpop.xlane.xlu2 %2773 }
0x17c3   :  { %v2778_v51 = vmul.f32 %v2774_v40, %v3729_v15 }
0x17c5   :  { %v2780_v52 = vadd.f32 1e-05, %v2778_v51 }
0x17c7   :  { %3429 = vrsqrt.f32 %v2780_v52  ;;  %vm2788_vm2 = vweird.f32 %v2780_v52 }
0x17ca   :  { %v2777_v53 = vpop.xlane.xlu1 %2776 }
0x17cb   :  { %v2779_v41 = vmul.f32 %v2777_v53, %v3729_v15 }
0x17cd   :  { %v3430_v54 = vpop.eup %3429  ;;  %v2781_v55 = vadd.f32 1e-05, %v2779_v41 }
0x17ce   :  { %v2783_v58 = vmul.f32 %v3430_v54, %v2780_v52  ;;  %vm2789_vm1 = vweird.f32 %v3430_v54 }
0x17cf   :  { %3431 = vrsqrt.f32 %v2781_v55  ;;  %vm2790_vm3 = vmor %vm2788_vm2, %vm2789_vm1  ;;  %vm2798_vm5 = vweird.f32 %v2781_v55 }
0x17d0   :  { %v2784_v59 = vmul.f32 %v3430_v54, %v2783_v58 }
0x17d2   :  { %v2785_v60 = vmul.f32 0.5, %v2784_v59 }
0x17d4   :  { %v2786_v61 = vsub.f32 1.5, %v2785_v60 }
0x17d5   :  { %v3432_v63 = vpop.eup %3431 }
0x17d6   :  { %v2787_v17 = vmul.f32 %v3430_v54, %v2786_v61  ;;  %v2793_v0 = vmul.f32 %v3432_v63, %v2781_v55  ;;  %vm2799_vm4 = vweird.f32 %v3432_v63 }
0x17d7   :  { %vm2800_vm13 = vmor %vm2798_vm5, %vm2799_vm4 }
0x17d8   :  { %v2794_v1 = vmul.f32 %v3432_v63, %v2793_v0  ;;  %v2791_v4 = vsel %vm2790_vm3, %v3430_v54, %v2787_v17 }
0x17d9   :  { %v2802_v7 = vmul.f32 %v2791_v4, %v2768_v43 }
0x17da   :  { %v2795_v22 = vmul.f32 0.5, %v2794_v1 }
0x17db   :  { %v2807_v11 = vmul.f32 %v3277_v6, %v2802_v7 }
0x17dc   :  { %v2796_v5 = vsub.f32 1.5, %v2795_v22 }
0x17dd   :  { %v2812_v57 = vadd.f32 %v3278_v56, %v2807_v11 }
0x17de   :  { %v2797_v8 = vmul.f32 %v3432_v63, %v2796_v5 }
0x17e0   :  { %v2801_v10 = vsel %vm2800_vm13, %v3432_v63, %v2797_v8  ;;  %v3281_v63 = vld [vmem:[%s4357_s18 + $0x1] ss:$0 sm:$0xff] }
0x17e1   :  { %v2803_v13 = vmul.f32 %v2801_v10, %v2769_v47 }
0x17e3   :  { %v2808_v2 = vmul.f32 %v3277_v6, %v2803_v13 }
0x17e5   :  { %v2813_v3 = vadd.f32 %v3278_v56, %v2808_v2 }
0x17e7   :  { %v2814_v14 = vpack.c.bf16 %v2813_v3, %v2812_v57 }
0x17e9   :  { %3197 = vmatmul.msk.bf16.vlgmr.msrb.gmra.mxu2 %vm96_vm0, %v2814_v14 }
0x186c   :  { %v2864_v21 = vpop.f32.mrf.mxu2 }
0x186d   :  { %v2865_v23 = vadd.f32 %v3279_v50, %v2864_v21 }
0x186f   :  { %v2869_v26 = vmax.f32 %v2865_v23, 0.0 }
0x1874   :  { %v2866_v24 = vpop.f32.mrf.mxu2 }
0x1875   :  { %v2867_v25 = vadd.f32 %v3279_v50, %v2866_v24 }
0x1877   :  { %v2870_v27 = vmax.f32 %v2867_v25, 0.0 }
0x1879   :  { %v2871_v28 = vpack.c.bf16 %v2870_v27, %v2869_v26 }
0x187b   :  { %3214 = vmatmul.msk.bf16.vlgmr.msrb.gmra.mxu0 %vm1449_vm9, %v2871_v28 }
0x18f8   :  { %v2911_v33 = vpop.f32.mrf.mxu0 }
0x18f9   :  { %v2912_v34 = vadd.f32 %v3280_v32, %v2911_v33 }
0x18fb   :  { %v2916_v35 = vadd.f32 %v2912_v34, %v2812_v57 }
0x18fd   :  { %v2918_v36 = vsel %vm96_vm0, %v2916_v35, 0.0 }
0x18fe   :  { %2919 = vadd.xlane.f32.xlu0 %v2918_v36 }
0x1900   :  { %v2913_v37 = vpop.f32.mrf.mxu0 }
0x1901   :  { %v2914_v12 = vadd.f32 %v3280_v32, %v2913_v37 }
0x1903   :  { %v2917_v38 = vadd.f32 %v2914_v12, %v2813_v3 }
0x1905   :  { %v2921_v62 = vsel %vm96_vm0, %v2917_v38, 0.0 }
0x1906   :  { %2922 = vadd.xlane.f32.xlu1 %v2921_v62 }
0x1971   :  { %v2920_v31 = vpop.xlane.xlu0 %2919 }
0x1972   :  { %v2924_v39 = vmul.f32 %v2920_v31, %v3729_v15 }
0x1974   :  { %v2926_v42 = vsub.f32 %v2916_v35, %v2924_v39 }
0x1976   :  { %v2928_v43 = vmul.f32 %v2926_v42, %v2926_v42 }
0x1978   :  { %v2930_v44 = vsel %vm96_vm0, %v2928_v43, 0.0 }
0x1979   :  { %v2923_v45 = vpop.xlane.xlu1 %2922  ;;  %2931 = vadd.xlane.f32.xlu0 %v2930_v44 }
0x197a   :  { %v2925_v46 = vmul.f32 %v2923_v45, %v3729_v15 }
0x197c   :  { %v2927_v29 = vsub.f32 %v2917_v38, %v2925_v46 }
0x197e   :  { %v2929_v47 = vmul.f32 %v2927_v29, %v2927_v29 }
0x1980   :  { %v2933_v48 = vsel %vm96_vm0, %v2929_v47, 0.0 }
0x1981   :  { %2934 = vadd.xlane.f32.xlu2 %v2933_v48 }
0x19ec   :  { %v2932_v49 = vpop.xlane.xlu0 %2931 }
0x19ed   :  { %v2936_v30 = vmul.f32 %v2932_v49, %v3729_v15 }
0x19ef   :  { %v2938_v40 = vadd.f32 1e-05, %v2936_v30 }
0x19f1   :  { %3433 = vrsqrt.f32 %v2938_v40  ;;  %vm2946_vm0 = vweird.f32 %v2938_v40 }
0x19f4   :  { %v2935_v51 = vpop.xlane.xlu2 %2934 }
0x19f5   :  { %v2937_v52 = vmul.f32 %v2935_v51, %v3729_v15  ;;  %v3282_v15 = vld [vmem:[%s4358_s19 + $0x1] ss:$0 sm:$0xff] }
0x19f7   :  { %v3434_v9 = vpop.eup %3433  ;;  %v2939_v53 = vadd.f32 1e-05, %v2937_v52 }
0x19f8   :  { %v2941_v41 = vmul.f32 %v3434_v9, %v2938_v40  ;;  %vm2947_vm9 = vweird.f32 %v3434_v9 }
0x19f9   :  { %3435 = vrsqrt.f32 %v2939_v53  ;;  %vm2948_vm14 = vmor %vm2946_vm0, %vm2947_vm9  ;;  %vm2956_vm7 = vweird.f32 %v2939_v53 }
0x19fa   :  { %v2942_v54 = vmul.f32 %v3434_v9, %v2941_v41 }
0x19fc   :  { %v2943_v55 = vmul.f32 0.5, %v2942_v54 }
0x19fe   :  { %v2944_v58 = vsub.f32 1.5, %v2943_v55 }
0x19ff   :  { %v3436_v59 = vpop.eup %3435 }
0x1a00   :  { %v2945_v60 = vmul.f32 %v3434_v9, %v2944_v58  ;;  %v2951_v61 = vmul.f32 %v3436_v59, %v2939_v53  ;;  %vm2957_vm15 = vweird.f32 %v3436_v59 }
0x1a01   :  { %vm2958_vm8 = vmor %vm2956_vm7, %vm2957_vm15 }
0x1a02   :  { %v2949_v17 = vsel %vm2948_vm14, %v3434_v9, %v2945_v60  ;;  %v2952_v0 = vmul.f32 %v3436_v59, %v2951_v61 }
0x1a03   :  { %v2960_v1 = vmul.f32 %v2949_v17, %v2926_v42 }
0x1a04   :  { %v2953_v4 = vmul.f32 0.5, %v2952_v0 }
0x1a05   :  { %v2965_v22 = vmul.f32 %v3281_v63, %v2960_v1 }
0x1a06   :  { %v2954_v5 = vsub.f32 1.5, %v2953_v4 }
0x1a07   :  { %v2970_v6 = vadd.f32 %v3282_v15, %v2965_v22 }
0x1a08   :  { %v2955_v7 = vmul.f32 %v3436_v59, %v2954_v5 }
0x1a09   :  { %v2972_v8 = vpack.c.bf16 %v2970_v6, %v2970_v6 }
0x1a0a   :  { %v2959_v10 = vsel %vm2958_vm8, %v3436_v59, %v2955_v7 }
0x1a0b   :  { %2975 = vst.msk [vmem:[%s4425_s26] sm:$0xf] %vm2974_vm6, %v2972_v8  ;;  %v2961_v56 = vmul.f32 %v2959_v10, %v2927_v29 }
0x1a0d   :  { %v2966_v11 = vmul.f32 %v3281_v63, %v2961_v56 }
0x1a0f   :  { %v2971_v13 = vadd.f32 %v3282_v15, %v2966_v11 }
0x1a11   :  { %v2973_v2 = vpack.c.bf16 %v2971_v13, %v2971_v13 }
0x1a13   :  { %2976 = vst.msk [vmem:[%s4425_s26 + $0x4] sm:$0xf] %vm2974_vm6, %v2973_v2 }

</bundles_post_ra>
